<compile_context>
chip_gen: v7x
topology: tpu7x:2x2x1
jax: 0.10.0
libtpu: 0.0.40
codegen_flags: <defaults>
</compile_context>

<pallas_src>
import jax
import jax.numpy as jnp
from jax.experimental import pallas as pl
from jax.experimental.pallas import tpu as pltpu

NEG_SLOPE = 0.01
BN_EPS = 1e-5
# Modest explicit VMEM budget: real per-call working set < 7 MiB, well inside
# v7x's 64 MiB physical VMEM (and v5e/v6e's 128 MiB).
VMEM_LIMIT = 24 * 1024 * 1024


# ----------------------------------------------------------------------------
# Pallas kernels
# ----------------------------------------------------------------------------
def _conv_gemm_kernel(x_ref, w_ref, b_ref, o_ref):
    """Full-K GEMM tile (BN scale pre-folded into w) + bias + LeakyReLU."""
    acc = jnp.dot(x_ref[...], w_ref[...], preferred_element_type=jnp.float32)
    y = acc + b_ref[...]
    o_ref[...] = jnp.where(y > 0, y, NEG_SLOPE * y).astype(o_ref.dtype)


def _fc_kernel(x_ref, w_ref, b_ref, o_ref):
    """out = x @ w + b; K tiled on the grid, accumulate into resident out block."""
    k = pl.program_id(0)

    @pl.when(k == 0)
    def _():
        o_ref[...] = jnp.zeros_like(o_ref)

    o_ref[...] += jnp.dot(x_ref[...], w_ref[...],
                          preferred_element_type=jnp.float32)

    @pl.when(k == pl.num_programs(0) - 1)
    def _():
        o_ref[...] += b_ref[...]


# ----------------------------------------------------------------------------
# Kernel wrappers
# ----------------------------------------------------------------------------
def conv_gemm_bias_lrelu(patches, w_mat, bias, *, tm, out_dtype):
    """(M,K)@(K,C) + bias, LeakyReLU.  K spans a single block (no K padding)."""
    m, k = patches.shape
    kk, c = w_mat.shape
    assert k == kk
    m_pad = ((m + tm - 1) // tm) * tm
    if m_pad != m:
        patches = jnp.pad(patches, ((0, m_pad - m), (0, 0)))

    out = pl.pallas_call(
        _conv_gemm_kernel,
        out_shape=jax.ShapeDtypeStruct((m_pad, c), out_dtype),
        grid_spec=pltpu.PrefetchScalarGridSpec(
            num_scalar_prefetch=0,
            grid=(m_pad // tm,),
            in_specs=[
                pl.BlockSpec((tm, k), lambda i: (i, 0)),
                pl.BlockSpec((k, c), lambda i: (0, 0)),   # weight: resident
                pl.BlockSpec((1, c), lambda i: (0, 0)),   # bias: resident
            ],
            out_specs=pl.BlockSpec((tm, c), lambda i: (i, 0)),
        ),
        compiler_params=pltpu.CompilerParams(
            dimension_semantics=("parallel",),            # M tiles split over TCs
            vmem_limit_bytes=VMEM_LIMIT,
        ),
    )(patches, w_mat, bias)
    return out[:m]


def fc_linear(x, w_t, bias, *, tk=5760):
    """(N,K)@(K,2)+b with M block == true batch (no padding of M)."""
    m, k = x.shape
    kk, c = w_t.shape
    assert k == kk and k % tk == 0
    return pl.pallas_call(
        _fc_kernel,
        out_shape=jax.ShapeDtypeStruct((m, c), jnp.float32),
        grid_spec=pltpu.PrefetchScalarGridSpec(
            num_scalar_prefetch=0,
            grid=(k // tk,),
            in_specs=[
                pl.BlockSpec((m, tk), lambda j: (0, j)),
                pl.BlockSpec((tk, c), lambda j: (j, 0)),
                pl.BlockSpec((1, c), lambda j: (0, 0)),
            ],
            out_specs=pl.BlockSpec((m, c), lambda j: (0, 0)),
        ),
        compiler_params=pltpu.CompilerParams(
            dimension_semantics=("arbitrary",),           # K reduction
            vmem_limit_bytes=VMEM_LIMIT,
        ),
    )(x, w_t, bias)


# ----------------------------------------------------------------------------
# Host-side glue: im2col (NHWC), layer composition, parameter preparation
# ----------------------------------------------------------------------------
def im2col_nhwc(x, kh=5, kw=3, stride=(3, 1), dilation=(2, 1), padding=(12, 1)):
    """NHWC conv patches -> (N*Ho*Wo, kh*kw*Cin), K ordered (tap, cin)."""
    n, h, w, cin = x.shape
    sh, sw = stride
    dh, dw = dilation
    ph, pw = padding
    xp = jnp.pad(x, ((0, 0), (ph, ph), (pw, pw), (0, 0)))
    hp, wp = h + 2 * ph, w + 2 * pw
    ho = (hp - (dh * (kh - 1) + 1)) // sh + 1
    wo = (wp - (dw * (kw - 1) + 1)) // sw + 1
    cols = []
    for i in range(kh):
        for j in range(kw):
            cols.append(jax.lax.slice(
                xp,
                (0, i * dh, j * dw, 0),
                (n, i * dh + sh * (ho - 1) + 1, j * dw + sw * (wo - 1) + 1, cin),
                (1, sh, sw, 1)))                      # (n, ho, wo, cin)
    p = jnp.stack(cols, axis=3)                       # (n, ho, wo, kh*kw, cin)
    return p.reshape(n * ho * wo, kh * kw * cin), ho, wo


def conv_bn_lrelu_pool(x_nhwc, prep, *, tm, out_dtype=jnp.bfloat16):
    """Conv(k=(5,3),s=(3,1),d=(2,1),pad=(12,1)) + BN(eval) + LeakyReLU + MaxPool(2,1)."""
    n = x_nhwc.shape[0]
    patches, ho, wo = im2col_nhwc(x_nhwc)
    c = prep["w"].shape[1]
    y = conv_gemm_bias_lrelu(patches, prep["w"], prep["b"],
                             tm=tm, out_dtype=out_dtype)
    y = y.reshape(n, ho, wo, c)
    # MaxPool2d((2,1), stride=(2,1)): floor mode drops an odd last row.  Done as
    # a fused XLA reshape+max (no extra Pallas launch / strided gathers).
    h2 = ho // 2
    y = y[:, :2 * h2].reshape(n, h2, 2, wo, c).max(axis=2)
    return y


def prepare_params(params):
    """One-time weight prep: fold BN into weight/bias, reorder, cast to bf16."""
    prep = {}
    for lname in ("layer1", "layer2", "layer3"):
        p = params[lname]
        cout, cin, kh, kw = p["w"].shape
        # K ordering matches im2col_nhwc: K = (i*kw + j)*cin + ci.
        w_mat = p["w"].transpose(2, 3, 1, 0).reshape(kh * kw * cin, cout)
        s = p["gamma"] / jnp.sqrt(p["var"] + BN_EPS)
        b = (p["b"] - p["mean"]) * s + p["beta"]
        prep[lname] = {
            "w": (w_mat * s[None, :]).astype(jnp.bfloat16),   # BN scale folded in
            "b": b.reshape(1, cout).astype(jnp.float32),
        }
    # fc1: PyTorch flattens NCHW (c,h,w); we flatten NHWC (h,w,c).  Permute the
    # weight's input features accordingly and pre-transpose to (K, 2) once.
    fcw = params["fc"]["w"]                                    # (2, 46080)
    fcw_t = fcw.reshape(2, 256, 3, 60).transpose(2, 3, 1, 0).reshape(46080, 2)
    prep["fc"] = {
        "w": fcw_t.astype(jnp.float32),
        "b": params["fc"]["b"].reshape(1, 2).astype(jnp.float32),
    }
    return prep


@jax.jit
def net_forward(prep, x):
    n = x.size // (64 * 60)
    # PyTorch: x.reshape(-1, 1, 64, 60); with Cin=1, NHWC is the same buffer.
    x = x.reshape(n, 64, 60, 1).astype(jnp.bfloat16)
    x = conv_bn_lrelu_pool(x, prep["layer1"], tm=512)                 # (n,13,60,64)
    x = conv_bn_lrelu_pool(x, prep["layer2"], tm=512)                 # (n, 5,60,128)
    x = conv_bn_lrelu_pool(x, prep["layer3"], tm=448,
                           out_dtype=jnp.float32)                     # (n, 3,60,256)
    x = x.reshape(n, 3 * 60 * 256)          # NHWC flatten; fc weight pre-permuted
    # fc1: Dropout(p=0.5) is identity in eval; Linear(46080, 2).
    out = fc_linear(x, prep["fc"]["w"], prep["fc"]["b"])
    # self.softmax exists on the module but is NOT applied in forward().
    return out


def init_params(key):
    def conv_block(key, cin, cout):
        k1, k2, k3, k4, k5, k6 = jax.random.split(key, 6)
        fan_in = cin * 5 * 3
        return dict(
            w=jax.random.normal(k1, (cout, cin, 5, 3), jnp.float32)
              / jnp.sqrt(float(fan_in)),
            b=0.01 * jax.random.normal(k2, (cout,), jnp.float32),
            gamma=1.0 + 0.1 * jax.random.normal(k3, (cout,), jnp.float32),
            beta=0.1 * jax.random.normal(k4, (cout,), jnp.float32),
            mean=0.1 * jax.random.normal(k5, (cout,), jnp.float32),
            var=0.5 + jax.random.uniform(k6, (cout,), jnp.float32),
        )

    k1, k2, k3, k4, k5 = jax.random.split(key, 5)
    return {
        "layer1": conv_block(k1, 1, 64),
        "layer2": conv_block(k2, 64, 128),
        "layer3": conv_block(k3, 128, 256),
        "fc": {
            "w": jax.random.normal(k4, (2, 46080), jnp.float32)
                 / jnp.sqrt(46080.0),
            "b": 0.01 * jax.random.normal(k5, (2,), jnp.float32),
        },
    }


if __name__ == "__main__":
    key = jax.random.PRNGKey(0)
    pkey, xkey = jax.random.split(key)
    params = init_params(pkey)
    prep = prepare_params(params)                 # one-time weight/BN preparation
    x = jax.random.normal(xkey, (2, 1, 64, 60), jnp.float32)   # N=2 example
    out = jax.block_until_ready(net_forward(prep, x))
    assert out.shape == (2, 2) and out.dtype == jnp.float32
    assert bool(jnp.all(jnp.isfinite(out)))
    print("KERNEL_OK")
</pallas_src>

<mosaic_0001>
module attributes {stable_mosaic.version = 11 : i64} {
  func.func @_conv_gemm_kernel(%arg0: i32, %arg1: memref<512x15xbf16, #tpu.memory_space<vmem>>, %arg2: memref<15x64xbf16, #tpu.memory_space<vmem>>, %arg3: memref<1x64xf32, #tpu.memory_space<vmem>>, %arg4: memref<512x64xbf16, #tpu.memory_space<vmem>>) attributes {dimension_semantics = [#tpu.dimension_semantics<parallel>], iteration_bounds = array<i64: 7>, scalar_prefetch = 0 : i64, scratch_operands = 0 : i64, tpu.core_type = #tpu.core_type<tc>, window_params = [{transform_indices = @transform_0, window_bounds = array<i64: 512, 15>}, {pipeline_mode = #tpu.pipeline_mode<synchronous>, transform_indices = @transform_1, window_bounds = array<i64: 15, 64>}, {pipeline_mode = #tpu.pipeline_mode<synchronous>, transform_indices = @transform_2, window_bounds = array<i64: 1, 64>}, {transform_indices = @transform_3, window_bounds = array<i64: 512, 64>}]} {
    %c0 = arith.constant 0 : index
    %c0_0 = arith.constant 0 : index
    %0 = vector.load %arg1[%c0, %c0_0] : memref<512x15xbf16, #tpu.memory_space<vmem>>, vector<512x15xbf16>
    %c0_1 = arith.constant 0 : index
    %c0_2 = arith.constant 0 : index
    %1 = vector.load %arg2[%c0_1, %c0_2] : memref<15x64xbf16, #tpu.memory_space<vmem>>, vector<15x64xbf16>
    %cst = arith.constant dense<0.000000e+00> : vector<512x64xf32>
    %2 = tpu.matmul %0, %1, %cst {dimension_numbers = #tpu.dot_dimension_numbers<[1], [0], [0], [1], [0, 0, 1, 1], [], []>} : vector<512x15xbf16>, vector<15x64xbf16>, vector<512x64xf32> -> vector<512x64xf32>
    %c0_3 = arith.constant 0 : index
    %c0_4 = arith.constant 0 : index
    %3 = vector.load %arg3[%c0_3, %c0_4] : memref<1x64xf32, #tpu.memory_space<vmem>>, vector<1x64xf32>
    %4 = vector.broadcast %3 : vector<1x64xf32> to vector<512x64xf32>
    %5 = arith.addf %2, %4 : vector<512x64xf32>
    %cst_5 = arith.constant 0.000000e+00 : f32
    %6 = vector.broadcast %cst_5 : f32 to vector<512x64xf32>
    %7 = arith.cmpf ogt, %5, %6 : vector<512x64xf32>
    %cst_6 = arith.constant 0.00999999977 : f32
    %8 = vector.broadcast %cst_6 : f32 to vector<512x64xf32>
    %9 = arith.mulf %8, %5 : vector<512x64xf32>
    %10 = arith.select %7, %5, %9 : vector<512x64xi1>, vector<512x64xf32>
    %11 = arith.truncf %10 : vector<512x64xf32> to vector<512x64xbf16>
    %c0_7 = arith.constant 0 : index
    %c0_8 = arith.constant 0 : index
    %12 = vector.load %arg4[%c0_7, %c0_8] : memref<512x64xbf16, #tpu.memory_space<vmem>>, vector<512x64xbf16>
    tpu.vector_store %arg4[%c0_7, %c0_8], %11 {strides = array<i32>} : memref<512x64xbf16, #tpu.memory_space<vmem>>, vector<512x64xbf16>,
    return
  }
  func.func @transform_0(%arg0: i32) -> (i32, i32) {
    %c0_i32 = arith.constant 0 : i32
    %c0_i32_0 = arith.constant 0 : i32
    return %arg0, %c0_i32 : i32, i32
  }
  func.func @transform_1(%arg0: i32) -> (i32, i32) {
    %c0_i32 = arith.constant 0 : i32
    %c0_i32_0 = arith.constant 0 : i32
    %c0_i32_1 = arith.constant 0 : i32
    return %c0_i32, %c0_i32_0 : i32, i32
  }
  func.func @transform_2(%arg0: i32) -> (i32, i32) {
    %c0_i32 = arith.constant 0 : i32
    %c0_i32_0 = arith.constant 0 : i32
    %c0_i32_1 = arith.constant 0 : i32
    return %c0_i32, %c0_i32_0 : i32, i32
  }
  func.func @transform_3(%arg0: i32) -> (i32, i32) {
    %c0_i32 = arith.constant 0 : i32
    %c0_i32_0 = arith.constant 0 : i32
    return %arg0, %c0_i32 : i32, i32
  }
}

module attributes {stable_mosaic.version = 11 : i64} {
  func.func @_conv_gemm_kernel(%arg0: i32, %arg1: memref<512x960xbf16, #tpu.memory_space<vmem>>, %arg2: memref<960x128xbf16, #tpu.memory_space<vmem>>, %arg3: memref<1x128xf32, #tpu.memory_space<vmem>>, %arg4: memref<512x128xbf16, #tpu.memory_space<vmem>>) attributes {dimension_semantics = [#tpu.dimension_semantics<parallel>], iteration_bounds = array<i64: 3>, scalar_prefetch = 0 : i64, scratch_operands = 0 : i64, tpu.core_type = #tpu.core_type<tc>, window_params = [{transform_indices = @transform_0, window_bounds = array<i64: 512, 960>}, {pipeline_mode = #tpu.pipeline_mode<synchronous>, transform_indices = @transform_1, window_bounds = array<i64: 960, 128>}, {pipeline_mode = #tpu.pipeline_mode<synchronous>, transform_indices = @transform_2, window_bounds = array<i64: 1, 128>}, {transform_indices = @transform_3, window_bounds = array<i64: 512, 128>}]} {
    %c0 = arith.constant 0 : index
    %c0_0 = arith.constant 0 : index
    %0 = vector.load %arg1[%c0, %c0_0] : memref<512x960xbf16, #tpu.memory_space<vmem>>, vector<512x960xbf16>
    %c0_1 = arith.constant 0 : index
    %c0_2 = arith.constant 0 : index
    %1 = vector.load %arg2[%c0_1, %c0_2] : memref<960x128xbf16, #tpu.memory_space<vmem>>, vector<960x128xbf16>
    %cst = arith.constant dense<0.000000e+00> : vector<512x128xf32>
    %2 = tpu.matmul %0, %1, %cst {dimension_numbers = #tpu.dot_dimension_numbers<[1], [0], [0], [1], [0, 0, 1, 1], [], []>} : vector<512x960xbf16>, vector<960x128xbf16>, vector<512x128xf32> -> vector<512x128xf32>
    %c0_3 = arith.constant 0 : index
    %c0_4 = arith.constant 0 : index
    %3 = vector.load %arg3[%c0_3, %c0_4] : memref<1x128xf32, #tpu.memory_space<vmem>>, vector<1x128xf32>
    %4 = vector.broadcast %3 : vector<1x128xf32> to vector<512x128xf32>
    %5 = arith.addf %2, %4 : vector<512x128xf32>
    %cst_5 = arith.constant 0.000000e+00 : f32
    %6 = vector.broadcast %cst_5 : f32 to vector<512x128xf32>
    %7 = arith.cmpf ogt, %5, %6 : vector<512x128xf32>
    %cst_6 = arith.constant 0.00999999977 : f32
    %8 = vector.broadcast %cst_6 : f32 to vector<512x128xf32>
    %9 = arith.mulf %8, %5 : vector<512x128xf32>
    %10 = arith.select %7, %5, %9 : vector<512x128xi1>, vector<512x128xf32>
    %11 = arith.truncf %10 : vector<512x128xf32> to vector<512x128xbf16>
    %c0_7 = arith.constant 0 : index
    %c0_8 = arith.constant 0 : index
    %12 = vector.load %arg4[%c0_7, %c0_8] : memref<512x128xbf16, #tpu.memory_space<vmem>>, vector<512x128xbf16>
    tpu.vector_store %arg4[%c0_7, %c0_8], %11 {strides = array<i32>} : memref<512x128xbf16, #tpu.memory_space<vmem>>, vector<512x128xbf16>,
    return
  }
  func.func @transform_0(%arg0: i32) -> (i32, i32) {
    %c0_i32 = arith.constant 0 : i32
    %c0_i32_0 = arith.constant 0 : i32
    return %arg0, %c0_i32 : i32, i32
  }
  func.func @transform_1(%arg0: i32) -> (i32, i32) {
    %c0_i32 = arith.constant 0 : i32
    %c0_i32_0 = arith.constant 0 : i32
    %c0_i32_1 = arith.constant 0 : i32
    return %c0_i32, %c0_i32_0 : i32, i32
  }
  func.func @transform_2(%arg0: i32) -> (i32, i32) {
    %c0_i32 = arith.constant 0 : i32
    %c0_i32_0 = arith.constant 0 : i32
    %c0_i32_1 = arith.constant 0 : i32
    return %c0_i32, %c0_i32_0 : i32, i32
  }
  func.func @transform_3(%arg0: i32) -> (i32, i32) {
    %c0_i32 = arith.constant 0 : i32
    %c0_i32_0 = arith.constant 0 : i32
    return %arg0, %c0_i32 : i32, i32
  }
}

module attributes {stable_mosaic.version = 11 : i64} {
  func.func @_conv_gemm_kernel(%arg0: i32, %arg1: memref<448x1920xbf16, #tpu.memory_space<vmem>>, %arg2: memref<1920x256xbf16, #tpu.memory_space<vmem>>, %arg3: memref<1x256xf32, #tpu.memory_space<vmem>>, %arg4: memref<448x256xf32, #tpu.memory_space<vmem>>) attributes {dimension_semantics = [#tpu.dimension_semantics<parallel>], iteration_bounds = array<i64: 2>, scalar_prefetch = 0 : i64, scratch_operands = 0 : i64, tpu.core_type = #tpu.core_type<tc>, window_params = [{transform_indices = @transform_0, window_bounds = array<i64: 448, 1920>}, {pipeline_mode = #tpu.pipeline_mode<synchronous>, transform_indices = @transform_1, window_bounds = array<i64: 1920, 256>}, {pipeline_mode = #tpu.pipeline_mode<synchronous>, transform_indices = @transform_2, window_bounds = array<i64: 1, 256>}, {transform_indices = @transform_3, window_bounds = array<i64: 448, 256>}]} {
    %c0 = arith.constant 0 : index
    %c0_0 = arith.constant 0 : index
    %0 = vector.load %arg1[%c0, %c0_0] : memref<448x1920xbf16, #tpu.memory_space<vmem>>, vector<448x1920xbf16>
    %c0_1 = arith.constant 0 : index
    %c0_2 = arith.constant 0 : index
    %1 = vector.load %arg2[%c0_1, %c0_2] : memref<1920x256xbf16, #tpu.memory_space<vmem>>, vector<1920x256xbf16>
    %cst = arith.constant dense<0.000000e+00> : vector<448x256xf32>
    %2 = tpu.matmul %0, %1, %cst {dimension_numbers = #tpu.dot_dimension_numbers<[1], [0], [0], [1], [0, 0, 1, 1], [], []>} : vector<448x1920xbf16>, vector<1920x256xbf16>, vector<448x256xf32> -> vector<448x256xf32>
    %c0_3 = arith.constant 0 : index
    %c0_4 = arith.constant 0 : index
    %3 = vector.load %arg3[%c0_3, %c0_4] : memref<1x256xf32, #tpu.memory_space<vmem>>, vector<1x256xf32>
    %4 = vector.broadcast %3 : vector<1x256xf32> to vector<448x256xf32>
    %5 = arith.addf %2, %4 : vector<448x256xf32>
    %cst_5 = arith.constant 0.000000e+00 : f32
    %6 = vector.broadcast %cst_5 : f32 to vector<448x256xf32>
    %7 = arith.cmpf ogt, %5, %6 : vector<448x256xf32>
    %cst_6 = arith.constant 0.00999999977 : f32
    %8 = vector.broadcast %cst_6 : f32 to vector<448x256xf32>
    %9 = arith.mulf %8, %5 : vector<448x256xf32>
    %10 = arith.select %7, %5, %9 : vector<448x256xi1>, vector<448x256xf32>
    %c0_7 = arith.constant 0 : index
    %c0_8 = arith.constant 0 : index
    %11 = vector.load %arg4[%c0_7, %c0_8] : memref<448x256xf32, #tpu.memory_space<vmem>>, vector<448x256xf32>
    tpu.vector_store %arg4[%c0_7, %c0_8], %10 {strides = array<i32>} : memref<448x256xf32, #tpu.memory_space<vmem>>, vector<448x256xf32>,
    return
  }
  func.func @transform_0(%arg0: i32) -> (i32, i32) {
    %c0_i32 = arith.constant 0 : i32
    %c0_i32_0 = arith.constant 0 : i32
    return %arg0, %c0_i32 : i32, i32
  }
  func.func @transform_1(%arg0: i32) -> (i32, i32) {
    %c0_i32 = arith.constant 0 : i32
    %c0_i32_0 = arith.constant 0 : i32
    %c0_i32_1 = arith.constant 0 : i32
    return %c0_i32, %c0_i32_0 : i32, i32
  }
  func.func @transform_2(%arg0: i32) -> (i32, i32) {
    %c0_i32 = arith.constant 0 : i32
    %c0_i32_0 = arith.constant 0 : i32
    %c0_i32_1 = arith.constant 0 : i32
    return %c0_i32, %c0_i32_0 : i32, i32
  }
  func.func @transform_3(%arg0: i32) -> (i32, i32) {
    %c0_i32 = arith.constant 0 : i32
    %c0_i32_0 = arith.constant 0 : i32
    return %arg0, %c0_i32 : i32, i32
  }
}

module attributes {stable_mosaic.version = 11 : i64} {
  func.func @_fc_kernel(%arg0: i32, %arg1: memref<2x5760xf32, #tpu.memory_space<vmem>>, %arg2: memref<5760x2xf32, #tpu.memory_space<vmem>>, %arg3: memref<1x2xf32, #tpu.memory_space<vmem>>, %arg4: memref<2x2xf32, #tpu.memory_space<vmem>>) attributes {dimension_semantics = [#tpu.dimension_semantics<arbitrary>], iteration_bounds = array<i64: 8>, scalar_prefetch = 0 : i64, scratch_operands = 0 : i64, tpu.core_type = #tpu.core_type<tc>, window_params = [{transform_indices = @transform_0, window_bounds = array<i64: 2, 5760>}, {transform_indices = @transform_1, window_bounds = array<i64: 5760, 2>}, {pipeline_mode = #tpu.pipeline_mode<synchronous>, transform_indices = @transform_2, window_bounds = array<i64: 1, 2>}, {pipeline_mode = #tpu.pipeline_mode<synchronous>, transform_indices = @transform_3, window_bounds = array<i64: 2, 2>}]} {
    %c0_i32 = arith.constant 0 : i32
    %0 = arith.cmpi eq, %arg0, %c0_i32 : i32
    %1 = arith.extui %0 : i1 to i32
    %c0_i32_0 = arith.constant 0 : i32
    %2 = arith.cmpi ne, %1, %c0_i32_0 : i32
    scf.if %2 {
      %cst_9 = arith.constant 0.000000e+00 : f32
      %12 = vector.broadcast %cst_9 : f32 to vector<2x2xf32>
      %c0_10 = arith.constant 0 : index
      %c0_11 = arith.constant 0 : index
      %13 = vector.load %arg4[%c0_10, %c0_11] : memref<2x2xf32, #tpu.memory_space<vmem>>, vector<2x2xf32>
      tpu.vector_store %arg4[%c0_10, %c0_11], %12 {strides = array<i32>} : memref<2x2xf32, #tpu.memory_space<vmem>>, vector<2x2xf32>,
    } else {
    }
    %c0 = arith.constant 0 : index
    %c0_1 = arith.constant 0 : index
    %3 = vector.load %arg4[%c0, %c0_1] : memref<2x2xf32, #tpu.memory_space<vmem>>, vector<2x2xf32>
    %c0_2 = arith.constant 0 : index
    %c0_3 = arith.constant 0 : index
    %4 = vector.load %arg1[%c0_2, %c0_3] : memref<2x5760xf32, #tpu.memory_space<vmem>>, vector<2x5760xf32>
    %c0_4 = arith.constant 0 : index
    %c0_5 = arith.constant 0 : index
    %5 = vector.load %arg2[%c0_4, %c0_5] : memref<5760x2xf32, #tpu.memory_space<vmem>>, vector<5760x2xf32>
    %cst = arith.constant dense<0.000000e+00> : vector<2x2xf32>
    %6 = tpu.matmul %4, %5, %cst {dimension_numbers = #tpu.dot_dimension_numbers<[1], [0], [0], [1], [0, 0, 1, 1], [], []>} : vector<2x5760xf32>, vector<5760x2xf32>, vector<2x2xf32> -> vector<2x2xf32>
    %7 = arith.addf %3, %6 : vector<2x2xf32>
    %c0_6 = arith.constant 0 : index
    %c0_7 = arith.constant 0 : index
    %8 = vector.load %arg4[%c0_6, %c0_7] : memref<2x2xf32, #tpu.memory_space<vmem>>, vector<2x2xf32>
    tpu.vector_store %arg4[%c0_6, %c0_7], %7 {strides = array<i32>} : memref<2x2xf32, #tpu.memory_space<vmem>>, vector<2x2xf32>,
    %c7_i32 = arith.constant 7 : i32
    %9 = arith.cmpi eq, %arg0, %c7_i32 : i32
    %10 = arith.extui %9 : i1 to i32
    %c0_i32_8 = arith.constant 0 : i32
    %11 = arith.cmpi ne, %10, %c0_i32_8 : i32
    scf.if %11 {
      %c0_9 = arith.constant 0 : index
      %c0_10 = arith.constant 0 : index
      %12 = vector.load %arg4[%c0_9, %c0_10] : memref<2x2xf32, #tpu.memory_space<vmem>>, vector<2x2xf32>
      %c0_11 = arith.constant 0 : index
      %c0_12 = arith.constant 0 : index
      %13 = vector.load %arg3[%c0_11, %c0_12] : memref<1x2xf32, #tpu.memory_space<vmem>>, vector<1x2xf32>
      %14 = vector.broadcast %13 : vector<1x2xf32> to vector<2x2xf32>
      %15 = arith.addf %12, %14 : vector<2x2xf32>
      %c0_13 = arith.constant 0 : index
      %c0_14 = arith.constant 0 : index
      %16 = vector.load %arg4[%c0_13, %c0_14] : memref<2x2xf32, #tpu.memory_space<vmem>>, vector<2x2xf32>
      tpu.vector_store %arg4[%c0_13, %c0_14], %15 {strides = array<i32>} : memref<2x2xf32, #tpu.memory_space<vmem>>, vector<2x2xf32>,
    } else {
    }
    return
  }
  func.func @transform_0(%arg0: i32) -> (i32, i32) {
    %c0_i32 = arith.constant 0 : i32
    %c0_i32_0 = arith.constant 0 : i32
    return %c0_i32, %arg0 : i32, i32
  }
  func.func @transform_1(%arg0: i32) -> (i32, i32) {
    %c0_i32 = arith.constant 0 : i32
    %c0_i32_0 = arith.constant 0 : i32
    return %arg0, %c0_i32 : i32, i32
  }
  func.func @transform_2(%arg0: i32) -> (i32, i32) {
    %c0_i32 = arith.constant 0 : i32
    %c0_i32_0 = arith.constant 0 : i32
    %c0_i32_1 = arith.constant 0 : i32
    return %c0_i32, %c0_i32_0 : i32, i32
  }
  func.func @transform_3(%arg0: i32) -> (i32, i32) {
    %c0_i32 = arith.constant 0 : i32
    %c0_i32_0 = arith.constant 0 : i32
    %c0_i32_1 = arith.constant 0 : i32
    return %c0_i32, %c0_i32_0 : i32, i32
  }
}

</mosaic_0001>

<bundles_post_ra>
// kernel: net_forward.4
= control target key start
LH: loop header
LB: loop body
LE: loop exit
PB: predicated region body
PF: predicated region fallthrough
CT: control target
= control target key end

     0   :  { %s1752_s12 = smov 0   ;;  %s2109_s0 = inlined_call_operand.vmem [shape: bf16[3584,15], index: 0, kind: input, shape index: {}]   ;;  %s2110_s1 = inlined_call_operand.vmem [shape: bf16[15,64], index: 1, kind: input, shape index: {}]   ;;  %s2111_s2 = inlined_call_operand.vmem [shape: f32[1,64], index: 2, kind: input, shape index: {}]   ;;  %s2112_s3 = inlined_call_operand.vmem [shape: bf16[3584,64], index: 3, kind: output, shape index: {}]  }
   0x1 LB: > { %s1375_s13 = sadd.s32 4294967295, %s1729_s12   ;;  %p1379_p0 = scmp.ge.s32.totalorder %s1729_s12, 1  ;;  %s1729_s12 = sphi %s1752_s12, %s13_s12  }
   0x2   : > { %p138_p1 = scmp.lt.s32.totalorder %s1729_s12, 8 }
   0x4   : > { %p139_p2 = pnand %p1379_p0, %p138_p1 }
   0x5   : > { %v1690_v0 = vld [vmem:[%s2110_s1] sm:$0xff] (!%p139_p2)   ;;  %vm510_vm0 = vcmask (!%p139_p2), 1046528   ;;  %vm511_vm1 = vcmask (!%p139_p2), 1047552   ;;  %s1380_s16 = sshll.u32 (!%p139_p2), %s1375_s13, 6  ;;  %v1731_v1 = vmov (!%p139_p2), 65535   ;;  %vm413_vm2 = vcmask (!%p139_p2), 121856  }
   0x6   : > { %142 = sbr.rel (%p139_p2) target bundleno = 317 (0x13d), region = 32  ;;  %v512_v2 = vsel (!%p139_p2), %vm510_vm0, 4294967295, %v1731_v1  ;;  %p163_p3 = scmp.lt.s32.totalorder (!%p139_p2), %s1380_s16, 447  ;;  %v1840_v37 = vld [vmem:[%s2111_s2] ss:$0 sm:$0xff] (!%p139_p2)  ;;  %vm1254_vm3 = vcmask (!%p139_p2), 519168  }
   0x7   : > { %v513_v3 = vsel (!%p139_p2), %vm511_vm1, %v512_v2, 0 }
   0x8   : > { %v515_v4 = vand.u32 (!%p139_p2), %v1690_v0, %v513_v3 }
   0xa   : > { %1613 = vmatprep.subr.bf16.mxu0 (!%p139_p2), %v515_v4  ;;  %1679 = vmatprep.subr.bf16.mxu1 (!%p139_p2), %v515_v4 }
   0xb   : > { %1614 = vmatpush3.bf16.msra.mxu0 (!%p139_p2), %v515_v4  ;;  %1680 = vmatpush3.bf16.msra.mxu1 (!%p139_p2), %v515_v4 }
   0xd   : > { %s2114_s16 = smov (!%p163_p3, %s1380_s16), 447 }
   0xe   : > { %s1381_s17 = sshll.u32 %s2114_s16, 2 }
   0xf   : > { %s1771_s20 = scalar_lea.vmem %s2109_s0, %s1381_s17  ;;  %s1852_s25 = scalar_lea.vmem %s2112_s3, %s1381_s17 }
  0x10   : > { %v1691_v5 = vld [vmem:[%s1771_s20] sm:$0xff]   ;;  %v1693_v7 = vld [vmem:[%s1771_s20 + $0x8] sm:$0xff]   ;;  %v1695_v9 = vld [vmem:[%s1771_s20 + $0x10] sm:$0xff]  }
  0x11   : > { %v1692_v6 = vld [vmem:[%s1771_s20 + $0x80] sm:$0xff]   ;;  %1615 = vmatprep.mubr.msk.bf16.mxu0 %vm413_vm2, %v1691_v5  ;;  %v1694_v8 = vld [vmem:[%s1771_s20 + $0x88] sm:$0xff]   ;;  %v1696_v10 = vld [vmem:[%s1771_s20 + $0x90] sm:$0xff]  }
  0x12   : > { %1647 = vmatprep.mubr.msk.bf16.mxu1 %vm413_vm2, %v1692_v6  ;;  %1616 = vmatmul.mubr.msk.bf16.vlgmr.msra.gmra.mrb[0].mxu0 %vm413_vm2, %v1693_v7  ;;  %v1697_v11 = vld [vmem:[%s1771_s20 + $0x18] sm:$0xff]   ;;  %v1699_v13 = vld [vmem:[%s1771_s20 + $0x20] sm:$0xff]   ;;  %v1701_v15 = vld [vmem:[%s1771_s20 + $0x28] sm:$0xff]  }
  0x13   : > { %1648 = vmatmul.mubr.msk.bf16.vlgmr.msra.gmra.mrb[0].mxu1 %vm413_vm2, %v1694_v8  ;;  %1619 = vmatprep.mubr.msk.bf16.mxu0 %vm413_vm2, %v1695_v9  ;;  %v1698_v12 = vld [vmem:[%s1771_s20 + $0x98] sm:$0xff]   ;;  %v1700_v14 = vld [vmem:[%s1771_s20 + $0xa0] sm:$0xff]   ;;  %v1702_v16 = vld [vmem:[%s1771_s20 + $0xa8] sm:$0xff]  }
  0x14   : > { %1651 = vmatprep.mubr.msk.bf16.mxu1 %vm413_vm2, %v1696_v10  ;;  %v1703_v17 = vld [vmem:[%s1771_s20 + $0x30] sm:$0xff]   ;;  %v1705_v19 = vld [vmem:[%s1771_s20 + $0x38] sm:$0xff]   ;;  %v1707_v21 = vld [vmem:[%s1771_s20 + $0x40] sm:$0xff]  }
  0x15   : > { %v1704_v18 = vld [vmem:[%s1771_s20 + $0xb0] sm:$0xff]   ;;  %v1706_v20 = vld [vmem:[%s1771_s20 + $0xb8] sm:$0xff]   ;;  %v1708_v22 = vld [vmem:[%s1771_s20 + $0xc0] sm:$0xff]  }
  0x16   : > { %v1709_v23 = vld [vmem:[%s1771_s20 + $0x48] sm:$0xff]   ;;  %v1711_v25 = vld [vmem:[%s1771_s20 + $0x50] sm:$0xff]   ;;  %v1713_v27 = vld [vmem:[%s1771_s20 + $0x58] sm:$0xff]  }
  0x17   : > { %v1710_v24 = vld [vmem:[%s1771_s20 + $0xc8] sm:$0xff]   ;;  %v1712_v26 = vld [vmem:[%s1771_s20 + $0xd0] sm:$0xff]   ;;  %v1714_v28 = vld [vmem:[%s1771_s20 + $0xd8] sm:$0xff]  }
  0x18   : > { %v1715_v29 = vld [vmem:[%s1771_s20 + $0x60] sm:$0xff]   ;;  %v1717_v31 = vld [vmem:[%s1771_s20 + $0x68] sm:$0xff]   ;;  %v1719_v33 = vld [vmem:[%s1771_s20 + $0x70] sm:$0xff]  }
  0x19   : > { %v1716_v30 = vld [vmem:[%s1771_s20 + $0xe0] sm:$0xff]   ;;  %v1718_v32 = vld [vmem:[%s1771_s20 + $0xe8] sm:$0xff]   ;;  %v1720_v34 = vld [vmem:[%s1771_s20 + $0xf0] sm:$0xff]  }
  0x1a   : > { %1620 = vmatmul.mubr.msk.bf16.gmra.mrb[4].mxu0 %vm413_vm2, %v1697_v11  ;;  %v1721_v35 = vld [vmem:[%s1771_s20 + $0x78] sm:$0xff]  }
  0x1b   : > { %1652 = vmatmul.mubr.msk.bf16.gmra.mrb[4].mxu1 %vm413_vm2, %v1698_v12  ;;  %1623 = vmatprep.mubr.msk.bf16.mxu0 %vm413_vm2, %v1699_v13  ;;  %v1722_v36 = vld [vmem:[%s1771_s20 + $0xf8] sm:$0xff]  }
  0x1c   : > { %1655 = vmatprep.mubr.msk.bf16.mxu1 %vm413_vm2, %v1700_v14 }
  0x22   : > { %1624 = vmatmul.mubr.msk.bf16.gmra.mrb[8].mxu0 %vm413_vm2, %v1701_v15 }
  0x23   : > { %1656 = vmatmul.mubr.msk.bf16.gmra.mrb[8].mxu1 %vm413_vm2, %v1702_v16  ;;  %1627 = vmatprep.mubr.msk.bf16.mxu0 %vm413_vm2, %v1703_v17 }
  0x24   : > { %1659 = vmatprep.mubr.msk.bf16.mxu1 %vm413_vm2, %v1704_v18 }
  0x2a   : > { %1628 = vmatmul.mubr.msk.bf16.gmra.mrb[12].mxu0 %vm413_vm2, %v1705_v19 }
  0x2b   : > { %1660 = vmatmul.mubr.msk.bf16.gmra.mrb[12].mxu1 %vm413_vm2, %v1706_v20  ;;  %1631 = vmatprep.mubr.msk.bf16.mxu0 %vm413_vm2, %v1707_v21 }
  0x2c   : > { %1663 = vmatprep.mubr.msk.bf16.mxu1 %vm413_vm2, %v1708_v22 }
  0x32   : > { %1632 = vmatmul.mubr.msk.bf16.gmra.mrb[16].mxu0 %vm413_vm2, %v1709_v23 }
  0x33   : > { %1664 = vmatmul.mubr.msk.bf16.gmra.mrb[16].mxu1 %vm413_vm2, %v1710_v24  ;;  %1635 = vmatprep.mubr.msk.bf16.mxu0 %vm413_vm2, %v1711_v25 }
  0x34   : > { %1667 = vmatprep.mubr.msk.bf16.mxu1 %vm413_vm2, %v1712_v26 }
  0x3a   : > { %1636 = vmatmul.mubr.msk.bf16.gmra.mrb[20].mxu0 %vm413_vm2, %v1713_v27 }
  0x3b   : > { %1668 = vmatmul.mubr.msk.bf16.gmra.mrb[20].mxu1 %vm413_vm2, %v1714_v28  ;;  %1639 = vmatprep.mubr.msk.bf16.mxu0 %vm413_vm2, %v1715_v29 }
  0x3c   : > { %1671 = vmatprep.mubr.msk.bf16.mxu1 %vm413_vm2, %v1716_v30 }
  0x42   : > { %1640 = vmatmul.mubr.msk.bf16.gmra.mrb[24].mxu0 %vm413_vm2, %v1717_v31 }
  0x43   : > { %1672 = vmatmul.mubr.msk.bf16.gmra.mrb[24].mxu1 %vm413_vm2, %v1718_v32  ;;  %1643 = vmatprep.mubr.msk.bf16.mxu0 %vm413_vm2, %v1719_v33 }
  0x44   : > { %1675 = vmatprep.mubr.msk.bf16.mxu1 %vm413_vm2, %v1720_v34 }
  0x4a   : > { %1644 = vmatmul.mubr.msk.bf16.gmra.mrb[28].mxu0 %vm413_vm2, %v1721_v35 }
  0x4b   : > { %1676 = vmatmul.mubr.msk.bf16.gmra.mrb[28].mxu1 %vm413_vm2, %v1722_v36 }
  0xe5   : > { %v1617_v38 = vpop.f32.mrb[0].mxu0 }
  0xe6   : > { %v560_v39 = vadd.f32 %v1617_v38, %v1840_v37  ;;  %v1649_v40 = vpop.f32.mrb[0].mxu1  ;;  %v551_v41 = vpop.f32.mrb[1].mxu0 }
  0xe7   : > { %v688_v42 = vadd.f32 %v1649_v40, %v1840_v37  ;;  %v552_v43 = vadd.f32 %v1840_v37, %v551_v41  ;;  %v679_v44 = vpop.f32.mrb[1].mxu1  ;;  %v1618_v45 = vpop.f32.mrb[2].mxu0 }
  0xe8   : > { %vm808_vm4 = vcmp.gt.f32.partialorder %v560_v39, 0.0  ;;  %v872_v46 = vmul.f32 0.01, %v560_v39  ;;  %v680_v47 = vadd.f32 %v1840_v37, %v679_v44  ;;  %v563_v48 = vadd.f32 %v1618_v45, %v1840_v37  ;;  %v1650_v49 = vpop.f32.mrb[2].mxu1  ;;  %v554_v50 = vpop.f32.mrb[3].mxu0 }
  0xe9   : > { %vm840_vm5 = vcmp.gt.f32.partialorder %v688_v42, 0.0  ;;  %v904_v51 = vmul.f32 0.01, %v688_v42  ;;  %vm806_vm6 = vcmp.gt.f32.partialorder %v552_v43, 0.0  ;;  %v870_v52 = vmul.f32 0.01, %v552_v43 }
  0xea   : > { %v936_v53 = vsel %vm808_vm4, %v560_v39, %v872_v46  ;;  %vm838_vm7 = vcmp.gt.f32.partialorder %v680_v47, 0.0  ;;  %v902_v54 = vmul.f32 0.01, %v680_v47  ;;  %vm809_vm8 = vcmp.gt.f32.partialorder %v563_v48, 0.0  ;;  %v682_v55 = vpop.f32.mrb[3].mxu1 }
  0xeb   : > { %v1518_v56 = vpack.c.bf16 %v936_v53, %v936_v53  ;;  %v968_v57 = vsel %vm840_vm5, %v688_v42, %v904_v51  ;;  %v934_v58 = vsel %vm806_vm6, %v552_v43, %v870_v52  ;;  %v873_v59 = vmul.f32 0.01, %v563_v48 }
  0xec   : > { %v1550_v60 = vpack.c.bf16 %v968_v57, %v968_v57  ;;  %v1516_v61 = vpack.c.bf16 %v934_v58, %v934_v58  ;;  %v966_v62 = vsel %vm838_vm7, %v680_v47, %v902_v54  ;;  %v691_v63 = vadd.f32 %v1650_v49, %v1840_v37 }
  0xed   : > { %1257 = vst.msk [vmem:[%s1852_s25 + $0x8] sm:$0xf] %vm1254_vm3, %v1518_v56  ;;  %v1548_v0 = vpack.c.bf16 %v966_v62, %v966_v62  ;;  %v937_v1 = vsel %vm809_vm8, %v563_v48, %v873_v59  ;;  %v555_v2 = vadd.f32 %v1840_v37, %v554_v50  ;;  %v683_v3 = vadd.f32 %v1840_v37, %v682_v55  ;;  %v1621_v4 = vpop.f32.mrb[4].mxu0 }
  0xee   : > { %1289 = vst.msk [vmem:[%s1852_s25 + $0x88] sm:$0xf] %vm1254_vm3, %v1550_v60  ;;  %1255 = vst.msk [vmem:[%s1852_s25] sm:$0xf] %vm1254_vm3, %v1516_v61  ;;  %v1519_v5 = vpack.c.bf16 %v937_v1, %v937_v1  ;;  %vm841_vm9 = vcmp.gt.f32.partialorder %v691_v63, 0.0  ;;  %v576_v7 = vadd.f32 %v1621_v4, %v1840_v37  ;;  %v1653_v8 = vpop.f32.mrb[4].mxu1 }
  0xef   : > { %v905_v6 = vmul.f32 0.01, %v691_v63  ;;  %v567_v9 = vpop.f32.mrb[5].mxu0  ;;  %1287 = vst.msk [vmem:[%s1852_s25 + $0x80] sm:$0xf] %vm1254_vm3, %v1548_v0  ;;  %vm807_vm10 = vcmp.gt.f32.partialorder %v555_v2, 0.0  ;;  %v704_v14 = vadd.f32 %v1653_v8, %v1840_v37 }
  0xf0   : > { %v871_v10 = vmul.f32 0.01, %v555_v2  ;;  %vm839_vm11 = vcmp.gt.f32.partialorder %v683_v3, 0.0  ;;  %v903_v11 = vmul.f32 0.01, %v683_v3  ;;  %vm812_vm12 = vcmp.gt.f32.partialorder %v576_v7, 0.0 }
  0xf1   : > { %1258 = vst.msk [vmem:[%s1852_s25 + $0xc] sm:$0xf] %vm1254_vm3, %v1519_v5  ;;  %v969_v12 = vsel %vm841_vm9, %v691_v63, %v905_v6  ;;  %v876_v13 = vmul.f32 0.01, %v576_v7  ;;  %v695_v15 = vpop.f32.mrb[5].mxu1  ;;  %v1622_v16 = vpop.f32.mrb[6].mxu0  ;;  %v568_v20 = vadd.f32 %v1840_v37, %v567_v9 }
  0xf2   : > { %v1551_v17 = vpack.c.bf16 %v969_v12, %v969_v12  ;;  %v935_v18 = vsel %vm807_vm10, %v555_v2, %v871_v10  ;;  %v967_v19 = vsel %vm839_vm11, %v683_v3, %v903_v11  ;;  %v1654_v21 = vpop.f32.mrb[6].mxu1  ;;  %v570_v22 = vpop.f32.mrb[7].mxu0  ;;  %vm844_vm13 = vcmp.gt.f32.partialorder %v704_v14, 0.0 }
  0xf3   : > { %v1517_v23 = vpack.c.bf16 %v935_v18, %v935_v18  ;;  %v1549_v24 = vpack.c.bf16 %v967_v19, %v967_v19  ;;  %v940_v25 = vsel %vm812_vm12, %v576_v7, %v876_v13  ;;  %v698_v26 = vpop.f32.mrb[7].mxu1  ;;  %v908_v28 = vmul.f32 0.01, %v704_v14 }
  0xf4   : > { %1290 = vst.msk [vmem:[%s1852_s25 + $0x8c] sm:$0xf] %vm1254_vm3, %v1551_v17  ;;  %v1522_v27 = vpack.c.bf16 %v940_v25, %v940_v25  ;;  %vm810_vm14 = vcmp.gt.f32.partialorder %v568_v20, 0.0  ;;  %v874_v29 = vmul.f32 0.01, %v568_v20  ;;  %v696_v30 = vadd.f32 %v1840_v37, %v695_v15 }
  0xf5   : > { %1256 = vst.msk [vmem:[%s1852_s25 + $0x4] sm:$0xf] %vm1254_vm3, %v1517_v23  ;;  %1288 = vst.msk [vmem:[%s1852_s25 + $0x84] sm:$0xf] %vm1254_vm3, %v1549_v24  ;;  %v579_v31 = vadd.f32 %v1622_v16, %v1840_v37  ;;  %v707_v32 = vadd.f32 %v1654_v21, %v1840_v37  ;;  %v571_v33 = vadd.f32 %v1840_v37, %v570_v22  ;;  %v1625_v38 = vpop.f32.mrb[8].mxu0 }
  0xf6   : > { %1261 = vst.msk [vmem:[%s1852_s25 + $0x18] sm:$0xf] %vm1254_vm3, %v1522_v27  ;;  %v972_v34 = vsel %vm844_vm13, %v704_v14, %v908_v28  ;;  %v938_v35 = vsel %vm810_vm14, %v568_v20, %v874_v29  ;;  %v699_v36 = vadd.f32 %v1840_v37, %v698_v26  ;;  %vm842_vm15 = vcmp.gt.f32.partialorder %v696_v30, 0.0  ;;  %v1657_v42 = vpop.f32.mrb[8].mxu1  ;;  %v583_v43 = vpop.f32.mrb[9].mxu0 }
  0xf7   : > { %v1554_v39 = vpack.c.bf16 %v972_v34, %v972_v34  ;;  %v1520_v40 = vpack.c.bf16 %v938_v35, %v938_v35  ;;  %v906_v41 = vmul.f32 0.01, %v696_v30  ;;  %vm813_vm0 = vcmp.gt.f32.partialorder %v579_v31, 0.0  ;;  %v711_v48 = vpop.f32.mrb[9].mxu1  ;;  %v1626_v49 = vpop.f32.mrb[10].mxu0 }
  0xf8   : > { %v877_v44 = vmul.f32 0.01, %v579_v31  ;;  %vm845_vm1 = vcmp.gt.f32.partialorder %v707_v32, 0.0  ;;  %v909_v45 = vmul.f32 0.01, %v707_v32  ;;  %vm811_vm2 = vcmp.gt.f32.partialorder %v571_v33, 0.0 }
  0xf9   : > { %1293 = vst.msk [vmem:[%s1852_s25 + $0x98] sm:$0xf] %vm1254_vm3, %v1554_v39  ;;  %1259 = vst.msk [vmem:[%s1852_s25 + $0x10] sm:$0xf] %vm1254_vm3, %v1520_v40  ;;  %v970_v46 = vsel %vm842_vm15, %v696_v30, %v906_v41  ;;  %v875_v47 = vmul.f32 0.01, %v571_v33  ;;  %v592_v59 = vadd.f32 %v1625_v38, %v1840_v37  ;;  %v720_v63 = vadd.f32 %v1657_v42, %v1840_v37 }
  0xfa   : > { %vm843_vm4 = vcmp.gt.f32.partialorder %v699_v36, 0.0  ;;  %v1552_v50 = vpack.c.bf16 %v970_v46, %v970_v46  ;;  %v941_v51 = vsel %vm813_vm0, %v579_v31, %v877_v44  ;;  %v973_v52 = vsel %vm845_vm1, %v707_v32, %v909_v45  ;;  %v1658_v54 = vpop.f32.mrb[10].mxu1  ;;  %v586_v55 = vpop.f32.mrb[11].mxu0 }
  0xfb   : > { %v907_v53 = vmul.f32 0.01, %v699_v36  ;;  %v1523_v56 = vpack.c.bf16 %v941_v51, %v941_v51  ;;  %v1555_v57 = vpack.c.bf16 %v973_v52, %v973_v52  ;;  %v939_v58 = vsel %vm811_vm2, %v571_v33, %v875_v47  ;;  %v714_v60 = vpop.f32.mrb[11].mxu1 }
  0xfc   : > { %1291 = vst.msk [vmem:[%s1852_s25 + $0x90] sm:$0xf] %vm1254_vm3, %v1552_v50  ;;  %v1521_v61 = vpack.c.bf16 %v939_v58, %v939_v58  ;;  %v584_v0 = vadd.f32 %v1840_v37, %v583_v43  ;;  %vm816_vm5 = vcmp.gt.f32.partialorder %v592_v59, 0.0  ;;  %v880_v2 = vmul.f32 0.01, %v592_v59 }
  0xfd   : > { %v971_v62 = vsel %vm843_vm4, %v699_v36, %v907_v53  ;;  %1262 = vst.msk [vmem:[%s1852_s25 + $0x1c] sm:$0xf] %vm1254_vm3, %v1523_v56  ;;  %1294 = vst.msk [vmem:[%s1852_s25 + $0x9c] sm:$0xf] %vm1254_vm3, %v1555_v57  ;;  %v712_v3 = vadd.f32 %v1840_v37, %v711_v48  ;;  %vm848_vm6 = vcmp.gt.f32.partialorder %v720_v63, 0.0  ;;  %v595_v8 = vadd.f32 %v1626_v49, %v1840_v37  ;;  %v1629_v9 = vpop.f32.mrb[12].mxu0 }
  0xfe   : > { %v1553_v1 = vpack.c.bf16 %v971_v62, %v971_v62  ;;  %1260 = vst.msk [vmem:[%s1852_s25 + $0x14] sm:$0xf] %vm1254_vm3, %v1521_v61  ;;  %v912_v4 = vmul.f32 0.01, %v720_v63  ;;  %vm814_vm7 = vcmp.gt.f32.partialorder %v584_v0, 0.0  ;;  %v944_v6 = vsel %vm816_vm5, %v592_v59, %v880_v2  ;;  %v1661_v10 = vpop.f32.mrb[12].mxu1 }
  0xff   : > { %v878_v5 = vmul.f32 0.01, %v584_v0  ;;  %vm846_vm8 = vcmp.gt.f32.partialorder %v712_v3, 0.0  ;;  %v910_v7 = vmul.f32 0.01, %v712_v3  ;;  %v1526_v11 = vpack.c.bf16 %v944_v6, %v944_v6  ;;  %v599_v15 = vpop.f32.mrb[13].mxu0 }
 0x100   : > { %1292 = vst.msk [vmem:[%s1852_s25 + $0x94] sm:$0xf] %vm1254_vm3, %v1553_v1  ;;  %v976_v12 = vsel %vm848_vm6, %v720_v63, %v912_v4  ;;  %v723_v14 = vadd.f32 %v1658_v54, %v1840_v37  ;;  %v727_v16 = vpop.f32.mrb[13].mxu1  ;;  %vm817_vm9 = vcmp.gt.f32.partialorder %v595_v8, 0.0  ;;  %v1630_v20 = vpop.f32.mrb[14].mxu0  ;;  %v587_v26 = vadd.f32 %v1840_v37, %v586_v55 }
 0x101   : > { %v942_v13 = vsel %vm814_vm7, %v584_v0, %v878_v5  ;;  %v1558_v17 = vpack.c.bf16 %v976_v12, %v976_v12  ;;  %v974_v19 = vsel %vm846_vm8, %v712_v3, %v910_v7  ;;  %v1662_v21 = vpop.f32.mrb[14].mxu1  ;;  %1265 = vst.msk [vmem:[%s1852_s25 + $0x28] sm:$0xf] %vm1254_vm3, %v1526_v11  ;;  %v881_v23 = vmul.f32 0.01, %v595_v8  ;;  %v602_v25 = vpop.f32.mrb[15].mxu0 }
 0x102   : > { %v1524_v18 = vpack.c.bf16 %v942_v13, %v942_v13  ;;  %v1556_v22 = vpack.c.bf16 %v974_v19, %v974_v19  ;;  %vm849_vm10 = vcmp.gt.f32.partialorder %v723_v14, 0.0  ;;  %v913_v24 = vmul.f32 0.01, %v723_v14  ;;  %v730_v30 = vpop.f32.mrb[15].mxu1 }
 0x103   : > { %1297 = vst.msk [vmem:[%s1852_s25 + $0xa8] sm:$0xf] %vm1254_vm3, %v1558_v17  ;;  %v715_v27 = vadd.f32 %v1840_v37, %v714_v60  ;;  %v608_v28 = vadd.f32 %v1629_v9, %v1840_v37  ;;  %v736_v29 = vadd.f32 %v1661_v10, %v1840_v37  ;;  %v945_v31 = vsel %vm817_vm9, %v595_v8, %v881_v23 }
 0x104   : > { %1263 = vst.msk [vmem:[%s1852_s25 + $0x20] sm:$0xf] %vm1254_vm3, %v1524_v18  ;;  %1295 = vst.msk [vmem:[%s1852_s25 + $0xa0] sm:$0xf] %vm1254_vm3, %v1556_v22  ;;  %v977_v32 = vsel %vm849_vm10, %v723_v14, %v913_v24  ;;  %v600_v33 = vadd.f32 %v1840_v37, %v599_v15  ;;  %v728_v34 = vadd.f32 %v1840_v37, %v727_v16  ;;  %vm815_vm11 = vcmp.gt.f32.partialorder %v587_v26, 0.0 }
 0x105   : > { %v1527_v35 = vpack.c.bf16 %v945_v31, %v945_v31  ;;  %v1559_v36 = vpack.c.bf16 %v977_v32, %v977_v32  ;;  %v879_v38 = vmul.f32 0.01, %v587_v26  ;;  %vm847_vm12 = vcmp.gt.f32.partialorder %v715_v27, 0.0  ;;  %v1633_v43 = vpop.f32.mrb[16].mxu0 }
 0x106   : > { %v911_v39 = vmul.f32 0.01, %v715_v27  ;;  %vm820_vm13 = vcmp.gt.f32.partialorder %v608_v28, 0.0  ;;  %v884_v40 = vmul.f32 0.01, %v608_v28  ;;  %vm852_vm14 = vcmp.gt.f32.partialorder %v736_v29, 0.0 }
 0x107   : > { %1266 = vst.msk [vmem:[%s1852_s25 + $0x2c] sm:$0xf] %vm1254_vm3, %v1527_v35  ;;  %1298 = vst.msk [vmem:[%s1852_s25 + $0xac] sm:$0xf] %vm1254_vm3, %v1559_v36  ;;  %v943_v41 = vsel %vm815_vm11, %v587_v26, %v879_v38  ;;  %v916_v42 = vmul.f32 0.01, %v736_v29  ;;  %v611_v59 = vadd.f32 %v1630_v20, %v1840_v37  ;;  %v739_v63 = vadd.f32 %v1662_v21, %v1840_v37 }
 0x108   : > { %vm818_vm15 = vcmp.gt.f32.partialorder %v600_v33, 0.0  ;;  %v1665_v44 = vpop.f32.mrb[16].mxu1  ;;  %v1525_v45 = vpack.c.bf16 %v943_v41, %v943_v41  ;;  %v975_v46 = vsel %vm847_vm12, %v715_v27, %v911_v39  ;;  %v948_v47 = vsel %vm820_vm13, %v608_v28, %v884_v40  ;;  %v615_v49 = vpop.f32.mrb[17].mxu0 }
 0x109   : > { %v882_v48 = vmul.f32 0.01, %v600_v33  ;;  %v743_v50 = vpop.f32.mrb[17].mxu1  ;;  %v1557_v51 = vpack.c.bf16 %v975_v46, %v975_v46  ;;  %v1530_v52 = vpack.c.bf16 %v948_v47, %v948_v47  ;;  %v980_v53 = vsel %vm852_vm14, %v736_v29, %v916_v42  ;;  %v1634_v54 = vpop.f32.mrb[18].mxu0 }
 0x10a   : > { %vm850_vm0 = vcmp.gt.f32.partialorder %v728_v34, 0.0  ;;  %v1666_v55 = vpop.f32.mrb[18].mxu1  ;;  %1264 = vst.msk [vmem:[%s1852_s25 + $0x24] sm:$0xf] %vm1254_vm3, %v1525_v45  ;;  %v1562_v56 = vpack.c.bf16 %v980_v53, %v980_v53  ;;  %v914_v58 = vmul.f32 0.01, %v728_v34  ;;  %v603_v0 = vadd.f32 %v1840_v37, %v602_v25 }
 0x10b   : > { %v946_v57 = vsel %vm818_vm15, %v600_v33, %v882_v48  ;;  %v618_v60 = vpop.f32.mrb[19].mxu0  ;;  %v1927_v61 = vpop.f32.mrb[19].mxu1  ;;  %1296 = vst.msk [vmem:[%s1852_s25 + $0xa4] sm:$0xf] %vm1254_vm3, %v1557_v51  ;;  %1269 = vst.msk [vmem:[%s1852_s25 + $0x38] sm:$0xf] %vm1254_vm3, %v1530_v52  ;;  %v731_v1 = vadd.f32 %v1840_v37, %v730_v30  ;;  %v624_v4 = vadd.f32 %v1633_v43, %v1840_v37 }
 0x10c   : > { %v1528_v62 = vpack.c.bf16 %v946_v57, %v946_v57  ;;  %1301 = vst.msk [vmem:[%s1852_s25 + $0xb8] sm:$0xf] %vm1254_vm3, %v1562_v56  ;;  %v978_v2 = vsel %vm850_vm0, %v728_v34, %v914_v58  ;;  %vm821_vm1 = vcmp.gt.f32.partialorder %v611_v59, 0.0  ;;  %v885_v3 = vmul.f32 0.01, %v611_v59 }
 0x10d   : > { %v1560_v5 = vpack.c.bf16 %v978_v2, %v978_v2  ;;  %vm853_vm2 = vcmp.gt.f32.partialorder %v739_v63, 0.0  ;;  %v917_v6 = vmul.f32 0.01, %v739_v63  ;;  %vm819_vm4 = vcmp.gt.f32.partialorder %v603_v0, 0.0  ;;  %v1637_v10 = vpop.f32.mrb[20].mxu0 }
 0x10e   : > { %1267 = vst.msk [vmem:[%s1852_s25 + $0x30] sm:$0xf] %vm1254_vm3, %v1528_v62  ;;  %v949_v7 = vsel %vm821_vm1, %v611_v59, %v885_v3  ;;  %v883_v8 = vmul.f32 0.01, %v603_v0  ;;  %vm851_vm5 = vcmp.gt.f32.partialorder %v731_v1, 0.0  ;;  %vm824_vm6 = vcmp.gt.f32.partialorder %v624_v4, 0.0 }
 0x10f   : > { %v915_v9 = vmul.f32 0.01, %v731_v1  ;;  %1299 = vst.msk [vmem:[%s1852_s25 + $0xb0] sm:$0xf] %vm1254_vm3, %v1560_v5  ;;  %v1531_v11 = vpack.c.bf16 %v949_v7, %v949_v7  ;;  %v981_v12 = vsel %vm853_vm2, %v739_v63, %v917_v6  ;;  %v888_v13 = vmul.f32 0.01, %v624_v4 }
 0x110   : > { %v1669_v14 = vpop.f32.mrb[20].mxu1  ;;  %v631_v15 = vpop.f32.mrb[21].mxu0  ;;  %v1563_v16 = vpack.c.bf16 %v981_v12, %v981_v12  ;;  %v947_v17 = vsel %vm819_vm4, %v603_v0, %v883_v8  ;;  %v752_v19 = vadd.f32 %v1665_v44, %v1840_v37  ;;  %v616_v25 = vadd.f32 %v1840_v37, %v615_v49 }
 0x111   : > { %v979_v18 = vsel %vm851_vm5, %v731_v1, %v915_v9  ;;  %v1945_v20 = vpop.f32.mrb[21].mxu1  ;;  %v1947_v21 = vpop.f32.mrb[22].mxu0  ;;  %1270 = vst.msk [vmem:[%s1852_s25 + $0x3c] sm:$0xf] %vm1254_vm3, %v1531_v11  ;;  %v1529_v22 = vpack.c.bf16 %v947_v17, %v947_v17  ;;  %v952_v24 = vsel %vm824_vm6, %v624_v4, %v888_v13  ;;  %v744_v30 = vadd.f32 %v1840_v37, %v743_v50 }
 0x112   : > { %v1561_v23 = vpack.c.bf16 %v979_v18, %v979_v18  ;;  %v1952_v26 = vpop.f32.mrb[22].mxu1  ;;  %v1954_v27 = vpop.f32.mrb[23].mxu0  ;;  %1302 = vst.msk [vmem:[%s1852_s25 + $0xbc] sm:$0xf] %vm1254_vm3, %v1563_v16  ;;  %v1534_v28 = vpack.c.bf16 %v952_v24, %v952_v24  ;;  %vm856_vm7 = vcmp.gt.f32.partialorder %v752_v19, 0.0  ;;  %vm822_vm8 = vcmp.gt.f32.partialorder %v616_v25, 0.0 }
 0x113   : > { %v920_v29 = vmul.f32 0.01, %v752_v19  ;;  %v1959_v31 = vpop.f32.mrb[23].mxu1  ;;  %1268 = vst.msk [vmem:[%s1852_s25 + $0x34] sm:$0xf] %vm1254_vm3, %v1529_v22  ;;  %v627_v33 = vadd.f32 %v1634_v54, %v1840_v37  ;;  %v755_v34 = vadd.f32 %v1666_v55, %v1840_v37  ;;  %vm854_vm9 = vcmp.gt.f32.partialorder %v744_v30, 0.0 }
 0x114   : > { %1300 = vst.msk [vmem:[%s1852_s25 + $0xb4] sm:$0xf] %vm1254_vm3, %v1561_v23  ;;  %v886_v32 = vmul.f32 0.01, %v616_v25  ;;  %1273 = vst.msk [vmem:[%s1852_s25 + $0x48] sm:$0xf] %vm1254_vm3, %v1534_v28  ;;  %v619_v38 = vadd.f32 %v1840_v37, %v618_v60  ;;  %v747_v53 = vadd.f32 %v1840_v37, %v1927_v61  ;;  %v640_v54 = vadd.f32 %v1637_v10, %v1840_v37 }
 0x115   : > { %v984_v35 = vsel %vm856_vm7, %v752_v19, %v920_v29  ;;  %v918_v36 = vmul.f32 0.01, %v744_v30  ;;  %vm825_vm10 = vcmp.gt.f32.partialorder %v627_v33, 0.0  ;;  %v889_v41 = vmul.f32 0.01, %v627_v33  ;;  %v1970_v45 = vpop.f32.mrb[24].mxu0 }
 0x116   : > { %v1566_v39 = vpack.c.bf16 %v984_v35, %v984_v35  ;;  %v950_v40 = vsel %vm822_vm8, %v616_v25, %v886_v32  ;;  %vm857_vm11 = vcmp.gt.f32.partialorder %v755_v34, 0.0  ;;  %v921_v44 = vmul.f32 0.01, %v755_v34  ;;  %v1673_v49 = vpop.f32.mrb[24].mxu1  ;;  %v1974_v50 = vpop.f32.mrb[25].mxu0 }
 0x117   : > { %v1532_v42 = vpack.c.bf16 %v950_v40, %v950_v40  ;;  %v982_v43 = vsel %vm854_vm9, %v744_v30, %v918_v36  ;;  %v953_v47 = vsel %vm825_vm10, %v627_v33, %v889_v41  ;;  %vm823_vm12 = vcmp.gt.f32.partialorder %v619_v38, 0.0  ;;  %v1981_v55 = vpop.f32.mrb[25].mxu1  ;;  %v1983_v56 = vpop.f32.mrb[26].mxu0 }
 0x118   : > { %1305 = vst.msk [vmem:[%s1852_s25 + $0xc8] sm:$0xf] %vm1254_vm3, %v1566_v39  ;;  %v1564_v46 = vpack.c.bf16 %v982_v43, %v982_v43  ;;  %v887_v48 = vmul.f32 0.01, %v619_v38  ;;  %v1535_v51 = vpack.c.bf16 %v953_v47, %v953_v47  ;;  %v985_v52 = vsel %vm857_vm11, %v755_v34, %v921_v44  ;;  %v1989_v62 = vpop.f32.mrb[26].mxu1  ;;  %v1991_v63 = vpop.f32.mrb[27].mxu0 }
 0x119   : > { %1271 = vst.msk [vmem:[%s1852_s25 + $0x40] sm:$0xf] %vm1254_vm3, %v1532_v42  ;;  %v1567_v57 = vpack.c.bf16 %v985_v52, %v985_v52  ;;  %v768_v59 = vadd.f32 %v1669_v14, %v1840_v37  ;;  %v632_v60 = vadd.f32 %v1840_v37, %v631_v15  ;;  %vm855_vm13 = vcmp.gt.f32.partialorder %v747_v53, 0.0  ;;  %v1995_v1 = vpop.f32.mrb[27].mxu1 }
 0x11a   : > { %1303 = vst.msk [vmem:[%s1852_s25 + $0xc0] sm:$0xf] %vm1254_vm3, %v1564_v46  ;;  %v951_v58 = vsel %vm823_vm12, %v619_v38, %v887_v48  ;;  %1274 = vst.msk [vmem:[%s1852_s25 + $0x4c] sm:$0xf] %vm1254_vm3, %v1535_v51  ;;  %v919_v0 = vmul.f32 0.01, %v747_v53  ;;  %v760_v6 = vadd.f32 %v1840_v37, %v1945_v20  ;;  %v643_v7 = vadd.f32 %v1947_v21, %v1840_v37 }
 0x11b   : > { %v1533_v61 = vpack.c.bf16 %v951_v58, %v951_v58  ;;  %vm828_vm14 = vcmp.gt.f32.partialorder %v640_v54, 0.0  ;;  %1306 = vst.msk [vmem:[%s1852_s25 + $0xcc] sm:$0xf] %vm1254_vm3, %v1567_v57  ;;  %v892_v2 = vmul.f32 0.01, %v640_v54  ;;  %vm860_vm15 = vcmp.gt.f32.partialorder %v768_v59, 0.0 }
 0x11c   : > { %v924_v3 = vmul.f32 0.01, %v768_v59  ;;  %vm826_vm0 = vcmp.gt.f32.partialorder %v632_v60, 0.0  ;;  %v983_v4 = vsel %vm855_vm13, %v747_v53, %v919_v0  ;;  %v890_v5 = vmul.f32 0.01, %v632_v60 }
 0x11d   : > { %1272 = vst.msk [vmem:[%s1852_s25 + $0x44] sm:$0xf] %vm1254_vm3, %v1533_v61  ;;  %v1565_v8 = vpack.c.bf16 %v983_v4, %v983_v4  ;;  %v956_v9 = vsel %vm828_vm14, %v640_v54, %v892_v2  ;;  %v771_v11 = vadd.f32 %v1952_v26, %v1840_v37  ;;  %vm858_vm1 = vcmp.gt.f32.partialorder %v760_v6, 0.0  ;;  %v1645_v15 = vpop.f32.mrb[28].mxu0 }
 0x11e   : > { %v988_v10 = vsel %vm860_vm15, %v768_v59, %v924_v3  ;;  %v1538_v12 = vpack.c.bf16 %v956_v9, %v956_v9  ;;  %v954_v14 = vsel %vm826_vm0, %v632_v60, %v890_v5  ;;  %v922_v17 = vmul.f32 0.01, %v760_v6  ;;  %v2009_v19 = vpop.f32.mrb[28].mxu1  ;;  %v2019_v23 = vpop.f32.mrb[29].mxu0 }
 0x11f   : > { %v1570_v13 = vpack.c.bf16 %v988_v10, %v988_v10  ;;  %1304 = vst.msk [vmem:[%s1852_s25 + $0xc4] sm:$0xf] %vm1254_vm3, %v1565_v8  ;;  %v1536_v16 = vpack.c.bf16 %v954_v14, %v954_v14  ;;  %vm829_vm2 = vcmp.gt.f32.partialorder %v643_v7, 0.0  ;;  %v893_v18 = vmul.f32 0.01, %v643_v7  ;;  %v2021_v24 = vpop.f32.mrb[29].mxu1 }
 0x120   : > { %1277 = vst.msk [vmem:[%s1852_s25 + $0x58] sm:$0xf] %vm1254_vm3, %v1538_v12  ;;  %vm861_vm4 = vcmp.gt.f32.partialorder %v771_v11, 0.0  ;;  %v925_v20 = vmul.f32 0.01, %v771_v11  ;;  %v635_v21 = vadd.f32 %v1840_v37, %v1954_v27  ;;  %v763_v22 = vadd.f32 %v1840_v37, %v1959_v31  ;;  %v2029_v27 = vpop.f32.mrb[30].mxu0 }
 0x121   : > { %1309 = vst.msk [vmem:[%s1852_s25 + $0xd8] sm:$0xf] %vm1254_vm3, %v1570_v13  ;;  %1275 = vst.msk [vmem:[%s1852_s25 + $0x50] sm:$0xf] %vm1254_vm3, %v1536_v16  ;;  %v986_v25 = vsel %vm858_vm1, %v760_v6, %v922_v17  ;;  %v957_v26 = vsel %vm829_vm2, %v643_v7, %v893_v18  ;;  %v656_v28 = vadd.f32 %v1970_v45, %v1840_v37  ;;  %v2031_v30 = vpop.f32.mrb[30].mxu1  ;;  %v2033_v34 = vpop.f32.mrb[31].mxu0 }
 0x122   : > { %v784_v29 = vadd.f32 %v1673_v49, %v1840_v37  ;;  %v1568_v31 = vpack.c.bf16 %v986_v25, %v986_v25  ;;  %v1539_v32 = vpack.c.bf16 %v957_v26, %v957_v26  ;;  %v989_v33 = vsel %vm861_vm4, %v771_v11, %v925_v20  ;;  %v2035_v35 = vpop.f32.mrb[31].mxu1 }
 0x123   : > { %vm827_vm5 = vcmp.gt.f32.partialorder %v635_v21, 0.0  ;;  %v1571_v36 = vpack.c.bf16 %v989_v33, %v989_v33  ;;  %v891_v38 = vmul.f32 0.01, %v635_v21  ;;  %vm859_vm6 = vcmp.gt.f32.partialorder %v763_v22, 0.0 }
 0x124   : > { %v923_v39 = vmul.f32 0.01, %v763_v22  ;;  %1307 = vst.msk [vmem:[%s1852_s25 + $0xd0] sm:$0xf] %vm1254_vm3, %v1568_v31  ;;  %1278 = vst.msk [vmem:[%s1852_s25 + $0x5c] sm:$0xf] %vm1254_vm3, %v1539_v32  ;;  %v648_v44 = vadd.f32 %v1840_v37, %v1974_v50  ;;  %v776_v45 = vadd.f32 %v1840_v37, %v1981_v55  ;;  %v659_v50 = vadd.f32 %v1983_v56, %v1840_v37 }
 0x125   : > { %vm832_vm7 = vcmp.gt.f32.partialorder %v656_v28, 0.0  ;;  %v896_v40 = vmul.f32 0.01, %v656_v28  ;;  %vm864_vm8 = vcmp.gt.f32.partialorder %v784_v29, 0.0  ;;  %v928_v41 = vmul.f32 0.01, %v784_v29 }
 0x126   : > { %1310 = vst.msk [vmem:[%s1852_s25 + $0xdc] sm:$0xf] %vm1254_vm3, %v1571_v36  ;;  %v955_v42 = vsel %vm827_vm5, %v635_v21, %v891_v38  ;;  %v987_v43 = vsel %vm859_vm6, %v763_v22, %v923_v39  ;;  %vm830_vm9 = vcmp.gt.f32.partialorder %v648_v44, 0.0  ;;  %v894_v53 = vmul.f32 0.01, %v648_v44 }
 0x127   : > { %v1537_v46 = vpack.c.bf16 %v955_v42, %v955_v42  ;;  %v1569_v47 = vpack.c.bf16 %v987_v43, %v987_v43  ;;  %v960_v48 = vsel %vm832_vm7, %v656_v28, %v896_v40  ;;  %v992_v49 = vsel %vm864_vm8, %v784_v29, %v928_v41 }
 0x128   : > { %v1542_v51 = vpack.c.bf16 %v960_v48, %v960_v48  ;;  %v1574_v52 = vpack.c.bf16 %v992_v49, %v992_v49  ;;  %vm862_vm10 = vcmp.gt.f32.partialorder %v776_v45, 0.0  ;;  %v926_v54 = vmul.f32 0.01, %v776_v45 }
 0x129   : > { %1276 = vst.msk [vmem:[%s1852_s25 + $0x54] sm:$0xf] %vm1254_vm3, %v1537_v46  ;;  %1308 = vst.msk [vmem:[%s1852_s25 + $0xd4] sm:$0xf] %vm1254_vm3, %v1569_v47  ;;  %v787_v55 = vadd.f32 %v1989_v62, %v1840_v37  ;;  %v958_v57 = vsel %vm830_vm9, %v648_v44, %v894_v53  ;;  %v651_v58 = vadd.f32 %v1840_v37, %v1991_v63  ;;  %vm833_vm11 = vcmp.gt.f32.partialorder %v659_v50, 0.0 }
 0x12a   : > { %1281 = vst.msk [vmem:[%s1852_s25 + $0x68] sm:$0xf] %vm1254_vm3, %v1542_v51  ;;  %1313 = vst.msk [vmem:[%s1852_s25 + $0xe8] sm:$0xf] %vm1254_vm3, %v1574_v52  ;;  %v779_v59 = vadd.f32 %v1840_v37, %v1995_v1  ;;  %v672_v60 = vadd.f32 %v1645_v15, %v1840_v37  ;;  %v1540_v61 = vpack.c.bf16 %v958_v57, %v958_v57  ;;  %v897_v0 = vmul.f32 0.01, %v659_v50 }
 0x12b   : > { %v990_v56 = vsel %vm862_vm10, %v776_v45, %v926_v54  ;;  %vm865_vm12 = vcmp.gt.f32.partialorder %v787_v55, 0.0  ;;  %v929_v62 = vmul.f32 0.01, %v787_v55  ;;  %vm831_vm13 = vcmp.gt.f32.partialorder %v651_v58, 0.0 }
 0x12c   : > { %v1572_v2 = vpack.c.bf16 %v990_v56, %v990_v56  ;;  %1279 = vst.msk [vmem:[%s1852_s25 + $0x60] sm:$0xf] %vm1254_vm3, %v1540_v61  ;;  %v961_v3 = vsel %vm833_vm11, %v659_v50, %v897_v0  ;;  %v895_v4 = vmul.f32 0.01, %v651_v58  ;;  %vm863_vm14 = vcmp.gt.f32.partialorder %v779_v59, 0.0 }
 0x12d   : > { %v927_v63 = vmul.f32 0.01, %v779_v59  ;;  %v1543_v1 = vpack.c.bf16 %v961_v3, %v961_v3  ;;  %v993_v5 = vsel %vm865_vm12, %v787_v55, %v929_v62  ;;  %vm836_vm15 = vcmp.gt.f32.partialorder %v672_v60, 0.0 }
 0x12e   : > { %1311 = vst.msk [vmem:[%s1852_s25 + $0xe0] sm:$0xf] %vm1254_vm3, %v1572_v2  ;;  %v900_v6 = vmul.f32 0.01, %v672_v60  ;;  %v1575_v7 = vpack.c.bf16 %v993_v5, %v993_v5  ;;  %v959_v8 = vsel %vm831_vm13, %v651_v58, %v895_v4  ;;  %v800_v10 = vadd.f32 %v2009_v19, %v1840_v37 }
 0x12f   : > { %v991_v9 = vsel %vm863_vm14, %v779_v59, %v927_v63  ;;  %1282 = vst.msk [vmem:[%s1852_s25 + $0x6c] sm:$0xf] %vm1254_vm3, %v1543_v1  ;;  %v1541_v11 = vpack.c.bf16 %v959_v8, %v959_v8  ;;  %v664_v14 = vadd.f32 %v1840_v37, %v2019_v23  ;;  %v792_v17 = vadd.f32 %v1840_v37, %v2021_v24 }
 0x130   : > { %v1573_v12 = vpack.c.bf16 %v991_v9, %v991_v9  ;;  %v964_v13 = vsel %vm836_vm15, %v672_v60, %v900_v6  ;;  %1314 = vst.msk [vmem:[%s1852_s25 + $0xec] sm:$0xf] %vm1254_vm3, %v1575_v7  ;;  %vm868_vm0 = vcmp.gt.f32.partialorder %v800_v10, 0.0  ;;  %v932_v16 = vmul.f32 0.01, %v800_v10 }
 0x131   : > { %v1546_v15 = vpack.c.bf16 %v964_v13, %v964_v13  ;;  %1280 = vst.msk [vmem:[%s1852_s25 + $0x64] sm:$0xf] %vm1254_vm3, %v1541_v11  ;;  %vm834_vm1 = vcmp.gt.f32.partialorder %v664_v14, 0.0  ;;  %v898_v18 = vmul.f32 0.01, %v664_v14  ;;  %v675_v19 = vadd.f32 %v2029_v27, %v1840_v37 }
 0x132   : > { %1312 = vst.msk [vmem:[%s1852_s25 + $0xe4] sm:$0xf] %vm1254_vm3, %v1573_v12  ;;  %v803_v20 = vadd.f32 %v2031_v30, %v1840_v37  ;;  %v996_v21 = vsel %vm868_vm0, %v800_v10, %v932_v16  ;;  %vm866_vm2 = vcmp.gt.f32.partialorder %v792_v17, 0.0  ;;  %v930_v22 = vmul.f32 0.01, %v792_v17 }
 0x133   : > { %1285 = vst.msk [vmem:[%s1852_s25 + $0x78] sm:$0xf] %vm1254_vm3, %v1546_v15  ;;  %v667_v23 = vadd.f32 %v1840_v37, %v2033_v34  ;;  %v1578_v24 = vpack.c.bf16 %v996_v21, %v996_v21  ;;  %v962_v25 = vsel %vm834_vm1, %v664_v14, %v898_v18  ;;  %vm837_vm4 = vcmp.gt.f32.partialorder %v675_v19, 0.0 }
 0x134   : > { %v901_v26 = vmul.f32 0.01, %v675_v19  ;;  %v1544_v28 = vpack.c.bf16 %v962_v25, %v962_v25  ;;  %v994_v29 = vsel %vm866_vm2, %v792_v17, %v930_v22  ;;  %vm869_vm5 = vcmp.gt.f32.partialorder %v803_v20, 0.0 }
 0x135   : > { %v933_v27 = vmul.f32 0.01, %v803_v20  ;;  %1317 = vst.msk [vmem:[%s1852_s25 + $0xf8] sm:$0xf] %vm1254_vm3, %v1578_v24  ;;  %v1576_v30 = vpack.c.bf16 %v994_v29, %v994_v29  ;;  %vm835_vm6 = vcmp.gt.f32.partialorder %v667_v23, 0.0  ;;  %v795_v36 = vadd.f32 %v1840_v37, %v2035_v35 }
 0x136   : > { %v965_v31 = vsel %vm837_vm4, %v675_v19, %v901_v26  ;;  %v899_v32 = vmul.f32 0.01, %v667_v23  ;;  %1283 = vst.msk [vmem:[%s1852_s25 + $0x70] sm:$0xf] %vm1254_vm3, %v1544_v28 }
 0x137   : > { %v1547_v33 = vpack.c.bf16 %v965_v31, %v965_v31  ;;  %v997_v34 = vsel %vm869_vm5, %v803_v20, %v933_v27  ;;  %1315 = vst.msk [vmem:[%s1852_s25 + $0xf0] sm:$0xf] %vm1254_vm3, %v1576_v30  ;;  %vm867_vm7 = vcmp.gt.f32.partialorder %v795_v36, 0.0  ;;  %v931_v41 = vmul.f32 0.01, %v795_v36 }
 0x138   : > { %v1579_v38 = vpack.c.bf16 %v997_v34, %v997_v34  ;;  %v963_v39 = vsel %vm835_vm6, %v667_v23, %v899_v32 }
 0x139   : > { %1286 = vst.msk [vmem:[%s1852_s25 + $0x7c] sm:$0xf] %vm1254_vm3, %v1547_v33  ;;  %v1545_v40 = vpack.c.bf16 %v963_v39, %v963_v39  ;;  %v995_v42 = vsel %vm867_vm7, %v795_v36, %v931_v41 }
 0x13a   : > { %1318 = vst.msk [vmem:[%s1852_s25 + $0xfc] sm:$0xf] %vm1254_vm3, %v1579_v38  ;;  %v1577_v43 = vpack.c.bf16 %v995_v42, %v995_v42 }
 0x13b   : > { %1284 = vst.msk [vmem:[%s1852_s25 + $0x74] sm:$0xf] %vm1254_vm3, %v1545_v40 }
 0x13c   : > { %1316 = vst.msk [vmem:[%s1852_s25 + $0xf4] sm:$0xf] %vm1254_vm3, %v1577_v43 }
 0x13d PF: > { %s13_s12 = sadd.s32 1, %s1729_s12  }
 0x13e   : > { %p10_p4 = scmp.ge.s32.totalorder %s13_s12, 9  }
 0x140   :  { %12 = sbr.rel (!%p10_p4) target bundleno = 1 (0x1), region = 62 }

// kernel: net_forward.5
= control target key start
LH: loop header
LB: loop body
LE: loop exit
PB: predicated region body
PF: predicated region fallthrough
CT: control target
= control target key end

     0   :  { %s5154_s12 = smov 0   ;;  %s5827_s0 = inlined_call_operand.vmem [shape: bf16[1536,960], index: 0, kind: input, shape index: {}]   ;;  %s5828_s1 = inlined_call_operand.vmem [shape: bf16[960,128], index: 1, kind: input, shape index: {}]   ;;  %s5829_s2 = inlined_call_operand.vmem [shape: f32[1,128], index: 2, kind: input, shape index: {}]   ;;  %s5830_s3 = inlined_call_operand.vmem [shape: bf16[1536,128], index: 3, kind: output, shape index: {}]  }
   0x1 LB: > { %s3990_s13 = sadd.s32 4294967295, %s5131_s12   ;;  %p3994_p0 = scmp.ge.s32.totalorder %s5131_s12, 1  ;;  %s5131_s12 = sphi %s5154_s12, %s13_s12  }
   0x2   : > { %p139_p1 = scmp.lt.s32.totalorder %s5131_s12, 4 }
   0x4   : > { %p140_p2 = pnand %p3994_p0, %p139_p1 }
   0x5   : > { %v5064_v0 = vld [vmem:[%s5828_s1] sm:$0xff] (!%p140_p2)   ;;  %v5133_v1 = vmov (!%p140_p2), 0   ;;  %v5066_v3 = vld [vmem:[%s5828_s1 + $0x8] sm:$0xff] (!%p140_p2)   ;;  %v5068_v5 = vld [vmem:[%s5828_s1 + $0x10] sm:$0xff] (!%p140_p2)   ;;  %s3995_s7 = sshll.u32 (!%p140_p2), %s3990_s13, 6  ;;  %vm2169_vm0 = vcmask (!%p140_p2), 523264  }
   0x6   : > { %143 = sbr.rel (%p140_p2) target bundleno = 798 (0x31e), region = 32  ;;  %2266 = vmatprep.subr.bf16.mxu1 (!%p140_p2), %v5133_v1  ;;  %2844 = vmatprep.subr.bf16.mxu0 (!%p140_p2), %v5133_v1  ;;  %v5065_v2 = vld [vmem:[%s5828_s1 + $0x100] sm:$0xff] (!%p140_p2)   ;;  %v5067_v4 = vld [vmem:[%s5828_s1 + $0x108] sm:$0xff] (!%p140_p2)   ;;  %v5069_v6 = vld [vmem:[%s5828_s1 + $0x110] sm:$0xff] (!%p140_p2)   ;;  %p165_p3 = scmp.lt.s32.totalorder (!%p140_p2), %s3995_s7, 191 }
   0x7   : > { %2267 = vmatpush1.bf16.msra.mxu1 (!%p140_p2), %v5064_v0  ;;  %2845 = vmatpush1.bf16.msra.mxu0 (!%p140_p2), %v5065_v2  ;;  %v5070_v7 = vld [vmem:[%s5828_s1 + $0x18] sm:$0xff] (!%p140_p2)   ;;  %v5072_v9 = vld [vmem:[%s5828_s1 + $0x20] sm:$0xff] (!%p140_p2)   ;;  %v5074_v11 = vld [vmem:[%s5828_s1 + $0x28] sm:$0xff] (!%p140_p2)  }
   0x8   : > { %2268 = vmatprep.subr.bf16.mxu1 (!%p140_p2), %v5133_v1  ;;  %2846 = vmatprep.subr.bf16.mxu0 (!%p140_p2), %v5133_v1  ;;  %v5071_v8 = vld [vmem:[%s5828_s1 + $0x118] sm:$0xff] (!%p140_p2)   ;;  %v5073_v10 = vld [vmem:[%s5828_s1 + $0x120] sm:$0xff] (!%p140_p2)   ;;  %v5075_v12 = vld [vmem:[%s5828_s1 + $0x128] sm:$0xff] (!%p140_p2)  }
   0x9   : > { %v5076_v13 = vld [vmem:[%s5828_s1 + $0x30] sm:$0xff] (!%p140_p2)   ;;  %v5078_v15 = vld [vmem:[%s5828_s1 + $0x38] sm:$0xff] (!%p140_p2)   ;;  %v5080_v17 = vld [vmem:[%s5828_s1 + $0x40] sm:$0xff] (!%p140_p2)  }
   0xa   : > { %v5077_v14 = vld [vmem:[%s5828_s1 + $0x130] sm:$0xff] (!%p140_p2)   ;;  %v5079_v16 = vld [vmem:[%s5828_s1 + $0x138] sm:$0xff] (!%p140_p2)   ;;  %v5081_v18 = vld [vmem:[%s5828_s1 + $0x140] sm:$0xff] (!%p140_p2)  }
   0xb   : > { %2269 = vmatpush1.bf16.msra.mxu1 (!%p140_p2), %v5066_v3  ;;  %2847 = vmatpush1.bf16.msra.mxu0 (!%p140_p2), %v5067_v4  ;;  %v5082_v24 = vld [vmem:[%s5828_s1 + $0x48] sm:$0xff] (!%p140_p2)   ;;  %v5084_v27 = vld [vmem:[%s5828_s1 + $0x50] sm:$0xff] (!%p140_p2)   ;;  %v5086_v29 = vld [vmem:[%s5828_s1 + $0x58] sm:$0xff] (!%p140_p2)  }
   0xc   : > { %2270 = vmatprep.subr.bf16.mxu1 (!%p140_p2), %v5133_v1  ;;  %2848 = vmatprep.subr.bf16.mxu0 (!%p140_p2), %v5133_v1  ;;  %v5083_v26 = vld [vmem:[%s5828_s1 + $0x148] sm:$0xff] (!%p140_p2)   ;;  %v5085_v28 = vld [vmem:[%s5828_s1 + $0x150] sm:$0xff] (!%p140_p2)   ;;  %v5087_v30 = vld [vmem:[%s5828_s1 + $0x158] sm:$0xff] (!%p140_p2)  }
   0xd   : > { %s5832_s7 = smov (!%p165_p3, %s3995_s7), 191  ;;  %v5088_v31 = vld [vmem:[%s5828_s1 + $0x60] sm:$0xff]   ;;  %v5090_v33 = vld [vmem:[%s5828_s1 + $0x68] sm:$0xff]   ;;  %v5092_v35 = vld [vmem:[%s5828_s1 + $0x70] sm:$0xff]  }
   0xe   : > { %s4415_s19 = sshll.u32 %s5832_s7, 5  ;;  %v5089_v32 = vld [vmem:[%s5828_s1 + $0x160] sm:$0xff]   ;;  %v5091_v34 = vld [vmem:[%s5828_s1 + $0x168] sm:$0xff]   ;;  %v5093_v36 = vld [vmem:[%s5828_s1 + $0x170] sm:$0xff]   ;;  %s3999_s18 = sshll.u32 %s5832_s7, 2 }
   0xf   : > { %2271 = vmatpush1.bf16.msra.mxu1 %v5068_v5  ;;  %2849 = vmatpush1.bf16.msra.mxu0 %v5069_v6  ;;  %s5234_s24 = scalar_lea.vmem %s5827_s0, %s4415_s19  ;;  %v5094_v37 = vld [vmem:[%s5828_s1 + $0x78] sm:$0xff]   ;;  %v5096_v45 = vld [vmem:[%s5828_s1 + $0x80] sm:$0xff]   ;;  %v5098_v49 = vld [vmem:[%s5828_s1 + $0x88] sm:$0xff]   ;;  %s5712_s21 = scalar_lea.vmem %s5830_s3, %s3999_s18 }
  0x10   : > { %2272 = vmatprep.subr.bf16.mxu1 %v5133_v1  ;;  %2850 = vmatprep.subr.bf16.mxu0 %v5133_v1  ;;  %v5245_v19 = vld [vmem:[%s5234_s24] sm:$0xff]  ;;  %v5251_v21 = vld [vmem:[%s5234_s24 + $0x10] sm:$0xff]  ;;  %v5095_v38 = vld [vmem:[%s5828_s1 + $0x178] sm:$0xff]  }
  0x11   : > { %v5248_v20 = vld [vmem:[%s5234_s24 + $0x20] sm:$0xff]  ;;  %v184_v23 = vld [vmem:[%s5234_s24 + $0x30] sm:$0xff]  ;;  %v5099_v52 = vld [vmem:[%s5828_s1 + $0x188] sm:$0xff]  }
  0x12   : > { %v4002_v22 = vcombine.high %v5245_v19, %v5248_v20  ;;  %v4006_v25 = vcombine.high %v5251_v21, %v184_v23  ;;  %v186_v39 = vld [vmem:[%s5234_s24 + $0x40] sm:$0xff]  ;;  %v4001_v41 = vcombine.low %v5245_v19, %v5248_v20  ;;  %v188_v42 = vld [vmem:[%s5234_s24 + $0x50] sm:$0xff]  ;;  %v4005_v44 = vcombine.low %v5251_v21, %v184_v23  ;;  %v5102_v2 = vld [vmem:[%s5828_s1 + $0x98] sm:$0xff]  }
  0x13   : > { %2273 = vmatpush1.bf16.msra.mxu1 %v5070_v7  ;;  %2851 = vmatpush1.bf16.msra.mxu0 %v5071_v8  ;;  %v190_v40 = vld [vmem:[%s5234_s24 + $0x60] sm:$0xff]  ;;  %v192_v43 = vld [vmem:[%s5234_s24 + $0x70] sm:$0xff]  ;;  %v5104_v3 = vld [vmem:[%s5828_s1 + $0x198] sm:$0xff]  }
  0x14   : > { %2274 = vmatprep.subr.bf16.mxu1 %v5133_v1  ;;  %2852 = vmatprep.subr.bf16.mxu0 %v5133_v1  ;;  %v5097_v46 = vld [vmem:[%s5828_s1 + $0x180] sm:$0xff]   ;;  %v4010_v47 = vcombine.high %v186_v39, %v190_v40  ;;  %v4014_v48 = vcombine.high %v188_v42, %v192_v43  ;;  %v196_v53 = vld [vmem:[%s5234_s24 + $0x90] sm:$0xff]  ;;  %v4009_v55 = vcombine.low %v186_v39, %v190_v40 }
  0x15   : > { %2298 = vmatprep.mubr.bf16.mxu1 %v4002_v22  ;;  %2876 = vmatprep.mubr.bf16.mxu0 %v4006_v25  ;;  %v194_v50 = vld [vmem:[%s5234_s24 + $0x80] sm:$0xff]  ;;  %v200_v54 = vld [vmem:[%s5234_s24 + $0xb0] sm:$0xff]  ;;  %v4013_v56 = vcombine.low %v188_v42, %v192_v43 }
  0x16   : > { %v198_v51 = vld [vmem:[%s5234_s24 + $0xa0] sm:$0xff]  ;;  %v4022_v58 = vcombine.high %v196_v53, %v200_v54  ;;  %v5100_v59 = vld [vmem:[%s5828_s1 + $0x90] sm:$0xff]   ;;  %v4021_v6 = vcombine.low %v196_v53, %v200_v54 }
  0x17   : > { %2275 = vmatpush1.bf16.msra.mxu1 %v5072_v9  ;;  %2853 = vmatpush1.bf16.msra.mxu0 %v5073_v10  ;;  %v4018_v57 = vcombine.high %v194_v50, %v198_v51  ;;  %v5101_v60 = vld [vmem:[%s5828_s1 + $0x190] sm:$0xff]   ;;  %v202_v61 = vld [vmem:[%s5234_s24 + $0xc0] sm:$0xff]  ;;  %v4017_v4 = vcombine.low %v194_v50, %v198_v51 }
  0x18   : > { %2276 = vmatprep.subr.bf16.mxu1 %v5133_v1  ;;  %2854 = vmatprep.subr.bf16.mxu0 %v5133_v1  ;;  %v206_v62 = vld [vmem:[%s5234_s24 + $0xe0] sm:$0xff]  ;;  %v204_v63 = vld [vmem:[%s5234_s24 + $0xd0] sm:$0xff] }
  0x19   : > { %v208_v0 = vld [vmem:[%s5234_s24 + $0xf0] sm:$0xff]  ;;  %v5103_v5 = vld [vmem:[%s5828_s1 + $0xa0] sm:$0xff]   ;;  %v4026_v7 = vcombine.high %v202_v61, %v206_v62 }
  0x1a   : > { %v5106_v8 = vld [vmem:[%s5828_s1 + $0x1a0] sm:$0xff]   ;;  %v4030_v9 = vcombine.high %v204_v63, %v208_v0  ;;  %v5107_v20 = vld [vmem:[%s5828_s1 + $0xb0] sm:$0xff]  }
  0x1b   : > { %2277 = vmatpush1.bf16.msra.mxu1 %v5074_v11  ;;  %2855 = vmatpush1.bf16.msra.mxu0 %v5075_v12  ;;  %v210_v10 = vld [vmem:[%s5234_s24 + $0x100] sm:$0xff]  ;;  %v5105_v12 = vld [vmem:[%s5828_s1 + $0xa8] sm:$0xff]   ;;  %v5111_v21 = vld [vmem:[%s5828_s1 + $0x1b0] sm:$0xff]  }
  0x1c   : > { %2278 = vmatprep.subr.bf16.mxu1 %v5133_v1  ;;  %2856 = vmatprep.subr.bf16.mxu0 %v5133_v1  ;;  %v214_v11 = vld [vmem:[%s5234_s24 + $0x120] sm:$0xff]  ;;  %v220_v25 = vld [vmem:[%s5234_s24 + $0x150] sm:$0xff] }
  0x1d   : > { %v218_v22 = vld [vmem:[%s5234_s24 + $0x140] sm:$0xff]  ;;  %v5114_v42 = vld [vmem:[%s5828_s1 + $0xd0] sm:$0xff]  }
  0x1e   : > { %v222_v23 = vld [vmem:[%s5234_s24 + $0x160] sm:$0xff] }
  0x1f   : > { %2279 = vmatpush1.bf16.msra.mxu1 %v5076_v13  ;;  %2857 = vmatpush1.bf16.msra.mxu0 %v5077_v14  ;;  %v212_v13 = vld [vmem:[%s5234_s24 + $0x110] sm:$0xff]  ;;  %v5115_v43 = vld [vmem:[%s5828_s1 + $0x1c0] sm:$0xff]  }
  0x20   : > { %2280 = vmatprep.subr.bf16.mxu1 %v5133_v1  ;;  %2858 = vmatprep.subr.bf16.mxu0 %v5133_v1  ;;  %v216_v14 = vld [vmem:[%s5234_s24 + $0x130] sm:$0xff]  ;;  %v242_v53 = vld [vmem:[%s5234_s24 + $0x200] sm:$0xff] }
  0x21   : > { %v4038_v19 = vcombine.high %v212_v13, %v216_v14  ;;  %v246_v54 = vld [vmem:[%s5234_s24 + $0x220] sm:$0xff] }
  0x23   : > { %2281 = vmatpush1.bf16.msra.mxu1 %v5078_v15  ;;  %2859 = vmatpush1.bf16.msra.mxu0 %v5079_v16  ;;  %v5108_v15 = vld [vmem:[%s5828_s1 + $0x1a8] sm:$0xff]   ;;  %v4025_v16 = vcombine.low %v202_v61, %v206_v62  ;;  %v250_v61 = vld [vmem:[%s5234_s24 + $0x240] sm:$0xff] }
  0x24   : > { %2282 = vmatprep.subr.bf16.mxu1 %v5133_v1  ;;  %2860 = vmatprep.subr.bf16.mxu0 %v5133_v1  ;;  %v254_v62 = vld [vmem:[%s5234_s24 + $0x260] sm:$0xff] }
  0x27   : > { %2283 = vmatpush1.bf16.msra.mxu1 %v5080_v17  ;;  %2861 = vmatpush1.bf16.msra.mxu0 %v5081_v18  ;;  %v4029_v17 = vcombine.low %v204_v63, %v208_v0  ;;  %v4034_v18 = vcombine.high %v210_v10, %v214_v11  ;;  %v252_v63 = vld [vmem:[%s5234_s24 + $0x250] sm:$0xff] }
  0x28   : > { %2284 = vmatprep.subr.bf16.mxu1 %v5133_v1  ;;  %2862 = vmatprep.subr.bf16.mxu0 %v5133_v1  ;;  %v256_v0 = vld [vmem:[%s5234_s24 + $0x270] sm:$0xff] }
  0x2b   : > { %2285 = vmatpush1.bf16.msra.mxu1 %v5082_v24  ;;  %2863 = vmatpush1.bf16.msra.mxu0 %v5083_v26  ;;  %v5109_v24 = vld [vmem:[%s5828_s1 + $0xb8] sm:$0xff]   ;;  %v224_v26 = vld [vmem:[%s5234_s24 + $0x170] sm:$0xff] }
  0x2c   : > { %2286 = vmatprep.subr.bf16.mxu1 %v5133_v1  ;;  %2864 = vmatprep.subr.bf16.mxu0 %v5133_v1  ;;  %v4045_v39 = vcombine.low %v220_v25, %v224_v26 }
  0x2f   : > { %2287 = vmatpush1.bf16.msra.mxu1 %v5084_v27  ;;  %2865 = vmatpush1.bf16.msra.mxu0 %v5085_v28  ;;  %v5113_v27 = vld [vmem:[%s5828_s1 + $0x1b8] sm:$0xff]   ;;  %v4033_v28 = vcombine.low %v210_v10, %v214_v11  ;;  %v260_v10 = vld [vmem:[%s5234_s24 + $0x290] sm:$0xff] }
  0x30   : > { %2288 = vmatprep.subr.bf16.mxu1 %v5133_v1  ;;  %2866 = vmatprep.subr.bf16.mxu0 %v5133_v1  ;;  %v264_v11 = vld [vmem:[%s5234_s24 + $0x2b0] sm:$0xff] }
  0x33   : > { %2289 = vmatpush1.bf16.msra.mxu1 %v5086_v29  ;;  %2867 = vmatpush1.bf16.msra.mxu0 %v5087_v30  ;;  %v4037_v29 = vcombine.low %v212_v13, %v216_v14  ;;  %v4042_v30 = vcombine.high %v218_v22, %v222_v23  ;;  %v4077_v13 = vcombine.low %v252_v63, %v256_v0 }
  0x34   : > { %2290 = vmatprep.subr.bf16.mxu1 %v5133_v1  ;;  %2868 = vmatprep.subr.bf16.mxu0 %v5133_v1 }
  0x37   : > { %2291 = vmatpush1.bf16.msra.mxu1 %v5088_v31  ;;  %2869 = vmatpush1.bf16.msra.mxu0 %v5089_v32  ;;  %v4046_v31 = vcombine.high %v220_v25, %v224_v26  ;;  %v5110_v32 = vld [vmem:[%s5828_s1 + $0xc0] sm:$0xff]  }
  0x38   : > { %2292 = vmatprep.subr.bf16.mxu1 %v5133_v1  ;;  %2870 = vmatprep.subr.bf16.mxu0 %v5133_v1  ;;  %v274_v25 = vld [vmem:[%s5234_s24 + $0x300] sm:$0xff] }
  0x39   : > { %v278_v26 = vld [vmem:[%s5234_s24 + $0x320] sm:$0xff] }
  0x3b   : > { %2293 = vmatpush1.bf16.msra.mxu1 %v5090_v33  ;;  %2871 = vmatpush1.bf16.msra.mxu0 %v5091_v34  ;;  %v226_v33 = vld [vmem:[%s5234_s24 + $0x180] sm:$0xff] }
  0x3c   : > { %2294 = vmatprep.subr.bf16.mxu1 %v5133_v1  ;;  %2872 = vmatprep.subr.bf16.mxu0 %v5133_v1  ;;  %v230_v34 = vld [vmem:[%s5234_s24 + $0x1a0] sm:$0xff] }
  0x3d   : > { %v4050_v40 = vcombine.high %v226_v33, %v230_v34 }
  0x3f   : > { %2295 = vmatpush1.bf16.msra.mxu1 %v5092_v35  ;;  %2873 = vmatpush1.bf16.msra.mxu0 %v5093_v36  ;;  %v5112_v35 = vld [vmem:[%s5828_s1 + $0xc8] sm:$0xff]   ;;  %v228_v36 = vld [vmem:[%s5234_s24 + $0x190] sm:$0xff] }
  0x40   : > { %2296 = vmatprep.subr.bf16.mxu1 %v5133_v1  ;;  %2874 = vmatprep.subr.bf16.mxu0 %v5133_v1 }
  0x43   : > { %2297 = vmatpush1.bf16.msra.mxu1 %v5094_v37  ;;  %2875 = vmatpush1.bf16.msra.mxu0 %v5095_v38  ;;  %v232_v37 = vld [vmem:[%s5234_s24 + $0x1b0] sm:$0xff]  ;;  %v4041_v38 = vcombine.low %v218_v22, %v222_v23 }
  0x44   : > { %2555 = vmatprep.subr.bf16.mxu1 %v5133_v1  ;;  %3133 = vmatprep.subr.bf16.mxu0 %v5133_v1 }
  0x46   : > { %2299 = vmatmul.mubr.bf16.vlgmr.msra.gmra.mrb[0].mxu1 %v4001_v41  ;;  %2877 = vmatmul.mubr.bf16.vlgmr.msra.gmra.mrb[0].mxu0 %v4005_v44  ;;  %v4054_v41 = vcombine.high %v228_v36, %v232_v37  ;;  %v234_v44 = vld [vmem:[%s5234_s24 + $0x1c0] sm:$0xff] }
  0x47   : > { %2556 = vmatpush1.bf16.msra.mxu1 %v5096_v45  ;;  %3134 = vmatpush1.bf16.msra.mxu0 %v5097_v46  ;;  %v238_v45 = vld [vmem:[%s5234_s24 + $0x1e0] sm:$0xff]  ;;  %v236_v46 = vld [vmem:[%s5234_s24 + $0x1d0] sm:$0xff] }
  0x48   : > { %2306 = vmatprep.mubr.bf16.mxu1 %v4010_v47  ;;  %2884 = vmatprep.mubr.bf16.mxu0 %v4014_v48  ;;  %v240_v47 = vld [vmem:[%s5234_s24 + $0x1f0] sm:$0xff]  ;;  %v4049_v48 = vcombine.low %v226_v33, %v230_v34  ;;  %v4058_v50 = vcombine.high %v234_v44, %v238_v45  ;;  %v282_v34 = vld [vmem:[%s5234_s24 + $0x340] sm:$0xff] }
  0x49   : > { %2557 = vmatprep.subr.bf16.mxu1 %v5133_v1  ;;  %3135 = vmatprep.subr.bf16.mxu0 %v5133_v1  ;;  %v4062_v51 = vcombine.high %v236_v46, %v240_v47  ;;  %v5120_v33 = vld [vmem:[%s5828_s1 + $0x1d0] sm:$0xff]  }
  0x4b   : > { %2558 = vmatpush1.bf16.msra.mxu1 %v5098_v49  ;;  %3136 = vmatpush1.bf16.msra.mxu0 %v5099_v52  ;;  %v4053_v49 = vcombine.low %v228_v36, %v232_v37  ;;  %v5116_v52 = vld [vmem:[%s5828_s1 + $0xd8] sm:$0xff]   ;;  %v284_v36 = vld [vmem:[%s5234_s24 + $0x350] sm:$0xff] }
  0x4c   : > { %2559 = vmatprep.subr.bf16.mxu1 %v5133_v1  ;;  %3137 = vmatprep.subr.bf16.mxu0 %v5133_v1  ;;  %v288_v37 = vld [vmem:[%s5234_s24 + $0x370] sm:$0xff] }
  0x4e   : > { %2307 = vmatmul.mubr.bf16.gmra.mrb[4].mxu1 %v4009_v55  ;;  %2885 = vmatmul.mubr.bf16.gmra.mrb[4].mxu0 %v4013_v56  ;;  %v244_v55 = vld [vmem:[%s5234_s24 + $0x210] sm:$0xff] }
  0x4f   : > { %2314 = vmatprep.mubr.bf16.mxu1 %v4018_v57  ;;  %2892 = vmatprep.mubr.bf16.mxu0 %v4022_v58  ;;  %v248_v56 = vld [vmem:[%s5234_s24 + $0x230] sm:$0xff]  ;;  %v4057_v57 = vcombine.low %v234_v44, %v238_v45  ;;  %v4061_v58 = vcombine.low %v236_v46, %v240_v47  ;;  %v294_v44 = vld [vmem:[%s5234_s24 + $0x3a0] sm:$0xff] }
  0x50   : > { %2560 = vmatpush1.bf16.msra.mxu1 %v5100_v59  ;;  %3138 = vmatpush1.bf16.msra.mxu0 %v5101_v60  ;;  %v4066_v59 = vcombine.high %v242_v53, %v246_v54  ;;  %v4070_v60 = vcombine.high %v244_v55, %v248_v56  ;;  %v292_v45 = vld [vmem:[%s5234_s24 + $0x390] sm:$0xff] }
  0x51   : > { %2561 = vmatprep.subr.bf16.mxu1 %v5133_v1  ;;  %3139 = vmatprep.subr.bf16.mxu0 %v5133_v1  ;;  %v296_v46 = vld [vmem:[%s5234_s24 + $0x3b0] sm:$0xff] }
  0x54   : > { %2562 = vmatpush1.bf16.msra.mxu1 %v5102_v2  ;;  %3140 = vmatpush1.bf16.msra.mxu0 %v5104_v3  ;;  %v4065_v2 = vcombine.low %v242_v53, %v246_v54  ;;  %v4069_v3 = vcombine.low %v244_v55, %v248_v56  ;;  %v302_v53 = vld [vmem:[%s5234_s24 + $0x3e0] sm:$0xff]  ;;  %v300_v54 = vld [vmem:[%s5234_s24 + $0x3d0] sm:$0xff]  ;;  %v4117_v56 = vcombine.low %v292_v45, %v296_v46 }
  0x55   : > { %2563 = vmatprep.subr.bf16.mxu1 %v5133_v1  ;;  %3141 = vmatprep.subr.bf16.mxu0 %v5133_v1  ;;  %v304_v55 = vld [vmem:[%s5234_s24 + $0x3f0] sm:$0xff] }
  0x56   : > { %2315 = vmatmul.mubr.bf16.gmra.mrb[8].mxu1 %v4017_v4  ;;  %2893 = vmatmul.mubr.bf16.gmra.mrb[8].mxu0 %v4021_v6  ;;  %v4074_v4 = vcombine.high %v250_v61, %v254_v62  ;;  %v5117_v6 = vld [vmem:[%s5828_s1 + $0xe0] sm:$0xff]  }
  0x57   : > { %2322 = vmatprep.mubr.bf16.mxu1 %v4026_v7  ;;  %2900 = vmatprep.mubr.bf16.mxu0 %v4030_v9  ;;  %v5118_v7 = vld [vmem:[%s5828_s1 + $0x1c8] sm:$0xff]   ;;  %v262_v9 = vld [vmem:[%s5234_s24 + $0x2a0] sm:$0xff] }
  0x58   : > { %2564 = vmatpush1.bf16.msra.mxu1 %v5103_v5  ;;  %3142 = vmatpush1.bf16.msra.mxu0 %v5106_v8  ;;  %v4078_v5 = vcombine.high %v252_v63, %v256_v0  ;;  %v258_v8 = vld [vmem:[%s5234_s24 + $0x280] sm:$0xff]  ;;  %v312_v63 = vld [vmem:[%s5234_s24 + $0x430] sm:$0xff] }
  0x59   : > { %2565 = vmatprep.subr.bf16.mxu1 %v5133_v1  ;;  %3143 = vmatprep.subr.bf16.mxu0 %v5133_v1  ;;  %v4082_v14 = vcombine.high %v258_v8, %v262_v9 }
  0x5c   : > { %2566 = vmatpush1.bf16.msra.mxu1 %v5105_v12  ;;  %3144 = vmatpush1.bf16.msra.mxu0 %v5108_v15  ;;  %v4073_v12 = vcombine.low %v250_v61, %v254_v62  ;;  %v4086_v15 = vcombine.high %v260_v10, %v264_v11  ;;  %v310_v61 = vld [vmem:[%s5234_s24 + $0x420] sm:$0xff]  ;;  %v308_v62 = vld [vmem:[%s5234_s24 + $0x410] sm:$0xff] }
  0x5d   : > { %2567 = vmatprep.subr.bf16.mxu1 %v5133_v1  ;;  %3145 = vmatprep.subr.bf16.mxu0 %v5133_v1 }
  0x5e   : > { %2323 = vmatmul.mubr.bf16.gmra.mrb[12].mxu1 %v4025_v16  ;;  %2901 = vmatmul.mubr.bf16.gmra.mrb[12].mxu0 %v4029_v17  ;;  %v266_v16 = vld [vmem:[%s5234_s24 + $0x2c0] sm:$0xff] }
  0x5f   : > { %2330 = vmatprep.mubr.bf16.mxu1 %v4034_v18  ;;  %2908 = vmatprep.mubr.bf16.mxu0 %v4038_v19  ;;  %v270_v17 = vld [vmem:[%s5234_s24 + $0x2e0] sm:$0xff]  ;;  %v268_v18 = vld [vmem:[%s5234_s24 + $0x2d0] sm:$0xff] }
  0x60   : > { %2568 = vmatpush1.bf16.msra.mxu1 %v5107_v20  ;;  %3146 = vmatpush1.bf16.msra.mxu0 %v5111_v21  ;;  %v272_v19 = vld [vmem:[%s5234_s24 + $0x2f0] sm:$0xff]  ;;  %v4081_v20 = vcombine.low %v258_v8, %v262_v9  ;;  %v4085_v21 = vcombine.low %v260_v10, %v264_v11  ;;  %v4090_v22 = vcombine.high %v266_v16, %v270_v17 }
  0x61   : > { %2569 = vmatprep.subr.bf16.mxu1 %v5133_v1  ;;  %3147 = vmatprep.subr.bf16.mxu0 %v5133_v1  ;;  %v4094_v23 = vcombine.high %v268_v18, %v272_v19  ;;  %v320_v8 = vld [vmem:[%s5234_s24 + $0x470] sm:$0xff]  ;;  %v4133_v10 = vcombine.low %v308_v62, %v312_v63 }
  0x64   : > { %2570 = vmatpush1.bf16.msra.mxu1 %v5109_v24  ;;  %3148 = vmatpush1.bf16.msra.mxu0 %v5113_v27  ;;  %v5119_v24 = vld [vmem:[%s5828_s1 + $0xe8] sm:$0xff]   ;;  %v276_v27 = vld [vmem:[%s5234_s24 + $0x310] sm:$0xff] }
  0x65   : > { %2571 = vmatprep.subr.bf16.mxu1 %v5133_v1  ;;  %3149 = vmatprep.subr.bf16.mxu0 %v5133_v1 }
  0x66   : > { %2331 = vmatmul.mubr.bf16.gmra.mrb[16].mxu1 %v4033_v28  ;;  %2909 = vmatmul.mubr.bf16.gmra.mrb[16].mxu0 %v4037_v29  ;;  %v280_v28 = vld [vmem:[%s5234_s24 + $0x330] sm:$0xff]  ;;  %v4089_v29 = vcombine.low %v266_v16, %v270_v17 }
  0x67   : > { %2338 = vmatprep.mubr.bf16.mxu1 %v4042_v30  ;;  %2916 = vmatprep.mubr.bf16.mxu0 %v4046_v31  ;;  %v4093_v30 = vcombine.low %v268_v18, %v272_v19  ;;  %v4098_v31 = vcombine.high %v274_v25, %v278_v26  ;;  %v328_v16 = vld [vmem:[%s5234_s24 + $0x4b0] sm:$0xff] }
  0x68   : > { %2572 = vmatpush1.bf16.msra.mxu1 %v5110_v32  ;;  %3150 = vmatpush1.bf16.msra.mxu0 %v5115_v43  ;;  %v4102_v32 = vcombine.high %v276_v27, %v280_v28  ;;  %v290_v43 = vld [vmem:[%s5234_s24 + $0x380] sm:$0xff] }
  0x69   : > { %2573 = vmatprep.subr.bf16.mxu1 %v5133_v1  ;;  %3151 = vmatprep.subr.bf16.mxu0 %v5133_v1 }
  0x6c   : > { %2574 = vmatpush1.bf16.msra.mxu1 %v5112_v35  ;;  %3152 = vmatpush1.bf16.msra.mxu0 %v5118_v7  ;;  %v286_v35 = vld [vmem:[%s5234_s24 + $0x360] sm:$0xff]  ;;  %v316_v7 = vld [vmem:[%s5234_s24 + $0x450] sm:$0xff] }
  0x6d   : > { %2575 = vmatprep.subr.bf16.mxu1 %v5133_v1  ;;  %3153 = vmatprep.subr.bf16.mxu0 %v5133_v1  ;;  %v4105_v47 = vcombine.low %v282_v34, %v286_v35  ;;  %v4141_v18 = vcombine.low %v316_v7, %v320_v8 }
  0x6e   : > { %2339 = vmatmul.mubr.bf16.gmra.mrb[20].mxu1 %v4041_v38  ;;  %2917 = vmatmul.mubr.bf16.gmra.mrb[20].mxu0 %v4045_v39  ;;  %v4097_v38 = vcombine.low %v274_v25, %v278_v26  ;;  %v4101_v39 = vcombine.low %v276_v27, %v280_v28 }
  0x6f   : > { %2346 = vmatprep.mubr.bf16.mxu1 %v4050_v40  ;;  %2924 = vmatprep.mubr.bf16.mxu0 %v4054_v41  ;;  %v4106_v40 = vcombine.high %v282_v34, %v286_v35  ;;  %v4110_v41 = vcombine.high %v284_v36, %v288_v37 }
  0x70   : > { %2576 = vmatpush1.bf16.msra.mxu1 %v5114_v42  ;;  %3154 = vmatpush1.bf16.msra.mxu0 %v5120_v33  ;;  %v5121_v42 = vld [vmem:[%s5828_s1 + $0xf0] sm:$0xff]  }
  0x71   : > { %2577 = vmatprep.subr.bf16.mxu1 %v5133_v1  ;;  %3155 = vmatprep.subr.bf16.mxu0 %v5133_v1 }
  0x74   : > { %2578 = vmatpush1.bf16.msra.mxu1 %v5116_v52  ;;  %v298_v52 = vld [vmem:[%s5234_s24 + $0x3c0] sm:$0xff] }
  0x75   : > { %2579 = vmatprep.subr.bf16.mxu1 %v5133_v1  ;;  %v4121_v0 = vcombine.low %v298_v52, %v302_v53 }
  0x76   : > { %2347 = vmatmul.mubr.bf16.gmra.mrb[24].mxu1 %v4049_v48  ;;  %2925 = vmatmul.mubr.bf16.gmra.mrb[24].mxu0 %v4053_v49  ;;  %v4109_v48 = vcombine.low %v284_v36, %v288_v37  ;;  %v4114_v49 = vcombine.high %v290_v43, %v294_v44  ;;  %v346_v37 = vld [vmem:[%s5234_s24 + $0x540] sm:$0xff] }
  0x77   : > { %2354 = vmatprep.mubr.bf16.mxu1 %v4058_v50  ;;  %2932 = vmatprep.mubr.bf16.mxu0 %v4062_v51  ;;  %v4118_v50 = vcombine.high %v292_v45, %v296_v46  ;;  %v5122_v51 = vld [vmem:[%s5828_s1 + $0x1d8] sm:$0xff]   ;;  %v354_v45 = vld [vmem:[%s5234_s24 + $0x580] sm:$0xff] }
  0x78   : > { %2580 = vmatpush1.bf16.msra.mxu1 %v5117_v6  ;;  %3156 = vmatpush1.bf16.msra.mxu0 %v5122_v51  ;;  %v318_v6 = vld [vmem:[%s5234_s24 + $0x460] sm:$0xff] }
  0x79   : > { %2581 = vmatprep.subr.bf16.mxu1 %v5133_v1  ;;  %v358_v46 = vld [vmem:[%s5234_s24 + $0x5a0] sm:$0xff] }
  0x7a   : > { %v4178_v51 = vcombine.high %v354_v45, %v358_v46 }
  0x7c   : > { %2582 = vmatpush1.bf16.msra.mxu1 %v5119_v24  ;;  %v336_v24 = vld [vmem:[%s5234_s24 + $0x4f0] sm:$0xff] }
  0x7d   : > { %2583 = vmatprep.subr.bf16.mxu1 %v5133_v1 }
  0x7e   : > { %2355 = vmatmul.mubr.bf16.gmra.mrb[28].mxu1 %v4057_v57  ;;  %2933 = vmatmul.mubr.bf16.gmra.mrb[28].mxu0 %v4061_v58  ;;  %v4122_v57 = vcombine.high %v298_v52, %v302_v53  ;;  %v4126_v58 = vcombine.high %v300_v54, %v304_v55  ;;  %v362_v53 = vld [vmem:[%s5234_s24 + $0x5c0] sm:$0xff] }
  0x7f   : > { %2362 = vmatprep.mubr.bf16.mxu1 %v4066_v59  ;;  %2940 = vmatprep.mubr.bf16.mxu0 %v4070_v60  ;;  %v5123_v59 = vld [vmem:[%s5828_s1 + $0xf8] sm:$0xff]   ;;  %v306_v60 = vld [vmem:[%s5234_s24 + $0x400] sm:$0xff] }
  0x80   : > { %2584 = vmatpush1.bf16.msra.mxu1 %v5121_v42  ;;  %v4129_v9 = vcombine.low %v306_v60, %v310_v61 }
  0x81   : > { %2585 = vmatprep.subr.bf16.mxu1 %v5133_v1  ;;  %v4113_v1 = vcombine.low %v290_v43, %v294_v44 }
  0x84   : > { %2586 = vmatpush1.bf16.msra.mxu1 %v5123_v59 }
  0x86   : > { %2363 = vmatmul.mubr.bf16.gmra.mrb[32].mxu1 %v4065_v2  ;;  %2941 = vmatmul.mubr.bf16.gmra.mrb[32].mxu0 %v4069_v3  ;;  %v4125_v2 = vcombine.low %v300_v54, %v304_v55  ;;  %v4130_v3 = vcombine.high %v306_v60, %v310_v61  ;;  %v366_v54 = vld [vmem:[%s5234_s24 + $0x5e0] sm:$0xff]  ;;  %v364_v55 = vld [vmem:[%s5234_s24 + $0x5d0] sm:$0xff] }
  0x87   : > { %2370 = vmatprep.mubr.bf16.mxu1 %v4074_v4  ;;  %2948 = vmatprep.mubr.bf16.mxu0 %v4078_v5  ;;  %v4134_v4 = vcombine.high %v308_v62, %v312_v63  ;;  %v314_v5 = vld [vmem:[%s5234_s24 + $0x440] sm:$0xff]  ;;  %v372_v62 = vld [vmem:[%s5234_s24 + $0x610] sm:$0xff] }
  0x88   : > { %v4138_v11 = vcombine.high %v314_v5, %v318_v6  ;;  %v4137_v17 = vcombine.low %v314_v5, %v318_v6  ;;  %v370_v60 = vld [vmem:[%s5234_s24 + $0x600] sm:$0xff]  ;;  %v376_v63 = vld [vmem:[%s5234_s24 + $0x630] sm:$0xff] }
  0x89   : > { %v374_v61 = vld [vmem:[%s5234_s24 + $0x620] sm:$0xff] }
  0x8a   : > { %v378_v5 = vld [vmem:[%s5234_s24 + $0x640] sm:$0xff] }
  0x8b   : > { %v382_v6 = vld [vmem:[%s5234_s24 + $0x660] sm:$0xff] }
  0x8e   : > { %2371 = vmatmul.mubr.bf16.gmra.mrb[36].mxu1 %v4073_v12  ;;  %2949 = vmatmul.mubr.bf16.gmra.mrb[36].mxu0 %v4077_v13  ;;  %v4142_v12 = vcombine.high %v316_v7, %v320_v8  ;;  %v322_v13 = vld [vmem:[%s5234_s24 + $0x480] sm:$0xff]  ;;  %v380_v7 = vld [vmem:[%s5234_s24 + $0x650] sm:$0xff] }
  0x8f   : > { %2378 = vmatprep.mubr.bf16.mxu1 %v4082_v14  ;;  %2956 = vmatprep.mubr.bf16.mxu0 %v4086_v15  ;;  %v326_v14 = vld [vmem:[%s5234_s24 + $0x4a0] sm:$0xff]  ;;  %v324_v15 = vld [vmem:[%s5234_s24 + $0x490] sm:$0xff] }
  0x90   : > { %v4146_v19 = vcombine.high %v322_v13, %v326_v14  ;;  %v4145_v25 = vcombine.low %v322_v13, %v326_v14  ;;  %v4149_v26 = vcombine.low %v324_v15, %v328_v16  ;;  %v384_v8 = vld [vmem:[%s5234_s24 + $0x670] sm:$0xff]  ;;  %v386_v13 = vld [vmem:[%s5234_s24 + $0x680] sm:$0xff] }
  0x91   : > { %v390_v14 = vld [vmem:[%s5234_s24 + $0x6a0] sm:$0xff] }
  0x96   : > { %2379 = vmatmul.mubr.bf16.gmra.mrb[40].mxu1 %v4081_v20  ;;  %2957 = vmatmul.mubr.bf16.gmra.mrb[40].mxu0 %v4085_v21  ;;  %v4150_v20 = vcombine.high %v324_v15, %v328_v16  ;;  %v330_v21 = vld [vmem:[%s5234_s24 + $0x4c0] sm:$0xff]  ;;  %v388_v15 = vld [vmem:[%s5234_s24 + $0x690] sm:$0xff] }
  0x97   : > { %2386 = vmatprep.mubr.bf16.mxu1 %v4090_v22  ;;  %2964 = vmatprep.mubr.bf16.mxu0 %v4094_v23  ;;  %v334_v22 = vld [vmem:[%s5234_s24 + $0x4e0] sm:$0xff]  ;;  %v332_v23 = vld [vmem:[%s5234_s24 + $0x4d0] sm:$0xff] }
  0x98   : > { %v4154_v27 = vcombine.high %v330_v21, %v334_v22  ;;  %v4158_v28 = vcombine.high %v332_v23, %v336_v24  ;;  %v4153_v33 = vcombine.low %v330_v21, %v334_v22  ;;  %v4157_v34 = vcombine.low %v332_v23, %v336_v24  ;;  %v392_v16 = vld [vmem:[%s5234_s24 + $0x6b0] sm:$0xff]  ;;  %v394_v21 = vld [vmem:[%s5234_s24 + $0x6c0] sm:$0xff] }
  0x99   : > { %v398_v22 = vld [vmem:[%s5234_s24 + $0x6e0] sm:$0xff]  ;;  %v396_v23 = vld [vmem:[%s5234_s24 + $0x6d0] sm:$0xff] }
  0x9a   : > { %v400_v24 = vld [vmem:[%s5234_s24 + $0x6f0] sm:$0xff] }
  0x9e   : > { %2387 = vmatmul.mubr.bf16.gmra.mrb[44].mxu1 %v4089_v29  ;;  %2965 = vmatmul.mubr.bf16.gmra.mrb[44].mxu0 %v4093_v30  ;;  %v338_v29 = vld [vmem:[%s5234_s24 + $0x500] sm:$0xff] }
  0x9f   : > { %2394 = vmatprep.mubr.bf16.mxu1 %v4098_v31  ;;  %2972 = vmatprep.mubr.bf16.mxu0 %v4102_v32  ;;  %v342_v30 = vld [vmem:[%s5234_s24 + $0x520] sm:$0xff]  ;;  %v340_v31 = vld [vmem:[%s5234_s24 + $0x510] sm:$0xff] }
  0xa0   : > { %v344_v32 = vld [vmem:[%s5234_s24 + $0x530] sm:$0xff]  ;;  %v4162_v35 = vcombine.high %v338_v29, %v342_v30 }
  0xa1   : > { %v4166_v36 = vcombine.high %v340_v31, %v344_v32  ;;  %v4165_v42 = vcombine.low %v340_v31, %v344_v32  ;;  %v404_v31 = vld [vmem:[%s5234_s24 + $0x710] sm:$0xff] }
  0xa2   : > { %v408_v32 = vld [vmem:[%s5234_s24 + $0x730] sm:$0xff] }
  0xa6   : > { %2395 = vmatmul.mubr.bf16.gmra.mrb[48].mxu1 %v4097_v38  ;;  %2973 = vmatmul.mubr.bf16.gmra.mrb[48].mxu0 %v4101_v39  ;;  %v350_v38 = vld [vmem:[%s5234_s24 + $0x560] sm:$0xff]  ;;  %v348_v39 = vld [vmem:[%s5234_s24 + $0x550] sm:$0xff] }
  0xa7   : > { %2402 = vmatprep.mubr.bf16.mxu1 %v4106_v40  ;;  %2980 = vmatprep.mubr.bf16.mxu0 %v4110_v41  ;;  %v352_v40 = vld [vmem:[%s5234_s24 + $0x570] sm:$0xff]  ;;  %v4161_v41 = vcombine.low %v338_v29, %v342_v30  ;;  %v4170_v43 = vcombine.high %v346_v37, %v350_v38  ;;  %v402_v29 = vld [vmem:[%s5234_s24 + $0x700] sm:$0xff] }
  0xa8   : > { %v4174_v44 = vcombine.high %v348_v39, %v352_v40  ;;  %v406_v30 = vld [vmem:[%s5234_s24 + $0x720] sm:$0xff] }
  0xae   : > { %2403 = vmatmul.mubr.bf16.gmra.mrb[52].mxu1 %v4105_v47  ;;  %2981 = vmatmul.mubr.bf16.gmra.mrb[52].mxu0 %v4109_v48  ;;  %v356_v47 = vld [vmem:[%s5234_s24 + $0x590] sm:$0xff] }
  0xaf   : > { %2410 = vmatprep.mubr.bf16.mxu1 %v4114_v49  ;;  %2988 = vmatprep.mubr.bf16.mxu0 %v4118_v50  ;;  %v360_v48 = vld [vmem:[%s5234_s24 + $0x5b0] sm:$0xff]  ;;  %v4169_v49 = vcombine.low %v346_v37, %v350_v38  ;;  %v4173_v50 = vcombine.low %v348_v39, %v352_v40  ;;  %v410_v37 = vld [vmem:[%s5234_s24 + $0x740] sm:$0xff] }
  0xb0   : > { %v4182_v52 = vcombine.high %v356_v47, %v360_v48  ;;  %v414_v38 = vld [vmem:[%s5234_s24 + $0x760] sm:$0xff]  ;;  %v412_v39 = vld [vmem:[%s5234_s24 + $0x750] sm:$0xff] }
  0xb1   : > { %v416_v40 = vld [vmem:[%s5234_s24 + $0x770] sm:$0xff] }
  0xb6   : > { %2411 = vmatmul.mubr.bf16.gmra.mrb[56].mxu1 %v4113_v1  ;;  %2989 = vmatmul.mubr.bf16.gmra.mrb[56].mxu0 %v4117_v56  ;;  %v368_v1 = vld [vmem:[%s5234_s24 + $0x5f0] sm:$0xff]  ;;  %v4177_v56 = vcombine.low %v354_v45, %v358_v46  ;;  %v418_v45 = vld [vmem:[%s5234_s24 + $0x780] sm:$0xff] }
  0xb7   : > { %2418 = vmatprep.mubr.bf16.mxu1 %v4122_v57  ;;  %2996 = vmatprep.mubr.bf16.mxu0 %v4126_v58  ;;  %v4181_v57 = vcombine.low %v356_v47, %v360_v48  ;;  %v4186_v58 = vcombine.high %v362_v53, %v366_v54  ;;  %v4190_v59 = vcombine.high %v364_v55, %v368_v1  ;;  %v422_v46 = vld [vmem:[%s5234_s24 + $0x7a0] sm:$0xff]  ;;  %v420_v47 = vld [vmem:[%s5234_s24 + $0x790] sm:$0xff] }
  0xb8   : > { %v424_v48 = vld [vmem:[%s5234_s24 + $0x7b0] sm:$0xff] }
  0xbe   : > { %2419 = vmatmul.mubr.bf16.gmra.mrb[60].mxu1 %v4121_v0  ;;  %2997 = vmatmul.mubr.bf16.gmra.mrb[60].mxu0 %v4125_v2  ;;  %v4185_v0 = vcombine.low %v362_v53, %v366_v54  ;;  %v4189_v2 = vcombine.low %v364_v55, %v368_v1  ;;  %v426_v53 = vld [vmem:[%s5234_s24 + $0x7c0] sm:$0xff]  ;;  %v428_v55 = vld [vmem:[%s5234_s24 + $0x7d0] sm:$0xff] }
  0xbf   : > { %2426 = vmatprep.mubr.bf16.mxu1 %v4130_v3  ;;  %3004 = vmatprep.mubr.bf16.mxu0 %v4134_v4  ;;  %v4194_v3 = vcombine.high %v370_v60, %v374_v61  ;;  %v4198_v4 = vcombine.high %v372_v62, %v376_v63  ;;  %v430_v54 = vld [vmem:[%s5234_s24 + $0x7e0] sm:$0xff]  ;;  %v432_v1 = vld [vmem:[%s5234_s24 + $0x7f0] sm:$0xff] }
  0xc6   : > { %2427 = vmatmul.mubr.bf16.gmra.mrb[64].mxu1 %v4129_v9  ;;  %3005 = vmatmul.mubr.bf16.gmra.mrb[64].mxu0 %v4133_v10  ;;  %v4193_v9 = vcombine.low %v370_v60, %v374_v61  ;;  %v4197_v10 = vcombine.low %v372_v62, %v376_v63  ;;  %v179_v60 = vld [vmem:[%s5234_s24 + $0x8] sm:$0xff]  ;;  %v181_v62 = vld [vmem:[%s5234_s24 + $0x18] sm:$0xff] }
  0xc7   : > { %2434 = vmatprep.mubr.bf16.mxu1 %v4138_v11  ;;  %3012 = vmatprep.mubr.bf16.mxu0 %v4142_v12  ;;  %v4202_v11 = vcombine.high %v378_v5, %v382_v6  ;;  %v4206_v12 = vcombine.high %v380_v7, %v384_v8  ;;  %v183_v61 = vld [vmem:[%s5234_s24 + $0x28] sm:$0xff]  ;;  %v185_v63 = vld [vmem:[%s5234_s24 + $0x38] sm:$0xff] }
  0xce   : > { %2435 = vmatmul.mubr.bf16.gmra.mrb[68].mxu1 %v4137_v17  ;;  %3013 = vmatmul.mubr.bf16.gmra.mrb[68].mxu0 %v4141_v18  ;;  %v4201_v17 = vcombine.low %v378_v5, %v382_v6  ;;  %v4205_v18 = vcombine.low %v380_v7, %v384_v8  ;;  %v187_v5 = vld [vmem:[%s5234_s24 + $0x48] sm:$0xff]  ;;  %v189_v7 = vld [vmem:[%s5234_s24 + $0x58] sm:$0xff] }
  0xcf   : > { %2442 = vmatprep.mubr.bf16.mxu1 %v4146_v19  ;;  %3020 = vmatprep.mubr.bf16.mxu0 %v4150_v20  ;;  %v4210_v19 = vcombine.high %v386_v13, %v390_v14  ;;  %v4214_v20 = vcombine.high %v388_v15, %v392_v16  ;;  %v191_v6 = vld [vmem:[%s5234_s24 + $0x68] sm:$0xff]  ;;  %v193_v8 = vld [vmem:[%s5234_s24 + $0x78] sm:$0xff] }
  0xd6   : > { %2443 = vmatmul.mubr.bf16.gmra.mrb[72].mxu1 %v4145_v25  ;;  %3021 = vmatmul.mubr.bf16.gmra.mrb[72].mxu0 %v4149_v26  ;;  %v4209_v25 = vcombine.low %v386_v13, %v390_v14  ;;  %v4213_v26 = vcombine.low %v388_v15, %v392_v16  ;;  %v195_v13 = vld [vmem:[%s5234_s24 + $0x88] sm:$0xff]  ;;  %v197_v15 = vld [vmem:[%s5234_s24 + $0x98] sm:$0xff] }
  0xd7   : > { %2450 = vmatprep.mubr.bf16.mxu1 %v4154_v27  ;;  %3028 = vmatprep.mubr.bf16.mxu0 %v4158_v28  ;;  %v4218_v27 = vcombine.high %v394_v21, %v398_v22  ;;  %v4222_v28 = vcombine.high %v396_v23, %v400_v24  ;;  %v199_v14 = vld [vmem:[%s5234_s24 + $0xa8] sm:$0xff]  ;;  %v201_v16 = vld [vmem:[%s5234_s24 + $0xb8] sm:$0xff] }
  0xde   : > { %2451 = vmatmul.mubr.bf16.gmra.mrb[76].mxu1 %v4153_v33  ;;  %3029 = vmatmul.mubr.bf16.gmra.mrb[76].mxu0 %v4157_v34  ;;  %v4217_v33 = vcombine.low %v394_v21, %v398_v22  ;;  %v4221_v34 = vcombine.low %v396_v23, %v400_v24  ;;  %v203_v21 = vld [vmem:[%s5234_s24 + $0xc8] sm:$0xff]  ;;  %v205_v23 = vld [vmem:[%s5234_s24 + $0xd8] sm:$0xff] }
  0xdf   : > { %2458 = vmatprep.mubr.bf16.mxu1 %v4162_v35  ;;  %3036 = vmatprep.mubr.bf16.mxu0 %v4166_v36  ;;  %v4226_v35 = vcombine.high %v402_v29, %v406_v30  ;;  %v4230_v36 = vcombine.high %v404_v31, %v408_v32  ;;  %v207_v22 = vld [vmem:[%s5234_s24 + $0xe8] sm:$0xff]  ;;  %v209_v24 = vld [vmem:[%s5234_s24 + $0xf8] sm:$0xff] }
  0xe6   : > { %2459 = vmatmul.mubr.bf16.gmra.mrb[80].mxu1 %v4161_v41  ;;  %3037 = vmatmul.mubr.bf16.gmra.mrb[80].mxu0 %v4165_v42  ;;  %v4225_v41 = vcombine.low %v402_v29, %v406_v30  ;;  %v4229_v42 = vcombine.low %v404_v31, %v408_v32  ;;  %v211_v29 = vld [vmem:[%s5234_s24 + $0x108] sm:$0xff]  ;;  %v213_v31 = vld [vmem:[%s5234_s24 + $0x118] sm:$0xff] }
  0xe7   : > { %2466 = vmatprep.mubr.bf16.mxu1 %v4170_v43  ;;  %3044 = vmatprep.mubr.bf16.mxu0 %v4174_v44  ;;  %v4234_v43 = vcombine.high %v410_v37, %v414_v38  ;;  %v4238_v44 = vcombine.high %v412_v39, %v416_v40  ;;  %v215_v30 = vld [vmem:[%s5234_s24 + $0x128] sm:$0xff]  ;;  %v217_v32 = vld [vmem:[%s5234_s24 + $0x138] sm:$0xff] }
  0xee   : > { %2467 = vmatmul.mubr.bf16.gmra.mrb[84].mxu1 %v4169_v49  ;;  %3045 = vmatmul.mubr.bf16.gmra.mrb[84].mxu0 %v4173_v50  ;;  %v4233_v49 = vcombine.low %v410_v37, %v414_v38  ;;  %v4237_v50 = vcombine.low %v412_v39, %v416_v40  ;;  %v219_v37 = vld [vmem:[%s5234_s24 + $0x148] sm:$0xff]  ;;  %v221_v39 = vld [vmem:[%s5234_s24 + $0x158] sm:$0xff] }
  0xef   : > { %2474 = vmatprep.mubr.bf16.mxu1 %v4178_v51  ;;  %3052 = vmatprep.mubr.bf16.mxu0 %v4182_v52  ;;  %v4242_v51 = vcombine.high %v418_v45, %v422_v46  ;;  %v4246_v52 = vcombine.high %v420_v47, %v424_v48  ;;  %v223_v38 = vld [vmem:[%s5234_s24 + $0x168] sm:$0xff]  ;;  %v225_v40 = vld [vmem:[%s5234_s24 + $0x178] sm:$0xff] }
  0xf6   : > { %2475 = vmatmul.mubr.bf16.gmra.mrb[88].mxu1 %v4177_v56  ;;  %3053 = vmatmul.mubr.bf16.gmra.mrb[88].mxu0 %v4181_v57  ;;  %v4241_v56 = vcombine.low %v418_v45, %v422_v46  ;;  %v4245_v57 = vcombine.low %v420_v47, %v424_v48  ;;  %v227_v45 = vld [vmem:[%s5234_s24 + $0x188] sm:$0xff]  ;;  %v229_v47 = vld [vmem:[%s5234_s24 + $0x198] sm:$0xff] }
  0xf7   : > { %2482 = vmatprep.mubr.bf16.mxu1 %v4186_v58  ;;  %3060 = vmatprep.mubr.bf16.mxu0 %v4190_v59  ;;  %v4250_v58 = vcombine.high %v426_v53, %v430_v54  ;;  %v4254_v59 = vcombine.high %v428_v55, %v432_v1  ;;  %v231_v46 = vld [vmem:[%s5234_s24 + $0x1a8] sm:$0xff]  ;;  %v233_v48 = vld [vmem:[%s5234_s24 + $0x1b8] sm:$0xff] }
  0xfe   : > { %2483 = vmatmul.mubr.bf16.gmra.mrb[92].mxu1 %v4185_v0  ;;  %3061 = vmatmul.mubr.bf16.gmra.mrb[92].mxu0 %v4189_v2  ;;  %v4249_v0 = vcombine.low %v426_v53, %v430_v54  ;;  %v4253_v2 = vcombine.low %v428_v55, %v432_v1  ;;  %v235_v53 = vld [vmem:[%s5234_s24 + $0x1c8] sm:$0xff]  ;;  %v237_v55 = vld [vmem:[%s5234_s24 + $0x1d8] sm:$0xff] }
  0xff   : > { %2490 = vmatprep.mubr.bf16.mxu1 %v4194_v3  ;;  %3068 = vmatprep.mubr.bf16.mxu0 %v4198_v4  ;;  %v4004_v3 = vcombine.high %v179_v60, %v183_v61  ;;  %v4008_v4 = vcombine.high %v181_v62, %v185_v63  ;;  %v239_v54 = vld [vmem:[%s5234_s24 + $0x1e8] sm:$0xff]  ;;  %v241_v1 = vld [vmem:[%s5234_s24 + $0x1f8] sm:$0xff] }
 0x106   : > { %2491 = vmatmul.mubr.bf16.gmra.mrb[96].mxu1 %v4193_v9  ;;  %3069 = vmatmul.mubr.bf16.gmra.mrb[96].mxu0 %v4197_v10  ;;  %v4003_v9 = vcombine.low %v179_v60, %v183_v61  ;;  %v4007_v10 = vcombine.low %v181_v62, %v185_v63  ;;  %v243_v60 = vld [vmem:[%s5234_s24 + $0x208] sm:$0xff]  ;;  %v245_v62 = vld [vmem:[%s5234_s24 + $0x218] sm:$0xff] }
 0x107   : > { %2498 = vmatprep.mubr.bf16.mxu1 %v4202_v11  ;;  %3076 = vmatprep.mubr.bf16.mxu0 %v4206_v12  ;;  %v4012_v11 = vcombine.high %v187_v5, %v191_v6  ;;  %v4016_v12 = vcombine.high %v189_v7, %v193_v8  ;;  %v247_v61 = vld [vmem:[%s5234_s24 + $0x228] sm:$0xff]  ;;  %v249_v63 = vld [vmem:[%s5234_s24 + $0x238] sm:$0xff] }
 0x10e   : > { %2499 = vmatmul.mubr.bf16.gmra.mrb[100].mxu1 %v4201_v17  ;;  %3077 = vmatmul.mubr.bf16.gmra.mrb[100].mxu0 %v4205_v18  ;;  %v4011_v17 = vcombine.low %v187_v5, %v191_v6  ;;  %v4015_v18 = vcombine.low %v189_v7, %v193_v8  ;;  %v251_v5 = vld [vmem:[%s5234_s24 + $0x248] sm:$0xff]  ;;  %v253_v7 = vld [vmem:[%s5234_s24 + $0x258] sm:$0xff] }
 0x10f   : > { %2506 = vmatprep.mubr.bf16.mxu1 %v4210_v19  ;;  %3084 = vmatprep.mubr.bf16.mxu0 %v4214_v20  ;;  %v4020_v19 = vcombine.high %v195_v13, %v199_v14  ;;  %v4024_v20 = vcombine.high %v197_v15, %v201_v16  ;;  %v255_v6 = vld [vmem:[%s5234_s24 + $0x268] sm:$0xff]  ;;  %v257_v8 = vld [vmem:[%s5234_s24 + $0x278] sm:$0xff] }
 0x116   : > { %2507 = vmatmul.mubr.bf16.gmra.mrb[104].mxu1 %v4209_v25  ;;  %3085 = vmatmul.mubr.bf16.gmra.mrb[104].mxu0 %v4213_v26  ;;  %v4019_v25 = vcombine.low %v195_v13, %v199_v14  ;;  %v4023_v26 = vcombine.low %v197_v15, %v201_v16  ;;  %v259_v13 = vld [vmem:[%s5234_s24 + $0x288] sm:$0xff]  ;;  %v261_v15 = vld [vmem:[%s5234_s24 + $0x298] sm:$0xff] }
 0x117   : > { %2514 = vmatprep.mubr.bf16.mxu1 %v4218_v27  ;;  %3092 = vmatprep.mubr.bf16.mxu0 %v4222_v28  ;;  %v4028_v27 = vcombine.high %v203_v21, %v207_v22  ;;  %v4032_v28 = vcombine.high %v205_v23, %v209_v24  ;;  %v263_v14 = vld [vmem:[%s5234_s24 + $0x2a8] sm:$0xff]  ;;  %v265_v16 = vld [vmem:[%s5234_s24 + $0x2b8] sm:$0xff] }
 0x11e   : > { %2515 = vmatmul.mubr.bf16.gmra.mrb[108].mxu1 %v4217_v33  ;;  %3093 = vmatmul.mubr.bf16.gmra.mrb[108].mxu0 %v4221_v34  ;;  %v4027_v33 = vcombine.low %v203_v21, %v207_v22  ;;  %v4031_v34 = vcombine.low %v205_v23, %v209_v24  ;;  %v267_v21 = vld [vmem:[%s5234_s24 + $0x2c8] sm:$0xff]  ;;  %v269_v23 = vld [vmem:[%s5234_s24 + $0x2d8] sm:$0xff] }
 0x11f   : > { %2522 = vmatprep.mubr.bf16.mxu1 %v4226_v35  ;;  %3100 = vmatprep.mubr.bf16.mxu0 %v4230_v36  ;;  %v4036_v35 = vcombine.high %v211_v29, %v215_v30  ;;  %v4040_v36 = vcombine.high %v213_v31, %v217_v32  ;;  %v271_v22 = vld [vmem:[%s5234_s24 + $0x2e8] sm:$0xff]  ;;  %v273_v24 = vld [vmem:[%s5234_s24 + $0x2f8] sm:$0xff] }
 0x126   : > { %2523 = vmatmul.mubr.bf16.gmra.mrb[112].mxu1 %v4225_v41  ;;  %3101 = vmatmul.mubr.bf16.gmra.mrb[112].mxu0 %v4229_v42  ;;  %v4035_v41 = vcombine.low %v211_v29, %v215_v30  ;;  %v4039_v42 = vcombine.low %v213_v31, %v217_v32  ;;  %v275_v29 = vld [vmem:[%s5234_s24 + $0x308] sm:$0xff]  ;;  %v277_v31 = vld [vmem:[%s5234_s24 + $0x318] sm:$0xff] }
 0x127   : > { %2530 = vmatprep.mubr.bf16.mxu1 %v4234_v43  ;;  %3108 = vmatprep.mubr.bf16.mxu0 %v4238_v44  ;;  %v4044_v43 = vcombine.high %v219_v37, %v223_v38  ;;  %v4048_v44 = vcombine.high %v221_v39, %v225_v40  ;;  %v279_v30 = vld [vmem:[%s5234_s24 + $0x328] sm:$0xff]  ;;  %v281_v32 = vld [vmem:[%s5234_s24 + $0x338] sm:$0xff] }
 0x12e   : > { %2531 = vmatmul.mubr.bf16.gmra.mrb[116].mxu1 %v4233_v49  ;;  %3109 = vmatmul.mubr.bf16.gmra.mrb[116].mxu0 %v4237_v50  ;;  %v4043_v49 = vcombine.low %v219_v37, %v223_v38  ;;  %v4047_v50 = vcombine.low %v221_v39, %v225_v40  ;;  %v283_v37 = vld [vmem:[%s5234_s24 + $0x348] sm:$0xff]  ;;  %v285_v39 = vld [vmem:[%s5234_s24 + $0x358] sm:$0xff] }
 0x12f   : > { %2538 = vmatprep.mubr.bf16.mxu1 %v4242_v51  ;;  %3116 = vmatprep.mubr.bf16.mxu0 %v4246_v52  ;;  %v4052_v51 = vcombine.high %v227_v45, %v231_v46  ;;  %v4056_v52 = vcombine.high %v229_v47, %v233_v48  ;;  %v287_v38 = vld [vmem:[%s5234_s24 + $0x368] sm:$0xff]  ;;  %v289_v40 = vld [vmem:[%s5234_s24 + $0x378] sm:$0xff] }
 0x136   : > { %2539 = vmatmul.mubr.bf16.gmra.mrb[120].mxu1 %v4241_v56  ;;  %3117 = vmatmul.mubr.bf16.gmra.mrb[120].mxu0 %v4245_v57  ;;  %v4051_v56 = vcombine.low %v227_v45, %v231_v46  ;;  %v4055_v57 = vcombine.low %v229_v47, %v233_v48  ;;  %v291_v45 = vld [vmem:[%s5234_s24 + $0x388] sm:$0xff]  ;;  %v293_v47 = vld [vmem:[%s5234_s24 + $0x398] sm:$0xff] }
 0x137   : > { %2546 = vmatprep.mubr.bf16.mxu1 %v4250_v58  ;;  %3124 = vmatprep.mubr.bf16.mxu0 %v4254_v59  ;;  %v4060_v58 = vcombine.high %v235_v53, %v239_v54  ;;  %v4064_v59 = vcombine.high %v237_v55, %v241_v1  ;;  %v295_v46 = vld [vmem:[%s5234_s24 + $0x3a8] sm:$0xff]  ;;  %v297_v48 = vld [vmem:[%s5234_s24 + $0x3b8] sm:$0xff] }
 0x13e   : > { %2547 = vmatmul.mubr.bf16.gmra.mrb[124].mxu1 %v4249_v0  ;;  %3125 = vmatmul.mubr.bf16.gmra.mrb[124].mxu0 %v4253_v2  ;;  %v4059_v0 = vcombine.low %v235_v53, %v239_v54  ;;  %v4063_v2 = vcombine.low %v237_v55, %v241_v1  ;;  %v299_v53 = vld [vmem:[%s5234_s24 + $0x3c8] sm:$0xff]  ;;  %v301_v55 = vld [vmem:[%s5234_s24 + $0x3d8] sm:$0xff] }
 0x13f   : > { %2587 = vmatprep.mubr.bf16.mxu1 %v4004_v3  ;;  %4317 = vmatprep.mubr.msk.bf16.mxu0 %vm2169_vm0, %v4008_v4  ;;  %v4068_v3 = vcombine.high %v243_v60, %v247_v61  ;;  %v4072_v4 = vcombine.high %v245_v62, %v249_v63  ;;  %v303_v54 = vld [vmem:[%s5234_s24 + $0x3e8] sm:$0xff]  ;;  %v305_v1 = vld [vmem:[%s5234_s24 + $0x3f8] sm:$0xff] }
 0x146   : > { %2588 = vmatmul.mubr.bf16.vlgmr.msra.gmra.mrb[0].mxu1 %v4003_v9  ;;  %3166 = vmatmul.mubr.bf16.vlgmr.msra.gmra.mrb[0].mxu0 %v4007_v10  ;;  %v4067_v9 = vcombine.low %v243_v60, %v247_v61  ;;  %v4071_v10 = vcombine.low %v245_v62, %v249_v63  ;;  %v307_v60 = vld [vmem:[%s5234_s24 + $0x408] sm:$0xff]  ;;  %v309_v62 = vld [vmem:[%s5234_s24 + $0x418] sm:$0xff] }
 0x147   : > { %2595 = vmatprep.mubr.bf16.mxu1 %v4012_v11  ;;  %4318 = vmatprep.mubr.msk.bf16.mxu0 %vm2169_vm0, %v4016_v12  ;;  %v4076_v11 = vcombine.high %v251_v5, %v255_v6  ;;  %v4080_v12 = vcombine.high %v253_v7, %v257_v8  ;;  %v311_v61 = vld [vmem:[%s5234_s24 + $0x428] sm:$0xff]  ;;  %v313_v63 = vld [vmem:[%s5234_s24 + $0x438] sm:$0xff] }
 0x14e   : > { %2596 = vmatmul.mubr.bf16.gmra.mrb[4].mxu1 %v4011_v17  ;;  %3174 = vmatmul.mubr.bf16.gmra.mrb[4].mxu0 %v4015_v18  ;;  %v4075_v17 = vcombine.low %v251_v5, %v255_v6  ;;  %v4079_v18 = vcombine.low %v253_v7, %v257_v8  ;;  %v315_v5 = vld [vmem:[%s5234_s24 + $0x448] sm:$0xff]  ;;  %v317_v7 = vld [vmem:[%s5234_s24 + $0x458] sm:$0xff] }
 0x14f   : > { %2603 = vmatprep.mubr.bf16.mxu1 %v4020_v19  ;;  %4319 = vmatprep.mubr.msk.bf16.mxu0 %vm2169_vm0, %v4024_v20  ;;  %v4084_v19 = vcombine.high %v259_v13, %v263_v14  ;;  %v4088_v20 = vcombine.high %v261_v15, %v265_v16  ;;  %v319_v6 = vld [vmem:[%s5234_s24 + $0x468] sm:$0xff]  ;;  %v321_v8 = vld [vmem:[%s5234_s24 + $0x478] sm:$0xff] }
 0x156   : > { %2604 = vmatmul.mubr.bf16.gmra.mrb[8].mxu1 %v4019_v25  ;;  %3182 = vmatmul.mubr.bf16.gmra.mrb[8].mxu0 %v4023_v26  ;;  %v4083_v25 = vcombine.low %v259_v13, %v263_v14  ;;  %v4087_v26 = vcombine.low %v261_v15, %v265_v16  ;;  %v323_v13 = vld [vmem:[%s5234_s24 + $0x488] sm:$0xff]  ;;  %v325_v15 = vld [vmem:[%s5234_s24 + $0x498] sm:$0xff] }
 0x157   : > { %2611 = vmatprep.mubr.bf16.mxu1 %v4028_v27  ;;  %4320 = vmatprep.mubr.msk.bf16.mxu0 %vm2169_vm0, %v4032_v28  ;;  %v4092_v27 = vcombine.high %v267_v21, %v271_v22  ;;  %v4096_v28 = vcombine.high %v269_v23, %v273_v24  ;;  %v327_v14 = vld [vmem:[%s5234_s24 + $0x4a8] sm:$0xff]  ;;  %v329_v16 = vld [vmem:[%s5234_s24 + $0x4b8] sm:$0xff] }
 0x15e   : > { %2612 = vmatmul.mubr.bf16.gmra.mrb[12].mxu1 %v4027_v33  ;;  %3190 = vmatmul.mubr.bf16.gmra.mrb[12].mxu0 %v4031_v34  ;;  %v4091_v33 = vcombine.low %v267_v21, %v271_v22  ;;  %v4095_v34 = vcombine.low %v269_v23, %v273_v24  ;;  %v331_v21 = vld [vmem:[%s5234_s24 + $0x4c8] sm:$0xff]  ;;  %v333_v23 = vld [vmem:[%s5234_s24 + $0x4d8] sm:$0xff] }
 0x15f   : > { %2619 = vmatprep.mubr.bf16.mxu1 %v4036_v35  ;;  %4321 = vmatprep.mubr.msk.bf16.mxu0 %vm2169_vm0, %v4040_v36  ;;  %v4100_v35 = vcombine.high %v275_v29, %v279_v30  ;;  %v4104_v36 = vcombine.high %v277_v31, %v281_v32  ;;  %v335_v22 = vld [vmem:[%s5234_s24 + $0x4e8] sm:$0xff]  ;;  %v337_v24 = vld [vmem:[%s5234_s24 + $0x4f8] sm:$0xff] }
 0x166   : > { %2620 = vmatmul.mubr.bf16.gmra.mrb[16].mxu1 %v4035_v41  ;;  %3198 = vmatmul.mubr.bf16.gmra.mrb[16].mxu0 %v4039_v42  ;;  %v4099_v41 = vcombine.low %v275_v29, %v279_v30  ;;  %v4103_v42 = vcombine.low %v277_v31, %v281_v32  ;;  %v339_v29 = vld [vmem:[%s5234_s24 + $0x508] sm:$0xff]  ;;  %v341_v31 = vld [vmem:[%s5234_s24 + $0x518] sm:$0xff] }
 0x167   : > { %2627 = vmatprep.mubr.bf16.mxu1 %v4044_v43  ;;  %4322 = vmatprep.mubr.msk.bf16.mxu0 %vm2169_vm0, %v4048_v44  ;;  %v4108_v43 = vcombine.high %v283_v37, %v287_v38  ;;  %v4112_v44 = vcombine.high %v285_v39, %v289_v40  ;;  %v343_v30 = vld [vmem:[%s5234_s24 + $0x528] sm:$0xff]  ;;  %v345_v32 = vld [vmem:[%s5234_s24 + $0x538] sm:$0xff] }
 0x16e   : > { %2628 = vmatmul.mubr.bf16.gmra.mrb[20].mxu1 %v4043_v49  ;;  %3206 = vmatmul.mubr.bf16.gmra.mrb[20].mxu0 %v4047_v50  ;;  %v4107_v49 = vcombine.low %v283_v37, %v287_v38  ;;  %v4111_v50 = vcombine.low %v285_v39, %v289_v40  ;;  %v347_v37 = vld [vmem:[%s5234_s24 + $0x548] sm:$0xff]  ;;  %v349_v39 = vld [vmem:[%s5234_s24 + $0x558] sm:$0xff] }
 0x16f   : > { %2635 = vmatprep.mubr.bf16.mxu1 %v4052_v51  ;;  %4323 = vmatprep.mubr.msk.bf16.mxu0 %vm2169_vm0, %v4056_v52  ;;  %v4116_v51 = vcombine.high %v291_v45, %v295_v46  ;;  %v4120_v52 = vcombine.high %v293_v47, %v297_v48  ;;  %v351_v38 = vld [vmem:[%s5234_s24 + $0x568] sm:$0xff]  ;;  %v353_v40 = vld [vmem:[%s5234_s24 + $0x578] sm:$0xff] }
 0x176   : > { %2636 = vmatmul.mubr.bf16.gmra.mrb[24].mxu1 %v4051_v56  ;;  %3214 = vmatmul.mubr.bf16.gmra.mrb[24].mxu0 %v4055_v57  ;;  %v4115_v56 = vcombine.low %v291_v45, %v295_v46  ;;  %v4119_v57 = vcombine.low %v293_v47, %v297_v48  ;;  %v355_v45 = vld [vmem:[%s5234_s24 + $0x588] sm:$0xff]  ;;  %v357_v47 = vld [vmem:[%s5234_s24 + $0x598] sm:$0xff] }
 0x177   : > { %2643 = vmatprep.mubr.bf16.mxu1 %v4060_v58  ;;  %4324 = vmatprep.mubr.msk.bf16.mxu0 %vm2169_vm0, %v4064_v59  ;;  %v4124_v58 = vcombine.high %v299_v53, %v303_v54  ;;  %v4128_v59 = vcombine.high %v301_v55, %v305_v1  ;;  %v359_v46 = vld [vmem:[%s5234_s24 + $0x5a8] sm:$0xff]  ;;  %v361_v48 = vld [vmem:[%s5234_s24 + $0x5b8] sm:$0xff] }
 0x17e   : > { %2644 = vmatmul.mubr.bf16.gmra.mrb[28].mxu1 %v4059_v0  ;;  %3222 = vmatmul.mubr.bf16.gmra.mrb[28].mxu0 %v4063_v2  ;;  %v4123_v0 = vcombine.low %v299_v53, %v303_v54  ;;  %v4127_v2 = vcombine.low %v301_v55, %v305_v1  ;;  %v363_v53 = vld [vmem:[%s5234_s24 + $0x5c8] sm:$0xff]  ;;  %v365_v55 = vld [vmem:[%s5234_s24 + $0x5d8] sm:$0xff] }
 0x17f   : > { %2651 = vmatprep.mubr.bf16.mxu1 %v4068_v3  ;;  %4325 = vmatprep.mubr.msk.bf16.mxu0 %vm2169_vm0, %v4072_v4  ;;  %v4132_v3 = vcombine.high %v307_v60, %v311_v61  ;;  %v4136_v4 = vcombine.high %v309_v62, %v313_v63  ;;  %v367_v54 = vld [vmem:[%s5234_s24 + $0x5e8] sm:$0xff]  ;;  %v369_v1 = vld [vmem:[%s5234_s24 + $0x5f8] sm:$0xff] }
 0x186   : > { %2652 = vmatmul.mubr.bf16.gmra.mrb[32].mxu1 %v4067_v9  ;;  %3230 = vmatmul.mubr.bf16.gmra.mrb[32].mxu0 %v4071_v10  ;;  %v4131_v9 = vcombine.low %v307_v60, %v311_v61  ;;  %v4135_v10 = vcombine.low %v309_v62, %v313_v63  ;;  %v371_v60 = vld [vmem:[%s5234_s24 + $0x608] sm:$0xff]  ;;  %v373_v62 = vld [vmem:[%s5234_s24 + $0x618] sm:$0xff] }
 0x187   : > { %2659 = vmatprep.mubr.bf16.mxu1 %v4076_v11  ;;  %4326 = vmatprep.mubr.msk.bf16.mxu0 %vm2169_vm0, %v4080_v12  ;;  %v4140_v11 = vcombine.high %v315_v5, %v319_v6  ;;  %v4144_v12 = vcombine.high %v317_v7, %v321_v8  ;;  %v375_v61 = vld [vmem:[%s5234_s24 + $0x628] sm:$0xff]  ;;  %v377_v63 = vld [vmem:[%s5234_s24 + $0x638] sm:$0xff] }
 0x18e   : > { %2660 = vmatmul.mubr.bf16.gmra.mrb[36].mxu1 %v4075_v17  ;;  %3238 = vmatmul.mubr.bf16.gmra.mrb[36].mxu0 %v4079_v18  ;;  %v4139_v17 = vcombine.low %v315_v5, %v319_v6  ;;  %v4143_v18 = vcombine.low %v317_v7, %v321_v8  ;;  %v379_v5 = vld [vmem:[%s5234_s24 + $0x648] sm:$0xff]  ;;  %v381_v7 = vld [vmem:[%s5234_s24 + $0x658] sm:$0xff] }
 0x18f   : > { %2667 = vmatprep.mubr.bf16.mxu1 %v4084_v19  ;;  %4327 = vmatprep.mubr.msk.bf16.mxu0 %vm2169_vm0, %v4088_v20  ;;  %v4148_v19 = vcombine.high %v323_v13, %v327_v14  ;;  %v4152_v20 = vcombine.high %v325_v15, %v329_v16  ;;  %v383_v6 = vld [vmem:[%s5234_s24 + $0x668] sm:$0xff]  ;;  %v385_v8 = vld [vmem:[%s5234_s24 + $0x678] sm:$0xff] }
 0x196   : > { %2668 = vmatmul.mubr.bf16.gmra.mrb[40].mxu1 %v4083_v25  ;;  %3246 = vmatmul.mubr.bf16.gmra.mrb[40].mxu0 %v4087_v26  ;;  %v4147_v25 = vcombine.low %v323_v13, %v327_v14  ;;  %v4151_v26 = vcombine.low %v325_v15, %v329_v16  ;;  %v387_v13 = vld [vmem:[%s5234_s24 + $0x688] sm:$0xff]  ;;  %v389_v15 = vld [vmem:[%s5234_s24 + $0x698] sm:$0xff] }
 0x197   : > { %2675 = vmatprep.mubr.bf16.mxu1 %v4092_v27  ;;  %4328 = vmatprep.mubr.msk.bf16.mxu0 %vm2169_vm0, %v4096_v28  ;;  %v4156_v27 = vcombine.high %v331_v21, %v335_v22  ;;  %v4160_v28 = vcombine.high %v333_v23, %v337_v24  ;;  %v391_v14 = vld [vmem:[%s5234_s24 + $0x6a8] sm:$0xff]  ;;  %v393_v16 = vld [vmem:[%s5234_s24 + $0x6b8] sm:$0xff] }
 0x19e   : > { %2676 = vmatmul.mubr.bf16.gmra.mrb[44].mxu1 %v4091_v33  ;;  %3254 = vmatmul.mubr.bf16.gmra.mrb[44].mxu0 %v4095_v34  ;;  %v4155_v33 = vcombine.low %v331_v21, %v335_v22  ;;  %v4159_v34 = vcombine.low %v333_v23, %v337_v24  ;;  %v395_v21 = vld [vmem:[%s5234_s24 + $0x6c8] sm:$0xff]  ;;  %v397_v23 = vld [vmem:[%s5234_s24 + $0x6d8] sm:$0xff] }
 0x19f   : > { %2683 = vmatprep.mubr.bf16.mxu1 %v4100_v35  ;;  %4329 = vmatprep.mubr.msk.bf16.mxu0 %vm2169_vm0, %v4104_v36  ;;  %v4164_v35 = vcombine.high %v339_v29, %v343_v30  ;;  %v4168_v36 = vcombine.high %v341_v31, %v345_v32  ;;  %v399_v22 = vld [vmem:[%s5234_s24 + $0x6e8] sm:$0xff]  ;;  %v401_v24 = vld [vmem:[%s5234_s24 + $0x6f8] sm:$0xff] }
 0x1a6   : > { %2684 = vmatmul.mubr.bf16.gmra.mrb[48].mxu1 %v4099_v41  ;;  %3262 = vmatmul.mubr.bf16.gmra.mrb[48].mxu0 %v4103_v42  ;;  %v4163_v41 = vcombine.low %v339_v29, %v343_v30  ;;  %v4167_v42 = vcombine.low %v341_v31, %v345_v32  ;;  %v5694_v29 = vld [vmem:[%s5829_s2] ss:$0 sm:$0xff]  ;;  %v403_v30 = vld [vmem:[%s5234_s24 + $0x708] sm:$0xff] }
 0x1a7   : > { %2691 = vmatprep.mubr.bf16.mxu1 %v4108_v43  ;;  %4330 = vmatprep.mubr.msk.bf16.mxu0 %vm2169_vm0, %v4112_v44  ;;  %v4172_v43 = vcombine.high %v347_v37, %v351_v38  ;;  %v4176_v44 = vcombine.high %v349_v39, %v353_v40  ;;  %v407_v31 = vld [vmem:[%s5234_s24 + $0x728] sm:$0xff] }
 0x1ae   : > { %2692 = vmatmul.mubr.bf16.gmra.mrb[52].mxu1 %v4107_v49  ;;  %3270 = vmatmul.mubr.bf16.gmra.mrb[52].mxu0 %v4111_v50  ;;  %v4171_v49 = vcombine.low %v347_v37, %v351_v38  ;;  %v4175_v50 = vcombine.low %v349_v39, %v353_v40  ;;  %v4219_v38 = vcombine.low %v395_v21, %v399_v22 }
 0x1af   : > { %2699 = vmatprep.mubr.bf16.mxu1 %v4116_v51  ;;  %4331 = vmatprep.mubr.msk.bf16.mxu0 %vm2169_vm0, %v4120_v52  ;;  %v4180_v51 = vcombine.high %v355_v45, %v359_v46  ;;  %v4184_v52 = vcombine.high %v357_v47, %v361_v48 }
 0x1b6   : > { %2700 = vmatmul.mubr.bf16.gmra.mrb[56].mxu1 %v4115_v56  ;;  %3278 = vmatmul.mubr.bf16.gmra.mrb[56].mxu0 %v4119_v57  ;;  %v4179_v56 = vcombine.low %v355_v45, %v359_v46  ;;  %v4183_v57 = vcombine.low %v357_v47, %v361_v48 }
 0x1b7   : > { %2707 = vmatprep.mubr.bf16.mxu1 %v4124_v58  ;;  %4332 = vmatprep.mubr.msk.bf16.mxu0 %vm2169_vm0, %v4128_v59  ;;  %v4188_v58 = vcombine.high %v363_v53, %v367_v54  ;;  %v4192_v59 = vcombine.high %v365_v55, %v369_v1 }
 0x1be   : > { %2708 = vmatmul.mubr.bf16.gmra.mrb[60].mxu1 %v4123_v0  ;;  %3286 = vmatmul.mubr.bf16.gmra.mrb[60].mxu0 %v4127_v2  ;;  %v4187_v0 = vcombine.low %v363_v53, %v367_v54  ;;  %v4191_v2 = vcombine.low %v365_v55, %v369_v1  ;;  %v415_v53 = vld [vmem:[%s5234_s24 + $0x768] sm:$0xff]  ;;  %v413_v55 = vld [vmem:[%s5234_s24 + $0x758] sm:$0xff] }
 0x1bf   : > { %2715 = vmatprep.mubr.bf16.mxu1 %v4132_v3  ;;  %4333 = vmatprep.mubr.msk.bf16.mxu0 %vm2169_vm0, %v4136_v4  ;;  %v4196_v3 = vcombine.high %v371_v60, %v375_v61  ;;  %v4200_v4 = vcombine.high %v373_v62, %v377_v63  ;;  %v417_v1 = vld [vmem:[%s5234_s24 + $0x778] sm:$0xff] }
 0x1c6   : > { %2716 = vmatmul.mubr.bf16.gmra.mrb[64].mxu1 %v4131_v9  ;;  %3294 = vmatmul.mubr.bf16.gmra.mrb[64].mxu0 %v4135_v10  ;;  %v4195_v9 = vcombine.low %v371_v60, %v375_v61  ;;  %v4199_v10 = vcombine.low %v373_v62, %v377_v63  ;;  %v4227_v61 = vcombine.low %v403_v30, %v407_v31 }
 0x1c7   : > { %2723 = vmatprep.mubr.bf16.mxu1 %v4140_v11  ;;  %4334 = vmatprep.mubr.msk.bf16.mxu0 %vm2169_vm0, %v4144_v12  ;;  %v4204_v11 = vcombine.high %v379_v5, %v383_v6  ;;  %v4208_v12 = vcombine.high %v381_v7, %v385_v8 }
 0x1ce   : > { %2724 = vmatmul.mubr.bf16.gmra.mrb[68].mxu1 %v4139_v17  ;;  %3302 = vmatmul.mubr.bf16.gmra.mrb[68].mxu0 %v4143_v18  ;;  %v4203_v17 = vcombine.low %v379_v5, %v383_v6  ;;  %v4207_v18 = vcombine.low %v381_v7, %v385_v8  ;;  %v4240_v8 = vcombine.high %v413_v55, %v417_v1 }
 0x1cf   : > { %2731 = vmatprep.mubr.bf16.mxu1 %v4148_v19  ;;  %4335 = vmatprep.mubr.msk.bf16.mxu0 %vm2169_vm0, %v4152_v20  ;;  %v4212_v19 = vcombine.high %v387_v13, %v391_v14  ;;  %v4216_v20 = vcombine.high %v389_v15, %v393_v16 }
 0x1d6   : > { %2732 = vmatmul.mubr.bf16.gmra.mrb[72].mxu1 %v4147_v25  ;;  %3310 = vmatmul.mubr.bf16.gmra.mrb[72].mxu0 %v4151_v26  ;;  %v4211_v25 = vcombine.low %v387_v13, %v391_v14  ;;  %v4215_v26 = vcombine.low %v389_v15, %v393_v16  ;;  %v419_v13 = vld [vmem:[%s5234_s24 + $0x788] sm:$0xff]  ;;  %v421_v16 = vld [vmem:[%s5234_s24 + $0x798] sm:$0xff] }
 0x1d7   : > { %2739 = vmatprep.mubr.bf16.mxu1 %v4156_v27  ;;  %4336 = vmatprep.mubr.msk.bf16.mxu0 %vm2169_vm0, %v4160_v28  ;;  %v4220_v27 = vcombine.high %v395_v21, %v399_v22  ;;  %v4224_v28 = vcombine.high %v397_v23, %v401_v24  ;;  %v423_v14 = vld [vmem:[%s5234_s24 + $0x7a8] sm:$0xff] }
 0x1de   : > { %2740 = vmatmul.mubr.bf16.gmra.mrb[76].mxu1 %v4155_v33  ;;  %3318 = vmatmul.mubr.bf16.gmra.mrb[76].mxu0 %v4159_v34  ;;  %v405_v33 = vld [vmem:[%s5234_s24 + $0x718] sm:$0xff] }
 0x1df   : > { %2747 = vmatprep.mubr.bf16.mxu1 %v4164_v35  ;;  %4337 = vmatprep.mubr.msk.bf16.mxu0 %vm2169_vm0, %v4168_v36  ;;  %v409_v34 = vld [vmem:[%s5234_s24 + $0x738] sm:$0xff] }
 0x1e0   : > { %v4232_v47 = vcombine.high %v405_v33, %v409_v34 }
 0x1e6   : > { %2748 = vmatmul.mubr.bf16.gmra.mrb[80].mxu1 %v4163_v41  ;;  %3326 = vmatmul.mubr.bf16.gmra.mrb[80].mxu0 %v4167_v42  ;;  %v4223_v41 = vcombine.low %v397_v23, %v401_v24  ;;  %v4228_v42 = vcombine.high %v403_v30, %v407_v31 }
 0x1e7   : > { %2755 = vmatprep.mubr.bf16.mxu1 %v4172_v43  ;;  %4338 = vmatprep.mubr.msk.bf16.mxu0 %vm2169_vm0, %v4176_v44 }
 0x1ee   : > { %2756 = vmatmul.mubr.bf16.gmra.mrb[84].mxu1 %v4171_v49  ;;  %3334 = vmatmul.mubr.bf16.gmra.mrb[84].mxu0 %v4175_v50 }
 0x1ef   : > { %2763 = vmatprep.mubr.bf16.mxu1 %v4180_v51  ;;  %4339 = vmatprep.mubr.msk.bf16.mxu0 %vm2169_vm0, %v4184_v52  ;;  %v411_v52 = vld [vmem:[%s5234_s24 + $0x748] sm:$0xff] }
 0x1f0   : > { %v4235_v23 = vcombine.low %v411_v52, %v415_v53 }
 0x1f6   : > { %2764 = vmatmul.mubr.bf16.gmra.mrb[88].mxu1 %v4179_v56  ;;  %3342 = vmatmul.mubr.bf16.gmra.mrb[88].mxu0 %v4183_v57 }
 0x1f7   : > { %2771 = vmatprep.mubr.bf16.mxu1 %v4188_v58  ;;  %4340 = vmatprep.mubr.msk.bf16.mxu0 %vm2169_vm0, %v4192_v59 }
 0x1fe   : > { %2772 = vmatmul.mubr.bf16.gmra.mrb[92].mxu1 %v4187_v0  ;;  %3350 = vmatmul.mubr.bf16.gmra.mrb[92].mxu0 %v4191_v2  ;;  %v4231_v2 = vcombine.low %v405_v33, %v409_v34 }
 0x1ff   : > { %2779 = vmatprep.mubr.bf16.mxu1 %v4196_v3  ;;  %4341 = vmatprep.mubr.msk.bf16.mxu0 %vm2169_vm0, %v4200_v4  ;;  %v4236_v3 = vcombine.high %v411_v52, %v415_v53 }
 0x206   : > { %2780 = vmatmul.mubr.bf16.gmra.mrb[96].mxu1 %v4195_v9  ;;  %3358 = vmatmul.mubr.bf16.gmra.mrb[96].mxu0 %v4199_v10 }
 0x207   : > { %2787 = vmatprep.mubr.bf16.mxu1 %v4204_v11  ;;  %4342 = vmatprep.mubr.msk.bf16.mxu0 %vm2169_vm0, %v4208_v12 }
 0x20e   : > { %2788 = vmatmul.mubr.bf16.gmra.mrb[100].mxu1 %v4203_v17  ;;  %3366 = vmatmul.mubr.bf16.gmra.mrb[100].mxu0 %v4207_v18  ;;  %v425_v17 = vld [vmem:[%s5234_s24 + $0x7b8] sm:$0xff] }
 0x20f   : > { %2795 = vmatprep.mubr.bf16.mxu1 %v4212_v19  ;;  %4343 = vmatprep.mubr.msk.bf16.mxu0 %vm2169_vm0, %v4216_v20  ;;  %v4248_v34 = vcombine.high %v421_v16, %v425_v17  ;;  %v4247_v53 = vcombine.low %v421_v16, %v425_v17 }
 0x216   : > { %2796 = vmatmul.mubr.bf16.gmra.mrb[104].mxu1 %v4211_v25  ;;  %3374 = vmatmul.mubr.bf16.gmra.mrb[104].mxu0 %v4215_v26 }
 0x217   : > { %2803 = vmatprep.mubr.bf16.mxu1 %v4220_v27  ;;  %4344 = vmatprep.mubr.msk.bf16.mxu0 %vm2169_vm0, %v4224_v28  ;;  %v4239_v27 = vcombine.low %v413_v55, %v417_v1  ;;  %v4244_v28 = vcombine.high %v419_v13, %v423_v14 }
 0x219   : > { %v2589_v32 = vpop.f32.mrb[0].mxu1  ;;  %v3167_v36 = vpop.f32.mrb[0].mxu0 }
 0x21a   : > { %v4671_v35 = vadd.f32 %v5694_v29, %v2589_v32  ;;  %v2591_v37 = vpop.f32.mrb[1].mxu1  ;;  %v3169_v39 = vpop.f32.mrb[1].mxu0 }
 0x21b   : > { %v2592_v40 = vpop.f32.mrb[2].mxu1  ;;  %v3170_v45 = vpop.f32.mrb[2].mxu0  ;;  %v427_v39 = vld [vmem:[%s5234_s24 + $0x7c8] sm:$0xff] }
 0x21c   : > { %v4672_v43 = vadd.f32 %v4671_v35, %v3167_v36  ;;  %v4673_v44 = vadd.f32 %v5694_v29, %v2592_v40  ;;  %v2594_v46 = vpop.f32.mrb[3].mxu1  ;;  %v3172_v48 = vpop.f32.mrb[3].mxu0  ;;  %v431_v40 = vld [vmem:[%s5234_s24 + $0x7e8] sm:$0xff] }
 0x21e   : > { %v3486_v49 = vmul.f32 0.01, %v4672_v43  ;;  %v4674_v50 = vadd.f32 %v4673_v44, %v3170_v45  ;;  %2804 = vmatmul.mubr.bf16.gmra.mrb[108].mxu1 %v4219_v38  ;;  %vm3422_vm1 = vcmp.gt.f32.partialorder %v4672_v43, 0.0  ;;  %3382 = vmatmul.mubr.bf16.gmra.mrb[108].mxu0 %v4223_v41 }
 0x21f   : > { %2811 = vmatprep.mubr.bf16.mxu1 %v4228_v42  ;;  %4345 = vmatprep.mubr.msk.bf16.mxu0 %vm2169_vm0, %v4232_v47  ;;  %v429_v42 = vld [vmem:[%s5234_s24 + $0x7d8] sm:$0xff] }
 0x220   : > { %vm3423_vm2 = vcmp.gt.f32.partialorder %v4674_v50, 0.0  ;;  %v3487_v51 = vmul.f32 0.01, %v4674_v50  ;;  %v3550_v56 = vsel %vm3422_vm1, %v4672_v43, %v3486_v49  ;;  %v433_v43 = vld [vmem:[%s5234_s24 + $0x7f8] sm:$0xff]  ;;  %v4243_v49 = vcombine.low %v419_v13, %v423_v14 }
 0x221   : > { %v2597_v54 = vpop.f32.mrb[4].mxu1  ;;  %v3175_v59 = vpop.f32.mrb[4].mxu0 }
 0x222   : > { %v3551_v57 = vsel %vm3423_vm2, %v4674_v50, %v3487_v51  ;;  %v4675_v58 = vadd.f32 %v5694_v29, %v2597_v54  ;;  %v2599_v60 = vpop.f32.mrb[5].mxu1  ;;  %v3177_v63 = vpop.f32.mrb[5].mxu0  ;;  %v4252_v54 = vcombine.high %v427_v39, %v431_v40 }
 0x223   : > { %v4483_v62 = vpack.c.bf16 %v3551_v57, %v3550_v56  ;;  %v2600_v0 = vpop.f32.mrb[6].mxu1  ;;  %v3178_v6 = vpop.f32.mrb[6].mxu0 }
 0x224   : > { %v4676_v4 = vadd.f32 %v4675_v58, %v3175_v59  ;;  %v4677_v5 = vadd.f32 %v5694_v29, %v2600_v0  ;;  %v2602_v7 = vpop.f32.mrb[7].mxu1  ;;  %v3180_v9 = vpop.f32.mrb[7].mxu0  ;;  %v4256_v58 = vcombine.high %v429_v42, %v433_v43 }
 0x225   : > { %4484 = vst [vmem:[%s5712_s21] sm:$0xff] %v4483_v62  }
 0x226   : > { %v3488_v10 = vmul.f32 0.01, %v4676_v4  ;;  %v4678_v11 = vadd.f32 %v4677_v5, %v3178_v6  ;;  %2812 = vmatmul.mubr.bf16.gmra.mrb[112].mxu1 %v4227_v61  ;;  %vm3424_vm3 = vcmp.gt.f32.partialorder %v4676_v4, 0.0  ;;  %3390 = vmatmul.mubr.bf16.gmra.mrb[112].mxu0 %v4231_v2  ;;  %v4251_v6 = vcombine.low %v427_v39, %v431_v40 }
 0x227   : > { %2819 = vmatprep.mubr.bf16.mxu1 %v4236_v3  ;;  %4346 = vmatprep.mubr.msk.bf16.mxu0 %vm2169_vm0, %v4240_v8 }
 0x228   : > { %vm3425_vm4 = vcmp.gt.f32.partialorder %v4678_v11, 0.0  ;;  %v3489_v12 = vmul.f32 0.01, %v4678_v11  ;;  %v3552_v18 = vsel %vm3424_vm3, %v4676_v4, %v3488_v10  ;;  %v4255_v10 = vcombine.low %v429_v42, %v433_v43 }
 0x229   : > { %v2605_v15 = vpop.f32.mrb[8].mxu1  ;;  %v3183_v21 = vpop.f32.mrb[8].mxu0 }
 0x22a   : > { %v3553_v19 = vsel %vm3425_vm4, %v4678_v11, %v3489_v12  ;;  %v4679_v20 = vadd.f32 %v5694_v29, %v2605_v15  ;;  %v2607_v22 = vpop.f32.mrb[9].mxu1  ;;  %v3185_v25 = vpop.f32.mrb[9].mxu0 }
 0x22b   : > { %v4488_v24 = vpack.c.bf16 %v3553_v19, %v3552_v18  ;;  %v2608_v26 = vpop.f32.mrb[10].mxu1  ;;  %v3186_v32 = vpop.f32.mrb[10].mxu0 }
 0x22c   : > { %v4680_v30 = vadd.f32 %v4679_v20, %v3183_v21  ;;  %v4681_v31 = vadd.f32 %v5694_v29, %v2608_v26  ;;  %v2610_v33 = vpop.f32.mrb[11].mxu1  ;;  %v3188_v35 = vpop.f32.mrb[11].mxu0 }
 0x22d   : > { %4640 = vst [vmem:[%s5712_s21 + $0x8] sm:$0xff] %v4488_v24  }
 0x22e   : > { %v3490_v36 = vmul.f32 0.01, %v4680_v30  ;;  %v4682_v37 = vadd.f32 %v4681_v31, %v3186_v32  ;;  %2820 = vmatmul.mubr.bf16.gmra.mrb[116].mxu1 %v4235_v23  ;;  %vm3426_vm5 = vcmp.gt.f32.partialorder %v4680_v30, 0.0  ;;  %3398 = vmatmul.mubr.bf16.gmra.mrb[116].mxu0 %v4239_v27 }
 0x22f   : > { %2827 = vmatprep.mubr.bf16.mxu1 %v4244_v28  ;;  %4347 = vmatprep.mubr.msk.bf16.mxu0 %vm2169_vm0, %v4248_v34 }
 0x230   : > { %vm3427_vm6 = vcmp.gt.f32.partialorder %v4682_v37, 0.0  ;;  %v3491_v38 = vmul.f32 0.01, %v4682_v37  ;;  %v3554_v44 = vsel %vm3426_vm5, %v4680_v30, %v3490_v36 }
 0x231   : > { %v2613_v41 = vpop.f32.mrb[12].mxu1  ;;  %v3191_v47 = vpop.f32.mrb[12].mxu0 }
 0x232   : > { %v3555_v45 = vsel %vm3427_vm6, %v4682_v37, %v3491_v38  ;;  %v4683_v46 = vadd.f32 %v5694_v29, %v2613_v41  ;;  %v2615_v48 = vpop.f32.mrb[13].mxu1  ;;  %v3193_v51 = vpop.f32.mrb[13].mxu0 }
 0x233   : > { %v4493_v50 = vpack.c.bf16 %v3555_v45, %v3554_v44  ;;  %v2616_v52 = vpop.f32.mrb[14].mxu1  ;;  %v3194_v56 = vpop.f32.mrb[14].mxu0 }
 0x234   : > { %v4684_v55 = vadd.f32 %v4683_v46, %v3191_v47  ;;  %v4685_v1 = vadd.f32 %v5694_v29, %v2616_v52  ;;  %v2618_v57 = vpop.f32.mrb[15].mxu1  ;;  %v3196_v59 = vpop.f32.mrb[15].mxu0 }
 0x235   : > { %4641 = vst [vmem:[%s5712_s21 + $0x10] sm:$0xff] %v4493_v50  }
 0x236   : > { %v3492_v60 = vmul.f32 0.01, %v4684_v55  ;;  %v4686_v61 = vadd.f32 %v4685_v1, %v3194_v56  ;;  %2828 = vmatmul.mubr.bf16.gmra.mrb[120].mxu1 %v4243_v49  ;;  %vm3428_vm7 = vcmp.gt.f32.partialorder %v4684_v55, 0.0  ;;  %3406 = vmatmul.mubr.bf16.gmra.mrb[120].mxu0 %v4247_v53 }
 0x237   : > { %2835 = vmatprep.mubr.bf16.mxu1 %v4252_v54  ;;  %4348 = vmatprep.mubr.msk.bf16.mxu0 %vm2169_vm0, %v4256_v58 }
 0x238   : > { %vm3429_vm8 = vcmp.gt.f32.partialorder %v4686_v61, 0.0  ;;  %v3493_v62 = vmul.f32 0.01, %v4686_v61  ;;  %v3556_v0 = vsel %vm3428_vm7, %v4684_v55, %v3492_v60 }
 0x239   : > { %v2621_v63 = vpop.f32.mrb[16].mxu1  ;;  %v3199_v4 = vpop.f32.mrb[16].mxu0 }
 0x23a   : > { %v3557_v2 = vsel %vm3429_vm8, %v4686_v61, %v3493_v62  ;;  %v4687_v3 = vadd.f32 %v5694_v29, %v2621_v63  ;;  %v2623_v5 = vpop.f32.mrb[17].mxu1  ;;  %v3201_v8 = vpop.f32.mrb[17].mxu0 }
 0x23b   : > { %v4498_v7 = vpack.c.bf16 %v3557_v2, %v3556_v0  ;;  %v2624_v9 = vpop.f32.mrb[18].mxu1  ;;  %v3202_v13 = vpop.f32.mrb[18].mxu0 }
 0x23c   : > { %v4688_v11 = vadd.f32 %v4687_v3, %v3199_v4  ;;  %v4689_v12 = vadd.f32 %v5694_v29, %v2624_v9  ;;  %v2626_v14 = vpop.f32.mrb[19].mxu1  ;;  %v3204_v15 = vpop.f32.mrb[19].mxu0 }
 0x23d   : > { %4642 = vst [vmem:[%s5712_s21 + $0x18] sm:$0xff] %v4498_v7  }
 0x23e   : > { %v3494_v16 = vmul.f32 0.01, %v4688_v11  ;;  %v4690_v17 = vadd.f32 %v4689_v12, %v3202_v13  ;;  %2836 = vmatmul.mubr.bf16.gmra.mrb[124].mxu1 %v4251_v6  ;;  %vm3430_vm9 = vcmp.gt.f32.partialorder %v4688_v11, 0.0  ;;  %3414 = vmatmul.mubr.bf16.gmra.mrb[124].mxu0 %v4255_v10 }
 0x240   : > { %vm3431_vm10 = vcmp.gt.f32.partialorder %v4690_v17, 0.0  ;;  %v3495_v18 = vmul.f32 0.01, %v4690_v17  ;;  %v3558_v20 = vsel %vm3430_vm9, %v4688_v11, %v3494_v16 }
 0x241   : > { %v2629_v19 = vpop.f32.mrb[20].mxu1  ;;  %v3207_v23 = vpop.f32.mrb[20].mxu0 }
 0x242   : > { %v3559_v21 = vsel %vm3431_vm10, %v4690_v17, %v3495_v18  ;;  %v4691_v22 = vadd.f32 %v5694_v29, %v2629_v19  ;;  %v2631_v24 = vpop.f32.mrb[21].mxu1  ;;  %v3209_v26 = vpop.f32.mrb[21].mxu0 }
 0x243   : > { %v4503_v25 = vpack.c.bf16 %v3559_v21, %v3558_v20  ;;  %v2632_v27 = vpop.f32.mrb[22].mxu1  ;;  %v3210_v31 = vpop.f32.mrb[22].mxu0 }
 0x244   : > { %v4692_v28 = vadd.f32 %v4691_v22, %v3207_v23  ;;  %v4693_v30 = vadd.f32 %v5694_v29, %v2632_v27  ;;  %v2634_v32 = vpop.f32.mrb[23].mxu1  ;;  %v3212_v33 = vpop.f32.mrb[23].mxu0 }
 0x245   : > { %4643 = vst [vmem:[%s5712_s21 + $0x20] sm:$0xff] %v4503_v25  }
 0x246   : > { %v3496_v34 = vmul.f32 0.01, %v4692_v28  ;;  %v4694_v35 = vadd.f32 %v4693_v30, %v3210_v31  ;;  %vm3432_vm11 = vcmp.gt.f32.partialorder %v4692_v28, 0.0 }
 0x248   : > { %vm3433_vm12 = vcmp.gt.f32.partialorder %v4694_v35, 0.0  ;;  %v3497_v36 = vmul.f32 0.01, %v4694_v35  ;;  %v3560_v38 = vsel %vm3432_vm11, %v4692_v28, %v3496_v34 }
 0x249   : > { %v2637_v37 = vpop.f32.mrb[24].mxu1  ;;  %v3215_v41 = vpop.f32.mrb[24].mxu0 }
 0x24a   : > { %v3561_v39 = vsel %vm3433_vm12, %v4694_v35, %v3497_v36  ;;  %v4695_v40 = vadd.f32 %v5694_v29, %v2637_v37  ;;  %v2639_v42 = vpop.f32.mrb[25].mxu1  ;;  %v3217_v44 = vpop.f32.mrb[25].mxu0 }
 0x24b   : > { %v4508_v43 = vpack.c.bf16 %v3561_v39, %v3560_v38  ;;  %v2640_v45 = vpop.f32.mrb[26].mxu1  ;;  %v3218_v48 = vpop.f32.mrb[26].mxu0 }
 0x24c   : > { %v4696_v46 = vadd.f32 %v4695_v40, %v3215_v41  ;;  %v4697_v47 = vadd.f32 %v5694_v29, %v2640_v45  ;;  %v2642_v49 = vpop.f32.mrb[27].mxu1  ;;  %v3220_v50 = vpop.f32.mrb[27].mxu0 }
 0x24d   : > { %4644 = vst [vmem:[%s5712_s21 + $0x28] sm:$0xff] %v4508_v43  }
 0x24e   : > { %v3498_v51 = vmul.f32 0.01, %v4696_v46  ;;  %v4698_v52 = vadd.f32 %v4697_v47, %v3218_v48  ;;  %vm3434_vm13 = vcmp.gt.f32.partialorder %v4696_v46, 0.0 }
 0x250   : > { %vm3435_vm14 = vcmp.gt.f32.partialorder %v4698_v52, 0.0  ;;  %v3499_v53 = vmul.f32 0.01, %v4698_v52  ;;  %v3562_v55 = vsel %vm3434_vm13, %v4696_v46, %v3498_v51 }
 0x251   : > { %v2645_v54 = vpop.f32.mrb[28].mxu1  ;;  %v3223_v57 = vpop.f32.mrb[28].mxu0 }
 0x252   : > { %v3563_v1 = vsel %vm3435_vm14, %v4698_v52, %v3499_v53  ;;  %v4699_v56 = vadd.f32 %v5694_v29, %v2645_v54  ;;  %v2647_v58 = vpop.f32.mrb[29].mxu1  ;;  %v3225_v60 = vpop.f32.mrb[29].mxu0 }
 0x253   : > { %v4513_v59 = vpack.c.bf16 %v3563_v1, %v3562_v55  ;;  %v2648_v61 = vpop.f32.mrb[30].mxu1  ;;  %v3226_v0 = vpop.f32.mrb[30].mxu0 }
 0x254   : > { %v4700_v62 = vadd.f32 %v4699_v56, %v3223_v57  ;;  %v4701_v63 = vadd.f32 %v5694_v29, %v2648_v61  ;;  %v2650_v2 = vpop.f32.mrb[31].mxu1  ;;  %v3228_v3 = vpop.f32.mrb[31].mxu0 }
 0x255   : > { %4645 = vst [vmem:[%s5712_s21 + $0x30] sm:$0xff] %v4513_v59  }
 0x256   : > { %v3500_v4 = vmul.f32 0.01, %v4700_v62  ;;  %v4702_v5 = vadd.f32 %v4701_v63, %v3226_v0  ;;  %vm3436_vm15 = vcmp.gt.f32.partialorder %v4700_v62, 0.0 }
 0x258   : > { %vm3437_vm0 = vcmp.gt.f32.partialorder %v4702_v5, 0.0  ;;  %v3501_v6 = vmul.f32 0.01, %v4702_v5  ;;  %v3564_v8 = vsel %vm3436_vm15, %v4700_v62, %v3500_v4 }
 0x259   : > { %v2653_v7 = vpop.f32.mrb[32].mxu1  ;;  %v3231_v11 = vpop.f32.mrb[32].mxu0 }
 0x25a   : > { %v3565_v9 = vsel %vm3437_vm0, %v4702_v5, %v3501_v6  ;;  %v4703_v10 = vadd.f32 %v5694_v29, %v2653_v7  ;;  %v2655_v12 = vpop.f32.mrb[33].mxu1  ;;  %v3233_v14 = vpop.f32.mrb[33].mxu0 }
 0x25b   : > { %v4518_v13 = vpack.c.bf16 %v3565_v9, %v3564_v8  ;;  %v2656_v15 = vpop.f32.mrb[34].mxu1  ;;  %v3234_v18 = vpop.f32.mrb[34].mxu0 }
 0x25c   : > { %v4704_v16 = vadd.f32 %v4703_v10, %v3231_v11  ;;  %v4705_v17 = vadd.f32 %v5694_v29, %v2656_v15  ;;  %v2658_v19 = vpop.f32.mrb[35].mxu1  ;;  %v3236_v20 = vpop.f32.mrb[35].mxu0 }
 0x25d   : > { %4646 = vst [vmem:[%s5712_s21 + $0x38] sm:$0xff] %v4518_v13  }
 0x25e   : > { %v3502_v21 = vmul.f32 0.01, %v4704_v16  ;;  %v4706_v22 = vadd.f32 %v4705_v17, %v3234_v18  ;;  %vm3438_vm1 = vcmp.gt.f32.partialorder %v4704_v16, 0.0 }
 0x260   : > { %vm3439_vm2 = vcmp.gt.f32.partialorder %v4706_v22, 0.0  ;;  %v3503_v23 = vmul.f32 0.01, %v4706_v22  ;;  %v3566_v25 = vsel %vm3438_vm1, %v4704_v16, %v3502_v21 }
 0x261   : > { %v2661_v24 = vpop.f32.mrb[36].mxu1  ;;  %v3239_v28 = vpop.f32.mrb[36].mxu0 }
 0x262   : > { %v3567_v26 = vsel %vm3439_vm2, %v4706_v22, %v3503_v23  ;;  %v4707_v27 = vadd.f32 %v5694_v29, %v2661_v24  ;;  %v2663_v30 = vpop.f32.mrb[37].mxu1  ;;  %v3241_v32 = vpop.f32.mrb[37].mxu0 }
 0x263   : > { %v4523_v31 = vpack.c.bf16 %v3567_v26, %v3566_v25  ;;  %v2664_v33 = vpop.f32.mrb[38].mxu1  ;;  %v3242_v36 = vpop.f32.mrb[38].mxu0 }
 0x264   : > { %v4708_v34 = vadd.f32 %v4707_v27, %v3239_v28  ;;  %v4709_v35 = vadd.f32 %v5694_v29, %v2664_v33  ;;  %v2666_v37 = vpop.f32.mrb[39].mxu1  ;;  %v3244_v38 = vpop.f32.mrb[39].mxu0 }
 0x265   : > { %4647 = vst [vmem:[%s5712_s21 + $0x40] sm:$0xff] %v4523_v31  }
 0x266   : > { %v3504_v39 = vmul.f32 0.01, %v4708_v34  ;;  %v4710_v40 = vadd.f32 %v4709_v35, %v3242_v36  ;;  %vm3440_vm3 = vcmp.gt.f32.partialorder %v4708_v34, 0.0 }
 0x268   : > { %vm3441_vm4 = vcmp.gt.f32.partialorder %v4710_v40, 0.0  ;;  %v3505_v41 = vmul.f32 0.01, %v4710_v40  ;;  %v3568_v43 = vsel %vm3440_vm3, %v4708_v34, %v3504_v39 }
 0x269   : > { %v2669_v42 = vpop.f32.mrb[40].mxu1  ;;  %v3247_v46 = vpop.f32.mrb[40].mxu0 }
 0x26a   : > { %v3569_v44 = vsel %vm3441_vm4, %v4710_v40, %v3505_v41  ;;  %v4711_v45 = vadd.f32 %v5694_v29, %v2669_v42  ;;  %v2671_v47 = vpop.f32.mrb[41].mxu1  ;;  %v3249_v49 = vpop.f32.mrb[41].mxu0 }
 0x26b   : > { %v4528_v48 = vpack.c.bf16 %v3569_v44, %v3568_v43  ;;  %v2672_v50 = vpop.f32.mrb[42].mxu1  ;;  %v3250_v53 = vpop.f32.mrb[42].mxu0 }
 0x26c   : > { %v4712_v51 = vadd.f32 %v4711_v45, %v3247_v46  ;;  %v4713_v52 = vadd.f32 %v5694_v29, %v2672_v50  ;;  %v2674_v54 = vpop.f32.mrb[43].mxu1  ;;  %v3252_v55 = vpop.f32.mrb[43].mxu0 }
 0x26d   : > { %4648 = vst [vmem:[%s5712_s21 + $0x48] sm:$0xff] %v4528_v48  }
 0x26e   : > { %v3506_v1 = vmul.f32 0.01, %v4712_v51  ;;  %v4714_v56 = vadd.f32 %v4713_v52, %v3250_v53  ;;  %vm3442_vm5 = vcmp.gt.f32.partialorder %v4712_v51, 0.0 }
 0x270   : > { %vm3443_vm6 = vcmp.gt.f32.partialorder %v4714_v56, 0.0  ;;  %v3507_v57 = vmul.f32 0.01, %v4714_v56  ;;  %v3570_v59 = vsel %vm3442_vm5, %v4712_v51, %v3506_v1 }
 0x271   : > { %v2677_v58 = vpop.f32.mrb[44].mxu1  ;;  %v3255_v62 = vpop.f32.mrb[44].mxu0 }
 0x272   : > { %v3571_v60 = vsel %vm3443_vm6, %v4714_v56, %v3507_v57  ;;  %v4715_v61 = vadd.f32 %v5694_v29, %v2677_v58  ;;  %v2679_v63 = vpop.f32.mrb[45].mxu1  ;;  %v3257_v2 = vpop.f32.mrb[45].mxu0 }
 0x273   : > { %v4533_v0 = vpack.c.bf16 %v3571_v60, %v3570_v59  ;;  %v2680_v3 = vpop.f32.mrb[46].mxu1  ;;  %v3258_v6 = vpop.f32.mrb[46].mxu0 }
 0x274   : > { %v4716_v4 = vadd.f32 %v4715_v61, %v3255_v62  ;;  %v4717_v5 = vadd.f32 %v5694_v29, %v2680_v3  ;;  %v2682_v7 = vpop.f32.mrb[47].mxu1  ;;  %v3260_v8 = vpop.f32.mrb[47].mxu0 }
 0x275   : > { %4649 = vst [vmem:[%s5712_s21 + $0x50] sm:$0xff] %v4533_v0  }
 0x276   : > { %v3508_v9 = vmul.f32 0.01, %v4716_v4  ;;  %v4718_v10 = vadd.f32 %v4717_v5, %v3258_v6  ;;  %vm3444_vm7 = vcmp.gt.f32.partialorder %v4716_v4, 0.0 }
 0x278   : > { %vm3445_vm8 = vcmp.gt.f32.partialorder %v4718_v10, 0.0  ;;  %v3509_v11 = vmul.f32 0.01, %v4718_v10  ;;  %v3572_v13 = vsel %vm3444_vm7, %v4716_v4, %v3508_v9 }
 0x279   : > { %v2685_v12 = vpop.f32.mrb[48].mxu1  ;;  %v3263_v16 = vpop.f32.mrb[48].mxu0 }
 0x27a   : > { %v3573_v14 = vsel %vm3445_vm8, %v4718_v10, %v3509_v11  ;;  %v4719_v15 = vadd.f32 %v5694_v29, %v2685_v12  ;;  %v2687_v17 = vpop.f32.mrb[49].mxu1  ;;  %v3265_v19 = vpop.f32.mrb[49].mxu0 }
 0x27b   : > { %v4538_v18 = vpack.c.bf16 %v3573_v14, %v3572_v13  ;;  %v2688_v20 = vpop.f32.mrb[50].mxu1  ;;  %v3266_v23 = vpop.f32.mrb[50].mxu0 }
 0x27c   : > { %v4720_v21 = vadd.f32 %v4719_v15, %v3263_v16  ;;  %v4721_v22 = vadd.f32 %v5694_v29, %v2688_v20  ;;  %v2690_v24 = vpop.f32.mrb[51].mxu1  ;;  %v3268_v25 = vpop.f32.mrb[51].mxu0 }
 0x27d   : > { %4650 = vst [vmem:[%s5712_s21 + $0x58] sm:$0xff] %v4538_v18  }
 0x27e   : > { %v3510_v26 = vmul.f32 0.01, %v4720_v21  ;;  %v4722_v27 = vadd.f32 %v4721_v22, %v3266_v23  ;;  %vm3446_vm9 = vcmp.gt.f32.partialorder %v4720_v21, 0.0 }
 0x280   : > { %vm3447_vm10 = vcmp.gt.f32.partialorder %v4722_v27, 0.0  ;;  %v3511_v28 = vmul.f32 0.01, %v4722_v27  ;;  %v3574_v31 = vsel %vm3446_vm9, %v4720_v21, %v3510_v26 }
 0x281   : > { %v2693_v30 = vpop.f32.mrb[52].mxu1  ;;  %v3271_v34 = vpop.f32.mrb[52].mxu0 }
 0x282   : > { %v3575_v32 = vsel %vm3447_vm10, %v4722_v27, %v3511_v28  ;;  %v4723_v33 = vadd.f32 %v5694_v29, %v2693_v30  ;;  %v2695_v35 = vpop.f32.mrb[53].mxu1  ;;  %v3273_v37 = vpop.f32.mrb[53].mxu0 }
 0x283   : > { %v4543_v36 = vpack.c.bf16 %v3575_v32, %v3574_v31  ;;  %v2696_v38 = vpop.f32.mrb[54].mxu1  ;;  %v3274_v41 = vpop.f32.mrb[54].mxu0 }
 0x284   : > { %v4724_v39 = vadd.f32 %v4723_v33, %v3271_v34  ;;  %v4725_v40 = vadd.f32 %v5694_v29, %v2696_v38  ;;  %v2698_v42 = vpop.f32.mrb[55].mxu1  ;;  %v3276_v43 = vpop.f32.mrb[55].mxu0 }
 0x285   : > { %4651 = vst [vmem:[%s5712_s21 + $0x60] sm:$0xff] %v4543_v36  }
 0x286   : > { %v3512_v44 = vmul.f32 0.01, %v4724_v39  ;;  %v4726_v45 = vadd.f32 %v4725_v40, %v3274_v41  ;;  %vm3448_vm11 = vcmp.gt.f32.partialorder %v4724_v39, 0.0 }
 0x288   : > { %vm3449_vm12 = vcmp.gt.f32.partialorder %v4726_v45, 0.0  ;;  %v3513_v46 = vmul.f32 0.01, %v4726_v45  ;;  %v3576_v48 = vsel %vm3448_vm11, %v4724_v39, %v3512_v44 }
 0x289   : > { %v2701_v47 = vpop.f32.mrb[56].mxu1  ;;  %v3279_v51 = vpop.f32.mrb[56].mxu0 }
 0x28a   : > { %v3577_v49 = vsel %vm3449_vm12, %v4726_v45, %v3513_v46  ;;  %v4727_v50 = vadd.f32 %v5694_v29, %v2701_v47  ;;  %v2703_v52 = vpop.f32.mrb[57].mxu1  ;;  %v3281_v54 = vpop.f32.mrb[57].mxu0 }
 0x28b   : > { %v4548_v53 = vpack.c.bf16 %v3577_v49, %v3576_v48  ;;  %v2704_v55 = vpop.f32.mrb[58].mxu1  ;;  %v3282_v57 = vpop.f32.mrb[58].mxu0 }
 0x28c   : > { %v4728_v1 = vadd.f32 %v4727_v50, %v3279_v51  ;;  %v4729_v56 = vadd.f32 %v5694_v29, %v2704_v55  ;;  %v2706_v58 = vpop.f32.mrb[59].mxu1  ;;  %v3284_v59 = vpop.f32.mrb[59].mxu0 }
 0x28d   : > { %4652 = vst [vmem:[%s5712_s21 + $0x68] sm:$0xff] %v4548_v53  }
 0x28e   : > { %v3514_v60 = vmul.f32 0.01, %v4728_v1  ;;  %v4730_v61 = vadd.f32 %v4729_v56, %v3282_v57  ;;  %vm3450_vm13 = vcmp.gt.f32.partialorder %v4728_v1, 0.0 }
 0x290   : > { %vm3451_vm14 = vcmp.gt.f32.partialorder %v4730_v61, 0.0  ;;  %v3515_v62 = vmul.f32 0.01, %v4730_v61  ;;  %v3578_v0 = vsel %vm3450_vm13, %v4728_v1, %v3514_v60 }
 0x291   : > { %v2709_v63 = vpop.f32.mrb[60].mxu1  ;;  %v3287_v4 = vpop.f32.mrb[60].mxu0 }
 0x292   : > { %v3579_v2 = vsel %vm3451_vm14, %v4730_v61, %v3515_v62  ;;  %v4731_v3 = vadd.f32 %v5694_v29, %v2709_v63  ;;  %v2711_v5 = vpop.f32.mrb[61].mxu1  ;;  %v3289_v7 = vpop.f32.mrb[61].mxu0 }
 0x293   : > { %v4553_v6 = vpack.c.bf16 %v3579_v2, %v3578_v0  ;;  %v2712_v8 = vpop.f32.mrb[62].mxu1  ;;  %v3290_v11 = vpop.f32.mrb[62].mxu0 }
 0x294   : > { %v4732_v9 = vadd.f32 %v4731_v3, %v3287_v4  ;;  %v4733_v10 = vadd.f32 %v5694_v29, %v2712_v8  ;;  %v2714_v12 = vpop.f32.mrb[63].mxu1  ;;  %v3292_v13 = vpop.f32.mrb[63].mxu0 }
 0x295   : > { %4653 = vst [vmem:[%s5712_s21 + $0x70] sm:$0xff] %v4553_v6  }
 0x296   : > { %v3516_v14 = vmul.f32 0.01, %v4732_v9  ;;  %v4734_v15 = vadd.f32 %v4733_v10, %v3290_v11  ;;  %vm3452_vm15 = vcmp.gt.f32.partialorder %v4732_v9, 0.0 }
 0x298   : > { %vm3453_vm0 = vcmp.gt.f32.partialorder %v4734_v15, 0.0  ;;  %v3517_v16 = vmul.f32 0.01, %v4734_v15  ;;  %v3580_v18 = vsel %vm3452_vm15, %v4732_v9, %v3516_v14 }
 0x299   : > { %v2717_v17 = vpop.f32.mrb[64].mxu1  ;;  %v3295_v21 = vpop.f32.mrb[64].mxu0 }
 0x29a   : > { %v3581_v19 = vsel %vm3453_vm0, %v4734_v15, %v3517_v16  ;;  %v4735_v20 = vadd.f32 %v5694_v29, %v2717_v17  ;;  %v2719_v22 = vpop.f32.mrb[65].mxu1  ;;  %v3297_v24 = vpop.f32.mrb[65].mxu0 }
 0x29b   : > { %v4558_v23 = vpack.c.bf16 %v3581_v19, %v3580_v18  ;;  %v2720_v25 = vpop.f32.mrb[66].mxu1  ;;  %v3298_v28 = vpop.f32.mrb[66].mxu0 }
 0x29c   : > { %v4736_v26 = vadd.f32 %v4735_v20, %v3295_v21  ;;  %v4737_v27 = vadd.f32 %v5694_v29, %v2720_v25  ;;  %v2722_v30 = vpop.f32.mrb[67].mxu1  ;;  %v3300_v31 = vpop.f32.mrb[67].mxu0 }
 0x29d   : > { %4654 = vst [vmem:[%s5712_s21 + $0x78] sm:$0xff] %v4558_v23  }
 0x29e   : > { %v3518_v32 = vmul.f32 0.01, %v4736_v26  ;;  %v4738_v33 = vadd.f32 %v4737_v27, %v3298_v28  ;;  %vm3454_vm1 = vcmp.gt.f32.partialorder %v4736_v26, 0.0 }
 0x2a0   : > { %vm3455_vm2 = vcmp.gt.f32.partialorder %v4738_v33, 0.0  ;;  %v3519_v34 = vmul.f32 0.01, %v4738_v33  ;;  %v3582_v36 = vsel %vm3454_vm1, %v4736_v26, %v3518_v32 }
 0x2a1   : > { %v2725_v35 = vpop.f32.mrb[68].mxu1  ;;  %v3303_v39 = vpop.f32.mrb[68].mxu0 }
 0x2a2   : > { %v3583_v37 = vsel %vm3455_vm2, %v4738_v33, %v3519_v34  ;;  %v4739_v38 = vadd.f32 %v5694_v29, %v2725_v35  ;;  %v2727_v40 = vpop.f32.mrb[69].mxu1  ;;  %v3305_v42 = vpop.f32.mrb[69].mxu0 }
 0x2a3   : > { %v4563_v41 = vpack.c.bf16 %v3583_v37, %v3582_v36  ;;  %v2728_v43 = vpop.f32.mrb[70].mxu1  ;;  %v3306_v46 = vpop.f32.mrb[70].mxu0 }
 0x2a4   : > { %v4740_v44 = vadd.f32 %v4739_v38, %v3303_v39  ;;  %v4741_v45 = vadd.f32 %v5694_v29, %v2728_v43  ;;  %v2730_v47 = vpop.f32.mrb[71].mxu1  ;;  %v3308_v48 = vpop.f32.mrb[71].mxu0 }
 0x2a5   : > { %4655 = vst [vmem:[%s5712_s21 + $0x80] sm:$0xff] %v4563_v41  }
 0x2a6   : > { %v3520_v49 = vmul.f32 0.01, %v4740_v44  ;;  %v4742_v50 = vadd.f32 %v4741_v45, %v3306_v46  ;;  %vm3456_vm3 = vcmp.gt.f32.partialorder %v4740_v44, 0.0 }
 0x2a8   : > { %vm3457_vm4 = vcmp.gt.f32.partialorder %v4742_v50, 0.0  ;;  %v3521_v51 = vmul.f32 0.01, %v4742_v50  ;;  %v3584_v53 = vsel %vm3456_vm3, %v4740_v44, %v3520_v49 }
 0x2a9   : > { %v2733_v52 = vpop.f32.mrb[72].mxu1  ;;  %v3311_v1 = vpop.f32.mrb[72].mxu0 }
 0x2aa   : > { %v3585_v54 = vsel %vm3457_vm4, %v4742_v50, %v3521_v51  ;;  %v4743_v55 = vadd.f32 %v5694_v29, %v2733_v52  ;;  %v2735_v56 = vpop.f32.mrb[73].mxu1  ;;  %v3313_v58 = vpop.f32.mrb[73].mxu0 }
 0x2ab   : > { %v4568_v57 = vpack.c.bf16 %v3585_v54, %v3584_v53  ;;  %v2736_v59 = vpop.f32.mrb[74].mxu1  ;;  %v3314_v62 = vpop.f32.mrb[74].mxu0 }
 0x2ac   : > { %v4744_v60 = vadd.f32 %v4743_v55, %v3311_v1  ;;  %v4745_v61 = vadd.f32 %v5694_v29, %v2736_v59  ;;  %v2738_v63 = vpop.f32.mrb[75].mxu1  ;;  %v3316_v0 = vpop.f32.mrb[75].mxu0 }
 0x2ad   : > { %4656 = vst [vmem:[%s5712_s21 + $0x88] sm:$0xff] %v4568_v57  }
 0x2ae   : > { %v3522_v2 = vmul.f32 0.01, %v4744_v60  ;;  %v4746_v3 = vadd.f32 %v4745_v61, %v3314_v62  ;;  %vm3458_vm5 = vcmp.gt.f32.partialorder %v4744_v60, 0.0 }
 0x2b0   : > { %vm3459_vm6 = vcmp.gt.f32.partialorder %v4746_v3, 0.0  ;;  %v3523_v4 = vmul.f32 0.01, %v4746_v3  ;;  %v3586_v6 = vsel %vm3458_vm5, %v4744_v60, %v3522_v2 }
 0x2b1   : > { %v2741_v5 = vpop.f32.mrb[76].mxu1  ;;  %v3319_v9 = vpop.f32.mrb[76].mxu0 }
 0x2b2   : > { %v3587_v7 = vsel %vm3459_vm6, %v4746_v3, %v3523_v4  ;;  %v4747_v8 = vadd.f32 %v5694_v29, %v2741_v5  ;;  %v2743_v10 = vpop.f32.mrb[77].mxu1  ;;  %v3321_v12 = vpop.f32.mrb[77].mxu0 }
 0x2b3   : > { %v4573_v11 = vpack.c.bf16 %v3587_v7, %v3586_v6  ;;  %v2744_v13 = vpop.f32.mrb[78].mxu1  ;;  %v3322_v16 = vpop.f32.mrb[78].mxu0 }
 0x2b4   : > { %v4748_v14 = vadd.f32 %v4747_v8, %v3319_v9  ;;  %v4749_v15 = vadd.f32 %v5694_v29, %v2744_v13  ;;  %v2746_v17 = vpop.f32.mrb[79].mxu1  ;;  %v3324_v18 = vpop.f32.mrb[79].mxu0  ;;  %v5794_v13 = vld [vmem:[%s5829_s2] ss:$0 sm:$0xff] }
 0x2b5   : > { %4657 = vst [vmem:[%s5712_s21 + $0x90] sm:$0xff] %v4573_v11  }
 0x2b6   : > { %v3524_v19 = vmul.f32 0.01, %v4748_v14  ;;  %v4750_v20 = vadd.f32 %v4749_v15, %v3322_v16  ;;  %vm3460_vm7 = vcmp.gt.f32.partialorder %v4748_v14, 0.0 }
 0x2b8   : > { %vm3461_vm8 = vcmp.gt.f32.partialorder %v4750_v20, 0.0  ;;  %v3525_v21 = vmul.f32 0.01, %v4750_v20  ;;  %v3588_v23 = vsel %vm3460_vm7, %v4748_v14, %v3524_v19 }
 0x2b9   : > { %v2749_v22 = vpop.f32.mrb[80].mxu1  ;;  %v3327_v26 = vpop.f32.mrb[80].mxu0 }
 0x2ba   : > { %v3589_v24 = vsel %vm3461_vm8, %v4750_v20, %v3525_v21  ;;  %v4751_v25 = vadd.f32 %v5694_v29, %v2749_v22  ;;  %v2751_v27 = vpop.f32.mrb[81].mxu1  ;;  %v3329_v30 = vpop.f32.mrb[81].mxu0 }
 0x2bb   : > { %v4578_v28 = vpack.c.bf16 %v3589_v24, %v3588_v23  ;;  %v2752_v31 = vpop.f32.mrb[82].mxu1  ;;  %v3330_v34 = vpop.f32.mrb[82].mxu0 }
 0x2bc   : > { %v4752_v32 = vadd.f32 %v4751_v25, %v3327_v26  ;;  %v4753_v33 = vadd.f32 %v5694_v29, %v2752_v31  ;;  %v2754_v35 = vpop.f32.mrb[83].mxu1  ;;  %v3332_v36 = vpop.f32.mrb[83].mxu0 }
 0x2bd   : > { %4658 = vst [vmem:[%s5712_s21 + $0x98] sm:$0xff] %v4578_v28  }
 0x2be   : > { %v3526_v37 = vmul.f32 0.01, %v4752_v32  ;;  %v4754_v38 = vadd.f32 %v4753_v33, %v3330_v34  ;;  %vm3462_vm9 = vcmp.gt.f32.partialorder %v4752_v32, 0.0 }
 0x2c0   : > { %vm3463_vm10 = vcmp.gt.f32.partialorder %v4754_v38, 0.0  ;;  %v3527_v39 = vmul.f32 0.01, %v4754_v38  ;;  %v3590_v41 = vsel %vm3462_vm9, %v4752_v32, %v3526_v37 }
 0x2c1   : > { %v2757_v40 = vpop.f32.mrb[84].mxu1  ;;  %v3335_v44 = vpop.f32.mrb[84].mxu0 }
 0x2c2   : > { %v3591_v42 = vsel %vm3463_vm10, %v4754_v38, %v3527_v39  ;;  %v4755_v43 = vadd.f32 %v5694_v29, %v2757_v40  ;;  %v2759_v45 = vpop.f32.mrb[85].mxu1  ;;  %v3337_v47 = vpop.f32.mrb[85].mxu0 }
 0x2c3   : > { %v4583_v46 = vpack.c.bf16 %v3591_v42, %v3590_v41  ;;  %v2760_v48 = vpop.f32.mrb[86].mxu1  ;;  %v3338_v51 = vpop.f32.mrb[86].mxu0 }
 0x2c4   : > { %v4756_v49 = vadd.f32 %v4755_v43, %v3335_v44  ;;  %v4757_v50 = vadd.f32 %v5694_v29, %v2760_v48  ;;  %v2762_v52 = vpop.f32.mrb[87].mxu1  ;;  %v3340_v53 = vpop.f32.mrb[87].mxu0 }
 0x2c5   : > { %4659 = vst [vmem:[%s5712_s21 + $0xa0] sm:$0xff] %v4583_v46  }
 0x2c6   : > { %v3528_v54 = vmul.f32 0.01, %v4756_v49  ;;  %v4758_v55 = vadd.f32 %v4757_v50, %v3338_v51  ;;  %vm3464_vm11 = vcmp.gt.f32.partialorder %v4756_v49, 0.0 }
 0x2c8   : > { %vm3465_vm12 = vcmp.gt.f32.partialorder %v4758_v55, 0.0  ;;  %v3529_v1 = vmul.f32 0.01, %v4758_v55  ;;  %v3592_v57 = vsel %vm3464_vm11, %v4756_v49, %v3528_v54 }
 0x2c9   : > { %v2765_v56 = vpop.f32.mrb[88].mxu1  ;;  %v3343_v60 = vpop.f32.mrb[88].mxu0 }
 0x2ca   : > { %v3593_v58 = vsel %vm3465_vm12, %v4758_v55, %v3529_v1  ;;  %v4759_v59 = vadd.f32 %v5694_v29, %v2765_v56  ;;  %v2767_v61 = vpop.f32.mrb[89].mxu1  ;;  %v3345_v63 = vpop.f32.mrb[89].mxu0 }
 0x2cb   : > { %v4588_v62 = vpack.c.bf16 %v3593_v58, %v3592_v57  ;;  %v2768_v0 = vpop.f32.mrb[90].mxu1  ;;  %v3346_v4 = vpop.f32.mrb[90].mxu0 }
 0x2cc   : > { %v4760_v2 = vadd.f32 %v4759_v59, %v3343_v60  ;;  %v4761_v3 = vadd.f32 %v5694_v29, %v2768_v0  ;;  %v2770_v5 = vpop.f32.mrb[91].mxu1  ;;  %v3348_v6 = vpop.f32.mrb[91].mxu0 }
 0x2cd   : > { %4660 = vst [vmem:[%s5712_s21 + $0xa8] sm:$0xff] %v4588_v62  }
 0x2ce   : > { %v3530_v7 = vmul.f32 0.01, %v4760_v2  ;;  %v4762_v8 = vadd.f32 %v4761_v3, %v3346_v4  ;;  %vm3466_vm13 = vcmp.gt.f32.partialorder %v4760_v2, 0.0 }
 0x2d0   : > { %vm3467_vm14 = vcmp.gt.f32.partialorder %v4762_v8, 0.0  ;;  %v3531_v9 = vmul.f32 0.01, %v4762_v8  ;;  %v3594_v11 = vsel %vm3466_vm13, %v4760_v2, %v3530_v7 }
 0x2d1   : > { %v2773_v10 = vpop.f32.mrb[92].mxu1  ;;  %v3351_v14 = vpop.f32.mrb[92].mxu0 }
 0x2d2   : > { %v3595_v12 = vsel %vm3467_vm14, %v4762_v8, %v3531_v9  ;;  %v4763_v29 = vadd.f32 %v5794_v13, %v2773_v10  ;;  %v2775_v15 = vpop.f32.mrb[93].mxu1  ;;  %v3353_v17 = vpop.f32.mrb[93].mxu0 }
 0x2d3   : > { %v4593_v16 = vpack.c.bf16 %v3595_v12, %v3594_v11  ;;  %v2776_v18 = vpop.f32.mrb[94].mxu1  ;;  %v3354_v21 = vpop.f32.mrb[94].mxu0 }
 0x2d4   : > { %v4764_v19 = vadd.f32 %v4763_v29, %v3351_v14  ;;  %v4765_v20 = vadd.f32 %v5794_v13, %v2776_v18  ;;  %v2778_v22 = vpop.f32.mrb[95].mxu1  ;;  %v3356_v23 = vpop.f32.mrb[95].mxu0 }
 0x2d5   : > { %4661 = vst [vmem:[%s5712_s21 + $0xb0] sm:$0xff] %v4593_v16  }
 0x2d6   : > { %v3532_v24 = vmul.f32 0.01, %v4764_v19  ;;  %v4766_v25 = vadd.f32 %v4765_v20, %v3354_v21  ;;  %vm3468_vm15 = vcmp.gt.f32.partialorder %v4764_v19, 0.0 }
 0x2d8   : > { %vm3469_vm0 = vcmp.gt.f32.partialorder %v4766_v25, 0.0  ;;  %v3533_v26 = vmul.f32 0.01, %v4766_v25  ;;  %v3596_v28 = vsel %vm3468_vm15, %v4764_v19, %v3532_v24 }
 0x2d9   : > { %v2781_v27 = vpop.f32.mrb[96].mxu1  ;;  %v3359_v32 = vpop.f32.mrb[96].mxu0 }
 0x2da   : > { %v3597_v30 = vsel %vm3469_vm0, %v4766_v25, %v3533_v26  ;;  %v4767_v31 = vadd.f32 %v5794_v13, %v2781_v27  ;;  %v2783_v33 = vpop.f32.mrb[97].mxu1  ;;  %v3361_v35 = vpop.f32.mrb[97].mxu0 }
 0x2db   : > { %v4598_v34 = vpack.c.bf16 %v3597_v30, %v3596_v28  ;;  %v2784_v36 = vpop.f32.mrb[98].mxu1  ;;  %v3362_v39 = vpop.f32.mrb[98].mxu0 }
 0x2dc   : > { %v4768_v37 = vadd.f32 %v4767_v31, %v3359_v32  ;;  %v4769_v38 = vadd.f32 %v5794_v13, %v2784_v36  ;;  %v2786_v40 = vpop.f32.mrb[99].mxu1  ;;  %v3364_v41 = vpop.f32.mrb[99].mxu0 }
 0x2dd   : > { %4662 = vst [vmem:[%s5712_s21 + $0xb8] sm:$0xff] %v4598_v34  }
 0x2de   : > { %v3534_v42 = vmul.f32 0.01, %v4768_v37  ;;  %v4770_v43 = vadd.f32 %v4769_v38, %v3362_v39  ;;  %vm3470_vm1 = vcmp.gt.f32.partialorder %v4768_v37, 0.0 }
 0x2e0   : > { %vm3471_vm2 = vcmp.gt.f32.partialorder %v4770_v43, 0.0  ;;  %v3535_v44 = vmul.f32 0.01, %v4770_v43  ;;  %v3598_v46 = vsel %vm3470_vm1, %v4768_v37, %v3534_v42 }
 0x2e1   : > { %v2789_v45 = vpop.f32.mrb[100].mxu1  ;;  %v3367_v49 = vpop.f32.mrb[100].mxu0 }
 0x2e2   : > { %v3599_v47 = vsel %vm3471_vm2, %v4770_v43, %v3535_v44  ;;  %v4771_v48 = vadd.f32 %v5794_v13, %v2789_v45  ;;  %v2791_v50 = vpop.f32.mrb[101].mxu1  ;;  %v3369_v52 = vpop.f32.mrb[101].mxu0 }
 0x2e3   : > { %v4603_v51 = vpack.c.bf16 %v3599_v47, %v3598_v46  ;;  %v2792_v53 = vpop.f32.mrb[102].mxu1  ;;  %v3370_v1 = vpop.f32.mrb[102].mxu0 }
 0x2e4   : > { %v4772_v54 = vadd.f32 %v4771_v48, %v3367_v49  ;;  %v4773_v55 = vadd.f32 %v5794_v13, %v2792_v53  ;;  %v2794_v56 = vpop.f32.mrb[103].mxu1  ;;  %v3372_v57 = vpop.f32.mrb[103].mxu0 }
 0x2e5   : > { %4663 = vst [vmem:[%s5712_s21 + $0xc0] sm:$0xff] %v4603_v51  }
 0x2e6   : > { %v3536_v58 = vmul.f32 0.01, %v4772_v54  ;;  %v4774_v59 = vadd.f32 %v4773_v55, %v3370_v1  ;;  %vm3472_vm3 = vcmp.gt.f32.partialorder %v4772_v54, 0.0 }
 0x2e8   : > { %vm3473_vm4 = vcmp.gt.f32.partialorder %v4774_v59, 0.0  ;;  %v3537_v60 = vmul.f32 0.01, %v4774_v59  ;;  %v3600_v62 = vsel %vm3472_vm3, %v4772_v54, %v3536_v58 }
 0x2e9   : > { %v2797_v61 = vpop.f32.mrb[104].mxu1  ;;  %v3375_v2 = vpop.f32.mrb[104].mxu0 }
 0x2ea   : > { %v3601_v63 = vsel %vm3473_vm4, %v4774_v59, %v3537_v60  ;;  %v4775_v0 = vadd.f32 %v5794_v13, %v2797_v61  ;;  %v2799_v3 = vpop.f32.mrb[105].mxu1  ;;  %v3377_v5 = vpop.f32.mrb[105].mxu0 }
 0x2eb   : > { %v4608_v4 = vpack.c.bf16 %v3601_v63, %v3600_v62  ;;  %v2800_v6 = vpop.f32.mrb[106].mxu1  ;;  %v3378_v9 = vpop.f32.mrb[106].mxu0 }
 0x2ec   : > { %v4776_v7 = vadd.f32 %v4775_v0, %v3375_v2  ;;  %v4777_v8 = vadd.f32 %v5794_v13, %v2800_v6  ;;  %v2802_v10 = vpop.f32.mrb[107].mxu1  ;;  %v3380_v11 = vpop.f32.mrb[107].mxu0 }
 0x2ed   : > { %4664 = vst [vmem:[%s5712_s21 + $0xc8] sm:$0xff] %v4608_v4  }
 0x2ee   : > { %v3538_v12 = vmul.f32 0.01, %v4776_v7  ;;  %v4778_v29 = vadd.f32 %v4777_v8, %v3378_v9  ;;  %vm3474_vm5 = vcmp.gt.f32.partialorder %v4776_v7, 0.0 }
 0x2f0   : > { %vm3475_vm6 = vcmp.gt.f32.partialorder %v4778_v29, 0.0  ;;  %v3539_v14 = vmul.f32 0.01, %v4778_v29  ;;  %v3602_v16 = vsel %vm3474_vm5, %v4776_v7, %v3538_v12 }
 0x2f1   : > { %v2805_v15 = vpop.f32.mrb[108].mxu1  ;;  %v3383_v19 = vpop.f32.mrb[108].mxu0 }
 0x2f2   : > { %v3603_v17 = vsel %vm3475_vm6, %v4778_v29, %v3539_v14  ;;  %v4779_v18 = vadd.f32 %v5794_v13, %v2805_v15  ;;  %v2807_v20 = vpop.f32.mrb[109].mxu1  ;;  %v3385_v22 = vpop.f32.mrb[109].mxu0 }
 0x2f3   : > { %v4613_v21 = vpack.c.bf16 %v3603_v17, %v3602_v16  ;;  %v2808_v23 = vpop.f32.mrb[110].mxu1  ;;  %v3386_v26 = vpop.f32.mrb[110].mxu0 }
 0x2f4   : > { %v4780_v24 = vadd.f32 %v4779_v18, %v3383_v19  ;;  %v4781_v25 = vadd.f32 %v5794_v13, %v2808_v23  ;;  %v2810_v27 = vpop.f32.mrb[111].mxu1  ;;  %v3388_v28 = vpop.f32.mrb[111].mxu0 }
 0x2f5   : > { %4665 = vst [vmem:[%s5712_s21 + $0xd0] sm:$0xff] %v4613_v21  }
 0x2f6   : > { %v3540_v30 = vmul.f32 0.01, %v4780_v24  ;;  %v4782_v31 = vadd.f32 %v4781_v25, %v3386_v26  ;;  %vm3476_vm7 = vcmp.gt.f32.partialorder %v4780_v24, 0.0 }
 0x2f8   : > { %vm3477_vm8 = vcmp.gt.f32.partialorder %v4782_v31, 0.0  ;;  %v3541_v32 = vmul.f32 0.01, %v4782_v31  ;;  %v3604_v34 = vsel %vm3476_vm7, %v4780_v24, %v3540_v30 }
 0x2f9   : > { %v2813_v33 = vpop.f32.mrb[112].mxu1  ;;  %v3391_v37 = vpop.f32.mrb[112].mxu0 }
 0x2fa   : > { %v3605_v35 = vsel %vm3477_vm8, %v4782_v31, %v3541_v32  ;;  %v4783_v36 = vadd.f32 %v5794_v13, %v2813_v33  ;;  %v2815_v38 = vpop.f32.mrb[113].mxu1  ;;  %v3393_v40 = vpop.f32.mrb[113].mxu0 }
 0x2fb   : > { %v4618_v39 = vpack.c.bf16 %v3605_v35, %v3604_v34  ;;  %v2816_v41 = vpop.f32.mrb[114].mxu1  ;;  %v3394_v44 = vpop.f32.mrb[114].mxu0 }
 0x2fc   : > { %v4784_v42 = vadd.f32 %v4783_v36, %v3391_v37  ;;  %v4785_v43 = vadd.f32 %v5794_v13, %v2816_v41  ;;  %v2818_v45 = vpop.f32.mrb[115].mxu1  ;;  %v3396_v46 = vpop.f32.mrb[115].mxu0 }
 0x2fd   : > { %4666 = vst [vmem:[%s5712_s21 + $0xd8] sm:$0xff] %v4618_v39  }
 0x2fe   : > { %v3542_v47 = vmul.f32 0.01, %v4784_v42  ;;  %v4786_v48 = vadd.f32 %v4785_v43, %v3394_v44  ;;  %vm3478_vm9 = vcmp.gt.f32.partialorder %v4784_v42, 0.0 }
 0x300   : > { %vm3479_vm10 = vcmp.gt.f32.partialorder %v4786_v48, 0.0  ;;  %v3543_v49 = vmul.f32 0.01, %v4786_v48  ;;  %v3606_v51 = vsel %vm3478_vm9, %v4784_v42, %v3542_v47 }
 0x301   : > { %v2821_v50 = vpop.f32.mrb[116].mxu1  ;;  %v3399_v54 = vpop.f32.mrb[116].mxu0 }
 0x302   : > { %v3607_v52 = vsel %vm3479_vm10, %v4786_v48, %v3543_v49  ;;  %v4787_v53 = vadd.f32 %v5794_v13, %v2821_v50  ;;  %v2823_v55 = vpop.f32.mrb[117].mxu1  ;;  %v3401_v56 = vpop.f32.mrb[117].mxu0 }
 0x303   : > { %v4623_v1 = vpack.c.bf16 %v3607_v52, %v3606_v51  ;;  %v2824_v57 = vpop.f32.mrb[118].mxu1  ;;  %v3402_v60 = vpop.f32.mrb[118].mxu0 }
 0x304   : > { %v4788_v58 = vadd.f32 %v4787_v53, %v3399_v54  ;;  %v4789_v59 = vadd.f32 %v5794_v13, %v2824_v57  ;;  %v2826_v61 = vpop.f32.mrb[119].mxu1  ;;  %v3404_v62 = vpop.f32.mrb[119].mxu0 }
 0x305   : > { %4667 = vst [vmem:[%s5712_s21 + $0xe0] sm:$0xff] %v4623_v1  }
 0x306   : > { %v3544_v63 = vmul.f32 0.01, %v4788_v58  ;;  %v4790_v0 = vadd.f32 %v4789_v59, %v3402_v60  ;;  %vm3480_vm11 = vcmp.gt.f32.partialorder %v4788_v58, 0.0 }
 0x308   : > { %vm3481_vm12 = vcmp.gt.f32.partialorder %v4790_v0, 0.0  ;;  %v3545_v2 = vmul.f32 0.01, %v4790_v0  ;;  %v3608_v4 = vsel %vm3480_vm11, %v4788_v58, %v3544_v63 }
 0x309   : > { %v2829_v3 = vpop.f32.mrb[120].mxu1  ;;  %v3407_v7 = vpop.f32.mrb[120].mxu0 }
 0x30a   : > { %v3609_v5 = vsel %vm3481_vm12, %v4790_v0, %v3545_v2  ;;  %v4791_v6 = vadd.f32 %v5794_v13, %v2829_v3  ;;  %v2831_v8 = vpop.f32.mrb[121].mxu1  ;;  %v3409_v10 = vpop.f32.mrb[121].mxu0 }
 0x30b   : > { %v4628_v9 = vpack.c.bf16 %v3609_v5, %v3608_v4  ;;  %v2832_v11 = vpop.f32.mrb[122].mxu1  ;;  %v3410_v14 = vpop.f32.mrb[122].mxu0 }
 0x30c   : > { %v4792_v12 = vadd.f32 %v4791_v6, %v3407_v7  ;;  %v4793_v29 = vadd.f32 %v5794_v13, %v2832_v11  ;;  %v2834_v15 = vpop.f32.mrb[123].mxu1  ;;  %v3412_v16 = vpop.f32.mrb[123].mxu0 }
 0x30d   : > { %4668 = vst [vmem:[%s5712_s21 + $0xe8] sm:$0xff] %v4628_v9  }
 0x30e   : > { %v3546_v17 = vmul.f32 0.01, %v4792_v12  ;;  %v4794_v18 = vadd.f32 %v4793_v29, %v3410_v14  ;;  %vm3482_vm13 = vcmp.gt.f32.partialorder %v4792_v12, 0.0 }
 0x310   : > { %vm3483_vm14 = vcmp.gt.f32.partialorder %v4794_v18, 0.0  ;;  %v3547_v19 = vmul.f32 0.01, %v4794_v18  ;;  %v3610_v21 = vsel %vm3482_vm13, %v4792_v12, %v3546_v17 }
 0x311   : > { %v2837_v20 = vpop.f32.mrb[124].mxu1  ;;  %v3415_v24 = vpop.f32.mrb[124].mxu0 }
 0x312   : > { %v3611_v22 = vsel %vm3483_vm14, %v4794_v18, %v3547_v19  ;;  %v4795_v23 = vadd.f32 %v5794_v13, %v2837_v20  ;;  %v2839_v25 = vpop.f32.mrb[125].mxu1  ;;  %v3417_v27 = vpop.f32.mrb[125].mxu0 }
 0x313   : > { %v4633_v26 = vpack.c.bf16 %v3611_v22, %v3610_v21  ;;  %v2840_v28 = vpop.f32.mrb[126].mxu1  ;;  %v3418_v32 = vpop.f32.mrb[126].mxu0 }
 0x314   : > { %v4796_v30 = vadd.f32 %v4795_v23, %v3415_v24  ;;  %v4797_v31 = vadd.f32 %v5794_v13, %v2840_v28  ;;  %v2842_v33 = vpop.f32.mrb[127].mxu1  ;;  %v3420_v34 = vpop.f32.mrb[127].mxu0 }
 0x315   : > { %4669 = vst [vmem:[%s5712_s21 + $0xf0] sm:$0xff] %v4633_v26  }
 0x316   : > { %v3548_v35 = vmul.f32 0.01, %v4796_v30  ;;  %v4798_v36 = vadd.f32 %v4797_v31, %v3418_v32  ;;  %vm3484_vm15 = vcmp.gt.f32.partialorder %v4796_v30, 0.0 }
 0x318   : > { %vm3485_vm0 = vcmp.gt.f32.partialorder %v4798_v36, 0.0  ;;  %v3549_v37 = vmul.f32 0.01, %v4798_v36  ;;  %v3612_v38 = vsel %vm3484_vm15, %v4796_v30, %v3548_v35 }
 0x31a   : > { %v3613_v39 = vsel %vm3485_vm0, %v4798_v36, %v3549_v37 }
 0x31b   : > { %v4638_v40 = vpack.c.bf16 %v3613_v39, %v3612_v38 }
 0x31d   : > { %4670 = vst [vmem:[%s5712_s21 + $0xf8] sm:$0xff] %v4638_v40  }
 0x31e PF: > { %s13_s12 = sadd.s32 1, %s5131_s12  }
 0x31f   : > { %p10_p4 = scmp.ge.s32.totalorder %s13_s12, 5  }
 0x321   :  { %12 = sbr.rel (!%p10_p4) target bundleno = 1 (0x1), region = 62 }

// kernel: net_forward.6
= control target key start
LH: loop header
LB: loop body
LE: loop exit
PB: predicated region body
PF: predicated region fallthrough
CT: control target
= control target key end

     0   :  { %s9800_s12 = smov 0   ;;  %s11226_s0 = inlined_call_operand.vmem [shape: bf16[896,1920], index: 0, kind: input, shape index: {}]   ;;  %s11227_s1 = inlined_call_operand.vmem [shape: bf16[1920,256], index: 1, kind: input, shape index: {}]   ;;  %s11228_s2 = inlined_call_operand.vmem [shape: f32[1,256], index: 2, kind: input, shape index: {}]   ;;  %s11229_s3 = inlined_call_operand.vmem [shape: f32[896,256], index: 3, kind: output, shape index: {}]  }
   0x1 LB: > { %s7218_s13 = sadd.s32 4294967295, %s9777_s12   ;;  %p7222_p0 = scmp.ge.s32.totalorder %s9777_s12, 1  ;;  %s9777_s12 = sphi %s9800_s12, %s13_s12  }
   0x2   : > { %p139_p1 = scmp.lt.s32.totalorder %s9777_s12, 3 }
   0x4   : > { %p140_p2 = pnand %p7222_p0, %p139_p1 }
   0x5   : > { %v8795_v0 = vld [vmem:[%s11227_s1 + $0x4] ss:$8 sps:$4 sm:$0xff] (!%p140_p2)   ;;  %v8799_v2 = vld [vmem:[%s11227_s1] ss:$8 sps:$4 sm:$0xff] (!%p140_p2)   ;;  %v8801_v4 = vld [vmem:[%s11227_s1 + $0x14] ss:$8 sps:$4 sm:$0xff] (!%p140_p2)  }
   0x6   : > { %143 = sbr.rel (%p140_p2) target bundleno = 1181 (0x49d), region = 32  ;;  %v8797_v1 = vld [vmem:[%s11227_s1 + $0x404] ss:$8 sps:$4 sm:$0xff] (!%p140_p2)   ;;  %4208 = vmatprep.subr.bf16.mxu1 (!%p140_p2), %v8795_v0  ;;  %v8800_v3 = vld [vmem:[%s11227_s1 + $0x400] ss:$8 sps:$4 sm:$0xff] (!%p140_p2)  }
   0x7   : > { %5460 = vmatprep.subr.bf16.mxu0 (!%p140_p2), %v8797_v1  ;;  %4209 = vmatpush1.bf16.msra.mxu1 (!%p140_p2), %v8799_v2  ;;  %v8803_v5 = vld [vmem:[%s11227_s1 + $0x414] ss:$8 sps:$4 sm:$0xff] (!%p140_p2)   ;;  %v8805_v6 = vld [vmem:[%s11227_s1 + $0x10] ss:$8 sps:$4 sm:$0xff] (!%p140_p2)   ;;  %v8807_v8 = vld [vmem:[%s11227_s1 + $0x24] ss:$8 sps:$4 sm:$0xff] (!%p140_p2)  }
   0x8   : > { %5461 = vmatpush1.bf16.msra.mxu0 (!%p140_p2), %v8800_v3  ;;  %4210 = vmatprep.subr.bf16.mxu1 (!%p140_p2), %v8801_v4  ;;  %v8806_v7 = vld [vmem:[%s11227_s1 + $0x410] ss:$8 sps:$4 sm:$0xff] (!%p140_p2)   ;;  %v8809_v9 = vld [vmem:[%s11227_s1 + $0x424] ss:$8 sps:$4 sm:$0xff] (!%p140_p2)   ;;  %v8811_v10 = vld [vmem:[%s11227_s1 + $0x20] ss:$8 sps:$4 sm:$0xff] (!%p140_p2)  }
   0x9   : > { %5462 = vmatprep.subr.bf16.mxu0 (!%p140_p2), %v8803_v5  ;;  %v8812_v11 = vld [vmem:[%s11227_s1 + $0x420] ss:$8 sps:$4 sm:$0xff] (!%p140_p2)   ;;  %v8813_v12 = vld [vmem:[%s11227_s1 + $0x34] ss:$8 sps:$4 sm:$0xff] (!%p140_p2)   ;;  %v8817_v14 = vld [vmem:[%s11227_s1 + $0x30] ss:$8 sps:$4 sm:$0xff] (!%p140_p2)  }
   0xa   : > { %v8815_v13 = vld [vmem:[%s11227_s1 + $0x434] ss:$8 sps:$4 sm:$0xff] (!%p140_p2)   ;;  %v8818_v15 = vld [vmem:[%s11227_s1 + $0x430] ss:$8 sps:$4 sm:$0xff] (!%p140_p2)   ;;  %v8819_v16 = vld [vmem:[%s11227_s1 + $0x44] ss:$8 sps:$4 sm:$0xff] (!%p140_p2)  }
   0xb   : > { %4211 = vmatpush1.bf16.msra.mxu1 (!%p140_p2), %v8805_v6  ;;  %v8821_v17 = vld [vmem:[%s11227_s1 + $0x444] ss:$8 sps:$4 sm:$0xff] (!%p140_p2)   ;;  %v8823_v18 = vld [vmem:[%s11227_s1 + $0x40] ss:$8 sps:$4 sm:$0xff] (!%p140_p2)   ;;  %v8825_v20 = vld [vmem:[%s11227_s1 + $0x54] ss:$8 sps:$4 sm:$0xff] (!%p140_p2)  }
   0xc   : > { %5463 = vmatpush1.bf16.msra.mxu0 (!%p140_p2), %v8806_v7  ;;  %4212 = vmatprep.subr.bf16.mxu1 (!%p140_p2), %v8807_v8  ;;  %v8824_v19 = vld [vmem:[%s11227_s1 + $0x440] ss:$8 sps:$4 sm:$0xff] (!%p140_p2)   ;;  %v8827_v21 = vld [vmem:[%s11227_s1 + $0x454] ss:$8 sps:$4 sm:$0xff] (!%p140_p2)   ;;  %v8829_v22 = vld [vmem:[%s11227_s1 + $0x50] ss:$8 sps:$4 sm:$0xff] (!%p140_p2)  }
   0xd   : > { %5464 = vmatprep.subr.bf16.mxu0 %v8809_v9  ;;  %v8830_v23 = vld [vmem:[%s11227_s1 + $0x450] ss:$8 sps:$4 sm:$0xff]   ;;  %v8831_v24 = vld [vmem:[%s11227_s1 + $0x64] ss:$8 sps:$4 sm:$0xff]   ;;  %v8835_v26 = vld [vmem:[%s11227_s1 + $0x60] ss:$8 sps:$4 sm:$0xff]  }
   0xe   : > { %v8833_v25 = vld [vmem:[%s11227_s1 + $0x464] ss:$8 sps:$4 sm:$0xff]   ;;  %v8836_v27 = vld [vmem:[%s11227_s1 + $0x460] ss:$8 sps:$4 sm:$0xff]   ;;  %v8837_v28 = vld [vmem:[%s11227_s1 + $0x74] ss:$8 sps:$4 sm:$0xff]  }
   0xf   : > { %4213 = vmatpush1.bf16.msra.mxu1 %v8811_v10  ;;  %s165_s22 = smul.u32 56, %s7218_s13  ;;  %v8839_v29 = vld [vmem:[%s11227_s1 + $0x474] ss:$8 sps:$4 sm:$0xff]   ;;  %v8841_v30 = vld [vmem:[%s11227_s1 + $0x70] ss:$8 sps:$4 sm:$0xff]  }
  0x10   : > { %5465 = vmatpush1.bf16.msra.mxu0 %v8812_v11  ;;  %4214 = vmatprep.subr.bf16.mxu1 %v8813_v12  ;;  %v8842_v31 = vld [vmem:[%s11227_s1 + $0x470] ss:$8 sps:$4 sm:$0xff]   ;;  %v8843_v32 = vld [vmem:[%s11227_s1 + $0x84] ss:$8 sps:$4 sm:$0xff]   ;;  %v8847_v34 = vld [vmem:[%s11227_s1 + $0x80] ss:$8 sps:$4 sm:$0xff]  }
  0x11   : > { %5466 = vmatprep.subr.bf16.mxu0 %v8815_v13  ;;  %p166_p3 = scmp.lt.s32.totalorder %s165_s22, 111  ;;  %v8845_v33 = vld [vmem:[%s11227_s1 + $0x484] ss:$8 sps:$4 sm:$0xff]   ;;  %v8848_v35 = vld [vmem:[%s11227_s1 + $0x480] ss:$8 sps:$4 sm:$0xff]  }
  0x12   : > { %v8849_v36 = vld [vmem:[%s11227_s1 + $0x94] ss:$8 sps:$4 sm:$0xff]   ;;  %v8853_v38 = vld [vmem:[%s11227_s1 + $0x90] ss:$8 sps:$4 sm:$0xff]   ;;  %v8855_v40 = vld [vmem:[%s11227_s1 + $0xa4] ss:$8 sps:$4 sm:$0xff]  }
  0x13   : > { %4215 = vmatpush1.bf16.msra.mxu1 %v8817_v14  ;;  %s11231_s22 = smov (!%p166_p3, %s165_s22), 111  ;;  %v8851_v37 = vld [vmem:[%s11227_s1 + $0x494] ss:$8 sps:$4 sm:$0xff]   ;;  %v8854_v39 = vld [vmem:[%s11227_s1 + $0x490] ss:$8 sps:$4 sm:$0xff]  }
  0x14   : > { %5467 = vmatpush1.bf16.msra.mxu0 %v8818_v15  ;;  %4216 = vmatprep.subr.bf16.mxu1 %v8819_v16  ;;  %s8785_s21 = smul.u32 60, %s11231_s22  ;;  %v8857_v41 = vld [vmem:[%s11227_s1 + $0x4a4] ss:$8 sps:$4 sm:$0xff]   ;;  %v8859_v42 = vld [vmem:[%s11227_s1 + $0xa0] ss:$8 sps:$4 sm:$0xff]   ;;  %s7888_s16 = sshll.u32 %s11231_s22, 4 }
  0x15   : > { %5468 = vmatprep.subr.bf16.mxu0 %v8821_v17  ;;  %v8860_v43 = vld [vmem:[%s11227_s1 + $0x4a0] ss:$8 sps:$4 sm:$0xff]   ;;  %v8861_v44 = vld [vmem:[%s11227_s1 + $0xb4] ss:$8 sps:$4 sm:$0xff]   ;;  %v8865_v46 = vld [vmem:[%s11227_s1 + $0xb0] ss:$8 sps:$4 sm:$0xff]   ;;  %s11001_s19 = scalar_lea.vmem %s11229_s3, %s7888_s16 }
  0x16   : > { %s9951_s5 = scalar_lea.vmem %s11226_s0, %s8785_s21  ;;  %v8863_v45 = vld [vmem:[%s11227_s1 + $0x4b4] ss:$8 sps:$4 sm:$0xff]   ;;  %v8866_v47 = vld [vmem:[%s11227_s1 + $0x4b0] ss:$8 sps:$4 sm:$0xff]   ;;  %v8867_v48 = vld [vmem:[%s11227_s1 + $0xc4] ss:$8 sps:$4 sm:$0xff]  }
  0x17   : > { %4217 = vmatpush1.bf16.msra.mxu1 %v8823_v18  ;;  %v8893_v49 = vld [vmem:[%s9951_s5 + $0x4] ss:$60 sps:$4 sm:$0xff]   ;;  %v8873_v54 = vld [vmem:[%s11227_s1 + $0xd4] ss:$8 sps:$4 sm:$0xff]   ;;  %v8877_v56 = vld [vmem:[%s11227_s1 + $0xd0] ss:$8 sps:$4 sm:$0xff]  }
  0x18   : > { %5469 = vmatpush1.bf16.msra.mxu0 %v8824_v19  ;;  %4218 = vmatprep.subr.bf16.mxu1 %v8825_v20  ;;  %v8869_v50 = vld [vmem:[%s11227_s1 + $0x4c4] ss:$8 sps:$4 sm:$0xff]   ;;  %v8871_v52 = vld [vmem:[%s11227_s1 + $0xc0] ss:$8 sps:$4 sm:$0xff]   ;;  %v8875_v55 = vld [vmem:[%s11227_s1 + $0x4d4] ss:$8 sps:$4 sm:$0xff]  }
  0x19   : > { %5470 = vmatprep.subr.bf16.mxu0 %v8827_v21  ;;  %v8896_v51 = vld [vmem:[%s9951_s5 + $0x24] ss:$60 sps:$4 sm:$0xff]   ;;  %4240 = vmatprep.mubr.bf16.mxu1 %v8893_v49  ;;  %v8878_v57 = vld [vmem:[%s11227_s1 + $0x4d0] ss:$8 sps:$4 sm:$0xff]   ;;  %v8885_v62 = vld [vmem:[%s11227_s1 + $0xf4] ss:$8 sps:$4 sm:$0xff]  }
  0x1a   : > { %v8872_v53 = vld [vmem:[%s11227_s1 + $0x4c0] ss:$8 sps:$4 sm:$0xff]   ;;  %5492 = vmatprep.mubr.bf16.mxu0 %v8896_v51  ;;  %v8879_v58 = vld [vmem:[%s11227_s1 + $0xe4] ss:$8 sps:$4 sm:$0xff]   ;;  %v8887_v63 = vld [vmem:[%s11227_s1 + $0x4f4] ss:$8 sps:$4 sm:$0xff]  }
  0x1b   : > { %4219 = vmatpush1.bf16.msra.mxu1 %v8829_v22  ;;  %v8881_v59 = vld [vmem:[%s11227_s1 + $0x4e4] ss:$8 sps:$4 sm:$0xff]   ;;  %v8883_v60 = vld [vmem:[%s11227_s1 + $0xe0] ss:$8 sps:$4 sm:$0xff]   ;;  %v8889_v0 = vld [vmem:[%s11227_s1 + $0xf0] ss:$8 sps:$4 sm:$0xff]  }
  0x1c   : > { %5471 = vmatpush1.bf16.msra.mxu0 %v8830_v23  ;;  %4220 = vmatprep.subr.bf16.mxu1 %v8831_v24  ;;  %v8884_v61 = vld [vmem:[%s11227_s1 + $0x4e0] ss:$8 sps:$4 sm:$0xff]   ;;  %v8890_v1 = vld [vmem:[%s11227_s1 + $0x4f0] ss:$8 sps:$4 sm:$0xff]   ;;  %v8899_v2 = vld [vmem:[%s11227_s1 + $0x104] ss:$8 sps:$4 sm:$0xff]  }
  0x1d   : > { %5472 = vmatprep.subr.bf16.mxu0 %v8833_v25  ;;  %v8902_v3 = vld [vmem:[%s11227_s1 + $0x504] ss:$8 sps:$4 sm:$0xff]   ;;  %v8891_v4 = vld [vmem:[%s9951_s5] ss:$60 sps:$4 sm:$0xff]   ;;  %v8909_v12 = vld [vmem:[%s11227_s1 + $0x110] ss:$8 sps:$4 sm:$0xff]  }
  0x1e   : > { %v8894_v5 = vld [vmem:[%s9951_s5 + $0x20] ss:$60 sps:$4 sm:$0xff]   ;;  %v8918_v13 = vld [vmem:[%s11227_s1 + $0x510] ss:$8 sps:$4 sm:$0xff]   ;;  %v8929_v14 = vld [vmem:[%s11227_s1 + $0x124] ss:$8 sps:$4 sm:$0xff]  }
  0x1f   : > { %4221 = vmatpush1.bf16.msra.mxu1 %v8835_v26  ;;  %v8897_v6 = vld [vmem:[%s11227_s1 + $0x100] ss:$8 sps:$4 sm:$0xff]   ;;  %v8903_v8 = vld [vmem:[%s9951_s5 + $0x7c] ss:$60 sps:$4 sm:$0xff]   ;;  %v8932_v16 = vld [vmem:[%s11227_s1 + $0x524] ss:$8 sps:$4 sm:$0xff]  }
  0x20   : > { %5473 = vmatpush1.bf16.msra.mxu0 %v8836_v27  ;;  %4222 = vmatprep.subr.bf16.mxu1 %v8837_v28  ;;  %v8900_v7 = vld [vmem:[%s11227_s1 + $0x500] ss:$8 sps:$4 sm:$0xff]   ;;  %v8905_v9 = vld [vmem:[%s9951_s5 + $0x9c] ss:$60 sps:$4 sm:$0xff]   ;;  %v8912_v18 = vld [vmem:[%s9951_s5 + $0xf4] ss:$60 sps:$4 sm:$0xff]  }
  0x21   : > { %5474 = vmatprep.subr.bf16.mxu0 %v8839_v29  ;;  %v8911_v10 = vld [vmem:[%s11227_s1 + $0x114] ss:$8 sps:$4 sm:$0xff]   ;;  %v8927_v20 = vld [vmem:[%s11227_s1 + $0x120] ss:$8 sps:$4 sm:$0xff]   ;;  %v8945_v24 = vld [vmem:[%s11227_s1 + $0x130] ss:$8 sps:$4 sm:$0xff]  }
  0x22   : > { %v8920_v11 = vld [vmem:[%s11227_s1 + $0x514] ss:$8 sps:$4 sm:$0xff]   ;;  %v8930_v21 = vld [vmem:[%s11227_s1 + $0x520] ss:$8 sps:$4 sm:$0xff]   ;;  %v8948_v25 = vld [vmem:[%s11227_s1 + $0x530] ss:$8 sps:$4 sm:$0xff]  }
  0x23   : > { %4223 = vmatpush1.bf16.msra.mxu1 %v8841_v30  ;;  %v8907_v15 = vld [vmem:[%s9951_s5 + $0x78] ss:$60 sps:$4 sm:$0xff]   ;;  %v8916_v26 = vld [vmem:[%s9951_s5 + $0xf0] ss:$60 sps:$4 sm:$0xff]  }
  0x24   : > { %5475 = vmatpush1.bf16.msra.mxu0 %v8842_v31  ;;  %4224 = vmatprep.subr.bf16.mxu1 %v8843_v32  ;;  %v8908_v17 = vld [vmem:[%s9951_s5 + $0x98] ss:$60 sps:$4 sm:$0xff]   ;;  %v8964_v27 = vld [vmem:[%s11227_s1 + $0x144] ss:$8 sps:$4 sm:$0xff]   ;;  %v8962_v32 = vld [vmem:[%s11227_s1 + $0x140] ss:$8 sps:$4 sm:$0xff]  }
  0x25   : > { %5476 = vmatprep.subr.bf16.mxu0 %v8845_v33  ;;  %v8914_v19 = vld [vmem:[%s9951_s5 + $0x114] ss:$60 sps:$4 sm:$0xff]   ;;  %v8968_v28 = vld [vmem:[%s11227_s1 + $0x544] ss:$8 sps:$4 sm:$0xff]   ;;  %v8966_v33 = vld [vmem:[%s11227_s1 + $0x540] ss:$8 sps:$4 sm:$0xff]  }
  0x26   : > { %v8947_v22 = vld [vmem:[%s11227_s1 + $0x134] ss:$8 sps:$4 sm:$0xff]   ;;  %v8917_v29 = vld [vmem:[%s9951_s5 + $0x110] ss:$60 sps:$4 sm:$0xff]  }
  0x27   : > { %4225 = vmatpush1.bf16.msra.mxu1 %v8847_v34  ;;  %v8950_v23 = vld [vmem:[%s11227_s1 + $0x534] ss:$8 sps:$4 sm:$0xff]   ;;  %v8921_v30 = vld [vmem:[%s9951_s5 + $0x16c] ss:$60 sps:$4 sm:$0xff]  }
  0x28   : > { %5477 = vmatpush1.bf16.msra.mxu0 %v8848_v35  ;;  %4226 = vmatprep.subr.bf16.mxu1 %v8849_v36  ;;  %v8923_v31 = vld [vmem:[%s9951_s5 + $0x18c] ss:$60 sps:$4 sm:$0xff]   ;;  %v8977_v34 = vld [vmem:[%s11227_s1 + $0x154] ss:$8 sps:$4 sm:$0xff]   ;;  %v8975_v35 = vld [vmem:[%s11227_s1 + $0x150] ss:$8 sps:$4 sm:$0xff]  }
  0x29   : > { %5478 = vmatprep.subr.bf16.mxu0 %v8851_v37  ;;  %v8984_v36 = vld [vmem:[%s11227_s1 + $0x550] ss:$8 sps:$4 sm:$0xff]   ;;  %v8986_v37 = vld [vmem:[%s11227_s1 + $0x554] ss:$8 sps:$4 sm:$0xff]  }
  0x2a   : > { %v8941_v49 = vld [vmem:[%s9951_s5 + $0x27c] ss:$60 sps:$4 sm:$0xff]  }
  0x2b   : > { %4227 = vmatpush1.bf16.msra.mxu1 %v8853_v38  ;;  %v8925_v38 = vld [vmem:[%s9951_s5 + $0x168] ss:$60 sps:$4 sm:$0xff]   ;;  %v9013_v51 = vld [vmem:[%s11227_s1 + $0x174] ss:$8 sps:$4 sm:$0xff]  }
  0x2c   : > { %5479 = vmatpush1.bf16.msra.mxu0 %v8854_v39  ;;  %4228 = vmatprep.subr.bf16.mxu1 %v8855_v40  ;;  %v8926_v39 = vld [vmem:[%s9951_s5 + $0x188] ss:$60 sps:$4 sm:$0xff]  }
  0x2d   : > { %5480 = vmatprep.subr.bf16.mxu0 %v8857_v41  ;;  %v8933_v40 = vld [vmem:[%s9951_s5 + $0x1e4] ss:$60 sps:$4 sm:$0xff]  }
  0x2e   : > { %v8935_v41 = vld [vmem:[%s9951_s5 + $0x204] ss:$60 sps:$4 sm:$0xff]  }
  0x2f   : > { %4229 = vmatpush1.bf16.msra.mxu1 %v8859_v42  ;;  %v8993_v42 = vld [vmem:[%s11227_s1 + $0x160] ss:$8 sps:$4 sm:$0xff]  }
  0x30   : > { %5481 = vmatpush1.bf16.msra.mxu0 %v8860_v43  ;;  %4230 = vmatprep.subr.bf16.mxu1 %v8861_v44  ;;  %v8995_v43 = vld [vmem:[%s11227_s1 + $0x164] ss:$8 sps:$4 sm:$0xff]   ;;  %v8996_v44 = vld [vmem:[%s11227_s1 + $0x560] ss:$8 sps:$4 sm:$0xff]  }
  0x31   : > { %5482 = vmatprep.subr.bf16.mxu0 %v8863_v45  ;;  %v8998_v45 = vld [vmem:[%s11227_s1 + $0x564] ss:$8 sps:$4 sm:$0xff]  }
  0x33   : > { %4231 = vmatpush1.bf16.msra.mxu1 %v8865_v46  ;;  %v8937_v46 = vld [vmem:[%s9951_s5 + $0x1e0] ss:$60 sps:$4 sm:$0xff]  }
  0x34   : > { %5483 = vmatpush1.bf16.msra.mxu0 %v8866_v47  ;;  %4232 = vmatprep.subr.bf16.mxu1 %v8867_v48  ;;  %v8938_v47 = vld [vmem:[%s9951_s5 + $0x200] ss:$60 sps:$4 sm:$0xff]  }
  0x35   : > { %5484 = vmatprep.subr.bf16.mxu0 %v8869_v50  ;;  %v8939_v48 = vld [vmem:[%s9951_s5 + $0x25c] ss:$60 sps:$4 sm:$0xff]  }
  0x36   : > { %v9011_v50 = vld [vmem:[%s11227_s1 + $0x170] ss:$8 sps:$4 sm:$0xff]  }
  0x37   : > { %4233 = vmatpush1.bf16.msra.mxu1 %v8871_v52  ;;  %v9014_v52 = vld [vmem:[%s11227_s1 + $0x570] ss:$8 sps:$4 sm:$0xff]  }
  0x38   : > { %5485 = vmatpush1.bf16.msra.mxu0 %v8872_v53  ;;  %4234 = vmatprep.subr.bf16.mxu1 %v8873_v54  ;;  %v9016_v53 = vld [vmem:[%s11227_s1 + $0x574] ss:$8 sps:$4 sm:$0xff]  }
  0x39   : > { %5486 = vmatprep.subr.bf16.mxu0 %v8875_v55  ;;  %v8943_v54 = vld [vmem:[%s9951_s5 + $0x258] ss:$60 sps:$4 sm:$0xff]  }
  0x3a   : > { %v8944_v55 = vld [vmem:[%s9951_s5 + $0x278] ss:$60 sps:$4 sm:$0xff]  }
  0x3b   : > { %4235 = vmatpush1.bf16.msra.mxu1 %v8877_v56  ;;  %v8951_v56 = vld [vmem:[%s9951_s5 + $0x2d4] ss:$60 sps:$4 sm:$0xff]  }
  0x3c   : > { %5487 = vmatpush1.bf16.msra.mxu0 %v8878_v57  ;;  %4236 = vmatprep.subr.bf16.mxu1 %v8879_v58  ;;  %v8953_v57 = vld [vmem:[%s9951_s5 + $0x2f4] ss:$60 sps:$4 sm:$0xff]   ;;  %v9030_v58 = vld [vmem:[%s11227_s1 + $0x184] ss:$8 sps:$4 sm:$0xff]  }
  0x3d   : > { %5488 = vmatprep.subr.bf16.mxu0 %v8881_v59  ;;  %v9028_v59 = vld [vmem:[%s11227_s1 + $0x180] ss:$8 sps:$4 sm:$0xff]  }
  0x3f   : > { %4237 = vmatpush1.bf16.msra.mxu1 %v8883_v60  ;;  %v9032_v60 = vld [vmem:[%s11227_s1 + $0x580] ss:$8 sps:$4 sm:$0xff]  }
  0x40   : > { %5489 = vmatpush1.bf16.msra.mxu0 %v8884_v61  ;;  %4238 = vmatprep.subr.bf16.mxu1 %v8885_v62  ;;  %v9034_v61 = vld [vmem:[%s11227_s1 + $0x584] ss:$8 sps:$4 sm:$0xff]  }
  0x41   : > { %5490 = vmatprep.subr.bf16.mxu0 %v8887_v63  ;;  %v8955_v62 = vld [vmem:[%s9951_s5 + $0x2d0] ss:$60 sps:$4 sm:$0xff]  }
  0x42   : > { %v9041_v63 = vld [vmem:[%s11227_s1 + $0x190] ss:$8 sps:$4 sm:$0xff]  }
  0x43   : > { %4239 = vmatpush1.bf16.msra.mxu1 %v8889_v0  ;;  %v9043_v0 = vld [vmem:[%s11227_s1 + $0x194] ss:$8 sps:$4 sm:$0xff]  }
  0x44   : > { %5491 = vmatpush1.bf16.msra.mxu0 %v8890_v1  ;;  %4521 = vmatprep.subr.bf16.mxu1 %v8899_v2  ;;  %v8956_v1 = vld [vmem:[%s9951_s5 + $0x2f0] ss:$60 sps:$4 sm:$0xff]  }
  0x45   : > { %5773 = vmatprep.subr.bf16.mxu0 %v8902_v3  ;;  %v8957_v2 = vld [vmem:[%s9951_s5 + $0x34c] ss:$60 sps:$4 sm:$0xff]  }
  0x46   : > { %4241 = vmatmul.mubr.bf16.vlgmr.msra.gmra.mrb[0].mxu1 %v8891_v4  ;;  %v8959_v3 = vld [vmem:[%s9951_s5 + $0x36c] ss:$60 sps:$4 sm:$0xff]   ;;  %v9050_v4 = vld [vmem:[%s11227_s1 + $0x590] ss:$8 sps:$4 sm:$0xff]  }
  0x47   : > { %5493 = vmatmul.mubr.bf16.vlgmr.msra.gmra.mrb[0].mxu0 %v8894_v5  ;;  %4522 = vmatpush1.bf16.msra.mxu1 %v8897_v6  ;;  %v9052_v5 = vld [vmem:[%s11227_s1 + $0x594] ss:$8 sps:$4 sm:$0xff]   ;;  %v8961_v6 = vld [vmem:[%s9951_s5 + $0x348] ss:$60 sps:$4 sm:$0xff]  }
  0x48   : > { %5774 = vmatpush1.bf16.msra.mxu0 %v8900_v7  ;;  %4250 = vmatprep.mubr.bf16.mxu1 %v8903_v8  ;;  %v8965_v7 = vld [vmem:[%s9951_s5 + $0x368] ss:$60 sps:$4 sm:$0xff]  }
  0x49   : > { %5502 = vmatprep.mubr.bf16.mxu0 %v8905_v9  ;;  %4523 = vmatprep.subr.bf16.mxu1 %v8911_v10  ;;  %v8969_v8 = vld [vmem:[%s9951_s5 + $0x3c4] ss:$60 sps:$4 sm:$0xff]  }
  0x4a   : > { %5775 = vmatprep.subr.bf16.mxu0 %v8920_v11  ;;  %v9059_v9 = vld [vmem:[%s11227_s1 + $0x1a0] ss:$8 sps:$4 sm:$0xff]   ;;  %v9061_v10 = vld [vmem:[%s11227_s1 + $0x1a4] ss:$8 sps:$4 sm:$0xff]  }
  0x4b   : > { %4524 = vmatpush1.bf16.msra.mxu1 %v8909_v12  ;;  %v9062_v11 = vld [vmem:[%s11227_s1 + $0x5a0] ss:$8 sps:$4 sm:$0xff]   ;;  %v9064_v12 = vld [vmem:[%s11227_s1 + $0x5a4] ss:$8 sps:$4 sm:$0xff]  }
  0x4c   : > { %5776 = vmatpush1.bf16.msra.mxu0 %v8918_v13  ;;  %4525 = vmatprep.subr.bf16.mxu1 %v8929_v14  ;;  %v8971_v13 = vld [vmem:[%s9951_s5 + $0x3e4] ss:$60 sps:$4 sm:$0xff]  }
  0x4d   : > { %5777 = vmatprep.subr.bf16.mxu0 %v8932_v16  ;;  %v8973_v14 = vld [vmem:[%s9951_s5 + $0x3c0] ss:$60 sps:$4 sm:$0xff]  }
  0x4e   : > { %4251 = vmatmul.mubr.bf16.gmra.mrb[4].mxu1 %v8907_v15  ;;  %v8974_v15 = vld [vmem:[%s9951_s5 + $0x3e0] ss:$60 sps:$4 sm:$0xff]  }
  0x4f   : > { %5503 = vmatmul.mubr.bf16.gmra.mrb[4].mxu0 %v8908_v17  ;;  %4260 = vmatprep.mubr.bf16.mxu1 %v8912_v18  ;;  %v8978_v16 = vld [vmem:[%s9951_s5 + $0x43c] ss:$60 sps:$4 sm:$0xff]  }
  0x50   : > { %5512 = vmatprep.mubr.bf16.mxu0 %v8914_v19  ;;  %4526 = vmatpush1.bf16.msra.mxu1 %v8927_v20  ;;  %v9077_v17 = vld [vmem:[%s11227_s1 + $0x1b0] ss:$8 sps:$4 sm:$0xff]   ;;  %v9079_v18 = vld [vmem:[%s11227_s1 + $0x1b4] ss:$8 sps:$4 sm:$0xff]  }
  0x51   : > { %5778 = vmatpush1.bf16.msra.mxu0 %v8930_v21  ;;  %4527 = vmatprep.subr.bf16.mxu1 %v8947_v22  ;;  %v9080_v19 = vld [vmem:[%s11227_s1 + $0x5b0] ss:$8 sps:$4 sm:$0xff]   ;;  %v9082_v20 = vld [vmem:[%s11227_s1 + $0x5b4] ss:$8 sps:$4 sm:$0xff]  }
  0x52   : > { %5779 = vmatprep.subr.bf16.mxu0 %v8950_v23  ;;  %v8980_v21 = vld [vmem:[%s9951_s5 + $0x45c] ss:$60 sps:$4 sm:$0xff]  }
  0x53   : > { %v8982_v22 = vld [vmem:[%s9951_s5 + $0x438] ss:$60 sps:$4 sm:$0xff]  }
  0x54   : > { %4528 = vmatpush1.bf16.msra.mxu1 %v8945_v24  ;;  %v8983_v23 = vld [vmem:[%s9951_s5 + $0x458] ss:$60 sps:$4 sm:$0xff]   ;;  %v9094_v24 = vld [vmem:[%s11227_s1 + $0x1c0] ss:$8 sps:$4 sm:$0xff]  }
  0x55   : > { %5780 = vmatpush1.bf16.msra.mxu0 %v8948_v25  ;;  %4529 = vmatprep.subr.bf16.mxu1 %v8964_v27  ;;  %v8987_v25 = vld [vmem:[%s9951_s5 + $0x4b4] ss:$60 sps:$4 sm:$0xff]   ;;  %v9098_v27 = vld [vmem:[%s11227_s1 + $0x5c0] ss:$8 sps:$4 sm:$0xff]  }
  0x56   : > { %5781 = vmatprep.subr.bf16.mxu0 %v8968_v28  ;;  %4261 = vmatmul.mubr.bf16.gmra.mrb[8].mxu1 %v8916_v26  ;;  %v9096_v26 = vld [vmem:[%s11227_s1 + $0x1c4] ss:$8 sps:$4 sm:$0xff]  }
  0x57   : > { %5513 = vmatmul.mubr.bf16.gmra.mrb[8].mxu0 %v8917_v29  ;;  %4270 = vmatprep.mubr.bf16.mxu1 %v8921_v30  ;;  %v9100_v28 = vld [vmem:[%s11227_s1 + $0x5c4] ss:$8 sps:$4 sm:$0xff]   ;;  %v8989_v29 = vld [vmem:[%s9951_s5 + $0x4d4] ss:$60 sps:$4 sm:$0xff]  }
  0x58   : > { %5522 = vmatprep.mubr.bf16.mxu0 %v8923_v31  ;;  %4530 = vmatpush1.bf16.msra.mxu1 %v8962_v32  ;;  %v9107_v30 = vld [vmem:[%s11227_s1 + $0x1d0] ss:$8 sps:$4 sm:$0xff]   ;;  %v9109_v31 = vld [vmem:[%s11227_s1 + $0x1d4] ss:$8 sps:$4 sm:$0xff]  }
  0x59   : > { %5782 = vmatpush1.bf16.msra.mxu0 %v8966_v33  ;;  %4531 = vmatprep.subr.bf16.mxu1 %v8977_v34  ;;  %v8991_v32 = vld [vmem:[%s9951_s5 + $0x4b0] ss:$60 sps:$4 sm:$0xff]  }
  0x5a   : > { %5783 = vmatprep.subr.bf16.mxu0 %v8986_v37  ;;  %v8992_v33 = vld [vmem:[%s9951_s5 + $0x4d0] ss:$60 sps:$4 sm:$0xff]  }
  0x5b   : > { %v8999_v34 = vld [vmem:[%s9951_s5 + $0x52c] ss:$60 sps:$4 sm:$0xff]  }
  0x5c   : > { %4532 = vmatpush1.bf16.msra.mxu1 %v8975_v35  ;;  %v9116_v35 = vld [vmem:[%s11227_s1 + $0x5d0] ss:$8 sps:$4 sm:$0xff]   ;;  %v9001_v37 = vld [vmem:[%s9951_s5 + $0x54c] ss:$60 sps:$4 sm:$0xff]  }
  0x5d   : > { %5784 = vmatpush1.bf16.msra.mxu0 %v8984_v36  ;;  %4533 = vmatprep.subr.bf16.mxu1 %v8995_v43  ;;  %v9118_v36 = vld [vmem:[%s11227_s1 + $0x5d4] ss:$8 sps:$4 sm:$0xff]   ;;  %v9004_v43 = vld [vmem:[%s9951_s5 + $0x548] ss:$60 sps:$4 sm:$0xff]  }
  0x5e   : > { %4271 = vmatmul.mubr.bf16.gmra.mrb[12].mxu1 %v8925_v38  ;;  %5785 = vmatprep.subr.bf16.mxu0 %v8998_v45  ;;  %v9125_v38 = vld [vmem:[%s11227_s1 + $0x1e0] ss:$8 sps:$4 sm:$0xff]  }
  0x5f   : > { %5523 = vmatmul.mubr.bf16.gmra.mrb[12].mxu0 %v8926_v39  ;;  %4280 = vmatprep.mubr.bf16.mxu1 %v8933_v40  ;;  %v9127_v39 = vld [vmem:[%s11227_s1 + $0x1e4] ss:$8 sps:$4 sm:$0xff]   ;;  %v9128_v40 = vld [vmem:[%s11227_s1 + $0x5e0] ss:$8 sps:$4 sm:$0xff]  }
  0x60   : > { %5532 = vmatprep.mubr.bf16.mxu0 %v8935_v41  ;;  %4534 = vmatpush1.bf16.msra.mxu1 %v8993_v42  ;;  %v9130_v41 = vld [vmem:[%s11227_s1 + $0x5e4] ss:$8 sps:$4 sm:$0xff]  }
  0x61   : > { %5786 = vmatpush1.bf16.msra.mxu0 %v8996_v44  ;;  %4535 = vmatprep.subr.bf16.mxu1 %v9013_v51  ;;  %v9003_v42 = vld [vmem:[%s9951_s5 + $0x528] ss:$60 sps:$4 sm:$0xff]   ;;  %v9010_v51 = vld [vmem:[%s9951_s5 + $0x5c0] ss:$60 sps:$4 sm:$0xff]  }
  0x62   : > { %5787 = vmatprep.subr.bf16.mxu0 %v9016_v53  ;;  %v9005_v44 = vld [vmem:[%s9951_s5 + $0x5a4] ss:$60 sps:$4 sm:$0xff]   ;;  %v9019_v53 = vld [vmem:[%s9951_s5 + $0x63c] ss:$60 sps:$4 sm:$0xff]  }
  0x63   : > { %v9007_v45 = vld [vmem:[%s9951_s5 + $0x5c4] ss:$60 sps:$4 sm:$0xff]  }
  0x64   : > { %4536 = vmatpush1.bf16.msra.mxu1 %v9011_v50  ;;  %v9009_v50 = vld [vmem:[%s9951_s5 + $0x5a0] ss:$60 sps:$4 sm:$0xff]  }
  0x65   : > { %5788 = vmatpush1.bf16.msra.mxu0 %v9014_v52  ;;  %4537 = vmatprep.subr.bf16.mxu1 %v9030_v58  ;;  %v9017_v52 = vld [vmem:[%s9951_s5 + $0x61c] ss:$60 sps:$4 sm:$0xff]   ;;  %v9023_v58 = vld [vmem:[%s9951_s5 + $0x694] ss:$60 sps:$4 sm:$0xff]  }
  0x66   : > { %4281 = vmatmul.mubr.bf16.gmra.mrb[16].mxu1 %v8937_v46  ;;  %5789 = vmatprep.subr.bf16.mxu0 %v9034_v61  ;;  %v9143_v46 = vld [vmem:[%s11227_s1 + $0x1f0] ss:$8 sps:$4 sm:$0xff]  }
  0x67   : > { %5533 = vmatmul.mubr.bf16.gmra.mrb[16].mxu0 %v8938_v47  ;;  %4290 = vmatprep.mubr.bf16.mxu1 %v8939_v48  ;;  %v9145_v47 = vld [vmem:[%s11227_s1 + $0x1f4] ss:$8 sps:$4 sm:$0xff]   ;;  %v9146_v48 = vld [vmem:[%s11227_s1 + $0x5f0] ss:$8 sps:$4 sm:$0xff]  }
  0x68   : > { %5542 = vmatprep.mubr.bf16.mxu0 %v8941_v49  ;;  %4538 = vmatpush1.bf16.msra.mxu1 %v9028_v59  ;;  %v9148_v49 = vld [vmem:[%s11227_s1 + $0x5f4] ss:$8 sps:$4 sm:$0xff]   ;;  %v9031_v61 = vld [vmem:[%s9951_s5 + $0x6b0] ss:$60 sps:$4 sm:$0xff]  }
  0x69   : > { %5790 = vmatpush1.bf16.msra.mxu0 %v9032_v60  ;;  %4539 = vmatprep.subr.bf16.mxu1 %v9043_v0  ;;  %v9025_v59 = vld [vmem:[%s9951_s5 + $0x6b4] ss:$60 sps:$4 sm:$0xff]   ;;  %v9039_v0 = vld [vmem:[%s9951_s5 + $0x708] ss:$60 sps:$4 sm:$0xff]  }
  0x6a   : > { %5791 = vmatprep.subr.bf16.mxu0 %v9052_v5  ;;  %v9027_v60 = vld [vmem:[%s9951_s5 + $0x690] ss:$60 sps:$4 sm:$0xff]   ;;  %v9049_v5 = vld [vmem:[%s9951_s5 + $0x7a0] ss:$60 sps:$4 sm:$0xff]  }
  0x6c   : > { %4540 = vmatpush1.bf16.msra.mxu1 %v9041_v63  ;;  %v9037_v63 = vld [vmem:[%s9951_s5 + $0x72c] ss:$60 sps:$4 sm:$0xff]  }
  0x6d   : > { %5792 = vmatpush1.bf16.msra.mxu0 %v9050_v4  ;;  %4541 = vmatprep.subr.bf16.mxu1 %v9061_v10  ;;  %v9048_v4 = vld [vmem:[%s9951_s5 + $0x780] ss:$60 sps:$4 sm:$0xff]   ;;  %v9065_v10 = vld [vmem:[%s9951_s5 + $0x874] ss:$60 sps:$4 sm:$0xff]  }
  0x6e   : > { %4291 = vmatmul.mubr.bf16.gmra.mrb[20].mxu1 %v8943_v54  ;;  %5793 = vmatprep.subr.bf16.mxu0 %v9064_v12  ;;  %v9163_v54 = vld [vmem:[%s11227_s1 + $0x204] ss:$8 sps:$4 sm:$0xff]  }
  0x6f   : > { %5543 = vmatmul.mubr.bf16.gmra.mrb[20].mxu0 %v8944_v55  ;;  %4300 = vmatprep.mubr.bf16.mxu1 %v8951_v56  ;;  %v9021_v55 = vld [vmem:[%s9951_s5 + $0x618] ss:$60 sps:$4 sm:$0xff]   ;;  %v9166_v56 = vld [vmem:[%s11227_s1 + $0x604] ss:$8 sps:$4 sm:$0xff]  }
  0x70   : > { %5552 = vmatprep.mubr.bf16.mxu0 %v8953_v57  ;;  %4542 = vmatpush1.bf16.msra.mxu1 %v9059_v9  ;;  %v9022_v57 = vld [vmem:[%s9951_s5 + $0x638] ss:$60 sps:$4 sm:$0xff]   ;;  %v9069_v12 = vld [vmem:[%s9951_s5 + $0x870] ss:$60 sps:$4 sm:$0xff]  }
  0x71   : > { %5794 = vmatpush1.bf16.msra.mxu0 %v9062_v11  ;;  %4543 = vmatprep.subr.bf16.mxu1 %v9079_v18  ;;  %v9058_v9 = vld [vmem:[%s9951_s5 + $0x818] ss:$60 sps:$4 sm:$0xff]   ;;  %v9083_v18 = vld [vmem:[%s9951_s5 + $0x964] ss:$60 sps:$4 sm:$0xff]  }
  0x72   : > { %5795 = vmatprep.subr.bf16.mxu0 %v9082_v20  ;;  %v9067_v11 = vld [vmem:[%s9951_s5 + $0x894] ss:$60 sps:$4 sm:$0xff]   ;;  %v9087_v20 = vld [vmem:[%s9951_s5 + $0x960] ss:$60 sps:$4 sm:$0xff]  }
  0x74   : > { %4544 = vmatpush1.bf16.msra.mxu1 %v9077_v17  ;;  %v9076_v17 = vld [vmem:[%s9951_s5 + $0x908] ss:$60 sps:$4 sm:$0xff]  }
  0x75   : > { %5796 = vmatpush1.bf16.msra.mxu0 %v9080_v19  ;;  %4545 = vmatprep.subr.bf16.mxu1 %v9096_v26  ;;  %v9085_v19 = vld [vmem:[%s9951_s5 + $0x984] ss:$60 sps:$4 sm:$0xff]   ;;  %v9101_v26 = vld [vmem:[%s9951_s5 + $0xa54] ss:$60 sps:$4 sm:$0xff]  }
  0x76   : > { %4301 = vmatmul.mubr.bf16.gmra.mrb[24].mxu1 %v8955_v62  ;;  %5797 = vmatprep.subr.bf16.mxu0 %v9100_v28  ;;  %v9035_v62 = vld [vmem:[%s9951_s5 + $0x70c] ss:$60 sps:$4 sm:$0xff]  }
  0x77   : > { %5553 = vmatmul.mubr.bf16.gmra.mrb[24].mxu0 %v8956_v1  ;;  %4310 = vmatprep.mubr.bf16.mxu1 %v8957_v2  ;;  %v9040_v1 = vld [vmem:[%s9951_s5 + $0x728] ss:$60 sps:$4 sm:$0xff]   ;;  %v9105_v28 = vld [vmem:[%s9951_s5 + $0xa50] ss:$60 sps:$4 sm:$0xff]  }
  0x78   : > { %5562 = vmatprep.mubr.bf16.mxu0 %v8959_v3  ;;  %4546 = vmatpush1.bf16.msra.mxu1 %v9094_v24  ;;  %v9044_v2 = vld [vmem:[%s9951_s5 + $0x784] ss:$60 sps:$4 sm:$0xff]   ;;  %v9093_v24 = vld [vmem:[%s9951_s5 + $0x9d8] ss:$60 sps:$4 sm:$0xff]  }
  0x79   : > { %5798 = vmatpush1.bf16.msra.mxu0 %v9098_v27  ;;  %4547 = vmatprep.subr.bf16.mxu1 %v9109_v31  ;;  %v9046_v3 = vld [vmem:[%s9951_s5 + $0x7a4] ss:$60 sps:$4 sm:$0xff]   ;;  %v9103_v27 = vld [vmem:[%s9951_s5 + $0xa74] ss:$60 sps:$4 sm:$0xff]   ;;  %v9112_v31 = vld [vmem:[%s9951_s5 + $0xaec] ss:$60 sps:$4 sm:$0xff]  }
  0x7a   : > { %5799 = vmatprep.subr.bf16.mxu0 %v9118_v36  ;;  %v9123_v36 = vld [vmem:[%s9951_s5 + $0xb40] ss:$60 sps:$4 sm:$0xff]  }
  0x7c   : > { %4548 = vmatpush1.bf16.msra.mxu1 %v9107_v30  ;;  %v9110_v30 = vld [vmem:[%s9951_s5 + $0xacc] ss:$60 sps:$4 sm:$0xff]  }
  0x7d   : > { %5800 = vmatpush1.bf16.msra.mxu0 %v9116_v35  ;;  %4549 = vmatprep.subr.bf16.mxu1 %v9127_v39  ;;  %v9121_v35 = vld [vmem:[%s9951_s5 + $0xb64] ss:$60 sps:$4 sm:$0xff]   ;;  %v9133_v39 = vld [vmem:[%s9951_s5 + $0xbdc] ss:$60 sps:$4 sm:$0xff]  }
  0x7e   : > { %4311 = vmatmul.mubr.bf16.gmra.mrb[28].mxu1 %v8961_v6  ;;  %5801 = vmatprep.subr.bf16.mxu0 %v9130_v41  ;;  %v9053_v6 = vld [vmem:[%s9951_s5 + $0x7fc] ss:$60 sps:$4 sm:$0xff]  }
  0x7f   : > { %5563 = vmatmul.mubr.bf16.gmra.mrb[28].mxu0 %v8965_v7  ;;  %4320 = vmatprep.mubr.bf16.mxu1 %v8969_v8  ;;  %v9055_v7 = vld [vmem:[%s9951_s5 + $0x81c] ss:$60 sps:$4 sm:$0xff]  }
  0x80   : > { %5572 = vmatprep.mubr.bf16.mxu0 %v8971_v13  ;;  %4550 = vmatpush1.bf16.msra.mxu1 %v9125_v38  ;;  %v9057_v8 = vld [vmem:[%s9951_s5 + $0x7f8] ss:$60 sps:$4 sm:$0xff]   ;;  %v9070_v13 = vld [vmem:[%s9951_s5 + $0x890] ss:$60 sps:$4 sm:$0xff]  }
  0x81   : > { %5802 = vmatpush1.bf16.msra.mxu0 %v9128_v40  ;;  %4551 = vmatprep.subr.bf16.mxu1 %v9145_v47  ;;  %v9131_v38 = vld [vmem:[%s9951_s5 + $0xbbc] ss:$60 sps:$4 sm:$0xff]   ;;  %v9151_v47 = vld [vmem:[%s9951_s5 + $0xccc] ss:$60 sps:$4 sm:$0xff]  }
  0x82   : > { %5803 = vmatprep.subr.bf16.mxu0 %v9148_v49  ;;  %v9135_v40 = vld [vmem:[%s9951_s5 + $0xbb8] ss:$60 sps:$4 sm:$0xff]   ;;  %v9154_v49 = vld [vmem:[%s9951_s5 + $0xcc8] ss:$60 sps:$4 sm:$0xff]  }
  0x83   : > { %v9136_v41 = vld [vmem:[%s9951_s5 + $0xbd8] ss:$60 sps:$4 sm:$0xff]  }
  0x84   : > { %4552 = vmatpush1.bf16.msra.mxu1 %v9143_v46  ;;  %v9149_v46 = vld [vmem:[%s9951_s5 + $0xcac] ss:$60 sps:$4 sm:$0xff]  }
  0x85   : > { %5804 = vmatpush1.bf16.msra.mxu0 %v9146_v48  ;;  %4834 = vmatprep.subr.bf16.mxu1 %v9163_v54  ;;  %v9153_v48 = vld [vmem:[%s9951_s5 + $0xca8] ss:$60 sps:$4 sm:$0xff]  }
  0x86   : > { %4321 = vmatmul.mubr.bf16.gmra.mrb[32].mxu1 %v8973_v14  ;;  %6086 = vmatprep.subr.bf16.mxu0 %v9166_v56  ;;  %v9071_v14 = vld [vmem:[%s9951_s5 + $0x8ec] ss:$60 sps:$4 sm:$0xff]   ;;  %v9167_v56 = vld [vmem:[%s9951_s5 + $0x84] ss:$60 sps:$4 sm:$0xff]  }
  0x87   : > { %5573 = vmatmul.mubr.bf16.gmra.mrb[32].mxu0 %v8974_v15  ;;  %4330 = vmatprep.mubr.bf16.mxu1 %v8978_v16  ;;  %v9073_v15 = vld [vmem:[%s9951_s5 + $0x90c] ss:$60 sps:$4 sm:$0xff]  }
  0x88   : > { %5582 = vmatprep.mubr.bf16.mxu0 %v8980_v21  ;;  %v9075_v16 = vld [vmem:[%s9951_s5 + $0x8e8] ss:$60 sps:$4 sm:$0xff]   ;;  %v9088_v21 = vld [vmem:[%s9951_s5 + $0x980] ss:$60 sps:$4 sm:$0xff]  }
  0x89   : > { %v9161_v54 = vld [vmem:[%s11227_s1 + $0x200] ss:$8 sps:$4 sm:$0xff]  }
  0x8e   : > { %4331 = vmatmul.mubr.bf16.gmra.mrb[36].mxu1 %v8982_v22  ;;  %v9089_v22 = vld [vmem:[%s9951_s5 + $0x9dc] ss:$60 sps:$4 sm:$0xff]  }
  0x8f   : > { %5583 = vmatmul.mubr.bf16.gmra.mrb[36].mxu0 %v8983_v23  ;;  %4340 = vmatprep.mubr.bf16.mxu1 %v8987_v25  ;;  %v9091_v23 = vld [vmem:[%s9951_s5 + $0x9fc] ss:$60 sps:$4 sm:$0xff]  }
  0x90   : > { %5592 = vmatprep.mubr.bf16.mxu0 %v8989_v29  ;;  %v9097_v25 = vld [vmem:[%s9951_s5 + $0x9f8] ss:$60 sps:$4 sm:$0xff]   ;;  %v9106_v29 = vld [vmem:[%s9951_s5 + $0xa70] ss:$60 sps:$4 sm:$0xff]  }
  0x96   : > { %4341 = vmatmul.mubr.bf16.gmra.mrb[40].mxu1 %v8991_v32  ;;  %v9114_v32 = vld [vmem:[%s9951_s5 + $0xac8] ss:$60 sps:$4 sm:$0xff]  }
  0x97   : > { %5593 = vmatmul.mubr.bf16.gmra.mrb[40].mxu0 %v8992_v33  ;;  %4350 = vmatprep.mubr.bf16.mxu1 %v8999_v34  ;;  %v9115_v33 = vld [vmem:[%s9951_s5 + $0xae8] ss:$60 sps:$4 sm:$0xff]  }
  0x98   : > { %5602 = vmatprep.mubr.bf16.mxu0 %v9001_v37  ;;  %v9119_v34 = vld [vmem:[%s9951_s5 + $0xb44] ss:$60 sps:$4 sm:$0xff]  }
  0x99   : > { %v9124_v37 = vld [vmem:[%s9951_s5 + $0xb60] ss:$60 sps:$4 sm:$0xff]  }
  0x9e   : > { %4351 = vmatmul.mubr.bf16.gmra.mrb[44].mxu1 %v9003_v42  ;;  %v9137_v42 = vld [vmem:[%s9951_s5 + $0xc34] ss:$60 sps:$4 sm:$0xff]  }
  0x9f   : > { %5603 = vmatmul.mubr.bf16.gmra.mrb[44].mxu0 %v9004_v43  ;;  %4360 = vmatprep.mubr.bf16.mxu1 %v9005_v44  ;;  %v9139_v43 = vld [vmem:[%s9951_s5 + $0xc54] ss:$60 sps:$4 sm:$0xff]  }
  0xa0   : > { %5612 = vmatprep.mubr.bf16.mxu0 %v9007_v45  ;;  %v9141_v44 = vld [vmem:[%s9951_s5 + $0xc30] ss:$60 sps:$4 sm:$0xff]  }
  0xa1   : > { %v9142_v45 = vld [vmem:[%s9951_s5 + $0xc50] ss:$60 sps:$4 sm:$0xff]  }
  0xa6   : > { %4361 = vmatmul.mubr.bf16.gmra.mrb[48].mxu1 %v9009_v50  ;;  %v9157_v50 = vld [vmem:[%s9951_s5 + $0xc] ss:$60 sps:$4 sm:$0xff]  }
  0xa7   : > { %5613 = vmatmul.mubr.bf16.gmra.mrb[48].mxu0 %v9010_v51  ;;  %4370 = vmatprep.mubr.bf16.mxu1 %v9017_v52  ;;  %v9160_v51 = vld [vmem:[%s9951_s5 + $0x2c] ss:$60 sps:$4 sm:$0xff]  }
  0xa8   : > { %5622 = vmatprep.mubr.bf16.mxu0 %v9019_v53  ;;  %v9155_v52 = vld [vmem:[%s9951_s5 + $0x8] ss:$60 sps:$4 sm:$0xff]  }
  0xa9   : > { %v9158_v53 = vld [vmem:[%s9951_s5 + $0x28] ss:$60 sps:$4 sm:$0xff]  }
  0xae   : > { %4371 = vmatmul.mubr.bf16.gmra.mrb[52].mxu1 %v9021_v55  ;;  %v9164_v55 = vld [vmem:[%s11227_s1 + $0x600] ss:$8 sps:$4 sm:$0xff]  }
  0xaf   : > { %5623 = vmatmul.mubr.bf16.gmra.mrb[52].mxu0 %v9022_v57  ;;  %4380 = vmatprep.mubr.bf16.mxu1 %v9023_v58  ;;  %v9169_v57 = vld [vmem:[%s9951_s5 + $0xa4] ss:$60 sps:$4 sm:$0xff]   ;;  %v9175_v58 = vld [vmem:[%s11227_s1 + $0x214] ss:$8 sps:$4 sm:$0xff]  }
  0xb0   : > { %5632 = vmatprep.mubr.bf16.mxu0 %v9025_v59  ;;  %v9184_v59 = vld [vmem:[%s11227_s1 + $0x614] ss:$8 sps:$4 sm:$0xff]  }
  0xb6   : > { %4381 = vmatmul.mubr.bf16.gmra.mrb[56].mxu1 %v9027_v60  ;;  %v9173_v60 = vld [vmem:[%s11227_s1 + $0x210] ss:$8 sps:$4 sm:$0xff]  }
  0xb7   : > { %5633 = vmatmul.mubr.bf16.gmra.mrb[56].mxu0 %v9031_v61  ;;  %4390 = vmatprep.mubr.bf16.mxu1 %v9035_v62  ;;  %v9182_v61 = vld [vmem:[%s11227_s1 + $0x610] ss:$8 sps:$4 sm:$0xff]   ;;  %v9193_v62 = vld [vmem:[%s11227_s1 + $0x224] ss:$8 sps:$4 sm:$0xff]  }
  0xb8   : > { %5642 = vmatprep.mubr.bf16.mxu0 %v9037_v63  ;;  %v9196_v63 = vld [vmem:[%s11227_s1 + $0x624] ss:$8 sps:$4 sm:$0xff]  }
  0xbe   : > { %4391 = vmatmul.mubr.bf16.gmra.mrb[60].mxu1 %v9039_v0  ;;  %v9171_v0 = vld [vmem:[%s9951_s5 + $0x80] ss:$60 sps:$4 sm:$0xff]  }
  0xbf   : > { %5643 = vmatmul.mubr.bf16.gmra.mrb[60].mxu0 %v9040_v1  ;;  %4400 = vmatprep.mubr.bf16.mxu1 %v9044_v2  ;;  %v9172_v1 = vld [vmem:[%s9951_s5 + $0xa0] ss:$60 sps:$4 sm:$0xff]  }
  0xc0   : > { %5652 = vmatprep.mubr.bf16.mxu0 %v9046_v3  ;;  %v9176_v2 = vld [vmem:[%s9951_s5 + $0xfc] ss:$60 sps:$4 sm:$0xff]  }
  0xc1   : > { %v9178_v3 = vld [vmem:[%s9951_s5 + $0x11c] ss:$60 sps:$4 sm:$0xff]  }
  0xc6   : > { %4401 = vmatmul.mubr.bf16.gmra.mrb[64].mxu1 %v9048_v4  ;;  %v9191_v4 = vld [vmem:[%s11227_s1 + $0x220] ss:$8 sps:$4 sm:$0xff]  }
  0xc7   : > { %5653 = vmatmul.mubr.bf16.gmra.mrb[64].mxu0 %v9049_v5  ;;  %4410 = vmatprep.mubr.bf16.mxu1 %v9053_v6  ;;  %v9194_v5 = vld [vmem:[%s11227_s1 + $0x620] ss:$8 sps:$4 sm:$0xff]   ;;  %v9211_v6 = vld [vmem:[%s11227_s1 + $0x234] ss:$8 sps:$4 sm:$0xff]  }
  0xc8   : > { %5662 = vmatprep.mubr.bf16.mxu0 %v9055_v7  ;;  %v9214_v7 = vld [vmem:[%s11227_s1 + $0x634] ss:$8 sps:$4 sm:$0xff]  }
  0xce   : > { %4411 = vmatmul.mubr.bf16.gmra.mrb[68].mxu1 %v9057_v8  ;;  %v9209_v8 = vld [vmem:[%s11227_s1 + $0x230] ss:$8 sps:$4 sm:$0xff]  }
  0xcf   : > { %5663 = vmatmul.mubr.bf16.gmra.mrb[68].mxu0 %v9058_v9  ;;  %4420 = vmatprep.mubr.bf16.mxu1 %v9065_v10  ;;  %v9212_v9 = vld [vmem:[%s11227_s1 + $0x630] ss:$8 sps:$4 sm:$0xff]   ;;  %v9228_v10 = vld [vmem:[%s11227_s1 + $0x244] ss:$8 sps:$4 sm:$0xff]  }
  0xd0   : > { %5672 = vmatprep.mubr.bf16.mxu0 %v9067_v11  ;;  %v9180_v11 = vld [vmem:[%s9951_s5 + $0xf8] ss:$60 sps:$4 sm:$0xff]  }
  0xd6   : > { %4421 = vmatmul.mubr.bf16.gmra.mrb[72].mxu1 %v9069_v12  ;;  %v9181_v12 = vld [vmem:[%s9951_s5 + $0x118] ss:$60 sps:$4 sm:$0xff]  }
  0xd7   : > { %5673 = vmatmul.mubr.bf16.gmra.mrb[72].mxu0 %v9070_v13  ;;  %4430 = vmatprep.mubr.bf16.mxu1 %v9071_v14  ;;  %v9232_v13 = vld [vmem:[%s11227_s1 + $0x644] ss:$8 sps:$4 sm:$0xff]   ;;  %v9185_v14 = vld [vmem:[%s9951_s5 + $0x174] ss:$60 sps:$4 sm:$0xff]  }
  0xd8   : > { %5682 = vmatprep.mubr.bf16.mxu0 %v9073_v15  ;;  %v9187_v15 = vld [vmem:[%s9951_s5 + $0x194] ss:$60 sps:$4 sm:$0xff]  }
  0xde   : > { %4431 = vmatmul.mubr.bf16.gmra.mrb[76].mxu1 %v9075_v16  ;;  %v9226_v16 = vld [vmem:[%s11227_s1 + $0x240] ss:$8 sps:$4 sm:$0xff]  }
  0xdf   : > { %5683 = vmatmul.mubr.bf16.gmra.mrb[76].mxu0 %v9076_v17  ;;  %4440 = vmatprep.mubr.bf16.mxu1 %v9083_v18  ;;  %v9230_v17 = vld [vmem:[%s11227_s1 + $0x640] ss:$8 sps:$4 sm:$0xff]   ;;  %v9241_v18 = vld [vmem:[%s11227_s1 + $0x254] ss:$8 sps:$4 sm:$0xff]  }
  0xe0   : > { %5692 = vmatprep.mubr.bf16.mxu0 %v9085_v19  ;;  %v9250_v19 = vld [vmem:[%s11227_s1 + $0x654] ss:$8 sps:$4 sm:$0xff]  }
  0xe6   : > { %4441 = vmatmul.mubr.bf16.gmra.mrb[80].mxu1 %v9087_v20  ;;  %v9239_v20 = vld [vmem:[%s11227_s1 + $0x250] ss:$8 sps:$4 sm:$0xff]  }
  0xe7   : > { %5693 = vmatmul.mubr.bf16.gmra.mrb[80].mxu0 %v9088_v21  ;;  %4450 = vmatprep.mubr.bf16.mxu1 %v9089_v22  ;;  %v9248_v21 = vld [vmem:[%s11227_s1 + $0x650] ss:$8 sps:$4 sm:$0xff]   ;;  %v9259_v22 = vld [vmem:[%s11227_s1 + $0x264] ss:$8 sps:$4 sm:$0xff]  }
  0xe8   : > { %5702 = vmatprep.mubr.bf16.mxu0 %v9091_v23  ;;  %v9262_v23 = vld [vmem:[%s11227_s1 + $0x664] ss:$8 sps:$4 sm:$0xff]  }
  0xee   : > { %4451 = vmatmul.mubr.bf16.gmra.mrb[84].mxu1 %v9093_v24  ;;  %v9189_v24 = vld [vmem:[%s9951_s5 + $0x170] ss:$60 sps:$4 sm:$0xff]  }
  0xef   : > { %5703 = vmatmul.mubr.bf16.gmra.mrb[84].mxu0 %v9097_v25  ;;  %4460 = vmatprep.mubr.bf16.mxu1 %v9101_v26  ;;  %v9190_v25 = vld [vmem:[%s9951_s5 + $0x190] ss:$60 sps:$4 sm:$0xff]  }
  0xf0   : > { %5712 = vmatprep.mubr.bf16.mxu0 %v9103_v27  ;;  %v9197_v26 = vld [vmem:[%s9951_s5 + $0x1ec] ss:$60 sps:$4 sm:$0xff]  }
  0xf1   : > { %v9199_v27 = vld [vmem:[%s9951_s5 + $0x20c] ss:$60 sps:$4 sm:$0xff]  }
  0xf6   : > { %4461 = vmatmul.mubr.bf16.gmra.mrb[88].mxu1 %v9105_v28  ;;  %v9257_v28 = vld [vmem:[%s11227_s1 + $0x260] ss:$8 sps:$4 sm:$0xff]  }
  0xf7   : > { %5713 = vmatmul.mubr.bf16.gmra.mrb[88].mxu0 %v9106_v29  ;;  %4470 = vmatprep.mubr.bf16.mxu1 %v9110_v30  ;;  %v9260_v29 = vld [vmem:[%s11227_s1 + $0x660] ss:$8 sps:$4 sm:$0xff]   ;;  %v9277_v30 = vld [vmem:[%s11227_s1 + $0x274] ss:$8 sps:$4 sm:$0xff]  }
  0xf8   : > { %5722 = vmatprep.mubr.bf16.mxu0 %v9112_v31  ;;  %v9280_v31 = vld [vmem:[%s11227_s1 + $0x674] ss:$8 sps:$4 sm:$0xff]  }
  0xfe   : > { %4471 = vmatmul.mubr.bf16.gmra.mrb[92].mxu1 %v9114_v32  ;;  %v9275_v32 = vld [vmem:[%s11227_s1 + $0x270] ss:$8 sps:$4 sm:$0xff]  }
  0xff   : > { %5723 = vmatmul.mubr.bf16.gmra.mrb[92].mxu0 %v9115_v33  ;;  %4480 = vmatprep.mubr.bf16.mxu1 %v9119_v34  ;;  %v9278_v33 = vld [vmem:[%s11227_s1 + $0x670] ss:$8 sps:$4 sm:$0xff]   ;;  %v9294_v34 = vld [vmem:[%s11227_s1 + $0x284] ss:$8 sps:$4 sm:$0xff]  }
 0x100   : > { %5732 = vmatprep.mubr.bf16.mxu0 %v9121_v35  ;;  %v9201_v35 = vld [vmem:[%s9951_s5 + $0x1e8] ss:$60 sps:$4 sm:$0xff]  }
 0x106   : > { %4481 = vmatmul.mubr.bf16.gmra.mrb[96].mxu1 %v9123_v36  ;;  %v9202_v36 = vld [vmem:[%s9951_s5 + $0x208] ss:$60 sps:$4 sm:$0xff]  }
 0x107   : > { %5733 = vmatmul.mubr.bf16.gmra.mrb[96].mxu0 %v9124_v37  ;;  %4490 = vmatprep.mubr.bf16.mxu1 %v9131_v38  ;;  %v9298_v37 = vld [vmem:[%s11227_s1 + $0x684] ss:$8 sps:$4 sm:$0xff]  }
 0x108   : > { %5742 = vmatprep.mubr.bf16.mxu0 %v9133_v39  ;;  %v9203_v38 = vld [vmem:[%s9951_s5 + $0x264] ss:$60 sps:$4 sm:$0xff]  }
 0x109   : > { %v9205_v39 = vld [vmem:[%s9951_s5 + $0x284] ss:$60 sps:$4 sm:$0xff]  }
 0x10e   : > { %4491 = vmatmul.mubr.bf16.gmra.mrb[100].mxu1 %v9135_v40  ;;  %v9292_v40 = vld [vmem:[%s11227_s1 + $0x280] ss:$8 sps:$4 sm:$0xff]  }
 0x10f   : > { %5743 = vmatmul.mubr.bf16.gmra.mrb[100].mxu0 %v9136_v41  ;;  %4500 = vmatprep.mubr.bf16.mxu1 %v9137_v42  ;;  %v9296_v41 = vld [vmem:[%s11227_s1 + $0x680] ss:$8 sps:$4 sm:$0xff]   ;;  %v9307_v42 = vld [vmem:[%s11227_s1 + $0x294] ss:$8 sps:$4 sm:$0xff]  }
 0x110   : > { %5752 = vmatprep.mubr.bf16.mxu0 %v9139_v43  ;;  %v9316_v43 = vld [vmem:[%s11227_s1 + $0x694] ss:$8 sps:$4 sm:$0xff]  }
 0x116   : > { %4501 = vmatmul.mubr.bf16.gmra.mrb[104].mxu1 %v9141_v44  ;;  %v9305_v44 = vld [vmem:[%s11227_s1 + $0x290] ss:$8 sps:$4 sm:$0xff]  }
 0x117   : > { %5753 = vmatmul.mubr.bf16.gmra.mrb[104].mxu0 %v9142_v45  ;;  %4510 = vmatprep.mubr.bf16.mxu1 %v9149_v46  ;;  %v9314_v45 = vld [vmem:[%s11227_s1 + $0x690] ss:$8 sps:$4 sm:$0xff]   ;;  %v9325_v46 = vld [vmem:[%s11227_s1 + $0x2a4] ss:$8 sps:$4 sm:$0xff]  }
 0x118   : > { %5762 = vmatprep.mubr.bf16.mxu0 %v9151_v47  ;;  %v9328_v47 = vld [vmem:[%s11227_s1 + $0x6a4] ss:$8 sps:$4 sm:$0xff]  }
 0x11e   : > { %4511 = vmatmul.mubr.bf16.gmra.mrb[108].mxu1 %v9153_v48  ;;  %v9207_v48 = vld [vmem:[%s9951_s5 + $0x260] ss:$60 sps:$4 sm:$0xff]  }
 0x11f   : > { %5763 = vmatmul.mubr.bf16.gmra.mrb[108].mxu0 %v9154_v49  ;;  %4553 = vmatprep.mubr.bf16.mxu1 %v9157_v50  ;;  %v9208_v49 = vld [vmem:[%s9951_s5 + $0x280] ss:$60 sps:$4 sm:$0xff]  }
 0x120   : > { %5805 = vmatprep.mubr.bf16.mxu0 %v9160_v51  ;;  %v9215_v50 = vld [vmem:[%s9951_s5 + $0x2dc] ss:$60 sps:$4 sm:$0xff]  }
 0x121   : > { %v9217_v51 = vld [vmem:[%s9951_s5 + $0x2fc] ss:$60 sps:$4 sm:$0xff]  }
 0x126   : > { %4554 = vmatmul.mubr.bf16.vlgmr.msra.gmra.mrb[0].mxu1 %v9155_v52  ;;  %v9323_v52 = vld [vmem:[%s11227_s1 + $0x2a0] ss:$8 sps:$4 sm:$0xff]  }
 0x127   : > { %5806 = vmatmul.mubr.bf16.vlgmr.msra.gmra.mrb[0].mxu0 %v9158_v53  ;;  %4835 = vmatpush1.bf16.msra.mxu1 %v9161_v54  ;;  %v9326_v53 = vld [vmem:[%s11227_s1 + $0x6a0] ss:$8 sps:$4 sm:$0xff]   ;;  %v9343_v54 = vld [vmem:[%s11227_s1 + $0x2b4] ss:$8 sps:$4 sm:$0xff]  }
 0x128   : > { %6087 = vmatpush1.bf16.msra.mxu0 %v9164_v55  ;;  %4563 = vmatprep.mubr.bf16.mxu1 %v9167_v56  ;;  %v9346_v55 = vld [vmem:[%s11227_s1 + $0x6b4] ss:$8 sps:$4 sm:$0xff]   ;;  %v9341_v56 = vld [vmem:[%s11227_s1 + $0x2b0] ss:$8 sps:$4 sm:$0xff]  }
 0x129   : > { %5815 = vmatprep.mubr.bf16.mxu0 %v9169_v57  ;;  %4836 = vmatprep.subr.bf16.mxu1 %v9175_v58  ;;  %v9344_v57 = vld [vmem:[%s11227_s1 + $0x6b0] ss:$8 sps:$4 sm:$0xff]   ;;  %v9360_v58 = vld [vmem:[%s11227_s1 + $0x2c4] ss:$8 sps:$4 sm:$0xff]  }
 0x12a   : > { %6088 = vmatprep.subr.bf16.mxu0 %v9184_v59  ;;  %v9219_v59 = vld [vmem:[%s9951_s5 + $0x2d8] ss:$60 sps:$4 sm:$0xff]  }
 0x12b   : > { %4837 = vmatpush1.bf16.msra.mxu1 %v9173_v60  ;;  %v9220_v60 = vld [vmem:[%s9951_s5 + $0x2f8] ss:$60 sps:$4 sm:$0xff]  }
 0x12c   : > { %6089 = vmatpush1.bf16.msra.mxu0 %v9182_v61  ;;  %4838 = vmatprep.subr.bf16.mxu1 %v9193_v62  ;;  %v9364_v61 = vld [vmem:[%s11227_s1 + $0x6c4] ss:$8 sps:$4 sm:$0xff]   ;;  %v9221_v62 = vld [vmem:[%s9951_s5 + $0x354] ss:$60 sps:$4 sm:$0xff]  }
 0x12d   : > { %6090 = vmatprep.subr.bf16.mxu0 %v9196_v63  ;;  %v9223_v63 = vld [vmem:[%s9951_s5 + $0x374] ss:$60 sps:$4 sm:$0xff]  }
 0x12e   : > { %4564 = vmatmul.mubr.bf16.gmra.mrb[4].mxu1 %v9171_v0  ;;  %v9358_v0 = vld [vmem:[%s11227_s1 + $0x2c0] ss:$8 sps:$4 sm:$0xff]  }
 0x12f   : > { %5816 = vmatmul.mubr.bf16.gmra.mrb[4].mxu0 %v9172_v1  ;;  %4573 = vmatprep.mubr.bf16.mxu1 %v9176_v2  ;;  %v9362_v1 = vld [vmem:[%s11227_s1 + $0x6c0] ss:$8 sps:$4 sm:$0xff]   ;;  %v9373_v2 = vld [vmem:[%s11227_s1 + $0x2d4] ss:$8 sps:$4 sm:$0xff]  }
 0x130   : > { %5825 = vmatprep.mubr.bf16.mxu0 %v9178_v3  ;;  %4839 = vmatpush1.bf16.msra.mxu1 %v9191_v4  ;;  %v9371_v3 = vld [vmem:[%s11227_s1 + $0x2d0] ss:$8 sps:$4 sm:$0xff]  }
 0x131   : > { %6091 = vmatpush1.bf16.msra.mxu0 %v9194_v5  ;;  %4840 = vmatprep.subr.bf16.mxu1 %v9211_v6  ;;  %v9225_v4 = vld [vmem:[%s9951_s5 + $0x350] ss:$60 sps:$4 sm:$0xff]  }
 0x132   : > { %6092 = vmatprep.subr.bf16.mxu0 %v9214_v7  ;;  %v9229_v5 = vld [vmem:[%s9951_s5 + $0x370] ss:$60 sps:$4 sm:$0xff]  }
 0x133   : > { %v9233_v6 = vld [vmem:[%s9951_s5 + $0x3cc] ss:$60 sps:$4 sm:$0xff]  }
 0x134   : > { %4841 = vmatpush1.bf16.msra.mxu1 %v9209_v8  ;;  %v9235_v7 = vld [vmem:[%s9951_s5 + $0x3ec] ss:$60 sps:$4 sm:$0xff]   ;;  %v9380_v8 = vld [vmem:[%s11227_s1 + $0x6d0] ss:$8 sps:$4 sm:$0xff]  }
 0x135   : > { %6093 = vmatpush1.bf16.msra.mxu0 %v9212_v9  ;;  %4842 = vmatprep.subr.bf16.mxu1 %v9228_v10  ;;  %v9382_v9 = vld [vmem:[%s11227_s1 + $0x6d4] ss:$8 sps:$4 sm:$0xff]   ;;  %v9237_v10 = vld [vmem:[%s9951_s5 + $0x3c8] ss:$60 sps:$4 sm:$0xff]  }
 0x136   : > { %6094 = vmatprep.subr.bf16.mxu0 %v9232_v13  ;;  %4574 = vmatmul.mubr.bf16.gmra.mrb[8].mxu1 %v9180_v11  ;;  %v9238_v11 = vld [vmem:[%s9951_s5 + $0x3e8] ss:$60 sps:$4 sm:$0xff]  }
 0x137   : > { %5826 = vmatmul.mubr.bf16.gmra.mrb[8].mxu0 %v9181_v12  ;;  %4583 = vmatprep.mubr.bf16.mxu1 %v9185_v14  ;;  %v9242_v12 = vld [vmem:[%s9951_s5 + $0x444] ss:$60 sps:$4 sm:$0xff]  }
 0x138   : > { %5835 = vmatprep.mubr.bf16.mxu0 %v9187_v15  ;;  %4843 = vmatpush1.bf16.msra.mxu1 %v9226_v16  ;;  %v9244_v13 = vld [vmem:[%s9951_s5 + $0x464] ss:$60 sps:$4 sm:$0xff]  }
 0x139   : > { %6095 = vmatpush1.bf16.msra.mxu0 %v9230_v17  ;;  %4844 = vmatprep.subr.bf16.mxu1 %v9241_v18  ;;  %v9389_v14 = vld [vmem:[%s11227_s1 + $0x2e0] ss:$8 sps:$4 sm:$0xff]   ;;  %v9391_v15 = vld [vmem:[%s11227_s1 + $0x2e4] ss:$8 sps:$4 sm:$0xff]  }
 0x13a   : > { %6096 = vmatprep.subr.bf16.mxu0 %v9250_v19  ;;  %v9392_v16 = vld [vmem:[%s11227_s1 + $0x6e0] ss:$8 sps:$4 sm:$0xff]   ;;  %v9394_v17 = vld [vmem:[%s11227_s1 + $0x6e4] ss:$8 sps:$4 sm:$0xff]  }
 0x13b   : > { %v9246_v18 = vld [vmem:[%s9951_s5 + $0x440] ss:$60 sps:$4 sm:$0xff]  }
 0x13c   : > { %4845 = vmatpush1.bf16.msra.mxu1 %v9239_v20  ;;  %v9247_v19 = vld [vmem:[%s9951_s5 + $0x460] ss:$60 sps:$4 sm:$0xff]  }
 0x13d   : > { %6097 = vmatpush1.bf16.msra.mxu0 %v9248_v21  ;;  %4846 = vmatprep.subr.bf16.mxu1 %v9259_v22  ;;  %v9251_v20 = vld [vmem:[%s9951_s5 + $0x4bc] ss:$60 sps:$4 sm:$0xff]  }
 0x13e   : > { %6098 = vmatprep.subr.bf16.mxu0 %v9262_v23  ;;  %4584 = vmatmul.mubr.bf16.gmra.mrb[12].mxu1 %v9189_v24  ;;  %v9253_v21 = vld [vmem:[%s9951_s5 + $0x4dc] ss:$60 sps:$4 sm:$0xff]   ;;  %v9263_v24 = vld [vmem:[%s9951_s5 + $0x534] ss:$60 sps:$4 sm:$0xff]  }
 0x13f   : > { %5836 = vmatmul.mubr.bf16.gmra.mrb[12].mxu0 %v9190_v25  ;;  %4593 = vmatprep.mubr.bf16.mxu1 %v9197_v26  ;;  %v9255_v22 = vld [vmem:[%s9951_s5 + $0x4b8] ss:$60 sps:$4 sm:$0xff]  }
 0x140   : > { %5845 = vmatprep.mubr.bf16.mxu0 %v9199_v27  ;;  %4847 = vmatpush1.bf16.msra.mxu1 %v9257_v28  ;;  %v9256_v23 = vld [vmem:[%s9951_s5 + $0x4d8] ss:$60 sps:$4 sm:$0xff]  }
 0x141   : > { %6099 = vmatpush1.bf16.msra.mxu0 %v9260_v29  ;;  %4848 = vmatprep.subr.bf16.mxu1 %v9277_v30  ;;  %v9265_v25 = vld [vmem:[%s9951_s5 + $0x554] ss:$60 sps:$4 sm:$0xff]  }
 0x142   : > { %6100 = vmatprep.subr.bf16.mxu0 %v9280_v31  ;;  %v9407_v26 = vld [vmem:[%s11227_s1 + $0x2f0] ss:$8 sps:$4 sm:$0xff]   ;;  %v9409_v27 = vld [vmem:[%s11227_s1 + $0x2f4] ss:$8 sps:$4 sm:$0xff]  }
 0x143   : > { %v9410_v28 = vld [vmem:[%s11227_s1 + $0x6f0] ss:$8 sps:$4 sm:$0xff]   ;;  %v9412_v29 = vld [vmem:[%s11227_s1 + $0x6f4] ss:$8 sps:$4 sm:$0xff]  }
 0x144   : > { %4849 = vmatpush1.bf16.msra.mxu1 %v9275_v32  ;;  %v9267_v30 = vld [vmem:[%s9951_s5 + $0x530] ss:$60 sps:$4 sm:$0xff]  }
 0x145   : > { %6101 = vmatpush1.bf16.msra.mxu0 %v9278_v33  ;;  %4850 = vmatprep.subr.bf16.mxu1 %v9294_v34  ;;  %v9268_v31 = vld [vmem:[%s9951_s5 + $0x550] ss:$60 sps:$4 sm:$0xff]   ;;  %v9273_v34 = vld [vmem:[%s9951_s5 + $0x5a8] ss:$60 sps:$4 sm:$0xff]  }
 0x146   : > { %6102 = vmatprep.subr.bf16.mxu0 %v9298_v37  ;;  %4594 = vmatmul.mubr.bf16.gmra.mrb[16].mxu1 %v9201_v35  ;;  %v9269_v32 = vld [vmem:[%s9951_s5 + $0x5ac] ss:$60 sps:$4 sm:$0xff]   ;;  %v9283_v37 = vld [vmem:[%s9951_s5 + $0x644] ss:$60 sps:$4 sm:$0xff]  }
 0x147   : > { %5846 = vmatmul.mubr.bf16.gmra.mrb[16].mxu0 %v9202_v36  ;;  %4603 = vmatprep.mubr.bf16.mxu1 %v9203_v38  ;;  %v9271_v33 = vld [vmem:[%s9951_s5 + $0x5cc] ss:$60 sps:$4 sm:$0xff]   ;;  %v9281_v36 = vld [vmem:[%s9951_s5 + $0x624] ss:$60 sps:$4 sm:$0xff]  }
 0x148   : > { %5855 = vmatprep.mubr.bf16.mxu0 %v9205_v39  ;;  %4851 = vmatpush1.bf16.msra.mxu1 %v9292_v40  ;;  %v9274_v35 = vld [vmem:[%s9951_s5 + $0x5c8] ss:$60 sps:$4 sm:$0xff]   ;;  %v9285_v40 = vld [vmem:[%s9951_s5 + $0x620] ss:$60 sps:$4 sm:$0xff]  }
 0x149   : > { %6103 = vmatpush1.bf16.msra.mxu0 %v9296_v41  ;;  %4852 = vmatprep.subr.bf16.mxu1 %v9307_v42  ;;  %v9427_v38 = vld [vmem:[%s11227_s1 + $0x304] ss:$8 sps:$4 sm:$0xff]   ;;  %v9286_v41 = vld [vmem:[%s9951_s5 + $0x640] ss:$60 sps:$4 sm:$0xff]  }
 0x14a   : > { %6104 = vmatprep.subr.bf16.mxu0 %v9316_v43  ;;  %v9430_v39 = vld [vmem:[%s11227_s1 + $0x704] ss:$8 sps:$4 sm:$0xff]   ;;  %v9287_v42 = vld [vmem:[%s9951_s5 + $0x69c] ss:$60 sps:$4 sm:$0xff]  }
 0x14b   : > { %v9289_v43 = vld [vmem:[%s9951_s5 + $0x6bc] ss:$60 sps:$4 sm:$0xff]  }
 0x14c   : > { %4853 = vmatpush1.bf16.msra.mxu1 %v9305_v44  ;;  %v9291_v44 = vld [vmem:[%s9951_s5 + $0x698] ss:$60 sps:$4 sm:$0xff]  }
 0x14d   : > { %6105 = vmatpush1.bf16.msra.mxu0 %v9314_v45  ;;  %4854 = vmatprep.subr.bf16.mxu1 %v9325_v46  ;;  %v9295_v45 = vld [vmem:[%s9951_s5 + $0x6b8] ss:$60 sps:$4 sm:$0xff]  }
 0x14e   : > { %6106 = vmatprep.subr.bf16.mxu0 %v9328_v47  ;;  %4604 = vmatmul.mubr.bf16.gmra.mrb[20].mxu1 %v9207_v48  ;;  %v9299_v46 = vld [vmem:[%s9951_s5 + $0x714] ss:$60 sps:$4 sm:$0xff]  }
 0x14f   : > { %5856 = vmatmul.mubr.bf16.gmra.mrb[20].mxu0 %v9208_v49  ;;  %4613 = vmatprep.mubr.bf16.mxu1 %v9215_v50  ;;  %v9301_v47 = vld [vmem:[%s9951_s5 + $0x734] ss:$60 sps:$4 sm:$0xff]   ;;  %v9308_v50 = vld [vmem:[%s9951_s5 + $0x78c] ss:$60 sps:$4 sm:$0xff]  }
 0x150   : > { %5865 = vmatprep.mubr.bf16.mxu0 %v9217_v51  ;;  %4855 = vmatpush1.bf16.msra.mxu1 %v9323_v52  ;;  %v9303_v48 = vld [vmem:[%s9951_s5 + $0x710] ss:$60 sps:$4 sm:$0xff]   ;;  %v9312_v52 = vld [vmem:[%s9951_s5 + $0x788] ss:$60 sps:$4 sm:$0xff]  }
 0x151   : > { %6107 = vmatpush1.bf16.msra.mxu0 %v9326_v53  ;;  %4856 = vmatprep.subr.bf16.mxu1 %v9343_v54  ;;  %v9304_v49 = vld [vmem:[%s9951_s5 + $0x730] ss:$60 sps:$4 sm:$0xff]   ;;  %v9313_v53 = vld [vmem:[%s9951_s5 + $0x7a8] ss:$60 sps:$4 sm:$0xff]  }
 0x152   : > { %6108 = vmatprep.subr.bf16.mxu0 %v9346_v55  ;;  %v9310_v51 = vld [vmem:[%s9951_s5 + $0x7ac] ss:$60 sps:$4 sm:$0xff]   ;;  %v9317_v54 = vld [vmem:[%s9951_s5 + $0x804] ss:$60 sps:$4 sm:$0xff]  }
 0x153   : > { %v9319_v55 = vld [vmem:[%s9951_s5 + $0x824] ss:$60 sps:$4 sm:$0xff]  }
 0x154   : > { %4857 = vmatpush1.bf16.msra.mxu1 %v9341_v56  ;;  %v9321_v56 = vld [vmem:[%s9951_s5 + $0x800] ss:$60 sps:$4 sm:$0xff]  }
 0x155   : > { %6109 = vmatpush1.bf16.msra.mxu0 %v9344_v57  ;;  %4858 = vmatprep.subr.bf16.mxu1 %v9360_v58  ;;  %v9322_v57 = vld [vmem:[%s9951_s5 + $0x820] ss:$60 sps:$4 sm:$0xff]  }
 0x156   : > { %6110 = vmatprep.subr.bf16.mxu0 %v9364_v61  ;;  %4614 = vmatmul.mubr.bf16.gmra.mrb[24].mxu1 %v9219_v59  ;;  %v9329_v58 = vld [vmem:[%s9951_s5 + $0x87c] ss:$60 sps:$4 sm:$0xff]  }
 0x157   : > { %5866 = vmatmul.mubr.bf16.gmra.mrb[24].mxu0 %v9220_v60  ;;  %4623 = vmatprep.mubr.bf16.mxu1 %v9221_v62  ;;  %v9331_v59 = vld [vmem:[%s9951_s5 + $0x89c] ss:$60 sps:$4 sm:$0xff]   ;;  %v9335_v62 = vld [vmem:[%s9951_s5 + $0x8f4] ss:$60 sps:$4 sm:$0xff]  }
 0x158   : > { %5875 = vmatprep.mubr.bf16.mxu0 %v9223_v63  ;;  %4859 = vmatpush1.bf16.msra.mxu1 %v9358_v0  ;;  %v9333_v60 = vld [vmem:[%s9951_s5 + $0x878] ss:$60 sps:$4 sm:$0xff]   ;;  %v9339_v0 = vld [vmem:[%s9951_s5 + $0x8f0] ss:$60 sps:$4 sm:$0xff]  }
 0x159   : > { %6111 = vmatpush1.bf16.msra.mxu0 %v9362_v1  ;;  %4860 = vmatprep.subr.bf16.mxu1 %v9373_v2  ;;  %v9334_v61 = vld [vmem:[%s9951_s5 + $0x898] ss:$60 sps:$4 sm:$0xff]   ;;  %v9340_v1 = vld [vmem:[%s9951_s5 + $0x910] ss:$60 sps:$4 sm:$0xff]  }
 0x15a   : > { %6112 = vmatprep.subr.bf16.mxu0 %v9382_v9  ;;  %v9337_v63 = vld [vmem:[%s9951_s5 + $0x914] ss:$60 sps:$4 sm:$0xff]   ;;  %v9347_v2 = vld [vmem:[%s9951_s5 + $0x96c] ss:$60 sps:$4 sm:$0xff]   ;;  %v9361_v9 = vld [vmem:[%s9951_s5 + $0xa00] ss:$60 sps:$4 sm:$0xff]  }
 0x15c   : > { %4861 = vmatpush1.bf16.msra.mxu1 %v9371_v3  ;;  %v9349_v3 = vld [vmem:[%s9951_s5 + $0x98c] ss:$60 sps:$4 sm:$0xff]  }
 0x15d   : > { %6113 = vmatpush1.bf16.msra.mxu0 %v9380_v8  ;;  %4862 = vmatprep.subr.bf16.mxu1 %v9391_v15  ;;  %v9357_v8 = vld [vmem:[%s9951_s5 + $0x9e0] ss:$60 sps:$4 sm:$0xff]   ;;  %v9376_v15 = vld [vmem:[%s9951_s5 + $0xaf4] ss:$60 sps:$4 sm:$0xff]  }
 0x15e   : > { %4624 = vmatmul.mubr.bf16.gmra.mrb[28].mxu1 %v9225_v4  ;;  %6114 = vmatprep.subr.bf16.mxu0 %v9394_v17  ;;  %v9351_v4 = vld [vmem:[%s9951_s5 + $0x968] ss:$60 sps:$4 sm:$0xff]   ;;  %v9379_v17 = vld [vmem:[%s9951_s5 + $0xaf0] ss:$60 sps:$4 sm:$0xff]  }
 0x15f   : > { %5876 = vmatmul.mubr.bf16.gmra.mrb[28].mxu0 %v9229_v5  ;;  %4633 = vmatprep.mubr.bf16.mxu1 %v9233_v6  ;;  %v9352_v5 = vld [vmem:[%s9951_s5 + $0x988] ss:$60 sps:$4 sm:$0xff]  }
 0x160   : > { %5885 = vmatprep.mubr.bf16.mxu0 %v9235_v7  ;;  %4863 = vmatpush1.bf16.msra.mxu1 %v9389_v14  ;;  %v9353_v6 = vld [vmem:[%s9951_s5 + $0x9e4] ss:$60 sps:$4 sm:$0xff]   ;;  %v9374_v14 = vld [vmem:[%s9951_s5 + $0xad4] ss:$60 sps:$4 sm:$0xff]  }
 0x161   : > { %6115 = vmatpush1.bf16.msra.mxu0 %v9392_v16  ;;  %4864 = vmatprep.subr.bf16.mxu1 %v9409_v27  ;;  %v9355_v7 = vld [vmem:[%s9951_s5 + $0xa04] ss:$60 sps:$4 sm:$0xff]   ;;  %v9378_v16 = vld [vmem:[%s9951_s5 + $0xad0] ss:$60 sps:$4 sm:$0xff]   ;;  %v9403_v27 = vld [vmem:[%s9951_s5 + $0xc5c] ss:$60 sps:$4 sm:$0xff]  }
 0x162   : > { %6116 = vmatprep.subr.bf16.mxu0 %v9412_v29  ;;  %v9406_v29 = vld [vmem:[%s9951_s5 + $0xc58] ss:$60 sps:$4 sm:$0xff]  }
 0x164   : > { %4865 = vmatpush1.bf16.msra.mxu1 %v9407_v26  ;;  %v9401_v26 = vld [vmem:[%s9951_s5 + $0xc3c] ss:$60 sps:$4 sm:$0xff]  }
 0x165   : > { %6117 = vmatpush1.bf16.msra.mxu0 %v9410_v28  ;;  %5147 = vmatprep.subr.bf16.mxu1 %v9427_v38  ;;  %v9405_v28 = vld [vmem:[%s9951_s5 + $0xc38] ss:$60 sps:$4 sm:$0xff]   ;;  %v9425_v38 = vld [vmem:[%s11227_s1 + $0x300] ss:$8 sps:$4 sm:$0xff]  }
 0x166   : > { %4634 = vmatmul.mubr.bf16.gmra.mrb[32].mxu1 %v9237_v10  ;;  %6399 = vmatprep.subr.bf16.mxu0 %v9430_v39  ;;  %v9365_v10 = vld [vmem:[%s9951_s5 + $0xa5c] ss:$60 sps:$4 sm:$0xff]   ;;  %v9428_v39 = vld [vmem:[%s11227_s1 + $0x700] ss:$8 sps:$4 sm:$0xff]  }
 0x167   : > { %5886 = vmatmul.mubr.bf16.gmra.mrb[32].mxu0 %v9238_v11  ;;  %4643 = vmatprep.mubr.bf16.mxu1 %v9242_v12  ;;  %v9367_v11 = vld [vmem:[%s9951_s5 + $0xa7c] ss:$60 sps:$4 sm:$0xff]  }
 0x168   : > { %5895 = vmatprep.mubr.bf16.mxu0 %v9244_v13  ;;  %v9369_v12 = vld [vmem:[%s9951_s5 + $0xa58] ss:$60 sps:$4 sm:$0xff]  }
 0x169   : > { %v9370_v13 = vld [vmem:[%s9951_s5 + $0xa78] ss:$60 sps:$4 sm:$0xff]  }
 0x16e   : > { %4644 = vmatmul.mubr.bf16.gmra.mrb[36].mxu1 %v9246_v18  ;;  %v9383_v18 = vld [vmem:[%s9951_s5 + $0xb4c] ss:$60 sps:$4 sm:$0xff]  }
 0x16f   : > { %5896 = vmatmul.mubr.bf16.gmra.mrb[36].mxu0 %v9247_v19  ;;  %4653 = vmatprep.mubr.bf16.mxu1 %v9251_v20  ;;  %v9385_v19 = vld [vmem:[%s9951_s5 + $0xb6c] ss:$60 sps:$4 sm:$0xff]  }
 0x170   : > { %5905 = vmatprep.mubr.bf16.mxu0 %v9253_v21  ;;  %v9387_v20 = vld [vmem:[%s9951_s5 + $0xb48] ss:$60 sps:$4 sm:$0xff]  }
 0x171   : > { %v9388_v21 = vld [vmem:[%s9951_s5 + $0xb68] ss:$60 sps:$4 sm:$0xff]  }
 0x176   : > { %4654 = vmatmul.mubr.bf16.gmra.mrb[40].mxu1 %v9255_v22  ;;  %v9395_v22 = vld [vmem:[%s9951_s5 + $0xbc4] ss:$60 sps:$4 sm:$0xff]  }
 0x177   : > { %5906 = vmatmul.mubr.bf16.gmra.mrb[40].mxu0 %v9256_v23  ;;  %4663 = vmatprep.mubr.bf16.mxu1 %v9263_v24  ;;  %v9397_v23 = vld [vmem:[%s9951_s5 + $0xbe4] ss:$60 sps:$4 sm:$0xff]  }
 0x178   : > { %5915 = vmatprep.mubr.bf16.mxu0 %v9265_v25  ;;  %v9399_v24 = vld [vmem:[%s9951_s5 + $0xbc0] ss:$60 sps:$4 sm:$0xff]  }
 0x179   : > { %v9400_v25 = vld [vmem:[%s9951_s5 + $0xbe0] ss:$60 sps:$4 sm:$0xff]  }
 0x17e   : > { %4664 = vmatmul.mubr.bf16.gmra.mrb[44].mxu1 %v9267_v30  ;;  %v9413_v30 = vld [vmem:[%s9951_s5 + $0xcb4] ss:$60 sps:$4 sm:$0xff]  }
 0x17f   : > { %5916 = vmatmul.mubr.bf16.gmra.mrb[44].mxu0 %v9268_v31  ;;  %4673 = vmatprep.mubr.bf16.mxu1 %v9269_v32  ;;  %v9415_v31 = vld [vmem:[%s9951_s5 + $0xcd4] ss:$60 sps:$4 sm:$0xff]  }
 0x180   : > { %5925 = vmatprep.mubr.bf16.mxu0 %v9271_v33  ;;  %v9417_v32 = vld [vmem:[%s9951_s5 + $0xcb0] ss:$60 sps:$4 sm:$0xff]  }
 0x181   : > { %v9418_v33 = vld [vmem:[%s9951_s5 + $0xcd0] ss:$60 sps:$4 sm:$0xff]  }
 0x186   : > { %4674 = vmatmul.mubr.bf16.gmra.mrb[48].mxu1 %v9273_v34  ;;  %v9421_v34 = vld [vmem:[%s9951_s5 + $0x14] ss:$60 sps:$4 sm:$0xff]  }
 0x187   : > { %5926 = vmatmul.mubr.bf16.gmra.mrb[48].mxu0 %v9274_v35  ;;  %4683 = vmatprep.mubr.bf16.mxu1 %v9281_v36  ;;  %v9424_v35 = vld [vmem:[%s9951_s5 + $0x34] ss:$60 sps:$4 sm:$0xff]  }
 0x188   : > { %5935 = vmatprep.mubr.bf16.mxu0 %v9283_v37  ;;  %v9419_v36 = vld [vmem:[%s9951_s5 + $0x10] ss:$60 sps:$4 sm:$0xff]  }
 0x189   : > { %v9422_v37 = vld [vmem:[%s9951_s5 + $0x30] ss:$60 sps:$4 sm:$0xff]  }
 0x18e   : > { %4684 = vmatmul.mubr.bf16.gmra.mrb[52].mxu1 %v9285_v40  ;;  %v9431_v40 = vld [vmem:[%s9951_s5 + $0x8c] ss:$60 sps:$4 sm:$0xff]  }
 0x18f   : > { %5936 = vmatmul.mubr.bf16.gmra.mrb[52].mxu0 %v9286_v41  ;;  %4693 = vmatprep.mubr.bf16.mxu1 %v9287_v42  ;;  %v9433_v41 = vld [vmem:[%s9951_s5 + $0xac] ss:$60 sps:$4 sm:$0xff]   ;;  %v9439_v42 = vld [vmem:[%s11227_s1 + $0x314] ss:$8 sps:$4 sm:$0xff]  }
 0x190   : > { %5945 = vmatprep.mubr.bf16.mxu0 %v9289_v43  ;;  %v9457_v43 = vld [vmem:[%s11227_s1 + $0x714] ss:$8 sps:$4 sm:$0xff]  }
 0x196   : > { %4694 = vmatmul.mubr.bf16.gmra.mrb[56].mxu1 %v9291_v44  ;;  %v9437_v44 = vld [vmem:[%s11227_s1 + $0x310] ss:$8 sps:$4 sm:$0xff]  }
 0x197   : > { %5946 = vmatmul.mubr.bf16.gmra.mrb[56].mxu0 %v9295_v45  ;;  %4703 = vmatprep.mubr.bf16.mxu1 %v9299_v46  ;;  %v9455_v45 = vld [vmem:[%s11227_s1 + $0x710] ss:$8 sps:$4 sm:$0xff]   ;;  %v9454_v46 = vld [vmem:[%s11227_s1 + $0x324] ss:$8 sps:$4 sm:$0xff]  }
 0x198   : > { %5955 = vmatprep.mubr.bf16.mxu0 %v9301_v47  ;;  %v9490_v47 = vld [vmem:[%s11227_s1 + $0x724] ss:$8 sps:$4 sm:$0xff]  }
 0x19e   : > { %4704 = vmatmul.mubr.bf16.gmra.mrb[60].mxu1 %v9303_v48  ;;  %v9435_v48 = vld [vmem:[%s9951_s5 + $0x88] ss:$60 sps:$4 sm:$0xff]  }
 0x19f   : > { %5956 = vmatmul.mubr.bf16.gmra.mrb[60].mxu0 %v9304_v49  ;;  %4713 = vmatprep.mubr.bf16.mxu1 %v9308_v50  ;;  %v9436_v49 = vld [vmem:[%s9951_s5 + $0xa8] ss:$60 sps:$4 sm:$0xff]  }
 0x1a0   : > { %5965 = vmatprep.mubr.bf16.mxu0 %v9310_v51  ;;  %v9440_v50 = vld [vmem:[%s9951_s5 + $0x104] ss:$60 sps:$4 sm:$0xff]  }
 0x1a1   : > { %v9442_v51 = vld [vmem:[%s9951_s5 + $0x124] ss:$60 sps:$4 sm:$0xff]  }
 0x1a6   : > { %4714 = vmatmul.mubr.bf16.gmra.mrb[64].mxu1 %v9312_v52  ;;  %v9452_v52 = vld [vmem:[%s11227_s1 + $0x320] ss:$8 sps:$4 sm:$0xff]  }
 0x1a7   : > { %5966 = vmatmul.mubr.bf16.gmra.mrb[64].mxu0 %v9313_v53  ;;  %4723 = vmatprep.mubr.bf16.mxu1 %v9317_v54  ;;  %v9488_v53 = vld [vmem:[%s11227_s1 + $0x720] ss:$8 sps:$4 sm:$0xff]   ;;  %v9472_v54 = vld [vmem:[%s11227_s1 + $0x334] ss:$8 sps:$4 sm:$0xff]  }
 0x1a8   : > { %5975 = vmatprep.mubr.bf16.mxu0 %v9319_v55  ;;  %v9517_v55 = vld [vmem:[%s11227_s1 + $0x734] ss:$8 sps:$4 sm:$0xff]  }
 0x1ae   : > { %4724 = vmatmul.mubr.bf16.gmra.mrb[68].mxu1 %v9321_v56  ;;  %v9470_v56 = vld [vmem:[%s11227_s1 + $0x330] ss:$8 sps:$4 sm:$0xff]  }
 0x1af   : > { %5976 = vmatmul.mubr.bf16.gmra.mrb[68].mxu0 %v9322_v57  ;;  %4733 = vmatprep.mubr.bf16.mxu1 %v9329_v58  ;;  %v9515_v57 = vld [vmem:[%s11227_s1 + $0x730] ss:$8 sps:$4 sm:$0xff]   ;;  %v9486_v58 = vld [vmem:[%s11227_s1 + $0x344] ss:$8 sps:$4 sm:$0xff]  }
 0x1b0   : > { %5985 = vmatprep.mubr.bf16.mxu0 %v9331_v59  ;;  %v9550_v59 = vld [vmem:[%s11227_s1 + $0x744] ss:$8 sps:$4 sm:$0xff]  }
 0x1b6   : > { %4734 = vmatmul.mubr.bf16.gmra.mrb[72].mxu1 %v9333_v60  ;;  %v9444_v60 = vld [vmem:[%s9951_s5 + $0x100] ss:$60 sps:$4 sm:$0xff]  }
 0x1b7   : > { %5986 = vmatmul.mubr.bf16.gmra.mrb[72].mxu0 %v9334_v61  ;;  %4743 = vmatprep.mubr.bf16.mxu1 %v9335_v62  ;;  %v9445_v61 = vld [vmem:[%s9951_s5 + $0x120] ss:$60 sps:$4 sm:$0xff]  }
 0x1b8   : > { %5995 = vmatprep.mubr.bf16.mxu0 %v9337_v63  ;;  %v9446_v62 = vld [vmem:[%s9951_s5 + $0x17c] ss:$60 sps:$4 sm:$0xff]  }
 0x1b9   : > { %v9448_v63 = vld [vmem:[%s9951_s5 + $0x19c] ss:$60 sps:$4 sm:$0xff]  }
 0x1be   : > { %4744 = vmatmul.mubr.bf16.gmra.mrb[76].mxu1 %v9339_v0  ;;  %v9484_v0 = vld [vmem:[%s11227_s1 + $0x340] ss:$8 sps:$4 sm:$0xff]  }
 0x1bf   : > { %5996 = vmatmul.mubr.bf16.gmra.mrb[76].mxu0 %v9340_v1  ;;  %4753 = vmatprep.mubr.bf16.mxu1 %v9347_v2  ;;  %v9548_v1 = vld [vmem:[%s11227_s1 + $0x740] ss:$8 sps:$4 sm:$0xff]   ;;  %v9499_v2 = vld [vmem:[%s11227_s1 + $0x354] ss:$8 sps:$4 sm:$0xff]  }
 0x1c0   : > { %6005 = vmatprep.mubr.bf16.mxu0 %v9349_v3  ;;  %v9577_v3 = vld [vmem:[%s11227_s1 + $0x754] ss:$8 sps:$4 sm:$0xff]  }
 0x1c6   : > { %4754 = vmatmul.mubr.bf16.gmra.mrb[80].mxu1 %v9351_v4  ;;  %v9497_v4 = vld [vmem:[%s11227_s1 + $0x350] ss:$8 sps:$4 sm:$0xff]  }
 0x1c7   : > { %6006 = vmatmul.mubr.bf16.gmra.mrb[80].mxu0 %v9352_v5  ;;  %4763 = vmatprep.mubr.bf16.mxu1 %v9353_v6  ;;  %v9575_v5 = vld [vmem:[%s11227_s1 + $0x750] ss:$8 sps:$4 sm:$0xff]   ;;  %v9514_v6 = vld [vmem:[%s11227_s1 + $0x364] ss:$8 sps:$4 sm:$0xff]  }
 0x1c8   : > { %6015 = vmatprep.mubr.bf16.mxu0 %v9355_v7  ;;  %v9450_v7 = vld [vmem:[%s9951_s5 + $0x178] ss:$60 sps:$4 sm:$0xff]  }
 0x1ce   : > { %4764 = vmatmul.mubr.bf16.gmra.mrb[84].mxu1 %v9357_v8  ;;  %v9451_v8 = vld [vmem:[%s9951_s5 + $0x198] ss:$60 sps:$4 sm:$0xff]  }
 0x1cf   : > { %6016 = vmatmul.mubr.bf16.gmra.mrb[84].mxu0 %v9361_v9  ;;  %4773 = vmatprep.mubr.bf16.mxu1 %v9365_v10  ;;  %v9458_v9 = vld [vmem:[%s9951_s5 + $0x1f4] ss:$60 sps:$4 sm:$0xff]  }
 0x1d0   : > { %6025 = vmatprep.mubr.bf16.mxu0 %v9367_v11  ;;  %v9460_v10 = vld [vmem:[%s9951_s5 + $0x214] ss:$60 sps:$4 sm:$0xff]   ;;  %v9512_v11 = vld [vmem:[%s11227_s1 + $0x360] ss:$8 sps:$4 sm:$0xff]  }
 0x1d6   : > { %4774 = vmatmul.mubr.bf16.gmra.mrb[88].mxu1 %v9369_v12  ;;  %v9532_v12 = vld [vmem:[%s11227_s1 + $0x374] ss:$8 sps:$4 sm:$0xff]  }
 0x1d7   : > { %6026 = vmatmul.mubr.bf16.gmra.mrb[88].mxu0 %v9370_v13  ;;  %4783 = vmatprep.mubr.bf16.mxu1 %v9374_v14  ;;  %v9530_v13 = vld [vmem:[%s11227_s1 + $0x370] ss:$8 sps:$4 sm:$0xff]   ;;  %v9546_v14 = vld [vmem:[%s11227_s1 + $0x384] ss:$8 sps:$4 sm:$0xff]  }
 0x1d8   : > { %6035 = vmatprep.mubr.bf16.mxu0 %v9376_v15  ;;  %v9462_v15 = vld [vmem:[%s9951_s5 + $0x1f0] ss:$60 sps:$4 sm:$0xff]  }
 0x1de   : > { %4784 = vmatmul.mubr.bf16.gmra.mrb[92].mxu1 %v9378_v16  ;;  %v9463_v16 = vld [vmem:[%s9951_s5 + $0x210] ss:$60 sps:$4 sm:$0xff]  }
 0x1df   : > { %6036 = vmatmul.mubr.bf16.gmra.mrb[92].mxu0 %v9379_v17  ;;  %4793 = vmatprep.mubr.bf16.mxu1 %v9383_v18  ;;  %v9464_v17 = vld [vmem:[%s9951_s5 + $0x26c] ss:$60 sps:$4 sm:$0xff]  }
 0x1e0   : > { %6045 = vmatprep.mubr.bf16.mxu0 %v9385_v19  ;;  %v9466_v18 = vld [vmem:[%s9951_s5 + $0x28c] ss:$60 sps:$4 sm:$0xff]  }
 0x1e1   : > { %v9544_v19 = vld [vmem:[%s11227_s1 + $0x380] ss:$8 sps:$4 sm:$0xff]  }
 0x1e6   : > { %4794 = vmatmul.mubr.bf16.gmra.mrb[96].mxu1 %v9387_v20  ;;  %v9559_v20 = vld [vmem:[%s11227_s1 + $0x394] ss:$8 sps:$4 sm:$0xff]  }
 0x1e7   : > { %6046 = vmatmul.mubr.bf16.gmra.mrb[96].mxu0 %v9388_v21  ;;  %4803 = vmatprep.mubr.bf16.mxu1 %v9395_v22  ;;  %v9557_v21 = vld [vmem:[%s11227_s1 + $0x390] ss:$8 sps:$4 sm:$0xff]   ;;  %v9574_v22 = vld [vmem:[%s11227_s1 + $0x3a4] ss:$8 sps:$4 sm:$0xff]  }
 0x1e8   : > { %6055 = vmatprep.mubr.bf16.mxu0 %v9397_v23  ;;  %v9468_v23 = vld [vmem:[%s9951_s5 + $0x268] ss:$60 sps:$4 sm:$0xff]  }
 0x1ee   : > { %4804 = vmatmul.mubr.bf16.gmra.mrb[100].mxu1 %v9399_v24  ;;  %v9469_v24 = vld [vmem:[%s9951_s5 + $0x288] ss:$60 sps:$4 sm:$0xff]  }
 0x1ef   : > { %6056 = vmatmul.mubr.bf16.gmra.mrb[100].mxu0 %v9400_v25  ;;  %4813 = vmatprep.mubr.bf16.mxu1 %v9401_v26  ;;  %v9473_v25 = vld [vmem:[%s9951_s5 + $0x2e4] ss:$60 sps:$4 sm:$0xff]  }
 0x1f0   : > { %6065 = vmatprep.mubr.bf16.mxu0 %v9403_v27  ;;  %v9475_v26 = vld [vmem:[%s9951_s5 + $0x304] ss:$60 sps:$4 sm:$0xff]  }
 0x1f1   : > { %v9572_v27 = vld [vmem:[%s11227_s1 + $0x3a0] ss:$8 sps:$4 sm:$0xff]  }
 0x1f6   : > { %4814 = vmatmul.mubr.bf16.gmra.mrb[104].mxu1 %v9405_v28  ;;  %v9592_v28 = vld [vmem:[%s11227_s1 + $0x3b4] ss:$8 sps:$4 sm:$0xff]  }
 0x1f7   : > { %6066 = vmatmul.mubr.bf16.gmra.mrb[104].mxu0 %v9406_v29  ;;  %4823 = vmatprep.mubr.bf16.mxu1 %v9413_v30  ;;  %v9608_v29 = vld [vmem:[%s11227_s1 + $0x760] ss:$8 sps:$4 sm:$0xff]   ;;  %v9610_v30 = vld [vmem:[%s11227_s1 + $0x764] ss:$8 sps:$4 sm:$0xff]  }
 0x1f8   : > { %6075 = vmatprep.mubr.bf16.mxu0 %v9415_v31  ;;  %v9590_v31 = vld [vmem:[%s11227_s1 + $0x3b0] ss:$8 sps:$4 sm:$0xff]  }
 0x1fe   : > { %4824 = vmatmul.mubr.bf16.gmra.mrb[108].mxu1 %v9417_v32  ;;  %v9606_v32 = vld [vmem:[%s11227_s1 + $0x3c4] ss:$8 sps:$4 sm:$0xff]  }
 0x1ff   : > { %6076 = vmatmul.mubr.bf16.gmra.mrb[108].mxu0 %v9418_v33  ;;  %4866 = vmatprep.mubr.bf16.mxu1 %v9421_v34  ;;  %v9477_v33 = vld [vmem:[%s9951_s5 + $0x2e0] ss:$60 sps:$4 sm:$0xff]  }
 0x200   : > { %6118 = vmatprep.mubr.bf16.mxu0 %v9424_v35  ;;  %v9478_v34 = vld [vmem:[%s9951_s5 + $0x300] ss:$60 sps:$4 sm:$0xff]  }
 0x201   : > { %v9479_v35 = vld [vmem:[%s9951_s5 + $0x35c] ss:$60 sps:$4 sm:$0xff]  }
 0x206   : > { %4867 = vmatmul.mubr.bf16.vlgmr.msra.gmra.mrb[0].mxu1 %v9419_v36  ;;  %v9481_v36 = vld [vmem:[%s9951_s5 + $0x37c] ss:$60 sps:$4 sm:$0xff]  }
 0x207   : > { %6119 = vmatmul.mubr.bf16.vlgmr.msra.gmra.mrb[0].mxu0 %v9422_v37  ;;  %5148 = vmatpush1.bf16.msra.mxu1 %v9425_v38  ;;  %v9604_v37 = vld [vmem:[%s11227_s1 + $0x3c0] ss:$8 sps:$4 sm:$0xff]   ;;  %v9619_v38 = vld [vmem:[%s11227_s1 + $0x3d4] ss:$8 sps:$4 sm:$0xff]  }
 0x208   : > { %6400 = vmatpush1.bf16.msra.mxu0 %v9428_v39  ;;  %4876 = vmatprep.mubr.bf16.mxu1 %v9431_v40  ;;  %v9617_v39 = vld [vmem:[%s11227_s1 + $0x3d0] ss:$8 sps:$4 sm:$0xff]  }
 0x209   : > { %6128 = vmatprep.mubr.bf16.mxu0 %v9433_v41  ;;  %5149 = vmatprep.subr.bf16.mxu1 %v9439_v42  ;;  %v9483_v40 = vld [vmem:[%s9951_s5 + $0x358] ss:$60 sps:$4 sm:$0xff]  }
 0x20a   : > { %6401 = vmatprep.subr.bf16.mxu0 %v9457_v43  ;;  %v9487_v41 = vld [vmem:[%s9951_s5 + $0x378] ss:$60 sps:$4 sm:$0xff]  }
 0x20b   : > { %5150 = vmatpush1.bf16.msra.mxu1 %v9437_v44  ;;  %v9491_v42 = vld [vmem:[%s9951_s5 + $0x3d4] ss:$60 sps:$4 sm:$0xff]  }
 0x20c   : > { %6402 = vmatpush1.bf16.msra.mxu0 %v9455_v45  ;;  %5151 = vmatprep.subr.bf16.mxu1 %v9454_v46  ;;  %v9493_v43 = vld [vmem:[%s9951_s5 + $0x3f4] ss:$60 sps:$4 sm:$0xff]   ;;  %v9500_v46 = vld [vmem:[%s9951_s5 + $0x44c] ss:$60 sps:$4 sm:$0xff]  }
 0x20d   : > { %6403 = vmatprep.subr.bf16.mxu0 %v9490_v47  ;;  %v9495_v44 = vld [vmem:[%s9951_s5 + $0x3d0] ss:$60 sps:$4 sm:$0xff]  }
 0x20e   : > { %4877 = vmatmul.mubr.bf16.gmra.mrb[4].mxu1 %v9435_v48  ;;  %v9496_v45 = vld [vmem:[%s9951_s5 + $0x3f0] ss:$60 sps:$4 sm:$0xff]   ;;  %v9632_v48 = vld [vmem:[%s11227_s1 + $0x3e0] ss:$8 sps:$4 sm:$0xff]  }
 0x20f   : > { %6129 = vmatmul.mubr.bf16.gmra.mrb[4].mxu0 %v9436_v49  ;;  %4886 = vmatprep.mubr.bf16.mxu1 %v9440_v50  ;;  %v9502_v47 = vld [vmem:[%s9951_s5 + $0x46c] ss:$60 sps:$4 sm:$0xff]   ;;  %v9635_v50 = vld [vmem:[%s11227_s1 + $0x770] ss:$8 sps:$4 sm:$0xff]  }
 0x210   : > { %6138 = vmatprep.mubr.bf16.mxu0 %v9442_v51  ;;  %5152 = vmatpush1.bf16.msra.mxu1 %v9452_v52  ;;  %v9634_v49 = vld [vmem:[%s11227_s1 + $0x3e4] ss:$8 sps:$4 sm:$0xff]   ;;  %v9637_v51 = vld [vmem:[%s11227_s1 + $0x774] ss:$8 sps:$4 sm:$0xff]  }
 0x211   : > { %6404 = vmatpush1.bf16.msra.mxu0 %v9488_v53  ;;  %5153 = vmatprep.subr.bf16.mxu1 %v9472_v54  ;;  %v9504_v52 = vld [vmem:[%s9951_s5 + $0x448] ss:$60 sps:$4 sm:$0xff]  }
 0x212   : > { %6405 = vmatprep.subr.bf16.mxu0 %v9517_v55  ;;  %v9505_v53 = vld [vmem:[%s9951_s5 + $0x468] ss:$60 sps:$4 sm:$0xff]  }
 0x213   : > { %v9506_v54 = vld [vmem:[%s9951_s5 + $0x4c4] ss:$60 sps:$4 sm:$0xff]  }
 0x214   : > { %5154 = vmatpush1.bf16.msra.mxu1 %v9470_v56  ;;  %v9508_v55 = vld [vmem:[%s9951_s5 + $0x4e4] ss:$60 sps:$4 sm:$0xff]  }
 0x215   : > { %6406 = vmatpush1.bf16.msra.mxu0 %v9515_v57  ;;  %5155 = vmatprep.subr.bf16.mxu1 %v9486_v58  ;;  %v9510_v56 = vld [vmem:[%s9951_s5 + $0x4c0] ss:$60 sps:$4 sm:$0xff]  }
 0x216   : > { %6407 = vmatprep.subr.bf16.mxu0 %v9550_v59  ;;  %4887 = vmatmul.mubr.bf16.gmra.mrb[8].mxu1 %v9444_v60  ;;  %v9511_v57 = vld [vmem:[%s9951_s5 + $0x4e0] ss:$60 sps:$4 sm:$0xff]   ;;  %v9650_v60 = vld [vmem:[%s11227_s1 + $0x3f0] ss:$8 sps:$4 sm:$0xff]  }
 0x217   : > { %6139 = vmatmul.mubr.bf16.gmra.mrb[8].mxu0 %v9445_v61  ;;  %4896 = vmatprep.mubr.bf16.mxu1 %v9446_v62  ;;  %v9518_v58 = vld [vmem:[%s9951_s5 + $0x53c] ss:$60 sps:$4 sm:$0xff]  }
 0x218   : > { %6148 = vmatprep.mubr.bf16.mxu0 %v9448_v63  ;;  %5156 = vmatpush1.bf16.msra.mxu1 %v9484_v0  ;;  %v9520_v59 = vld [vmem:[%s9951_s5 + $0x55c] ss:$60 sps:$4 sm:$0xff]   ;;  %v9524_v0 = vld [vmem:[%s9951_s5 + $0x5b4] ss:$60 sps:$4 sm:$0xff]  }
 0x219   : > { %6408 = vmatpush1.bf16.msra.mxu0 %v9548_v1  ;;  %5157 = vmatprep.subr.bf16.mxu1 %v9499_v2  ;;  %v9652_v61 = vld [vmem:[%s11227_s1 + $0x3f4] ss:$8 sps:$4 sm:$0xff]   ;;  %v9528_v2 = vld [vmem:[%s9951_s5 + $0x5b0] ss:$60 sps:$4 sm:$0xff]  }
 0x21a   : > { %6409 = vmatprep.subr.bf16.mxu0 %v9577_v3  ;;  %v9522_v62 = vld [vmem:[%s9951_s5 + $0x538] ss:$60 sps:$4 sm:$0xff]   ;;  %v9529_v3 = vld [vmem:[%s9951_s5 + $0x5d0] ss:$60 sps:$4 sm:$0xff]  }
 0x21b   : > { %v9523_v63 = vld [vmem:[%s9951_s5 + $0x558] ss:$60 sps:$4 sm:$0xff]  }
 0x21c   : > { %5158 = vmatpush1.bf16.msra.mxu1 %v9497_v4  ;;  %v9526_v1 = vld [vmem:[%s9951_s5 + $0x5d4] ss:$60 sps:$4 sm:$0xff]   ;;  %v9533_v4 = vld [vmem:[%s9951_s5 + $0x62c] ss:$60 sps:$4 sm:$0xff]  }
 0x21d   : > { %6410 = vmatpush1.bf16.msra.mxu0 %v9575_v5  ;;  %5159 = vmatprep.subr.bf16.mxu1 %v9514_v6  ;;  %v9535_v5 = vld [vmem:[%s9951_s5 + $0x64c] ss:$60 sps:$4 sm:$0xff]  }
 0x21e   : > { %4897 = vmatmul.mubr.bf16.gmra.mrb[12].mxu1 %v9450_v7  ;;  %6411 = vmatprep.subr.bf16.mxu0 %v9610_v30  ;;  %v9537_v6 = vld [vmem:[%s9951_s5 + $0x628] ss:$60 sps:$4 sm:$0xff]   ;;  %v9588_v30 = vld [vmem:[%s9951_s5 + $0x8f8] ss:$60 sps:$4 sm:$0xff]  }
 0x21f   : > { %6149 = vmatmul.mubr.bf16.gmra.mrb[12].mxu0 %v9451_v8  ;;  %4906 = vmatprep.mubr.bf16.mxu1 %v9458_v9  ;;  %v9538_v7 = vld [vmem:[%s9951_s5 + $0x648] ss:$60 sps:$4 sm:$0xff]  }
 0x220   : > { %6158 = vmatprep.mubr.bf16.mxu0 %v9460_v10  ;;  %5160 = vmatpush1.bf16.msra.mxu1 %v9512_v11  ;;  %v9539_v8 = vld [vmem:[%s9951_s5 + $0x6a4] ss:$60 sps:$4 sm:$0xff]  }
 0x221   : > { %5161 = vmatprep.subr.bf16.mxu1 %v9532_v12  ;;  %6412 = vmatpush1.bf16.msra.mxu0 %v9608_v29  ;;  %v9541_v9 = vld [vmem:[%s9951_s5 + $0x6c4] ss:$60 sps:$4 sm:$0xff]   ;;  %v9551_v12 = vld [vmem:[%s9951_s5 + $0x71c] ss:$60 sps:$4 sm:$0xff]  }
 0x222   : > { %6413 = vmatprep.subr.bf16.mxu0 %v9637_v51  ;;  %v9543_v10 = vld [vmem:[%s9951_s5 + $0x6a0] ss:$60 sps:$4 sm:$0xff]   ;;  %v9631_v51 = vld [vmem:[%s9951_s5 + $0xb70] ss:$60 sps:$4 sm:$0xff]  }
 0x223   : > { %v9547_v11 = vld [vmem:[%s9951_s5 + $0x6c0] ss:$60 sps:$4 sm:$0xff]  }
 0x224   : > { %5162 = vmatpush1.bf16.msra.mxu1 %v9530_v13  ;;  %v9553_v13 = vld [vmem:[%s9951_s5 + $0x73c] ss:$60 sps:$4 sm:$0xff]  }
 0x225   : > { %5163 = vmatprep.subr.bf16.mxu1 %v9546_v14  ;;  %6414 = vmatpush1.bf16.msra.mxu0 %v9635_v50  ;;  %v9555_v14 = vld [vmem:[%s9951_s5 + $0x718] ss:$60 sps:$4 sm:$0xff]   ;;  %v9630_v50 = vld [vmem:[%s9951_s5 + $0xb50] ss:$60 sps:$4 sm:$0xff]  }
 0x226   : > { %4907 = vmatmul.mubr.bf16.gmra.mrb[16].mxu1 %v9462_v15  ;;  %v9556_v15 = vld [vmem:[%s9951_s5 + $0x738] ss:$60 sps:$4 sm:$0xff]  }
 0x227   : > { %6159 = vmatmul.mubr.bf16.gmra.mrb[16].mxu0 %v9463_v16  ;;  %4916 = vmatprep.mubr.bf16.mxu1 %v9464_v17  ;;  %v9560_v16 = vld [vmem:[%s9951_s5 + $0x794] ss:$60 sps:$4 sm:$0xff]   ;;  %v9586_v29 = vld [vmem:[%s9951_s5 + $0x91c] ss:$60 sps:$4 sm:$0xff]  }
 0x228   : > { %6168 = vmatprep.mubr.bf16.mxu0 %v9466_v18  ;;  %5164 = vmatpush1.bf16.msra.mxu1 %v9544_v19  ;;  %v9562_v17 = vld [vmem:[%s9951_s5 + $0x7b4] ss:$60 sps:$4 sm:$0xff]  }
 0x229   : > { %5165 = vmatprep.subr.bf16.mxu1 %v9559_v20  ;;  %v9564_v18 = vld [vmem:[%s9951_s5 + $0x790] ss:$60 sps:$4 sm:$0xff]  }
 0x22a   : > { %v9565_v19 = vld [vmem:[%s9951_s5 + $0x7b0] ss:$60 sps:$4 sm:$0xff]  }
 0x22b   : > { %v9566_v20 = vld [vmem:[%s9951_s5 + $0x80c] ss:$60 sps:$4 sm:$0xff]  }
 0x22c   : > { %5166 = vmatpush1.bf16.msra.mxu1 %v9557_v21  ;;  %v9568_v21 = vld [vmem:[%s9951_s5 + $0x82c] ss:$60 sps:$4 sm:$0xff]  }
 0x22d   : > { %5167 = vmatprep.subr.bf16.mxu1 %v9574_v22  ;;  %v9570_v22 = vld [vmem:[%s9951_s5 + $0x808] ss:$60 sps:$4 sm:$0xff]  }
 0x22e   : > { %4917 = vmatmul.mubr.bf16.gmra.mrb[20].mxu1 %v9468_v23  ;;  %v9571_v23 = vld [vmem:[%s9951_s5 + $0x828] ss:$60 sps:$4 sm:$0xff]  }
 0x22f   : > { %6169 = vmatmul.mubr.bf16.gmra.mrb[20].mxu0 %v9469_v24  ;;  %4926 = vmatprep.mubr.bf16.mxu1 %v9473_v25  ;;  %v9578_v24 = vld [vmem:[%s9951_s5 + $0x884] ss:$60 sps:$4 sm:$0xff]  }
 0x230   : > { %6178 = vmatprep.mubr.bf16.mxu0 %v9475_v26  ;;  %5168 = vmatpush1.bf16.msra.mxu1 %v9572_v27  ;;  %v9580_v25 = vld [vmem:[%s9951_s5 + $0x8a4] ss:$60 sps:$4 sm:$0xff]  }
 0x231   : > { %5169 = vmatprep.subr.bf16.mxu1 %v9592_v28  ;;  %v9582_v26 = vld [vmem:[%s9951_s5 + $0x880] ss:$60 sps:$4 sm:$0xff]  }
 0x232   : > { %v9583_v27 = vld [vmem:[%s9951_s5 + $0x8a0] ss:$60 sps:$4 sm:$0xff]  }
 0x233   : > { %v9584_v28 = vld [vmem:[%s9951_s5 + $0x8fc] ss:$60 sps:$4 sm:$0xff]  }
 0x234   : > { %5170 = vmatpush1.bf16.msra.mxu1 %v9590_v31  ;;  %v9589_v31 = vld [vmem:[%s9951_s5 + $0x918] ss:$60 sps:$4 sm:$0xff]  }
 0x235   : > { %5171 = vmatprep.subr.bf16.mxu1 %v9606_v32  ;;  %v9593_v32 = vld [vmem:[%s9951_s5 + $0x974] ss:$60 sps:$4 sm:$0xff]  }
 0x236   : > { %4927 = vmatmul.mubr.bf16.gmra.mrb[24].mxu1 %v9477_v33  ;;  %v9595_v33 = vld [vmem:[%s9951_s5 + $0x994] ss:$60 sps:$4 sm:$0xff]  }
 0x237   : > { %6179 = vmatmul.mubr.bf16.gmra.mrb[24].mxu0 %v9478_v34  ;;  %4936 = vmatprep.mubr.bf16.mxu1 %v9479_v35  ;;  %v9597_v34 = vld [vmem:[%s9951_s5 + $0x970] ss:$60 sps:$4 sm:$0xff]  }
 0x238   : > { %6188 = vmatprep.mubr.bf16.mxu0 %v9481_v36  ;;  %5172 = vmatpush1.bf16.msra.mxu1 %v9604_v37  ;;  %v9598_v35 = vld [vmem:[%s9951_s5 + $0x990] ss:$60 sps:$4 sm:$0xff]  }
 0x239   : > { %5173 = vmatprep.subr.bf16.mxu1 %v9619_v38  ;;  %v9599_v36 = vld [vmem:[%s9951_s5 + $0x9ec] ss:$60 sps:$4 sm:$0xff]  }
 0x23a   : > { %v9601_v37 = vld [vmem:[%s9951_s5 + $0xa0c] ss:$60 sps:$4 sm:$0xff]  }
 0x23b   : > { %v9603_v38 = vld [vmem:[%s9951_s5 + $0x9e8] ss:$60 sps:$4 sm:$0xff]  }
 0x23c   : > { %5174 = vmatpush1.bf16.msra.mxu1 %v9617_v39  ;;  %v9607_v39 = vld [vmem:[%s9951_s5 + $0xa08] ss:$60 sps:$4 sm:$0xff]  }
 0x23d   : > { %5175 = vmatprep.subr.bf16.mxu1 %v9634_v49  ;;  %v9628_v49 = vld [vmem:[%s9951_s5 + $0xb74] ss:$60 sps:$4 sm:$0xff]  }
 0x23e   : > { %4937 = vmatmul.mubr.bf16.gmra.mrb[28].mxu1 %v9483_v40  ;;  %v9611_v40 = vld [vmem:[%s9951_s5 + $0xa64] ss:$60 sps:$4 sm:$0xff]  }
 0x23f   : > { %6189 = vmatmul.mubr.bf16.gmra.mrb[28].mxu0 %v9487_v41  ;;  %4946 = vmatprep.mubr.bf16.mxu1 %v9491_v42  ;;  %v9613_v41 = vld [vmem:[%s9951_s5 + $0xa84] ss:$60 sps:$4 sm:$0xff]  }
 0x240   : > { %6198 = vmatprep.mubr.bf16.mxu0 %v9493_v43  ;;  %5176 = vmatpush1.bf16.msra.mxu1 %v9632_v48  ;;  %v9615_v42 = vld [vmem:[%s9951_s5 + $0xa60] ss:$60 sps:$4 sm:$0xff]   ;;  %v9626_v48 = vld [vmem:[%s9951_s5 + $0xb54] ss:$60 sps:$4 sm:$0xff]  }
 0x241   : > { %5177 = vmatprep.subr.bf16.mxu1 %v9652_v61  ;;  %v9616_v43 = vld [vmem:[%s9951_s5 + $0xa80] ss:$60 sps:$4 sm:$0xff]  }
 0x242   : > { %v9655_v61 = vld [vmem:[%s9951_s5 + $0xcdc] ss:$60 sps:$4 sm:$0xff]  }
 0x244   : > { %5178 = vmatpush1.bf16.msra.mxu1 %v9650_v60  ;;  %v9653_v60 = vld [vmem:[%s9951_s5 + $0xcbc] ss:$60 sps:$4 sm:$0xff]  }
 0x246   : > { %4947 = vmatmul.mubr.bf16.gmra.mrb[32].mxu1 %v9495_v44  ;;  %v9620_v44 = vld [vmem:[%s9951_s5 + $0xadc] ss:$60 sps:$4 sm:$0xff]  }
 0x247   : > { %6199 = vmatmul.mubr.bf16.gmra.mrb[32].mxu0 %v9496_v45  ;;  %4956 = vmatprep.mubr.bf16.mxu1 %v9500_v46  ;;  %v9622_v45 = vld [vmem:[%s9951_s5 + $0xafc] ss:$60 sps:$4 sm:$0xff]  }
 0x248   : > { %6208 = vmatprep.mubr.bf16.mxu0 %v9502_v47  ;;  %v9624_v46 = vld [vmem:[%s9951_s5 + $0xad8] ss:$60 sps:$4 sm:$0xff]  }
 0x249   : > { %v9625_v47 = vld [vmem:[%s9951_s5 + $0xaf8] ss:$60 sps:$4 sm:$0xff]  }
 0x24e   : > { %4957 = vmatmul.mubr.bf16.gmra.mrb[36].mxu1 %v9504_v52  ;;  %v9638_v52 = vld [vmem:[%s9951_s5 + $0xbcc] ss:$60 sps:$4 sm:$0xff]  }
 0x24f   : > { %6209 = vmatmul.mubr.bf16.gmra.mrb[36].mxu0 %v9505_v53  ;;  %4966 = vmatprep.mubr.bf16.mxu1 %v9506_v54  ;;  %v9640_v53 = vld [vmem:[%s9951_s5 + $0xbec] ss:$60 sps:$4 sm:$0xff]  }
 0x250   : > { %6218 = vmatprep.mubr.bf16.mxu0 %v9508_v55  ;;  %v9642_v54 = vld [vmem:[%s9951_s5 + $0xbc8] ss:$60 sps:$4 sm:$0xff]  }
 0x251   : > { %v9643_v55 = vld [vmem:[%s9951_s5 + $0xbe8] ss:$60 sps:$4 sm:$0xff]  }
 0x256   : > { %4967 = vmatmul.mubr.bf16.gmra.mrb[40].mxu1 %v9510_v56  ;;  %v9644_v56 = vld [vmem:[%s9951_s5 + $0xc44] ss:$60 sps:$4 sm:$0xff]  }
 0x257   : > { %6219 = vmatmul.mubr.bf16.gmra.mrb[40].mxu0 %v9511_v57  ;;  %4976 = vmatprep.mubr.bf16.mxu1 %v9518_v58  ;;  %v9646_v57 = vld [vmem:[%s9951_s5 + $0xc64] ss:$60 sps:$4 sm:$0xff]  }
 0x258   : > { %6228 = vmatprep.mubr.bf16.mxu0 %v9520_v59  ;;  %v9648_v58 = vld [vmem:[%s9951_s5 + $0xc40] ss:$60 sps:$4 sm:$0xff]  }
 0x259   : > { %v9649_v59 = vld [vmem:[%s9951_s5 + $0xc60] ss:$60 sps:$4 sm:$0xff]  }
 0x25e   : > { %4977 = vmatmul.mubr.bf16.gmra.mrb[44].mxu1 %v9522_v62  ;;  %v9657_v62 = vld [vmem:[%s9951_s5 + $0xcb8] ss:$60 sps:$4 sm:$0xff]  }
 0x25f   : > { %6229 = vmatmul.mubr.bf16.gmra.mrb[44].mxu0 %v9523_v63  ;;  %4986 = vmatprep.mubr.bf16.mxu1 %v9524_v0  ;;  %v9658_v63 = vld [vmem:[%s9951_s5 + $0xcd8] ss:$60 sps:$4 sm:$0xff]  }
 0x260   : > { %6238 = vmatprep.mubr.bf16.mxu0 %v9526_v1  ;;  %v9661_v0 = vld [vmem:[%s9951_s5 + $0x1c] ss:$60 sps:$4 sm:$0xff]   ;;  %v9779_v1 = vmov 0  }
 0x266   : > { %4987 = vmatmul.mubr.bf16.gmra.mrb[48].mxu1 %v9528_v2  ;;  %v9659_v2 = vld [vmem:[%s9951_s5 + $0x18] ss:$60 sps:$4 sm:$0xff]  }
 0x267   : > { %6239 = vmatmul.mubr.bf16.gmra.mrb[48].mxu0 %v9529_v3  ;;  %4996 = vmatprep.mubr.bf16.mxu1 %v9533_v4  ;;  %v9662_v3 = vld [vmem:[%s9951_s5 + $0x38] ss:$60 sps:$4 sm:$0xff]  }
 0x268   : > { %6248 = vmatprep.mubr.bf16.mxu0 %v9535_v5  ;;  %v9663_v4 = vld [vmem:[%s9951_s5 + $0x94] ss:$60 sps:$4 sm:$0xff]  }
 0x269   : > { %v9665_v5 = vld [vmem:[%s9951_s5 + $0x90] ss:$60 sps:$4 sm:$0xff]  }
 0x26e   : > { %4997 = vmatmul.mubr.bf16.gmra.mrb[52].mxu1 %v9537_v6  ;;  %v9666_v6 = vld [vmem:[%s9951_s5 + $0xb0] ss:$60 sps:$4 sm:$0xff]  }
 0x26f   : > { %6249 = vmatmul.mubr.bf16.gmra.mrb[52].mxu0 %v9538_v7  ;;  %5006 = vmatprep.mubr.bf16.mxu1 %v9539_v8  ;;  %v9667_v7 = vld [vmem:[%s9951_s5 + $0x10c] ss:$60 sps:$4 sm:$0xff]  }
 0x270   : > { %6258 = vmatprep.mubr.bf16.mxu0 %v9541_v9  ;;  %v9669_v8 = vld [vmem:[%s9951_s5 + $0x108] ss:$60 sps:$4 sm:$0xff]  }
 0x271   : > { %v9670_v9 = vld [vmem:[%s9951_s5 + $0x128] ss:$60 sps:$4 sm:$0xff]  }
 0x276   : > { %5007 = vmatmul.mubr.bf16.gmra.mrb[56].mxu1 %v9543_v10  ;;  %v9671_v10 = vld [vmem:[%s9951_s5 + $0x184] ss:$60 sps:$4 sm:$0xff]  }
 0x277   : > { %6259 = vmatmul.mubr.bf16.gmra.mrb[56].mxu0 %v9547_v11  ;;  %5016 = vmatprep.mubr.bf16.mxu1 %v9551_v12  ;;  %v9673_v11 = vld [vmem:[%s9951_s5 + $0x180] ss:$60 sps:$4 sm:$0xff]  }
 0x278   : > { %6268 = vmatprep.mubr.bf16.mxu0 %v9553_v13  ;;  %v9674_v12 = vld [vmem:[%s9951_s5 + $0x1a0] ss:$60 sps:$4 sm:$0xff]  }
 0x279   : > { %v9675_v13 = vld [vmem:[%s9951_s5 + $0x1fc] ss:$60 sps:$4 sm:$0xff]  }
 0x27e   : > { %5017 = vmatmul.mubr.bf16.gmra.mrb[60].mxu1 %v9555_v14  ;;  %v9677_v14 = vld [vmem:[%s9951_s5 + $0x1f8] ss:$60 sps:$4 sm:$0xff]  }
 0x27f   : > { %6269 = vmatmul.mubr.bf16.gmra.mrb[60].mxu0 %v9556_v15  ;;  %5026 = vmatprep.mubr.bf16.mxu1 %v9560_v16  ;;  %v9678_v15 = vld [vmem:[%s9951_s5 + $0x218] ss:$60 sps:$4 sm:$0xff]  }
 0x280   : > { %6278 = vmatprep.mubr.bf16.mxu0 %v9562_v17  ;;  %v9679_v16 = vld [vmem:[%s9951_s5 + $0x274] ss:$60 sps:$4 sm:$0xff]  }
 0x281   : > { %v9681_v17 = vld [vmem:[%s9951_s5 + $0x270] ss:$60 sps:$4 sm:$0xff]  }
 0x286   : > { %5027 = vmatmul.mubr.bf16.gmra.mrb[64].mxu1 %v9564_v18  ;;  %v9682_v18 = vld [vmem:[%s9951_s5 + $0x290] ss:$60 sps:$4 sm:$0xff]  }
 0x287   : > { %6279 = vmatmul.mubr.bf16.gmra.mrb[64].mxu0 %v9565_v19  ;;  %5036 = vmatprep.mubr.bf16.mxu1 %v9566_v20  ;;  %v9683_v19 = vld [vmem:[%s9951_s5 + $0x2ec] ss:$60 sps:$4 sm:$0xff]  }
 0x288   : > { %6288 = vmatprep.mubr.bf16.mxu0 %v9568_v21  ;;  %v9685_v20 = vld [vmem:[%s9951_s5 + $0x2e8] ss:$60 sps:$4 sm:$0xff]  }
 0x289   : > { %v9686_v21 = vld [vmem:[%s9951_s5 + $0x308] ss:$60 sps:$4 sm:$0xff]  }
 0x28e   : > { %5037 = vmatmul.mubr.bf16.gmra.mrb[68].mxu1 %v9570_v22  ;;  %v9687_v22 = vld [vmem:[%s9951_s5 + $0x364] ss:$60 sps:$4 sm:$0xff]  }
 0x28f   : > { %6289 = vmatmul.mubr.bf16.gmra.mrb[68].mxu0 %v9571_v23  ;;  %5046 = vmatprep.mubr.bf16.mxu1 %v9578_v24  ;;  %v9689_v23 = vld [vmem:[%s9951_s5 + $0x360] ss:$60 sps:$4 sm:$0xff]  }
 0x290   : > { %6298 = vmatprep.mubr.bf16.mxu0 %v9580_v25  ;;  %v9690_v24 = vld [vmem:[%s9951_s5 + $0x380] ss:$60 sps:$4 sm:$0xff]  }
 0x291   : > { %v9691_v25 = vld [vmem:[%s9951_s5 + $0x3dc] ss:$60 sps:$4 sm:$0xff]  }
 0x296   : > { %5047 = vmatmul.mubr.bf16.gmra.mrb[72].mxu1 %v9582_v26  ;;  %v9693_v26 = vld [vmem:[%s9951_s5 + $0x3d8] ss:$60 sps:$4 sm:$0xff]  }
 0x297   : > { %6299 = vmatmul.mubr.bf16.gmra.mrb[72].mxu0 %v9583_v27  ;;  %5056 = vmatprep.mubr.bf16.mxu1 %v9584_v28  ;;  %v9694_v27 = vld [vmem:[%s9951_s5 + $0x3f8] ss:$60 sps:$4 sm:$0xff]  }
 0x298   : > { %6308 = vmatprep.mubr.bf16.mxu0 %v9586_v29  ;;  %v9695_v28 = vld [vmem:[%s9951_s5 + $0x454] ss:$60 sps:$4 sm:$0xff]  }
 0x299   : > { %v9697_v29 = vld [vmem:[%s9951_s5 + $0x450] ss:$60 sps:$4 sm:$0xff]  }
 0x29e   : > { %5057 = vmatmul.mubr.bf16.gmra.mrb[76].mxu1 %v9588_v30  ;;  %v9698_v30 = vld [vmem:[%s9951_s5 + $0x470] ss:$60 sps:$4 sm:$0xff]  }
 0x29f   : > { %6309 = vmatmul.mubr.bf16.gmra.mrb[76].mxu0 %v9589_v31  ;;  %5066 = vmatprep.mubr.bf16.mxu1 %v9593_v32  ;;  %v9699_v31 = vld [vmem:[%s9951_s5 + $0x4cc] ss:$60 sps:$4 sm:$0xff]  }
 0x2a0   : > { %6318 = vmatprep.mubr.bf16.mxu0 %v9595_v33  ;;  %v9701_v32 = vld [vmem:[%s9951_s5 + $0x4c8] ss:$60 sps:$4 sm:$0xff]  }
 0x2a1   : > { %v9702_v33 = vld [vmem:[%s9951_s5 + $0x4e8] ss:$60 sps:$4 sm:$0xff]  }
 0x2a6   : > { %5067 = vmatmul.mubr.bf16.gmra.mrb[80].mxu1 %v9597_v34  ;;  %v9703_v34 = vld [vmem:[%s9951_s5 + $0x544] ss:$60 sps:$4 sm:$0xff]  }
 0x2a7   : > { %6319 = vmatmul.mubr.bf16.gmra.mrb[80].mxu0 %v9598_v35  ;;  %5076 = vmatprep.mubr.bf16.mxu1 %v9599_v36  ;;  %v9705_v35 = vld [vmem:[%s9951_s5 + $0x540] ss:$60 sps:$4 sm:$0xff]  }
 0x2a8   : > { %6328 = vmatprep.mubr.bf16.mxu0 %v9601_v37  ;;  %v9706_v36 = vld [vmem:[%s9951_s5 + $0x560] ss:$60 sps:$4 sm:$0xff]  }
 0x2a9   : > { %v9707_v37 = vld [vmem:[%s9951_s5 + $0x5bc] ss:$60 sps:$4 sm:$0xff]  }
 0x2ae   : > { %5077 = vmatmul.mubr.bf16.gmra.mrb[84].mxu1 %v9603_v38  ;;  %v9709_v38 = vld [vmem:[%s9951_s5 + $0x5b8] ss:$60 sps:$4 sm:$0xff]  }
 0x2af   : > { %6329 = vmatmul.mubr.bf16.gmra.mrb[84].mxu0 %v9607_v39  ;;  %5086 = vmatprep.mubr.bf16.mxu1 %v9611_v40  ;;  %v9710_v39 = vld [vmem:[%s9951_s5 + $0x5d8] ss:$60 sps:$4 sm:$0xff]  }
 0x2b0   : > { %6338 = vmatprep.mubr.bf16.mxu0 %v9613_v41  ;;  %v9711_v40 = vld [vmem:[%s9951_s5 + $0x634] ss:$60 sps:$4 sm:$0xff]  }
 0x2b1   : > { %v9713_v41 = vld [vmem:[%s9951_s5 + $0x630] ss:$60 sps:$4 sm:$0xff]  }
 0x2b6   : > { %5087 = vmatmul.mubr.bf16.gmra.mrb[88].mxu1 %v9615_v42  ;;  %v9714_v42 = vld [vmem:[%s9951_s5 + $0x650] ss:$60 sps:$4 sm:$0xff]  }
 0x2b7   : > { %6339 = vmatmul.mubr.bf16.gmra.mrb[88].mxu0 %v9616_v43  ;;  %5096 = vmatprep.mubr.bf16.mxu1 %v9620_v44  ;;  %v9715_v43 = vld [vmem:[%s9951_s5 + $0x6ac] ss:$60 sps:$4 sm:$0xff]  }
 0x2b8   : > { %6348 = vmatprep.mubr.bf16.mxu0 %v9622_v45  ;;  %v9717_v44 = vld [vmem:[%s9951_s5 + $0x6a8] ss:$60 sps:$4 sm:$0xff]  }
 0x2b9   : > { %v9718_v45 = vld [vmem:[%s9951_s5 + $0x6c8] ss:$60 sps:$4 sm:$0xff]  }
 0x2be   : > { %5097 = vmatmul.mubr.bf16.gmra.mrb[92].mxu1 %v9624_v46  ;;  %v9719_v46 = vld [vmem:[%s9951_s5 + $0x724] ss:$60 sps:$4 sm:$0xff]  }
 0x2bf   : > { %6349 = vmatmul.mubr.bf16.gmra.mrb[92].mxu0 %v9625_v47  ;;  %5106 = vmatprep.mubr.bf16.mxu1 %v9626_v48  ;;  %v9721_v47 = vld [vmem:[%s9951_s5 + $0x720] ss:$60 sps:$4 sm:$0xff]  }
 0x2c0   : > { %6358 = vmatprep.mubr.bf16.mxu0 %v9628_v49  ;;  %v9722_v48 = vld [vmem:[%s9951_s5 + $0x740] ss:$60 sps:$4 sm:$0xff]  }
 0x2c1   : > { %v9723_v49 = vld [vmem:[%s9951_s5 + $0x79c] ss:$60 sps:$4 sm:$0xff]  }
 0x2c6   : > { %5107 = vmatmul.mubr.bf16.gmra.mrb[96].mxu1 %v9630_v50  ;;  %v9725_v50 = vld [vmem:[%s9951_s5 + $0x798] ss:$60 sps:$4 sm:$0xff]  }
 0x2c7   : > { %6359 = vmatmul.mubr.bf16.gmra.mrb[96].mxu0 %v9631_v51  ;;  %5116 = vmatprep.mubr.bf16.mxu1 %v9638_v52  ;;  %v9726_v51 = vld [vmem:[%s9951_s5 + $0x7b8] ss:$60 sps:$4 sm:$0xff]  }
 0x2c8   : > { %6368 = vmatprep.mubr.bf16.mxu0 %v9640_v53  ;;  %v9727_v52 = vld [vmem:[%s9951_s5 + $0x814] ss:$60 sps:$4 sm:$0xff]  }
 0x2c9   : > { %v9729_v53 = vld [vmem:[%s9951_s5 + $0x810] ss:$60 sps:$4 sm:$0xff]  }
 0x2ce   : > { %5117 = vmatmul.mubr.bf16.gmra.mrb[100].mxu1 %v9642_v54  ;;  %v9730_v54 = vld [vmem:[%s9951_s5 + $0x830] ss:$60 sps:$4 sm:$0xff]  }
 0x2cf   : > { %6369 = vmatmul.mubr.bf16.gmra.mrb[100].mxu0 %v9643_v55  ;;  %5126 = vmatprep.mubr.bf16.mxu1 %v9644_v56  ;;  %v9731_v55 = vld [vmem:[%s9951_s5 + $0x88c] ss:$60 sps:$4 sm:$0xff]  }
 0x2d0   : > { %6378 = vmatprep.mubr.bf16.mxu0 %v9646_v57  ;;  %v9733_v56 = vld [vmem:[%s9951_s5 + $0x888] ss:$60 sps:$4 sm:$0xff]  }
 0x2d1   : > { %v9734_v57 = vld [vmem:[%s9951_s5 + $0x8a8] ss:$60 sps:$4 sm:$0xff]  }
 0x2d6   : > { %5127 = vmatmul.mubr.bf16.gmra.mrb[104].mxu1 %v9648_v58  ;;  %v9735_v58 = vld [vmem:[%s9951_s5 + $0x904] ss:$60 sps:$4 sm:$0xff]  }
 0x2d7   : > { %6379 = vmatmul.mubr.bf16.gmra.mrb[104].mxu0 %v9649_v59  ;;  %5136 = vmatprep.mubr.bf16.mxu1 %v9653_v60  ;;  %v9737_v59 = vld [vmem:[%s9951_s5 + $0x900] ss:$60 sps:$4 sm:$0xff]  }
 0x2d8   : > { %6388 = vmatprep.mubr.bf16.mxu0 %v9655_v61  ;;  %v9738_v60 = vld [vmem:[%s9951_s5 + $0x920] ss:$60 sps:$4 sm:$0xff]  }
 0x2d9   : > { %v9739_v61 = vld [vmem:[%s9951_s5 + $0x97c] ss:$60 sps:$4 sm:$0xff]  }
 0x2de   : > { %5137 = vmatmul.mubr.bf16.gmra.mrb[108].mxu1 %v9657_v62  ;;  %v9741_v62 = vld [vmem:[%s9951_s5 + $0x978] ss:$60 sps:$4 sm:$0xff]  }
 0x2df   : > { %6389 = vmatmul.mubr.bf16.gmra.mrb[108].mxu0 %v9658_v63  ;;  %5179 = vmatprep.mubr.bf16.mxu1 %v9661_v0  ;;  %v9742_v63 = vld [vmem:[%s9951_s5 + $0x998] ss:$60 sps:$4 sm:$0xff]  }
 0x2e0   : > { %6431 = vmatprep.mubr.bf16.mxu0 %v9779_v1  ;;  %v9743_v0 = vld [vmem:[%s9951_s5 + $0x9f4] ss:$60 sps:$4 sm:$0xff]  }
 0x2e6   : > { %5180 = vmatmul.mubr.bf16.vlgmr.msra.gmra.mrb[0].mxu1 %v9659_v2  ;;  %v9745_v2 = vld [vmem:[%s9951_s5 + $0x9f0] ss:$60 sps:$4 sm:$0xff]  }
 0x2e7   : > { %6432 = vmatmul.mubr.bf16.vlgmr.msra.gmra.mrb[0].mxu0 %v9662_v3  ;;  %5189 = vmatprep.mubr.bf16.mxu1 %v9663_v4  ;;  %v9746_v3 = vld [vmem:[%s9951_s5 + $0xa10] ss:$60 sps:$4 sm:$0xff]  }
 0x2e8   : > { %6441 = vmatprep.mubr.bf16.mxu0 %v9779_v1  ;;  %v9747_v4 = vld [vmem:[%s9951_s5 + $0xa6c] ss:$60 sps:$4 sm:$0xff]  }
 0x2ee   : > { %5190 = vmatmul.mubr.bf16.gmra.mrb[4].mxu1 %v9665_v5  ;;  %v9749_v5 = vld [vmem:[%s9951_s5 + $0xa68] ss:$60 sps:$4 sm:$0xff]  }
 0x2ef   : > { %6442 = vmatmul.mubr.bf16.gmra.mrb[4].mxu0 %v9666_v6  ;;  %5199 = vmatprep.mubr.bf16.mxu1 %v9667_v7  ;;  %v9750_v6 = vld [vmem:[%s9951_s5 + $0xa88] ss:$60 sps:$4 sm:$0xff]  }
 0x2f0   : > { %6451 = vmatprep.mubr.bf16.mxu0 %v9779_v1  ;;  %v9751_v7 = vld [vmem:[%s9951_s5 + $0xae4] ss:$60 sps:$4 sm:$0xff]  }
 0x2f6   : > { %5200 = vmatmul.mubr.bf16.gmra.mrb[8].mxu1 %v9669_v8  ;;  %v9753_v8 = vld [vmem:[%s9951_s5 + $0xae0] ss:$60 sps:$4 sm:$0xff]  }
 0x2f7   : > { %6452 = vmatmul.mubr.bf16.gmra.mrb[8].mxu0 %v9670_v9  ;;  %5209 = vmatprep.mubr.bf16.mxu1 %v9671_v10  ;;  %v9754_v9 = vld [vmem:[%s9951_s5 + $0xb00] ss:$60 sps:$4 sm:$0xff]  }
 0x2f8   : > { %6461 = vmatprep.mubr.bf16.mxu0 %v9779_v1  ;;  %v9755_v10 = vld [vmem:[%s9951_s5 + $0xb5c] ss:$60 sps:$4 sm:$0xff]  }
 0x2fe   : > { %5210 = vmatmul.mubr.bf16.gmra.mrb[12].mxu1 %v9673_v11  ;;  %v9757_v11 = vld [vmem:[%s9951_s5 + $0xb58] ss:$60 sps:$4 sm:$0xff]  }
 0x2ff   : > { %6462 = vmatmul.mubr.bf16.gmra.mrb[12].mxu0 %v9674_v12  ;;  %5219 = vmatprep.mubr.bf16.mxu1 %v9675_v13  ;;  %v9758_v12 = vld [vmem:[%s9951_s5 + $0xb78] ss:$60 sps:$4 sm:$0xff]  }
 0x300   : > { %6471 = vmatprep.mubr.bf16.mxu0 %v9779_v1  ;;  %v9759_v13 = vld [vmem:[%s9951_s5 + $0xbd4] ss:$60 sps:$4 sm:$0xff]  }
 0x306   : > { %5220 = vmatmul.mubr.bf16.gmra.mrb[16].mxu1 %v9677_v14  ;;  %v9761_v14 = vld [vmem:[%s9951_s5 + $0xbd0] ss:$60 sps:$4 sm:$0xff]  }
 0x307   : > { %6472 = vmatmul.mubr.bf16.gmra.mrb[16].mxu0 %v9678_v15  ;;  %5229 = vmatprep.mubr.bf16.mxu1 %v9679_v16  ;;  %v9762_v15 = vld [vmem:[%s9951_s5 + $0xbf0] ss:$60 sps:$4 sm:$0xff]   ;;  %v870_v16 = vlaneseq }
 0x308   : > { %6481 = vmatprep.mubr.bf16.mxu0 %v9779_v1 }
 0x30e   : > { %5230 = vmatmul.mubr.bf16.gmra.mrb[20].mxu1 %v9681_v17  ;;  %v9763_v17 = vld [vmem:[%s9951_s5 + $0xc4c] ss:$60 sps:$4 sm:$0xff]  }
 0x30f   : > { %6482 = vmatmul.mubr.bf16.gmra.mrb[20].mxu0 %v9682_v18  ;;  %5239 = vmatprep.mubr.bf16.mxu1 %v9683_v19  ;;  %v871_v18 = vshrl.u32 %v870_v16, 7  ;;  %v9765_v19 = vld [vmem:[%s9951_s5 + $0xc48] ss:$60 sps:$4 sm:$0xff]  }
 0x310   : > { %6491 = vmatprep.mubr.bf16.mxu0 %v9779_v1 }
 0x316   : > { %5240 = vmatmul.mubr.bf16.gmra.mrb[24].mxu1 %v9685_v20  ;;  %v9766_v20 = vld [vmem:[%s9951_s5 + $0xc68] ss:$60 sps:$4 sm:$0xff]  }
 0x317   : > { %6492 = vmatmul.mubr.bf16.gmra.mrb[24].mxu0 %v9686_v21  ;;  %5249 = vmatprep.mubr.bf16.mxu1 %v9687_v22  ;;  %v872_v21 = vsub.s32 0, %v871_v18  ;;  %v868_v22 = vld [vmem:[%s11228_s2] sm:$0x3] }
 0x318   : > { %6501 = vmatprep.mubr.bf16.mxu0 %v9779_v1 }
 0x31e   : > { %5250 = vmatmul.mubr.bf16.gmra.mrb[28].mxu1 %v9689_v23  ;;  %v876_v23 = vsub.s32 1, %v871_v18 }
 0x31f   : > { %6502 = vmatmul.mubr.bf16.gmra.mrb[28].mxu0 %v9690_v24  ;;  %5259 = vmatprep.mubr.bf16.mxu1 %v9691_v25  ;;  %v9767_v24 = vld [vmem:[%s9951_s5 + $0xcc4] ss:$60 sps:$4 sm:$0xff]   ;;  %v10986_v25 = vrot.slane %v868_v22, %v872_v21 }
 0x320   : > { %6511 = vmatprep.mubr.bf16.mxu0 %v9779_v1 }
 0x326   : > { %5260 = vmatmul.mubr.bf16.gmra.mrb[32].mxu1 %v9693_v26  ;;  %v10988_v26 = vrot.slane %v868_v22, %v876_v23 }
 0x327   : > { %6512 = vmatmul.mubr.bf16.gmra.mrb[32].mxu0 %v9694_v27  ;;  %5269 = vmatprep.mubr.bf16.mxu1 %v9695_v28 }
 0x328   : > { %6521 = vmatprep.mubr.bf16.mxu0 %v9779_v1 }
 0x32e   : > { %5270 = vmatmul.mubr.bf16.gmra.mrb[36].mxu1 %v9697_v29 }
 0x32f   : > { %6522 = vmatmul.mubr.bf16.gmra.mrb[36].mxu0 %v9698_v30  ;;  %5279 = vmatprep.mubr.bf16.mxu1 %v9699_v31 }
 0x330   : > { %6531 = vmatprep.mubr.bf16.mxu0 %v9779_v1 }
 0x336   : > { %5280 = vmatmul.mubr.bf16.gmra.mrb[40].mxu1 %v9701_v32  ;;  %v9769_v32 = vld [vmem:[%s9951_s5 + $0xcc0] ss:$60 sps:$4 sm:$0xff]  }
 0x337   : > { %6532 = vmatmul.mubr.bf16.gmra.mrb[40].mxu0 %v9702_v33  ;;  %5289 = vmatprep.mubr.bf16.mxu1 %v9703_v34  ;;  %v9770_v33 = vld [vmem:[%s9951_s5 + $0xce0] ss:$60 sps:$4 sm:$0xff]  }
 0x338   : > { %6541 = vmatprep.mubr.bf16.mxu0 %v9779_v1 }
 0x33e   : > { %5290 = vmatmul.mubr.bf16.gmra.mrb[44].mxu1 %v9705_v35 }
 0x33f   : > { %6542 = vmatmul.mubr.bf16.gmra.mrb[44].mxu0 %v9706_v36  ;;  %5299 = vmatprep.mubr.bf16.mxu1 %v9707_v37 }
 0x340   : > { %6551 = vmatprep.mubr.bf16.mxu0 %v9779_v1 }
 0x346   : > { %5300 = vmatmul.mubr.bf16.gmra.mrb[48].mxu1 %v9709_v38 }
 0x347   : > { %6552 = vmatmul.mubr.bf16.gmra.mrb[48].mxu0 %v9710_v39  ;;  %5309 = vmatprep.mubr.bf16.mxu1 %v9711_v40 }
 0x348   : > { %6561 = vmatprep.mubr.bf16.mxu0 %v9779_v1 }
 0x34e   : > { %5310 = vmatmul.mubr.bf16.gmra.mrb[52].mxu1 %v9713_v41 }
 0x34f   : > { %6562 = vmatmul.mubr.bf16.gmra.mrb[52].mxu0 %v9714_v42  ;;  %5319 = vmatprep.mubr.bf16.mxu1 %v9715_v43 }
 0x350   : > { %6571 = vmatprep.mubr.bf16.mxu0 %v9779_v1 }
 0x356   : > { %5320 = vmatmul.mubr.bf16.gmra.mrb[56].mxu1 %v9717_v44 }
 0x357   : > { %6572 = vmatmul.mubr.bf16.gmra.mrb[56].mxu0 %v9718_v45  ;;  %5329 = vmatprep.mubr.bf16.mxu1 %v9719_v46 }
 0x358   : > { %6581 = vmatprep.mubr.bf16.mxu0 %v9779_v1 }
 0x35e   : > { %5330 = vmatmul.mubr.bf16.gmra.mrb[60].mxu1 %v9721_v47 }
 0x35f   : > { %6582 = vmatmul.mubr.bf16.gmra.mrb[60].mxu0 %v9722_v48  ;;  %5339 = vmatprep.mubr.bf16.mxu1 %v9723_v49 }
 0x360   : > { %6591 = vmatprep.mubr.bf16.mxu0 %v9779_v1 }
 0x366   : > { %5340 = vmatmul.mubr.bf16.gmra.mrb[64].mxu1 %v9725_v50 }
 0x367   : > { %6592 = vmatmul.mubr.bf16.gmra.mrb[64].mxu0 %v9726_v51  ;;  %5349 = vmatprep.mubr.bf16.mxu1 %v9727_v52 }
 0x368   : > { %6601 = vmatprep.mubr.bf16.mxu0 %v9779_v1 }
 0x36e   : > { %5350 = vmatmul.mubr.bf16.gmra.mrb[68].mxu1 %v9729_v53 }
 0x36f   : > { %6602 = vmatmul.mubr.bf16.gmra.mrb[68].mxu0 %v9730_v54  ;;  %5359 = vmatprep.mubr.bf16.mxu1 %v9731_v55 }
 0x370   : > { %6611 = vmatprep.mubr.bf16.mxu0 %v9779_v1 }
 0x376   : > { %5360 = vmatmul.mubr.bf16.gmra.mrb[72].mxu1 %v9733_v56 }
 0x377   : > { %6612 = vmatmul.mubr.bf16.gmra.mrb[72].mxu0 %v9734_v57  ;;  %5369 = vmatprep.mubr.bf16.mxu1 %v9735_v58 }
 0x378   : > { %6621 = vmatprep.mubr.bf16.mxu0 %v9779_v1 }
 0x37e   : > { %5370 = vmatmul.mubr.bf16.gmra.mrb[76].mxu1 %v9737_v59 }
 0x37f   : > { %6622 = vmatmul.mubr.bf16.gmra.mrb[76].mxu0 %v9738_v60  ;;  %5379 = vmatprep.mubr.bf16.mxu1 %v9739_v61 }
 0x380   : > { %6631 = vmatprep.mubr.bf16.mxu0 %v9779_v1 }
 0x386   : > { %5380 = vmatmul.mubr.bf16.gmra.mrb[80].mxu1 %v9741_v62 }
 0x387   : > { %6632 = vmatmul.mubr.bf16.gmra.mrb[80].mxu0 %v9742_v63  ;;  %5389 = vmatprep.mubr.bf16.mxu1 %v9743_v0 }
 0x388   : > { %6641 = vmatprep.mubr.bf16.mxu0 %v9779_v1 }
 0x38e   : > { %5390 = vmatmul.mubr.bf16.gmra.mrb[84].mxu1 %v9745_v2 }
 0x38f   : > { %6642 = vmatmul.mubr.bf16.gmra.mrb[84].mxu0 %v9746_v3  ;;  %5399 = vmatprep.mubr.bf16.mxu1 %v9747_v4 }
 0x390   : > { %6651 = vmatprep.mubr.bf16.mxu0 %v9779_v1 }
 0x396   : > { %5400 = vmatmul.mubr.bf16.gmra.mrb[88].mxu1 %v9749_v5 }
 0x397   : > { %6652 = vmatmul.mubr.bf16.gmra.mrb[88].mxu0 %v9750_v6  ;;  %5409 = vmatprep.mubr.bf16.mxu1 %v9751_v7 }
 0x398   : > { %6661 = vmatprep.mubr.bf16.mxu0 %v9779_v1 }
 0x39e   : > { %5410 = vmatmul.mubr.bf16.gmra.mrb[92].mxu1 %v9753_v8 }
 0x39f   : > { %6662 = vmatmul.mubr.bf16.gmra.mrb[92].mxu0 %v9754_v9  ;;  %5419 = vmatprep.mubr.bf16.mxu1 %v9755_v10 }
 0x3a0   : > { %6671 = vmatprep.mubr.bf16.mxu0 %v9779_v1 }
 0x3a6   : > { %5420 = vmatmul.mubr.bf16.gmra.mrb[96].mxu1 %v9757_v11 }
 0x3a7   : > { %6672 = vmatmul.mubr.bf16.gmra.mrb[96].mxu0 %v9758_v12  ;;  %5429 = vmatprep.mubr.bf16.mxu1 %v9759_v13 }
 0x3a8   : > { %6681 = vmatprep.mubr.bf16.mxu0 %v9779_v1 }
 0x3ae   : > { %5430 = vmatmul.mubr.bf16.gmra.mrb[100].mxu1 %v9761_v14 }
 0x3af   : > { %6682 = vmatmul.mubr.bf16.gmra.mrb[100].mxu0 %v9762_v15  ;;  %5439 = vmatprep.mubr.bf16.mxu1 %v9763_v17 }
 0x3b0   : > { %6691 = vmatprep.mubr.bf16.mxu0 %v9779_v1 }
 0x3b6   : > { %5440 = vmatmul.mubr.bf16.gmra.mrb[104].mxu1 %v9765_v19 }
 0x3b7   : > { %6692 = vmatmul.mubr.bf16.gmra.mrb[104].mxu0 %v9766_v20  ;;  %5449 = vmatprep.mubr.bf16.mxu1 %v9767_v24 }
 0x3b8   : > { %6701 = vmatprep.mubr.bf16.mxu0 %v9779_v1 }
 0x3b9   : > { %v5181_v27 = vpop.f32.mrb[0].mxu1 }
 0x3ba   : > { %v6433_v28 = vpop.f32.mrb[0].mxu0  ;;  %v7889_v29 = vadd.f32 %v5181_v27, %v10986_v25  ;;  %v5183_v30 = vpop.f32.mrb[1].mxu1 }
 0x3bb   : > { %v6435_v31 = vpop.f32.mrb[1].mxu0  ;;  %v7891_v34 = vadd.f32 %v5183_v30, %v10988_v26  ;;  %v5185_v35 = vpop.f32.mrb[2].mxu1 }
 0x3bc   : > { %v6437_v36 = vpop.f32.mrb[2].mxu0  ;;  %v7890_v37 = vadd.f32 %v7889_v29, %v6433_v28  ;;  %v7893_v38 = vadd.f32 %v5185_v35, %v10986_v25  ;;  %v5187_v39 = vpop.f32.mrb[3].mxu1 }
 0x3bd   : > { %v6439_v40 = vpop.f32.mrb[3].mxu0  ;;  %v7892_v41 = vadd.f32 %v7891_v34, %v6435_v31  ;;  %v7895_v1 = vadd.f32 %v5187_v39, %v10988_v26 }
 0x3be   : > { %vm6712_vm0 = vcmp.gt.f32.partialorder %v7890_v37, 0.0  ;;  %v6824_v42 = vmul.f32 0.01, %v7890_v37  ;;  %v7894_v43 = vadd.f32 %v7893_v38, %v6437_v36  ;;  %5450 = vmatmul.mubr.bf16.gmra.mrb[108].mxu1 %v9769_v32 }
 0x3bf   : > { %6702 = vmatmul.mubr.bf16.gmra.mrb[108].mxu0 %v9770_v33  ;;  %vm6713_vm1 = vcmp.gt.f32.partialorder %v7892_v41, 0.0  ;;  %v6825_v44 = vmul.f32 0.01, %v7892_v41  ;;  %v7896_v45 = vadd.f32 %v7895_v1, %v6439_v40 }
 0x3c0   : > { %v6936_v46 = vsel %vm6712_vm0, %v7890_v37, %v6824_v42  ;;  %vm6714_vm2 = vcmp.gt.f32.partialorder %v7894_v43, 0.0  ;;  %v6826_v47 = vmul.f32 0.01, %v7894_v43 }
 0x3c1   : > { %7048 = vst [vmem:[%s11001_s19] sm:$0xff] %v6936_v46  ;;  %v6937_v48 = vsel %vm6713_vm1, %v7892_v41, %v6825_v44  ;;  %vm6715_vm3 = vcmp.gt.f32.partialorder %v7896_v45, 0.0  ;;  %v6827_v49 = vmul.f32 0.01, %v7896_v45  ;;  %v5191_v50 = vpop.f32.mrb[4].mxu1 }
 0x3c2   : > { %v6443_v51 = vpop.f32.mrb[4].mxu0  ;;  %7049 = vst [vmem:[%s11001_s19 + $0x8] sm:$0xff] %v6937_v48  ;;  %v6938_v52 = vsel %vm6714_vm2, %v7894_v43, %v6826_v47  ;;  %v7897_v53 = vadd.f32 %v5191_v50, %v10986_v25  ;;  %v5193_v54 = vpop.f32.mrb[5].mxu1 }
 0x3c3   : > { %v6445_v55 = vpop.f32.mrb[5].mxu0  ;;  %7050 = vst [vmem:[%s11001_s19 + $0x10] sm:$0xff] %v6938_v52  ;;  %v6939_v56 = vsel %vm6715_vm3, %v7896_v45, %v6827_v49  ;;  %v7899_v57 = vadd.f32 %v5193_v54, %v10988_v26  ;;  %v5195_v58 = vpop.f32.mrb[6].mxu1 }
 0x3c4   : > { %v6447_v59 = vpop.f32.mrb[6].mxu0  ;;  %7051 = vst [vmem:[%s11001_s19 + $0x18] sm:$0xff] %v6939_v56  ;;  %v7898_v60 = vadd.f32 %v7897_v53, %v6443_v51  ;;  %v7901_v61 = vadd.f32 %v5195_v58, %v10986_v25  ;;  %v5197_v62 = vpop.f32.mrb[7].mxu1 }
 0x3c5   : > { %v6449_v63 = vpop.f32.mrb[7].mxu0  ;;  %v7900_v0 = vadd.f32 %v7899_v57, %v6445_v55  ;;  %v7903_v2 = vadd.f32 %v5197_v62, %v10988_v26 }
 0x3c6   : > { %vm6716_vm4 = vcmp.gt.f32.partialorder %v7898_v60, 0.0  ;;  %v6828_v3 = vmul.f32 0.01, %v7898_v60  ;;  %v7902_v4 = vadd.f32 %v7901_v61, %v6447_v59 }
 0x3c7   : > { %vm6717_vm5 = vcmp.gt.f32.partialorder %v7900_v0, 0.0  ;;  %v6829_v5 = vmul.f32 0.01, %v7900_v0  ;;  %v7904_v6 = vadd.f32 %v7903_v2, %v6449_v63 }
 0x3c8   : > { %v6940_v7 = vsel %vm6716_vm4, %v7898_v60, %v6828_v3  ;;  %vm6718_vm6 = vcmp.gt.f32.partialorder %v7902_v4, 0.0  ;;  %v6830_v8 = vmul.f32 0.01, %v7902_v4 }
 0x3c9   : > { %7052 = vst [vmem:[%s11001_s19 + $0x20] sm:$0xff] %v6940_v7  ;;  %v6941_v9 = vsel %vm6717_vm5, %v7900_v0, %v6829_v5  ;;  %vm6719_vm7 = vcmp.gt.f32.partialorder %v7904_v6, 0.0  ;;  %v6831_v10 = vmul.f32 0.01, %v7904_v6  ;;  %v5201_v11 = vpop.f32.mrb[8].mxu1 }
 0x3ca   : > { %v6453_v12 = vpop.f32.mrb[8].mxu0  ;;  %7053 = vst [vmem:[%s11001_s19 + $0x28] sm:$0xff] %v6941_v9  ;;  %v6942_v13 = vsel %vm6718_vm6, %v7902_v4, %v6830_v8  ;;  %v7905_v14 = vadd.f32 %v5201_v11, %v10986_v25  ;;  %v5203_v15 = vpop.f32.mrb[9].mxu1 }
 0x3cb   : > { %v6455_v16 = vpop.f32.mrb[9].mxu0  ;;  %7054 = vst [vmem:[%s11001_s19 + $0x30] sm:$0xff] %v6942_v13  ;;  %v6943_v17 = vsel %vm6719_vm7, %v7904_v6, %v6831_v10  ;;  %v7907_v18 = vadd.f32 %v5203_v15, %v10988_v26  ;;  %v5205_v19 = vpop.f32.mrb[10].mxu1 }
 0x3cc   : > { %v6457_v20 = vpop.f32.mrb[10].mxu0  ;;  %7055 = vst [vmem:[%s11001_s19 + $0x38] sm:$0xff] %v6943_v17  ;;  %v7906_v21 = vadd.f32 %v7905_v14, %v6453_v12  ;;  %v7909_v22 = vadd.f32 %v5205_v19, %v10986_v25  ;;  %v5207_v23 = vpop.f32.mrb[11].mxu1 }
 0x3cd   : > { %v6459_v24 = vpop.f32.mrb[11].mxu0  ;;  %v7908_v27 = vadd.f32 %v7907_v18, %v6455_v16  ;;  %v7911_v28 = vadd.f32 %v5207_v23, %v10988_v26 }
 0x3ce   : > { %vm6720_vm8 = vcmp.gt.f32.partialorder %v7906_v21, 0.0  ;;  %v6832_v29 = vmul.f32 0.01, %v7906_v21  ;;  %v7910_v30 = vadd.f32 %v7909_v22, %v6457_v20 }
 0x3cf   : > { %vm6721_vm9 = vcmp.gt.f32.partialorder %v7908_v27, 0.0  ;;  %v6833_v31 = vmul.f32 0.01, %v7908_v27  ;;  %v7912_v32 = vadd.f32 %v7911_v28, %v6459_v24 }
 0x3d0   : > { %v6944_v33 = vsel %vm6720_vm8, %v7906_v21, %v6832_v29  ;;  %vm6722_vm10 = vcmp.gt.f32.partialorder %v7910_v30, 0.0  ;;  %v6834_v34 = vmul.f32 0.01, %v7910_v30 }
 0x3d1   : > { %7056 = vst [vmem:[%s11001_s19 + $0x40] sm:$0xff] %v6944_v33  ;;  %v6945_v35 = vsel %vm6721_vm9, %v7908_v27, %v6833_v31  ;;  %vm6723_vm11 = vcmp.gt.f32.partialorder %v7912_v32, 0.0  ;;  %v6835_v36 = vmul.f32 0.01, %v7912_v32  ;;  %v5211_v37 = vpop.f32.mrb[12].mxu1 }
 0x3d2   : > { %v6463_v38 = vpop.f32.mrb[12].mxu0  ;;  %7057 = vst [vmem:[%s11001_s19 + $0x48] sm:$0xff] %v6945_v35  ;;  %v6946_v39 = vsel %vm6722_vm10, %v7910_v30, %v6834_v34  ;;  %v7913_v40 = vadd.f32 %v5211_v37, %v10986_v25  ;;  %v5213_v41 = vpop.f32.mrb[13].mxu1 }
 0x3d3   : > { %v6465_v1 = vpop.f32.mrb[13].mxu0  ;;  %7058 = vst [vmem:[%s11001_s19 + $0x50] sm:$0xff] %v6946_v39  ;;  %v6947_v42 = vsel %vm6723_vm11, %v7912_v32, %v6835_v36  ;;  %v7915_v43 = vadd.f32 %v5213_v41, %v10988_v26  ;;  %v5215_v44 = vpop.f32.mrb[14].mxu1 }
 0x3d4   : > { %v6467_v45 = vpop.f32.mrb[14].mxu0  ;;  %7059 = vst [vmem:[%s11001_s19 + $0x58] sm:$0xff] %v6947_v42  ;;  %v7914_v46 = vadd.f32 %v7913_v40, %v6463_v38  ;;  %v7917_v47 = vadd.f32 %v5215_v44, %v10986_v25  ;;  %v5217_v48 = vpop.f32.mrb[15].mxu1 }
 0x3d5   : > { %v6469_v49 = vpop.f32.mrb[15].mxu0  ;;  %v7916_v50 = vadd.f32 %v7915_v43, %v6465_v1  ;;  %v7919_v51 = vadd.f32 %v5217_v48, %v10988_v26 }
 0x3d6   : > { %vm6724_vm12 = vcmp.gt.f32.partialorder %v7914_v46, 0.0  ;;  %v6836_v52 = vmul.f32 0.01, %v7914_v46  ;;  %v7918_v53 = vadd.f32 %v7917_v47, %v6467_v45 }
 0x3d7   : > { %vm6725_vm13 = vcmp.gt.f32.partialorder %v7916_v50, 0.0  ;;  %v6837_v54 = vmul.f32 0.01, %v7916_v50  ;;  %v7920_v55 = vadd.f32 %v7919_v51, %v6469_v49 }
 0x3d8   : > { %v6948_v56 = vsel %vm6724_vm12, %v7914_v46, %v6836_v52  ;;  %vm6726_vm14 = vcmp.gt.f32.partialorder %v7918_v53, 0.0  ;;  %v6838_v57 = vmul.f32 0.01, %v7918_v53 }
 0x3d9   : > { %7060 = vst [vmem:[%s11001_s19 + $0x60] sm:$0xff] %v6948_v56  ;;  %v6949_v58 = vsel %vm6725_vm13, %v7916_v50, %v6837_v54  ;;  %vm6727_vm15 = vcmp.gt.f32.partialorder %v7920_v55, 0.0  ;;  %v6839_v59 = vmul.f32 0.01, %v7920_v55  ;;  %v5221_v60 = vpop.f32.mrb[16].mxu1 }
 0x3da   : > { %v6473_v61 = vpop.f32.mrb[16].mxu0  ;;  %7061 = vst [vmem:[%s11001_s19 + $0x68] sm:$0xff] %v6949_v58  ;;  %v6950_v62 = vsel %vm6726_vm14, %v7918_v53, %v6838_v57  ;;  %v7921_v63 = vadd.f32 %v5221_v60, %v10986_v25  ;;  %v5223_v0 = vpop.f32.mrb[17].mxu1 }
 0x3db   : > { %v6475_v2 = vpop.f32.mrb[17].mxu0  ;;  %7062 = vst [vmem:[%s11001_s19 + $0x70] sm:$0xff] %v6950_v62  ;;  %v6951_v3 = vsel %vm6727_vm15, %v7920_v55, %v6839_v59  ;;  %v7923_v4 = vadd.f32 %v5223_v0, %v10988_v26  ;;  %v5225_v5 = vpop.f32.mrb[18].mxu1 }
 0x3dc   : > { %v6477_v6 = vpop.f32.mrb[18].mxu0  ;;  %7063 = vst [vmem:[%s11001_s19 + $0x78] sm:$0xff] %v6951_v3  ;;  %v7922_v7 = vadd.f32 %v7921_v63, %v6473_v61  ;;  %v7925_v8 = vadd.f32 %v5225_v5, %v10986_v25  ;;  %v5227_v9 = vpop.f32.mrb[19].mxu1 }
 0x3dd   : > { %v6479_v10 = vpop.f32.mrb[19].mxu0  ;;  %v7924_v11 = vadd.f32 %v7923_v4, %v6475_v2  ;;  %v7927_v12 = vadd.f32 %v5227_v9, %v10988_v26 }
 0x3de   : > { %vm6728_vm0 = vcmp.gt.f32.partialorder %v7922_v7, 0.0  ;;  %v6840_v13 = vmul.f32 0.01, %v7922_v7  ;;  %v7926_v14 = vadd.f32 %v7925_v8, %v6477_v6 }
 0x3df   : > { %vm6729_vm1 = vcmp.gt.f32.partialorder %v7924_v11, 0.0  ;;  %v6841_v15 = vmul.f32 0.01, %v7924_v11  ;;  %v7928_v16 = vadd.f32 %v7927_v12, %v6479_v10 }
 0x3e0   : > { %v6952_v17 = vsel %vm6728_vm0, %v7922_v7, %v6840_v13  ;;  %vm6730_vm2 = vcmp.gt.f32.partialorder %v7926_v14, 0.0  ;;  %v6842_v18 = vmul.f32 0.01, %v7926_v14 }
 0x3e1   : > { %7064 = vst [vmem:[%s11001_s19 + $0x80] sm:$0xff] %v6952_v17  ;;  %v6953_v19 = vsel %vm6729_vm1, %v7924_v11, %v6841_v15  ;;  %vm6731_vm3 = vcmp.gt.f32.partialorder %v7928_v16, 0.0  ;;  %v6843_v20 = vmul.f32 0.01, %v7928_v16  ;;  %v5231_v21 = vpop.f32.mrb[20].mxu1 }
 0x3e2   : > { %v6483_v22 = vpop.f32.mrb[20].mxu0  ;;  %7065 = vst [vmem:[%s11001_s19 + $0x88] sm:$0xff] %v6953_v19  ;;  %v6954_v23 = vsel %vm6730_vm2, %v7926_v14, %v6842_v18  ;;  %v7929_v24 = vadd.f32 %v5231_v21, %v10986_v25  ;;  %v5233_v27 = vpop.f32.mrb[21].mxu1 }
 0x3e3   : > { %v6485_v28 = vpop.f32.mrb[21].mxu0  ;;  %7066 = vst [vmem:[%s11001_s19 + $0x90] sm:$0xff] %v6954_v23  ;;  %v6955_v29 = vsel %vm6731_vm3, %v7928_v16, %v6843_v20  ;;  %v7931_v30 = vadd.f32 %v5233_v27, %v10988_v26  ;;  %v5235_v31 = vpop.f32.mrb[22].mxu1 }
 0x3e4   : > { %v6487_v32 = vpop.f32.mrb[22].mxu0  ;;  %7067 = vst [vmem:[%s11001_s19 + $0x98] sm:$0xff] %v6955_v29  ;;  %v7930_v33 = vadd.f32 %v7929_v24, %v6483_v22  ;;  %v7933_v34 = vadd.f32 %v5235_v31, %v10986_v25  ;;  %v5237_v35 = vpop.f32.mrb[23].mxu1 }
 0x3e5   : > { %v6489_v36 = vpop.f32.mrb[23].mxu0  ;;  %v7932_v37 = vadd.f32 %v7931_v30, %v6485_v28  ;;  %v7935_v38 = vadd.f32 %v5237_v35, %v10988_v26 }
 0x3e6   : > { %vm6732_vm4 = vcmp.gt.f32.partialorder %v7930_v33, 0.0  ;;  %v6844_v39 = vmul.f32 0.01, %v7930_v33  ;;  %v7934_v40 = vadd.f32 %v7933_v34, %v6487_v32 }
 0x3e7   : > { %vm6733_vm5 = vcmp.gt.f32.partialorder %v7932_v37, 0.0  ;;  %v6845_v41 = vmul.f32 0.01, %v7932_v37  ;;  %v7936_v1 = vadd.f32 %v7935_v38, %v6489_v36 }
 0x3e8   : > { %v6956_v42 = vsel %vm6732_vm4, %v7930_v33, %v6844_v39  ;;  %vm6734_vm6 = vcmp.gt.f32.partialorder %v7934_v40, 0.0  ;;  %v6846_v43 = vmul.f32 0.01, %v7934_v40 }
 0x3e9   : > { %7068 = vst [vmem:[%s11001_s19 + $0xa0] sm:$0xff] %v6956_v42  ;;  %v6957_v44 = vsel %vm6733_vm5, %v7932_v37, %v6845_v41  ;;  %vm6735_vm7 = vcmp.gt.f32.partialorder %v7936_v1, 0.0  ;;  %v6847_v45 = vmul.f32 0.01, %v7936_v1  ;;  %v5241_v46 = vpop.f32.mrb[24].mxu1 }
 0x3ea   : > { %v6493_v47 = vpop.f32.mrb[24].mxu0  ;;  %7069 = vst [vmem:[%s11001_s19 + $0xa8] sm:$0xff] %v6957_v44  ;;  %v6958_v48 = vsel %vm6734_vm6, %v7934_v40, %v6846_v43  ;;  %v7937_v49 = vadd.f32 %v5241_v46, %v10986_v25  ;;  %v5243_v50 = vpop.f32.mrb[25].mxu1 }
 0x3eb   : > { %v6495_v51 = vpop.f32.mrb[25].mxu0  ;;  %7070 = vst [vmem:[%s11001_s19 + $0xb0] sm:$0xff] %v6958_v48  ;;  %v6959_v52 = vsel %vm6735_vm7, %v7936_v1, %v6847_v45  ;;  %v7939_v53 = vadd.f32 %v5243_v50, %v10988_v26  ;;  %v5245_v54 = vpop.f32.mrb[26].mxu1 }
 0x3ec   : > { %v6497_v55 = vpop.f32.mrb[26].mxu0  ;;  %7071 = vst [vmem:[%s11001_s19 + $0xb8] sm:$0xff] %v6959_v52  ;;  %v7938_v56 = vadd.f32 %v7937_v49, %v6493_v47  ;;  %v7941_v57 = vadd.f32 %v5245_v54, %v10986_v25  ;;  %v5247_v58 = vpop.f32.mrb[27].mxu1 }
 0x3ed   : > { %v6499_v59 = vpop.f32.mrb[27].mxu0  ;;  %v7940_v60 = vadd.f32 %v7939_v53, %v6495_v51  ;;  %v7943_v61 = vadd.f32 %v5247_v58, %v10988_v26 }
 0x3ee   : > { %vm6736_vm8 = vcmp.gt.f32.partialorder %v7938_v56, 0.0  ;;  %v6848_v62 = vmul.f32 0.01, %v7938_v56  ;;  %v7942_v63 = vadd.f32 %v7941_v57, %v6497_v55 }
 0x3ef   : > { %vm6737_vm9 = vcmp.gt.f32.partialorder %v7940_v60, 0.0  ;;  %v6849_v0 = vmul.f32 0.01, %v7940_v60  ;;  %v7944_v2 = vadd.f32 %v7943_v61, %v6499_v59 }
 0x3f0   : > { %v6960_v3 = vsel %vm6736_vm8, %v7938_v56, %v6848_v62  ;;  %vm6738_vm10 = vcmp.gt.f32.partialorder %v7942_v63, 0.0  ;;  %v6850_v4 = vmul.f32 0.01, %v7942_v63 }
 0x3f1   : > { %7072 = vst [vmem:[%s11001_s19 + $0xc0] sm:$0xff] %v6960_v3  ;;  %v6961_v5 = vsel %vm6737_vm9, %v7940_v60, %v6849_v0  ;;  %vm6739_vm11 = vcmp.gt.f32.partialorder %v7944_v2, 0.0  ;;  %v6851_v6 = vmul.f32 0.01, %v7944_v2  ;;  %v5251_v7 = vpop.f32.mrb[28].mxu1 }
 0x3f2   : > { %v6503_v8 = vpop.f32.mrb[28].mxu0  ;;  %7073 = vst [vmem:[%s11001_s19 + $0xc8] sm:$0xff] %v6961_v5  ;;  %v6962_v9 = vsel %vm6738_vm10, %v7942_v63, %v6850_v4  ;;  %v7945_v10 = vadd.f32 %v5251_v7, %v10986_v25  ;;  %v5253_v11 = vpop.f32.mrb[29].mxu1 }
 0x3f3   : > { %v6505_v12 = vpop.f32.mrb[29].mxu0  ;;  %7074 = vst [vmem:[%s11001_s19 + $0xd0] sm:$0xff] %v6962_v9  ;;  %v6963_v13 = vsel %vm6739_vm11, %v7944_v2, %v6851_v6  ;;  %v7947_v14 = vadd.f32 %v5253_v11, %v10988_v26  ;;  %v5255_v15 = vpop.f32.mrb[30].mxu1 }
 0x3f4   : > { %v6507_v16 = vpop.f32.mrb[30].mxu0  ;;  %7075 = vst [vmem:[%s11001_s19 + $0xd8] sm:$0xff] %v6963_v13  ;;  %v7946_v17 = vadd.f32 %v7945_v10, %v6503_v8  ;;  %v7949_v18 = vadd.f32 %v5255_v15, %v10986_v25  ;;  %v5257_v19 = vpop.f32.mrb[31].mxu1 }
 0x3f5   : > { %v6509_v20 = vpop.f32.mrb[31].mxu0  ;;  %v7948_v21 = vadd.f32 %v7947_v14, %v6505_v12  ;;  %v7951_v22 = vadd.f32 %v5257_v19, %v10988_v26 }
 0x3f6   : > { %vm6740_vm12 = vcmp.gt.f32.partialorder %v7946_v17, 0.0  ;;  %v6852_v23 = vmul.f32 0.01, %v7946_v17  ;;  %v7950_v24 = vadd.f32 %v7949_v18, %v6507_v16 }
 0x3f7   : > { %vm6741_vm13 = vcmp.gt.f32.partialorder %v7948_v21, 0.0  ;;  %v6853_v27 = vmul.f32 0.01, %v7948_v21  ;;  %v7952_v28 = vadd.f32 %v7951_v22, %v6509_v20 }
 0x3f8   : > { %v6964_v29 = vsel %vm6740_vm12, %v7946_v17, %v6852_v23  ;;  %vm6742_vm14 = vcmp.gt.f32.partialorder %v7950_v24, 0.0  ;;  %v6854_v30 = vmul.f32 0.01, %v7950_v24 }
 0x3f9   : > { %7076 = vst [vmem:[%s11001_s19 + $0xe0] sm:$0xff] %v6964_v29  ;;  %v6965_v31 = vsel %vm6741_vm13, %v7948_v21, %v6853_v27  ;;  %vm6743_vm15 = vcmp.gt.f32.partialorder %v7952_v28, 0.0  ;;  %v6855_v32 = vmul.f32 0.01, %v7952_v28  ;;  %v5261_v33 = vpop.f32.mrb[32].mxu1 }
 0x3fa   : > { %v6513_v34 = vpop.f32.mrb[32].mxu0  ;;  %7077 = vst [vmem:[%s11001_s19 + $0xe8] sm:$0xff] %v6965_v31  ;;  %v6966_v35 = vsel %vm6742_vm14, %v7950_v24, %v6854_v30  ;;  %v7953_v36 = vadd.f32 %v5261_v33, %v10986_v25  ;;  %v5263_v37 = vpop.f32.mrb[33].mxu1 }
 0x3fb   : > { %v6515_v38 = vpop.f32.mrb[33].mxu0  ;;  %7078 = vst [vmem:[%s11001_s19 + $0xf0] sm:$0xff] %v6966_v35  ;;  %v6967_v39 = vsel %vm6743_vm15, %v7952_v28, %v6855_v32  ;;  %v7955_v40 = vadd.f32 %v5263_v37, %v10988_v26  ;;  %v5265_v41 = vpop.f32.mrb[34].mxu1 }
 0x3fc   : > { %v6517_v1 = vpop.f32.mrb[34].mxu0  ;;  %7079 = vst [vmem:[%s11001_s19 + $0xf8] sm:$0xff] %v6967_v39  ;;  %v7954_v42 = vadd.f32 %v7953_v36, %v6513_v34  ;;  %v7957_v43 = vadd.f32 %v5265_v41, %v10986_v25  ;;  %v5267_v44 = vpop.f32.mrb[35].mxu1 }
 0x3fd   : > { %v6519_v45 = vpop.f32.mrb[35].mxu0  ;;  %v7956_v46 = vadd.f32 %v7955_v40, %v6515_v38  ;;  %v7959_v47 = vadd.f32 %v5267_v44, %v10988_v26 }
 0x3fe   : > { %vm6744_vm0 = vcmp.gt.f32.partialorder %v7954_v42, 0.0  ;;  %v6856_v48 = vmul.f32 0.01, %v7954_v42  ;;  %v7958_v49 = vadd.f32 %v7957_v43, %v6517_v1 }
 0x3ff   : > { %vm6745_vm1 = vcmp.gt.f32.partialorder %v7956_v46, 0.0  ;;  %v6857_v50 = vmul.f32 0.01, %v7956_v46  ;;  %v7960_v51 = vadd.f32 %v7959_v47, %v6519_v45 }
 0x400   : > { %v6968_v52 = vsel %vm6744_vm0, %v7954_v42, %v6856_v48  ;;  %vm6746_vm2 = vcmp.gt.f32.partialorder %v7958_v49, 0.0  ;;  %v6858_v53 = vmul.f32 0.01, %v7958_v49 }
 0x401   : > { %7080 = vst [vmem:[%s11001_s19 + $0x100] sm:$0xff] %v6968_v52  ;;  %v6969_v54 = vsel %vm6745_vm1, %v7956_v46, %v6857_v50  ;;  %vm6747_vm3 = vcmp.gt.f32.partialorder %v7960_v51, 0.0  ;;  %v6859_v55 = vmul.f32 0.01, %v7960_v51  ;;  %v5271_v56 = vpop.f32.mrb[36].mxu1 }
 0x402   : > { %v6523_v57 = vpop.f32.mrb[36].mxu0  ;;  %7081 = vst [vmem:[%s11001_s19 + $0x108] sm:$0xff] %v6969_v54  ;;  %v6970_v58 = vsel %vm6746_vm2, %v7958_v49, %v6858_v53  ;;  %v7961_v59 = vadd.f32 %v5271_v56, %v10986_v25  ;;  %v5273_v60 = vpop.f32.mrb[37].mxu1 }
 0x403   : > { %v6525_v61 = vpop.f32.mrb[37].mxu0  ;;  %7082 = vst [vmem:[%s11001_s19 + $0x110] sm:$0xff] %v6970_v58  ;;  %v6971_v62 = vsel %vm6747_vm3, %v7960_v51, %v6859_v55  ;;  %v7963_v63 = vadd.f32 %v5273_v60, %v10988_v26  ;;  %v5275_v0 = vpop.f32.mrb[38].mxu1 }
 0x404   : > { %v6527_v2 = vpop.f32.mrb[38].mxu0  ;;  %7083 = vst [vmem:[%s11001_s19 + $0x118] sm:$0xff] %v6971_v62  ;;  %v7962_v3 = vadd.f32 %v7961_v59, %v6523_v57  ;;  %v7965_v4 = vadd.f32 %v5275_v0, %v10986_v25  ;;  %v5277_v5 = vpop.f32.mrb[39].mxu1 }
 0x405   : > { %v6529_v6 = vpop.f32.mrb[39].mxu0  ;;  %v7964_v7 = vadd.f32 %v7963_v63, %v6525_v61  ;;  %v7967_v8 = vadd.f32 %v5277_v5, %v10988_v26 }
 0x406   : > { %vm6748_vm4 = vcmp.gt.f32.partialorder %v7962_v3, 0.0  ;;  %v6860_v9 = vmul.f32 0.01, %v7962_v3  ;;  %v7966_v10 = vadd.f32 %v7965_v4, %v6527_v2 }
 0x407   : > { %vm6749_vm5 = vcmp.gt.f32.partialorder %v7964_v7, 0.0  ;;  %v6861_v11 = vmul.f32 0.01, %v7964_v7  ;;  %v7968_v12 = vadd.f32 %v7967_v8, %v6529_v6 }
 0x408   : > { %v6972_v13 = vsel %vm6748_vm4, %v7962_v3, %v6860_v9  ;;  %vm6750_vm6 = vcmp.gt.f32.partialorder %v7966_v10, 0.0  ;;  %v6862_v14 = vmul.f32 0.01, %v7966_v10 }
 0x409   : > { %7084 = vst [vmem:[%s11001_s19 + $0x120] sm:$0xff] %v6972_v13  ;;  %v6973_v15 = vsel %vm6749_vm5, %v7964_v7, %v6861_v11  ;;  %vm6751_vm7 = vcmp.gt.f32.partialorder %v7968_v12, 0.0  ;;  %v6863_v16 = vmul.f32 0.01, %v7968_v12  ;;  %v5281_v17 = vpop.f32.mrb[40].mxu1 }
 0x40a   : > { %v6533_v18 = vpop.f32.mrb[40].mxu0  ;;  %7085 = vst [vmem:[%s11001_s19 + $0x128] sm:$0xff] %v6973_v15  ;;  %v6974_v19 = vsel %vm6750_vm6, %v7966_v10, %v6862_v14  ;;  %v7969_v20 = vadd.f32 %v5281_v17, %v10986_v25  ;;  %v5283_v21 = vpop.f32.mrb[41].mxu1 }
 0x40b   : > { %v6535_v22 = vpop.f32.mrb[41].mxu0  ;;  %7086 = vst [vmem:[%s11001_s19 + $0x130] sm:$0xff] %v6974_v19  ;;  %v6975_v23 = vsel %vm6751_vm7, %v7968_v12, %v6863_v16  ;;  %v7971_v24 = vadd.f32 %v5283_v21, %v10988_v26  ;;  %v5285_v27 = vpop.f32.mrb[42].mxu1 }
 0x40c   : > { %v6537_v28 = vpop.f32.mrb[42].mxu0  ;;  %7087 = vst [vmem:[%s11001_s19 + $0x138] sm:$0xff] %v6975_v23  ;;  %v7970_v29 = vadd.f32 %v7969_v20, %v6533_v18  ;;  %v7973_v30 = vadd.f32 %v5285_v27, %v10986_v25  ;;  %v5287_v31 = vpop.f32.mrb[43].mxu1 }
 0x40d   : > { %v6539_v32 = vpop.f32.mrb[43].mxu0  ;;  %v7972_v33 = vadd.f32 %v7971_v24, %v6535_v22  ;;  %v7975_v34 = vadd.f32 %v5287_v31, %v10988_v26 }
 0x40e   : > { %vm6752_vm8 = vcmp.gt.f32.partialorder %v7970_v29, 0.0  ;;  %v6864_v35 = vmul.f32 0.01, %v7970_v29  ;;  %v7974_v36 = vadd.f32 %v7973_v30, %v6537_v28 }
 0x40f   : > { %vm6753_vm9 = vcmp.gt.f32.partialorder %v7972_v33, 0.0  ;;  %v6865_v37 = vmul.f32 0.01, %v7972_v33  ;;  %v7976_v38 = vadd.f32 %v7975_v34, %v6539_v32 }
 0x410   : > { %v6976_v39 = vsel %vm6752_vm8, %v7970_v29, %v6864_v35  ;;  %vm6754_vm10 = vcmp.gt.f32.partialorder %v7974_v36, 0.0  ;;  %v6866_v40 = vmul.f32 0.01, %v7974_v36 }
 0x411   : > { %7088 = vst [vmem:[%s11001_s19 + $0x140] sm:$0xff] %v6976_v39  ;;  %v6977_v41 = vsel %vm6753_vm9, %v7972_v33, %v6865_v37  ;;  %vm6755_vm11 = vcmp.gt.f32.partialorder %v7976_v38, 0.0  ;;  %v6867_v1 = vmul.f32 0.01, %v7976_v38  ;;  %v5291_v42 = vpop.f32.mrb[44].mxu1 }
 0x412   : > { %v6543_v43 = vpop.f32.mrb[44].mxu0  ;;  %7089 = vst [vmem:[%s11001_s19 + $0x148] sm:$0xff] %v6977_v41  ;;  %v6978_v44 = vsel %vm6754_vm10, %v7974_v36, %v6866_v40  ;;  %v7977_v45 = vadd.f32 %v5291_v42, %v10986_v25  ;;  %v5293_v46 = vpop.f32.mrb[45].mxu1 }
 0x413   : > { %v6545_v47 = vpop.f32.mrb[45].mxu0  ;;  %7090 = vst [vmem:[%s11001_s19 + $0x150] sm:$0xff] %v6978_v44  ;;  %v6979_v48 = vsel %vm6755_vm11, %v7976_v38, %v6867_v1  ;;  %v7979_v49 = vadd.f32 %v5293_v46, %v10988_v26  ;;  %v5295_v50 = vpop.f32.mrb[46].mxu1 }
 0x414   : > { %v6547_v51 = vpop.f32.mrb[46].mxu0  ;;  %7091 = vst [vmem:[%s11001_s19 + $0x158] sm:$0xff] %v6979_v48  ;;  %v7978_v52 = vadd.f32 %v7977_v45, %v6543_v43  ;;  %v7981_v53 = vadd.f32 %v5295_v50, %v10986_v25  ;;  %v5297_v54 = vpop.f32.mrb[47].mxu1 }
 0x415   : > { %v6549_v55 = vpop.f32.mrb[47].mxu0  ;;  %v7980_v56 = vadd.f32 %v7979_v49, %v6545_v47  ;;  %v7983_v57 = vadd.f32 %v5297_v54, %v10988_v26 }
 0x416   : > { %vm6756_vm12 = vcmp.gt.f32.partialorder %v7978_v52, 0.0  ;;  %v6868_v58 = vmul.f32 0.01, %v7978_v52  ;;  %v7982_v59 = vadd.f32 %v7981_v53, %v6547_v51 }
 0x417   : > { %vm6757_vm13 = vcmp.gt.f32.partialorder %v7980_v56, 0.0  ;;  %v6869_v60 = vmul.f32 0.01, %v7980_v56  ;;  %v7984_v61 = vadd.f32 %v7983_v57, %v6549_v55 }
 0x418   : > { %v6980_v62 = vsel %vm6756_vm12, %v7978_v52, %v6868_v58  ;;  %vm6758_vm14 = vcmp.gt.f32.partialorder %v7982_v59, 0.0  ;;  %v6870_v63 = vmul.f32 0.01, %v7982_v59 }
 0x419   : > { %7092 = vst [vmem:[%s11001_s19 + $0x160] sm:$0xff] %v6980_v62  ;;  %v6981_v0 = vsel %vm6757_vm13, %v7980_v56, %v6869_v60  ;;  %vm6759_vm15 = vcmp.gt.f32.partialorder %v7984_v61, 0.0  ;;  %v6871_v2 = vmul.f32 0.01, %v7984_v61  ;;  %v5301_v3 = vpop.f32.mrb[48].mxu1 }
 0x41a   : > { %v6553_v4 = vpop.f32.mrb[48].mxu0  ;;  %7093 = vst [vmem:[%s11001_s19 + $0x168] sm:$0xff] %v6981_v0  ;;  %v6982_v5 = vsel %vm6758_vm14, %v7982_v59, %v6870_v63  ;;  %v7985_v6 = vadd.f32 %v5301_v3, %v10986_v25  ;;  %v5303_v7 = vpop.f32.mrb[49].mxu1 }
 0x41b   : > { %v6555_v8 = vpop.f32.mrb[49].mxu0  ;;  %7094 = vst [vmem:[%s11001_s19 + $0x170] sm:$0xff] %v6982_v5  ;;  %v6983_v9 = vsel %vm6759_vm15, %v7984_v61, %v6871_v2  ;;  %v7987_v10 = vadd.f32 %v5303_v7, %v10988_v26  ;;  %v5305_v11 = vpop.f32.mrb[50].mxu1 }
 0x41c   : > { %v6557_v12 = vpop.f32.mrb[50].mxu0  ;;  %7095 = vst [vmem:[%s11001_s19 + $0x178] sm:$0xff] %v6983_v9  ;;  %v7986_v13 = vadd.f32 %v7985_v6, %v6553_v4  ;;  %v7989_v14 = vadd.f32 %v5305_v11, %v10986_v25  ;;  %v5307_v15 = vpop.f32.mrb[51].mxu1 }
 0x41d   : > { %v6559_v16 = vpop.f32.mrb[51].mxu0  ;;  %v7988_v17 = vadd.f32 %v7987_v10, %v6555_v8  ;;  %v7991_v18 = vadd.f32 %v5307_v15, %v10988_v26 }
 0x41e   : > { %vm6760_vm0 = vcmp.gt.f32.partialorder %v7986_v13, 0.0  ;;  %v6872_v19 = vmul.f32 0.01, %v7986_v13  ;;  %v7990_v20 = vadd.f32 %v7989_v14, %v6557_v12 }
 0x41f   : > { %vm6761_vm1 = vcmp.gt.f32.partialorder %v7988_v17, 0.0  ;;  %v6873_v21 = vmul.f32 0.01, %v7988_v17  ;;  %v7992_v22 = vadd.f32 %v7991_v18, %v6559_v16 }
 0x420   : > { %v6984_v23 = vsel %vm6760_vm0, %v7986_v13, %v6872_v19  ;;  %vm6762_vm2 = vcmp.gt.f32.partialorder %v7990_v20, 0.0  ;;  %v6874_v24 = vmul.f32 0.01, %v7990_v20 }
 0x421   : > { %7096 = vst [vmem:[%s11001_s19 + $0x180] sm:$0xff] %v6984_v23  ;;  %v6985_v27 = vsel %vm6761_vm1, %v7988_v17, %v6873_v21  ;;  %vm6763_vm3 = vcmp.gt.f32.partialorder %v7992_v22, 0.0  ;;  %v6875_v28 = vmul.f32 0.01, %v7992_v22  ;;  %v5311_v29 = vpop.f32.mrb[52].mxu1 }
 0x422   : > { %v6563_v30 = vpop.f32.mrb[52].mxu0  ;;  %7097 = vst [vmem:[%s11001_s19 + $0x188] sm:$0xff] %v6985_v27  ;;  %v6986_v31 = vsel %vm6762_vm2, %v7990_v20, %v6874_v24  ;;  %v7993_v32 = vadd.f32 %v5311_v29, %v10986_v25  ;;  %v5313_v33 = vpop.f32.mrb[53].mxu1 }
 0x423   : > { %v6565_v34 = vpop.f32.mrb[53].mxu0  ;;  %7098 = vst [vmem:[%s11001_s19 + $0x190] sm:$0xff] %v6986_v31  ;;  %v6987_v35 = vsel %vm6763_vm3, %v7992_v22, %v6875_v28  ;;  %v7995_v36 = vadd.f32 %v5313_v33, %v10988_v26  ;;  %v5315_v37 = vpop.f32.mrb[54].mxu1 }
 0x424   : > { %v6567_v38 = vpop.f32.mrb[54].mxu0  ;;  %7099 = vst [vmem:[%s11001_s19 + $0x198] sm:$0xff] %v6987_v35  ;;  %v7994_v39 = vadd.f32 %v7993_v32, %v6563_v30  ;;  %v7997_v40 = vadd.f32 %v5315_v37, %v10986_v25  ;;  %v5317_v41 = vpop.f32.mrb[55].mxu1 }
 0x425   : > { %v6569_v1 = vpop.f32.mrb[55].mxu0  ;;  %v7996_v42 = vadd.f32 %v7995_v36, %v6565_v34  ;;  %v7999_v43 = vadd.f32 %v5317_v41, %v10988_v26 }
 0x426   : > { %vm6764_vm4 = vcmp.gt.f32.partialorder %v7994_v39, 0.0  ;;  %v6876_v44 = vmul.f32 0.01, %v7994_v39  ;;  %v7998_v45 = vadd.f32 %v7997_v40, %v6567_v38 }
 0x427   : > { %vm6765_vm5 = vcmp.gt.f32.partialorder %v7996_v42, 0.0  ;;  %v6877_v46 = vmul.f32 0.01, %v7996_v42  ;;  %v8000_v47 = vadd.f32 %v7999_v43, %v6569_v1 }
 0x428   : > { %v6988_v48 = vsel %vm6764_vm4, %v7994_v39, %v6876_v44  ;;  %vm6766_vm6 = vcmp.gt.f32.partialorder %v7998_v45, 0.0  ;;  %v6878_v49 = vmul.f32 0.01, %v7998_v45 }
 0x429   : > { %7100 = vst [vmem:[%s11001_s19 + $0x1a0] sm:$0xff] %v6988_v48  ;;  %v6989_v50 = vsel %vm6765_vm5, %v7996_v42, %v6877_v46  ;;  %vm6767_vm7 = vcmp.gt.f32.partialorder %v8000_v47, 0.0  ;;  %v6879_v51 = vmul.f32 0.01, %v8000_v47  ;;  %v5321_v52 = vpop.f32.mrb[56].mxu1 }
 0x42a   : > { %v6573_v53 = vpop.f32.mrb[56].mxu0  ;;  %7101 = vst [vmem:[%s11001_s19 + $0x1a8] sm:$0xff] %v6989_v50  ;;  %v6990_v54 = vsel %vm6766_vm6, %v7998_v45, %v6878_v49  ;;  %v8001_v55 = vadd.f32 %v5321_v52, %v10986_v25  ;;  %v5323_v56 = vpop.f32.mrb[57].mxu1 }
 0x42b   : > { %v6575_v57 = vpop.f32.mrb[57].mxu0  ;;  %7102 = vst [vmem:[%s11001_s19 + $0x1b0] sm:$0xff] %v6990_v54  ;;  %v6991_v58 = vsel %vm6767_vm7, %v8000_v47, %v6879_v51  ;;  %v8003_v59 = vadd.f32 %v5323_v56, %v10988_v26  ;;  %v5325_v60 = vpop.f32.mrb[58].mxu1 }
 0x42c   : > { %v6577_v61 = vpop.f32.mrb[58].mxu0  ;;  %7103 = vst [vmem:[%s11001_s19 + $0x1b8] sm:$0xff] %v6991_v58  ;;  %v8002_v62 = vadd.f32 %v8001_v55, %v6573_v53  ;;  %v8005_v63 = vadd.f32 %v5325_v60, %v10986_v25  ;;  %v5327_v0 = vpop.f32.mrb[59].mxu1 }
 0x42d   : > { %v6579_v2 = vpop.f32.mrb[59].mxu0  ;;  %v8004_v3 = vadd.f32 %v8003_v59, %v6575_v57  ;;  %v8007_v4 = vadd.f32 %v5327_v0, %v10988_v26 }
 0x42e   : > { %vm6768_vm8 = vcmp.gt.f32.partialorder %v8002_v62, 0.0  ;;  %v6880_v5 = vmul.f32 0.01, %v8002_v62  ;;  %v8006_v6 = vadd.f32 %v8005_v63, %v6577_v61 }
 0x42f   : > { %vm6769_vm9 = vcmp.gt.f32.partialorder %v8004_v3, 0.0  ;;  %v6881_v7 = vmul.f32 0.01, %v8004_v3  ;;  %v8008_v8 = vadd.f32 %v8007_v4, %v6579_v2 }
 0x430   : > { %v6992_v9 = vsel %vm6768_vm8, %v8002_v62, %v6880_v5  ;;  %vm6770_vm10 = vcmp.gt.f32.partialorder %v8006_v6, 0.0  ;;  %v6882_v10 = vmul.f32 0.01, %v8006_v6 }
 0x431   : > { %7104 = vst [vmem:[%s11001_s19 + $0x1c0] sm:$0xff] %v6992_v9  ;;  %v6993_v11 = vsel %vm6769_vm9, %v8004_v3, %v6881_v7  ;;  %vm6771_vm11 = vcmp.gt.f32.partialorder %v8008_v8, 0.0  ;;  %v6883_v12 = vmul.f32 0.01, %v8008_v8  ;;  %v5331_v13 = vpop.f32.mrb[60].mxu1 }
 0x432   : > { %v6583_v14 = vpop.f32.mrb[60].mxu0  ;;  %7105 = vst [vmem:[%s11001_s19 + $0x1c8] sm:$0xff] %v6993_v11  ;;  %v6994_v15 = vsel %vm6770_vm10, %v8006_v6, %v6882_v10  ;;  %v8009_v16 = vadd.f32 %v5331_v13, %v10986_v25  ;;  %v5333_v17 = vpop.f32.mrb[61].mxu1 }
 0x433   : > { %v6585_v18 = vpop.f32.mrb[61].mxu0  ;;  %7106 = vst [vmem:[%s11001_s19 + $0x1d0] sm:$0xff] %v6994_v15  ;;  %v6995_v19 = vsel %vm6771_vm11, %v8008_v8, %v6883_v12  ;;  %v8011_v20 = vadd.f32 %v5333_v17, %v10988_v26  ;;  %v5335_v21 = vpop.f32.mrb[62].mxu1 }
 0x434   : > { %v6587_v22 = vpop.f32.mrb[62].mxu0  ;;  %7107 = vst [vmem:[%s11001_s19 + $0x1d8] sm:$0xff] %v6995_v19  ;;  %v8010_v23 = vadd.f32 %v8009_v16, %v6583_v14  ;;  %v8013_v24 = vadd.f32 %v5335_v21, %v10986_v25  ;;  %v5337_v27 = vpop.f32.mrb[63].mxu1 }
 0x435   : > { %v6589_v28 = vpop.f32.mrb[63].mxu0  ;;  %v8012_v29 = vadd.f32 %v8011_v20, %v6585_v18  ;;  %v8015_v30 = vadd.f32 %v5337_v27, %v10988_v26 }
 0x436   : > { %vm6772_vm12 = vcmp.gt.f32.partialorder %v8010_v23, 0.0  ;;  %v6884_v31 = vmul.f32 0.01, %v8010_v23  ;;  %v8014_v32 = vadd.f32 %v8013_v24, %v6587_v22 }
 0x437   : > { %vm6773_vm13 = vcmp.gt.f32.partialorder %v8012_v29, 0.0  ;;  %v6885_v33 = vmul.f32 0.01, %v8012_v29  ;;  %v8016_v34 = vadd.f32 %v8015_v30, %v6589_v28 }
 0x438   : > { %v6996_v35 = vsel %vm6772_vm12, %v8010_v23, %v6884_v31  ;;  %vm6774_vm14 = vcmp.gt.f32.partialorder %v8014_v32, 0.0  ;;  %v6886_v36 = vmul.f32 0.01, %v8014_v32 }
 0x439   : > { %7108 = vst [vmem:[%s11001_s19 + $0x1e0] sm:$0xff] %v6996_v35  ;;  %v6997_v37 = vsel %vm6773_vm13, %v8012_v29, %v6885_v33  ;;  %vm6775_vm15 = vcmp.gt.f32.partialorder %v8016_v34, 0.0  ;;  %v6887_v38 = vmul.f32 0.01, %v8016_v34  ;;  %v5341_v39 = vpop.f32.mrb[64].mxu1 }
 0x43a   : > { %v6593_v40 = vpop.f32.mrb[64].mxu0  ;;  %7109 = vst [vmem:[%s11001_s19 + $0x1e8] sm:$0xff] %v6997_v37  ;;  %v6998_v41 = vsel %vm6774_vm14, %v8014_v32, %v6886_v36  ;;  %v8017_v1 = vadd.f32 %v5341_v39, %v10986_v25  ;;  %v5343_v42 = vpop.f32.mrb[65].mxu1 }
 0x43b   : > { %v6595_v43 = vpop.f32.mrb[65].mxu0  ;;  %7110 = vst [vmem:[%s11001_s19 + $0x1f0] sm:$0xff] %v6998_v41  ;;  %v6999_v44 = vsel %vm6775_vm15, %v8016_v34, %v6887_v38  ;;  %v8019_v45 = vadd.f32 %v5343_v42, %v10988_v26  ;;  %v5345_v46 = vpop.f32.mrb[66].mxu1 }
 0x43c   : > { %v6597_v47 = vpop.f32.mrb[66].mxu0  ;;  %7111 = vst [vmem:[%s11001_s19 + $0x1f8] sm:$0xff] %v6999_v44  ;;  %v8018_v48 = vadd.f32 %v8017_v1, %v6593_v40  ;;  %v8021_v49 = vadd.f32 %v5345_v46, %v10986_v25  ;;  %v5347_v50 = vpop.f32.mrb[67].mxu1 }
 0x43d   : > { %v6599_v51 = vpop.f32.mrb[67].mxu0  ;;  %v8020_v52 = vadd.f32 %v8019_v45, %v6595_v43  ;;  %v8023_v53 = vadd.f32 %v5347_v50, %v10988_v26 }
 0x43e   : > { %vm6776_vm0 = vcmp.gt.f32.partialorder %v8018_v48, 0.0  ;;  %v6888_v54 = vmul.f32 0.01, %v8018_v48  ;;  %v8022_v55 = vadd.f32 %v8021_v49, %v6597_v47 }
 0x43f   : > { %vm6777_vm1 = vcmp.gt.f32.partialorder %v8020_v52, 0.0  ;;  %v6889_v56 = vmul.f32 0.01, %v8020_v52  ;;  %v8024_v57 = vadd.f32 %v8023_v53, %v6599_v51 }
 0x440   : > { %v7000_v58 = vsel %vm6776_vm0, %v8018_v48, %v6888_v54  ;;  %vm6778_vm2 = vcmp.gt.f32.partialorder %v8022_v55, 0.0  ;;  %v6890_v59 = vmul.f32 0.01, %v8022_v55 }
 0x441   : > { %7112 = vst [vmem:[%s11001_s19 + $0x200] sm:$0xff] %v7000_v58  ;;  %v7001_v60 = vsel %vm6777_vm1, %v8020_v52, %v6889_v56  ;;  %vm6779_vm3 = vcmp.gt.f32.partialorder %v8024_v57, 0.0  ;;  %v6891_v61 = vmul.f32 0.01, %v8024_v57  ;;  %v5351_v62 = vpop.f32.mrb[68].mxu1 }
 0x442   : > { %v6603_v63 = vpop.f32.mrb[68].mxu0  ;;  %7113 = vst [vmem:[%s11001_s19 + $0x208] sm:$0xff] %v7001_v60  ;;  %v7002_v0 = vsel %vm6778_vm2, %v8022_v55, %v6890_v59  ;;  %v8025_v2 = vadd.f32 %v5351_v62, %v10986_v25  ;;  %v5353_v3 = vpop.f32.mrb[69].mxu1 }
 0x443   : > { %v6605_v4 = vpop.f32.mrb[69].mxu0  ;;  %7114 = vst [vmem:[%s11001_s19 + $0x210] sm:$0xff] %v7002_v0  ;;  %v7003_v5 = vsel %vm6779_vm3, %v8024_v57, %v6891_v61  ;;  %v8027_v6 = vadd.f32 %v5353_v3, %v10988_v26  ;;  %v5355_v7 = vpop.f32.mrb[70].mxu1 }
 0x444   : > { %v6607_v8 = vpop.f32.mrb[70].mxu0  ;;  %7115 = vst [vmem:[%s11001_s19 + $0x218] sm:$0xff] %v7003_v5  ;;  %v8026_v9 = vadd.f32 %v8025_v2, %v6603_v63  ;;  %v8029_v10 = vadd.f32 %v5355_v7, %v10986_v25  ;;  %v5357_v11 = vpop.f32.mrb[71].mxu1 }
 0x445   : > { %v6609_v12 = vpop.f32.mrb[71].mxu0  ;;  %v8028_v13 = vadd.f32 %v8027_v6, %v6605_v4  ;;  %v8031_v14 = vadd.f32 %v5357_v11, %v10988_v26 }
 0x446   : > { %vm6780_vm4 = vcmp.gt.f32.partialorder %v8026_v9, 0.0  ;;  %v6892_v15 = vmul.f32 0.01, %v8026_v9  ;;  %v8030_v16 = vadd.f32 %v8029_v10, %v6607_v8 }
 0x447   : > { %vm6781_vm5 = vcmp.gt.f32.partialorder %v8028_v13, 0.0  ;;  %v6893_v17 = vmul.f32 0.01, %v8028_v13  ;;  %v8032_v18 = vadd.f32 %v8031_v14, %v6609_v12 }
 0x448   : > { %v7004_v19 = vsel %vm6780_vm4, %v8026_v9, %v6892_v15  ;;  %vm6782_vm6 = vcmp.gt.f32.partialorder %v8030_v16, 0.0  ;;  %v6894_v20 = vmul.f32 0.01, %v8030_v16 }
 0x449   : > { %7116 = vst [vmem:[%s11001_s19 + $0x220] sm:$0xff] %v7004_v19  ;;  %v7005_v21 = vsel %vm6781_vm5, %v8028_v13, %v6893_v17  ;;  %vm6783_vm7 = vcmp.gt.f32.partialorder %v8032_v18, 0.0  ;;  %v6895_v22 = vmul.f32 0.01, %v8032_v18  ;;  %v5361_v23 = vpop.f32.mrb[72].mxu1 }
 0x44a   : > { %v6613_v24 = vpop.f32.mrb[72].mxu0  ;;  %7117 = vst [vmem:[%s11001_s19 + $0x228] sm:$0xff] %v7005_v21  ;;  %v7006_v27 = vsel %vm6782_vm6, %v8030_v16, %v6894_v20  ;;  %v8033_v28 = vadd.f32 %v5361_v23, %v10986_v25  ;;  %v5363_v29 = vpop.f32.mrb[73].mxu1 }
 0x44b   : > { %v6615_v30 = vpop.f32.mrb[73].mxu0  ;;  %7118 = vst [vmem:[%s11001_s19 + $0x230] sm:$0xff] %v7006_v27  ;;  %v7007_v31 = vsel %vm6783_vm7, %v8032_v18, %v6895_v22  ;;  %v8035_v32 = vadd.f32 %v5363_v29, %v10988_v26  ;;  %v5365_v33 = vpop.f32.mrb[74].mxu1 }
 0x44c   : > { %v6617_v34 = vpop.f32.mrb[74].mxu0  ;;  %7119 = vst [vmem:[%s11001_s19 + $0x238] sm:$0xff] %v7007_v31  ;;  %v8034_v35 = vadd.f32 %v8033_v28, %v6613_v24  ;;  %v8037_v36 = vadd.f32 %v5365_v33, %v10986_v25  ;;  %v5367_v37 = vpop.f32.mrb[75].mxu1 }
 0x44d   : > { %v6619_v38 = vpop.f32.mrb[75].mxu0  ;;  %v8036_v39 = vadd.f32 %v8035_v32, %v6615_v30  ;;  %v8039_v40 = vadd.f32 %v5367_v37, %v10988_v26 }
 0x44e   : > { %vm6784_vm8 = vcmp.gt.f32.partialorder %v8034_v35, 0.0  ;;  %v6896_v41 = vmul.f32 0.01, %v8034_v35  ;;  %v8038_v1 = vadd.f32 %v8037_v36, %v6617_v34 }
 0x44f   : > { %vm6785_vm9 = vcmp.gt.f32.partialorder %v8036_v39, 0.0  ;;  %v6897_v42 = vmul.f32 0.01, %v8036_v39  ;;  %v8040_v43 = vadd.f32 %v8039_v40, %v6619_v38 }
 0x450   : > { %v7008_v44 = vsel %vm6784_vm8, %v8034_v35, %v6896_v41  ;;  %vm6786_vm10 = vcmp.gt.f32.partialorder %v8038_v1, 0.0  ;;  %v6898_v45 = vmul.f32 0.01, %v8038_v1 }
 0x451   : > { %7120 = vst [vmem:[%s11001_s19 + $0x240] sm:$0xff] %v7008_v44  ;;  %v7009_v46 = vsel %vm6785_vm9, %v8036_v39, %v6897_v42  ;;  %vm6787_vm11 = vcmp.gt.f32.partialorder %v8040_v43, 0.0  ;;  %v6899_v47 = vmul.f32 0.01, %v8040_v43  ;;  %v5371_v48 = vpop.f32.mrb[76].mxu1 }
 0x452   : > { %v6623_v49 = vpop.f32.mrb[76].mxu0  ;;  %7121 = vst [vmem:[%s11001_s19 + $0x248] sm:$0xff] %v7009_v46  ;;  %v7010_v50 = vsel %vm6786_vm10, %v8038_v1, %v6898_v45  ;;  %v8041_v51 = vadd.f32 %v5371_v48, %v10986_v25  ;;  %v5373_v52 = vpop.f32.mrb[77].mxu1 }
 0x453   : > { %v6625_v53 = vpop.f32.mrb[77].mxu0  ;;  %7122 = vst [vmem:[%s11001_s19 + $0x250] sm:$0xff] %v7010_v50  ;;  %v7011_v54 = vsel %vm6787_vm11, %v8040_v43, %v6899_v47  ;;  %v8043_v55 = vadd.f32 %v5373_v52, %v10988_v26  ;;  %v5375_v56 = vpop.f32.mrb[78].mxu1 }
 0x454   : > { %v6627_v57 = vpop.f32.mrb[78].mxu0  ;;  %7123 = vst [vmem:[%s11001_s19 + $0x258] sm:$0xff] %v7011_v54  ;;  %v8042_v58 = vadd.f32 %v8041_v51, %v6623_v49  ;;  %v8045_v59 = vadd.f32 %v5375_v56, %v10986_v25  ;;  %v5377_v60 = vpop.f32.mrb[79].mxu1 }
 0x455   : > { %v6629_v61 = vpop.f32.mrb[79].mxu0  ;;  %v8044_v62 = vadd.f32 %v8043_v55, %v6625_v53  ;;  %v8047_v63 = vadd.f32 %v5377_v60, %v10988_v26 }
 0x456   : > { %vm6788_vm12 = vcmp.gt.f32.partialorder %v8042_v58, 0.0  ;;  %v6900_v0 = vmul.f32 0.01, %v8042_v58  ;;  %v8046_v2 = vadd.f32 %v8045_v59, %v6627_v57 }
 0x457   : > { %vm6789_vm13 = vcmp.gt.f32.partialorder %v8044_v62, 0.0  ;;  %v6901_v3 = vmul.f32 0.01, %v8044_v62  ;;  %v8048_v4 = vadd.f32 %v8047_v63, %v6629_v61 }
 0x458   : > { %v7012_v5 = vsel %vm6788_vm12, %v8042_v58, %v6900_v0  ;;  %vm6790_vm14 = vcmp.gt.f32.partialorder %v8046_v2, 0.0  ;;  %v6902_v6 = vmul.f32 0.01, %v8046_v2 }
 0x459   : > { %7124 = vst [vmem:[%s11001_s19 + $0x260] sm:$0xff] %v7012_v5  ;;  %v7013_v7 = vsel %vm6789_vm13, %v8044_v62, %v6901_v3  ;;  %vm6791_vm15 = vcmp.gt.f32.partialorder %v8048_v4, 0.0  ;;  %v6903_v8 = vmul.f32 0.01, %v8048_v4  ;;  %v5381_v9 = vpop.f32.mrb[80].mxu1 }
 0x45a   : > { %v6633_v10 = vpop.f32.mrb[80].mxu0  ;;  %7125 = vst [vmem:[%s11001_s19 + $0x268] sm:$0xff] %v7013_v7  ;;  %v7014_v11 = vsel %vm6790_vm14, %v8046_v2, %v6902_v6  ;;  %v8049_v12 = vadd.f32 %v5381_v9, %v10986_v25  ;;  %v5383_v13 = vpop.f32.mrb[81].mxu1 }
 0x45b   : > { %v6635_v14 = vpop.f32.mrb[81].mxu0  ;;  %7126 = vst [vmem:[%s11001_s19 + $0x270] sm:$0xff] %v7014_v11  ;;  %v7015_v15 = vsel %vm6791_vm15, %v8048_v4, %v6903_v8  ;;  %v8051_v16 = vadd.f32 %v5383_v13, %v10988_v26  ;;  %v5385_v17 = vpop.f32.mrb[82].mxu1 }
 0x45c   : > { %v6637_v18 = vpop.f32.mrb[82].mxu0  ;;  %7127 = vst [vmem:[%s11001_s19 + $0x278] sm:$0xff] %v7015_v15  ;;  %v8050_v19 = vadd.f32 %v8049_v12, %v6633_v10  ;;  %v8053_v20 = vadd.f32 %v5385_v17, %v10986_v25  ;;  %v5387_v21 = vpop.f32.mrb[83].mxu1 }
 0x45d   : > { %v6639_v22 = vpop.f32.mrb[83].mxu0  ;;  %v8052_v23 = vadd.f32 %v8051_v16, %v6635_v14  ;;  %v8055_v24 = vadd.f32 %v5387_v21, %v10988_v26 }
 0x45e   : > { %vm6792_vm0 = vcmp.gt.f32.partialorder %v8050_v19, 0.0  ;;  %v6904_v27 = vmul.f32 0.01, %v8050_v19  ;;  %v8054_v28 = vadd.f32 %v8053_v20, %v6637_v18 }
 0x45f   : > { %vm6793_vm1 = vcmp.gt.f32.partialorder %v8052_v23, 0.0  ;;  %v6905_v29 = vmul.f32 0.01, %v8052_v23  ;;  %v8056_v30 = vadd.f32 %v8055_v24, %v6639_v22 }
 0x460   : > { %v7016_v31 = vsel %vm6792_vm0, %v8050_v19, %v6904_v27  ;;  %vm6794_vm2 = vcmp.gt.f32.partialorder %v8054_v28, 0.0  ;;  %v6906_v32 = vmul.f32 0.01, %v8054_v28 }
 0x461   : > { %7128 = vst [vmem:[%s11001_s19 + $0x280] sm:$0xff] %v7016_v31  ;;  %v7017_v33 = vsel %vm6793_vm1, %v8052_v23, %v6905_v29  ;;  %vm6795_vm3 = vcmp.gt.f32.partialorder %v8056_v30, 0.0  ;;  %v6907_v34 = vmul.f32 0.01, %v8056_v30  ;;  %v5391_v35 = vpop.f32.mrb[84].mxu1 }
 0x462   : > { %v6643_v36 = vpop.f32.mrb[84].mxu0  ;;  %7129 = vst [vmem:[%s11001_s19 + $0x288] sm:$0xff] %v7017_v33  ;;  %v7018_v37 = vsel %vm6794_vm2, %v8054_v28, %v6906_v32  ;;  %v8057_v38 = vadd.f32 %v5391_v35, %v10986_v25  ;;  %v5393_v39 = vpop.f32.mrb[85].mxu1 }
 0x463   : > { %v6645_v40 = vpop.f32.mrb[85].mxu0  ;;  %7130 = vst [vmem:[%s11001_s19 + $0x290] sm:$0xff] %v7018_v37  ;;  %v7019_v41 = vsel %vm6795_vm3, %v8056_v30, %v6907_v34  ;;  %v8059_v1 = vadd.f32 %v5393_v39, %v10988_v26  ;;  %v5395_v42 = vpop.f32.mrb[86].mxu1 }
 0x464   : > { %v6647_v43 = vpop.f32.mrb[86].mxu0  ;;  %7131 = vst [vmem:[%s11001_s19 + $0x298] sm:$0xff] %v7019_v41  ;;  %v8058_v44 = vadd.f32 %v8057_v38, %v6643_v36  ;;  %v8061_v45 = vadd.f32 %v5395_v42, %v10986_v25  ;;  %v5397_v46 = vpop.f32.mrb[87].mxu1 }
 0x465   : > { %v6649_v47 = vpop.f32.mrb[87].mxu0  ;;  %v8060_v48 = vadd.f32 %v8059_v1, %v6645_v40  ;;  %v8063_v49 = vadd.f32 %v5397_v46, %v10988_v26 }
 0x466   : > { %vm6796_vm4 = vcmp.gt.f32.partialorder %v8058_v44, 0.0  ;;  %v6908_v50 = vmul.f32 0.01, %v8058_v44  ;;  %v8062_v51 = vadd.f32 %v8061_v45, %v6647_v43 }
 0x467   : > { %vm6797_vm5 = vcmp.gt.f32.partialorder %v8060_v48, 0.0  ;;  %v6909_v52 = vmul.f32 0.01, %v8060_v48  ;;  %v8064_v53 = vadd.f32 %v8063_v49, %v6649_v47 }
 0x468   : > { %v7020_v54 = vsel %vm6796_vm4, %v8058_v44, %v6908_v50  ;;  %vm6798_vm6 = vcmp.gt.f32.partialorder %v8062_v51, 0.0  ;;  %v6910_v55 = vmul.f32 0.01, %v8062_v51 }
 0x469   : > { %7132 = vst [vmem:[%s11001_s19 + $0x2a0] sm:$0xff] %v7020_v54  ;;  %v7021_v56 = vsel %vm6797_vm5, %v8060_v48, %v6909_v52  ;;  %vm6799_vm7 = vcmp.gt.f32.partialorder %v8064_v53, 0.0  ;;  %v6911_v57 = vmul.f32 0.01, %v8064_v53  ;;  %v5401_v58 = vpop.f32.mrb[88].mxu1 }
 0x46a   : > { %v6653_v59 = vpop.f32.mrb[88].mxu0  ;;  %7133 = vst [vmem:[%s11001_s19 + $0x2a8] sm:$0xff] %v7021_v56  ;;  %v7022_v60 = vsel %vm6798_vm6, %v8062_v51, %v6910_v55  ;;  %v8065_v61 = vadd.f32 %v5401_v58, %v10986_v25  ;;  %v5403_v62 = vpop.f32.mrb[89].mxu1 }
 0x46b   : > { %v6655_v63 = vpop.f32.mrb[89].mxu0  ;;  %7134 = vst [vmem:[%s11001_s19 + $0x2b0] sm:$0xff] %v7022_v60  ;;  %v7023_v0 = vsel %vm6799_vm7, %v8064_v53, %v6911_v57  ;;  %v8067_v2 = vadd.f32 %v5403_v62, %v10988_v26  ;;  %v5405_v3 = vpop.f32.mrb[90].mxu1 }
 0x46c   : > { %v6657_v4 = vpop.f32.mrb[90].mxu0  ;;  %7135 = vst [vmem:[%s11001_s19 + $0x2b8] sm:$0xff] %v7023_v0  ;;  %v8066_v5 = vadd.f32 %v8065_v61, %v6653_v59  ;;  %v8069_v6 = vadd.f32 %v5405_v3, %v10986_v25  ;;  %v5407_v7 = vpop.f32.mrb[91].mxu1 }
 0x46d   : > { %v6659_v8 = vpop.f32.mrb[91].mxu0  ;;  %v8068_v9 = vadd.f32 %v8067_v2, %v6655_v63  ;;  %v8071_v10 = vadd.f32 %v5407_v7, %v10988_v26 }
 0x46e   : > { %vm6800_vm8 = vcmp.gt.f32.partialorder %v8066_v5, 0.0  ;;  %v6912_v11 = vmul.f32 0.01, %v8066_v5  ;;  %v8070_v12 = vadd.f32 %v8069_v6, %v6657_v4 }
 0x46f   : > { %vm6801_vm9 = vcmp.gt.f32.partialorder %v8068_v9, 0.0  ;;  %v6913_v13 = vmul.f32 0.01, %v8068_v9  ;;  %v8072_v14 = vadd.f32 %v8071_v10, %v6659_v8 }
 0x470   : > { %v7024_v15 = vsel %vm6800_vm8, %v8066_v5, %v6912_v11  ;;  %vm6802_vm10 = vcmp.gt.f32.partialorder %v8070_v12, 0.0  ;;  %v6914_v16 = vmul.f32 0.01, %v8070_v12 }
 0x471   : > { %7136 = vst [vmem:[%s11001_s19 + $0x2c0] sm:$0xff] %v7024_v15  ;;  %v7025_v17 = vsel %vm6801_vm9, %v8068_v9, %v6913_v13  ;;  %vm6803_vm11 = vcmp.gt.f32.partialorder %v8072_v14, 0.0  ;;  %v6915_v18 = vmul.f32 0.01, %v8072_v14  ;;  %v5411_v19 = vpop.f32.mrb[92].mxu1 }
 0x472   : > { %v6663_v20 = vpop.f32.mrb[92].mxu0  ;;  %7137 = vst [vmem:[%s11001_s19 + $0x2c8] sm:$0xff] %v7025_v17  ;;  %v7026_v21 = vsel %vm6802_vm10, %v8070_v12, %v6914_v16  ;;  %v8073_v22 = vadd.f32 %v5411_v19, %v10986_v25  ;;  %v5413_v23 = vpop.f32.mrb[93].mxu1 }
 0x473   : > { %v6665_v24 = vpop.f32.mrb[93].mxu0  ;;  %7138 = vst [vmem:[%s11001_s19 + $0x2d0] sm:$0xff] %v7026_v21  ;;  %v7027_v27 = vsel %vm6803_vm11, %v8072_v14, %v6915_v18  ;;  %v8075_v28 = vadd.f32 %v5413_v23, %v10988_v26  ;;  %v5415_v29 = vpop.f32.mrb[94].mxu1 }
 0x474   : > { %v6667_v30 = vpop.f32.mrb[94].mxu0  ;;  %7139 = vst [vmem:[%s11001_s19 + $0x2d8] sm:$0xff] %v7027_v27  ;;  %v8074_v31 = vadd.f32 %v8073_v22, %v6663_v20  ;;  %v8077_v32 = vadd.f32 %v5415_v29, %v10986_v25  ;;  %v5417_v33 = vpop.f32.mrb[95].mxu1 }
 0x475   : > { %v6669_v34 = vpop.f32.mrb[95].mxu0  ;;  %v8076_v35 = vadd.f32 %v8075_v28, %v6665_v24  ;;  %v8079_v36 = vadd.f32 %v5417_v33, %v10988_v26 }
 0x476   : > { %vm6804_vm12 = vcmp.gt.f32.partialorder %v8074_v31, 0.0  ;;  %v6916_v37 = vmul.f32 0.01, %v8074_v31  ;;  %v8078_v38 = vadd.f32 %v8077_v32, %v6667_v30 }
 0x477   : > { %vm6805_vm13 = vcmp.gt.f32.partialorder %v8076_v35, 0.0  ;;  %v6917_v39 = vmul.f32 0.01, %v8076_v35  ;;  %v8080_v40 = vadd.f32 %v8079_v36, %v6669_v34 }
 0x478   : > { %v7028_v41 = vsel %vm6804_vm12, %v8074_v31, %v6916_v37  ;;  %vm6806_vm14 = vcmp.gt.f32.partialorder %v8078_v38, 0.0  ;;  %v6918_v1 = vmul.f32 0.01, %v8078_v38 }
 0x479   : > { %7140 = vst [vmem:[%s11001_s19 + $0x2e0] sm:$0xff] %v7028_v41  ;;  %v7029_v42 = vsel %vm6805_vm13, %v8076_v35, %v6917_v39  ;;  %vm6807_vm15 = vcmp.gt.f32.partialorder %v8080_v40, 0.0  ;;  %v6919_v43 = vmul.f32 0.01, %v8080_v40  ;;  %v5421_v44 = vpop.f32.mrb[96].mxu1 }
 0x47a   : > { %v6673_v45 = vpop.f32.mrb[96].mxu0  ;;  %7141 = vst [vmem:[%s11001_s19 + $0x2e8] sm:$0xff] %v7029_v42  ;;  %v7030_v46 = vsel %vm6806_vm14, %v8078_v38, %v6918_v1  ;;  %v8081_v47 = vadd.f32 %v5421_v44, %v10986_v25  ;;  %v5423_v48 = vpop.f32.mrb[97].mxu1 }
 0x47b   : > { %v6675_v49 = vpop.f32.mrb[97].mxu0  ;;  %7142 = vst [vmem:[%s11001_s19 + $0x2f0] sm:$0xff] %v7030_v46  ;;  %v7031_v50 = vsel %vm6807_vm15, %v8080_v40, %v6919_v43  ;;  %v8083_v51 = vadd.f32 %v5423_v48, %v10988_v26  ;;  %v5425_v52 = vpop.f32.mrb[98].mxu1 }
 0x47c   : > { %v6677_v53 = vpop.f32.mrb[98].mxu0  ;;  %7143 = vst [vmem:[%s11001_s19 + $0x2f8] sm:$0xff] %v7031_v50  ;;  %v8082_v54 = vadd.f32 %v8081_v47, %v6673_v45  ;;  %v8085_v55 = vadd.f32 %v5425_v52, %v10986_v25  ;;  %v5427_v56 = vpop.f32.mrb[99].mxu1 }
 0x47d   : > { %v6679_v57 = vpop.f32.mrb[99].mxu0  ;;  %v8084_v58 = vadd.f32 %v8083_v51, %v6675_v49  ;;  %v8087_v59 = vadd.f32 %v5427_v56, %v10988_v26 }
 0x47e   : > { %vm6808_vm0 = vcmp.gt.f32.partialorder %v8082_v54, 0.0  ;;  %v6920_v60 = vmul.f32 0.01, %v8082_v54  ;;  %v8086_v61 = vadd.f32 %v8085_v55, %v6677_v53 }
 0x47f   : > { %vm6809_vm1 = vcmp.gt.f32.partialorder %v8084_v58, 0.0  ;;  %v6921_v62 = vmul.f32 0.01, %v8084_v58  ;;  %v8088_v63 = vadd.f32 %v8087_v59, %v6679_v57 }
 0x480   : > { %v7032_v0 = vsel %vm6808_vm0, %v8082_v54, %v6920_v60  ;;  %vm6810_vm2 = vcmp.gt.f32.partialorder %v8086_v61, 0.0  ;;  %v6922_v2 = vmul.f32 0.01, %v8086_v61 }
 0x481   : > { %7144 = vst [vmem:[%s11001_s19 + $0x300] sm:$0xff] %v7032_v0  ;;  %v7033_v3 = vsel %vm6809_vm1, %v8084_v58, %v6921_v62  ;;  %vm6811_vm3 = vcmp.gt.f32.partialorder %v8088_v63, 0.0  ;;  %v6923_v4 = vmul.f32 0.01, %v8088_v63  ;;  %v5431_v5 = vpop.f32.mrb[100].mxu1 }
 0x482   : > { %v6683_v6 = vpop.f32.mrb[100].mxu0  ;;  %7145 = vst [vmem:[%s11001_s19 + $0x308] sm:$0xff] %v7033_v3  ;;  %v7034_v7 = vsel %vm6810_vm2, %v8086_v61, %v6922_v2  ;;  %v8089_v8 = vadd.f32 %v5431_v5, %v10986_v25  ;;  %v5433_v9 = vpop.f32.mrb[101].mxu1 }
 0x483   : > { %v6685_v10 = vpop.f32.mrb[101].mxu0  ;;  %7146 = vst [vmem:[%s11001_s19 + $0x310] sm:$0xff] %v7034_v7  ;;  %v7035_v11 = vsel %vm6811_vm3, %v8088_v63, %v6923_v4  ;;  %v8091_v12 = vadd.f32 %v5433_v9, %v10988_v26  ;;  %v5435_v13 = vpop.f32.mrb[102].mxu1 }
 0x484   : > { %v6687_v14 = vpop.f32.mrb[102].mxu0  ;;  %7147 = vst [vmem:[%s11001_s19 + $0x318] sm:$0xff] %v7035_v11  ;;  %v8090_v15 = vadd.f32 %v8089_v8, %v6683_v6  ;;  %v8093_v16 = vadd.f32 %v5435_v13, %v10986_v25  ;;  %v5437_v17 = vpop.f32.mrb[103].mxu1 }
 0x485   : > { %v6689_v18 = vpop.f32.mrb[103].mxu0  ;;  %v8092_v19 = vadd.f32 %v8091_v12, %v6685_v10  ;;  %v8095_v20 = vadd.f32 %v5437_v17, %v10988_v26 }
 0x486   : > { %vm6812_vm4 = vcmp.gt.f32.partialorder %v8090_v15, 0.0  ;;  %v6924_v21 = vmul.f32 0.01, %v8090_v15  ;;  %v8094_v22 = vadd.f32 %v8093_v16, %v6687_v14 }
 0x487   : > { %vm6813_vm5 = vcmp.gt.f32.partialorder %v8092_v19, 0.0  ;;  %v6925_v23 = vmul.f32 0.01, %v8092_v19  ;;  %v8096_v24 = vadd.f32 %v8095_v20, %v6689_v18 }
 0x488   : > { %v7036_v27 = vsel %vm6812_vm4, %v8090_v15, %v6924_v21  ;;  %vm6814_vm6 = vcmp.gt.f32.partialorder %v8094_v22, 0.0  ;;  %v6926_v28 = vmul.f32 0.01, %v8094_v22 }
 0x489   : > { %7148 = vst [vmem:[%s11001_s19 + $0x320] sm:$0xff] %v7036_v27  ;;  %v7037_v29 = vsel %vm6813_vm5, %v8092_v19, %v6925_v23  ;;  %vm6815_vm7 = vcmp.gt.f32.partialorder %v8096_v24, 0.0  ;;  %v6927_v30 = vmul.f32 0.01, %v8096_v24  ;;  %v5441_v31 = vpop.f32.mrb[104].mxu1 }
 0x48a   : > { %v6693_v32 = vpop.f32.mrb[104].mxu0  ;;  %7149 = vst [vmem:[%s11001_s19 + $0x328] sm:$0xff] %v7037_v29  ;;  %v7038_v33 = vsel %vm6814_vm6, %v8094_v22, %v6926_v28  ;;  %v8097_v34 = vadd.f32 %v5441_v31, %v10986_v25  ;;  %v5443_v35 = vpop.f32.mrb[105].mxu1 }
 0x48b   : > { %v6695_v36 = vpop.f32.mrb[105].mxu0  ;;  %7150 = vst [vmem:[%s11001_s19 + $0x330] sm:$0xff] %v7038_v33  ;;  %v7039_v37 = vsel %vm6815_vm7, %v8096_v24, %v6927_v30  ;;  %v8099_v38 = vadd.f32 %v5443_v35, %v10988_v26  ;;  %v5445_v39 = vpop.f32.mrb[106].mxu1 }
 0x48c   : > { %v6697_v40 = vpop.f32.mrb[106].mxu0  ;;  %7151 = vst [vmem:[%s11001_s19 + $0x338] sm:$0xff] %v7039_v37  ;;  %v8098_v41 = vadd.f32 %v8097_v34, %v6693_v32  ;;  %v8101_v1 = vadd.f32 %v5445_v39, %v10986_v25  ;;  %v5447_v42 = vpop.f32.mrb[107].mxu1 }
 0x48d   : > { %v6699_v43 = vpop.f32.mrb[107].mxu0  ;;  %v8100_v44 = vadd.f32 %v8099_v38, %v6695_v36  ;;  %v8103_v45 = vadd.f32 %v5447_v42, %v10988_v26 }
 0x48e   : > { %vm6816_vm8 = vcmp.gt.f32.partialorder %v8098_v41, 0.0  ;;  %v6928_v46 = vmul.f32 0.01, %v8098_v41  ;;  %v8102_v47 = vadd.f32 %v8101_v1, %v6697_v40 }
 0x48f   : > { %vm6817_vm9 = vcmp.gt.f32.partialorder %v8100_v44, 0.0  ;;  %v6929_v48 = vmul.f32 0.01, %v8100_v44  ;;  %v8104_v49 = vadd.f32 %v8103_v45, %v6699_v43 }
 0x490   : > { %v7040_v50 = vsel %vm6816_vm8, %v8098_v41, %v6928_v46  ;;  %vm6818_vm10 = vcmp.gt.f32.partialorder %v8102_v47, 0.0  ;;  %v6930_v51 = vmul.f32 0.01, %v8102_v47 }
 0x491   : > { %7152 = vst [vmem:[%s11001_s19 + $0x340] sm:$0xff] %v7040_v50  ;;  %v7041_v52 = vsel %vm6817_vm9, %v8100_v44, %v6929_v48  ;;  %vm6819_vm11 = vcmp.gt.f32.partialorder %v8104_v49, 0.0  ;;  %v6931_v53 = vmul.f32 0.01, %v8104_v49  ;;  %v5451_v54 = vpop.f32.mrb[108].mxu1 }
 0x492   : > { %v6703_v55 = vpop.f32.mrb[108].mxu0  ;;  %7153 = vst [vmem:[%s11001_s19 + $0x348] sm:$0xff] %v7041_v52  ;;  %v7042_v56 = vsel %vm6818_vm10, %v8102_v47, %v6930_v51  ;;  %v8105_v57 = vadd.f32 %v5451_v54, %v10986_v25  ;;  %v5453_v58 = vpop.f32.mrb[109].mxu1 }
 0x493   : > { %v6705_v59 = vpop.f32.mrb[109].mxu0  ;;  %7154 = vst [vmem:[%s11001_s19 + $0x350] sm:$0xff] %v7042_v56  ;;  %v7043_v60 = vsel %vm6819_vm11, %v8104_v49, %v6931_v53  ;;  %v8107_v61 = vadd.f32 %v5453_v58, %v10988_v26  ;;  %v5455_v62 = vpop.f32.mrb[110].mxu1 }
 0x494   : > { %v6707_v63 = vpop.f32.mrb[110].mxu0  ;;  %7155 = vst [vmem:[%s11001_s19 + $0x358] sm:$0xff] %v7043_v60  ;;  %v8106_v0 = vadd.f32 %v8105_v57, %v6703_v55  ;;  %v8109_v2 = vadd.f32 %v5455_v62, %v10986_v25  ;;  %v5457_v3 = vpop.f32.mrb[111].mxu1 }
 0x495   : > { %v6709_v4 = vpop.f32.mrb[111].mxu0  ;;  %v8108_v5 = vadd.f32 %v8107_v61, %v6705_v59  ;;  %v8111_v6 = vadd.f32 %v5457_v3, %v10988_v26 }
 0x496   : > { %vm6820_vm12 = vcmp.gt.f32.partialorder %v8106_v0, 0.0  ;;  %v6932_v7 = vmul.f32 0.01, %v8106_v0  ;;  %v8110_v8 = vadd.f32 %v8109_v2, %v6707_v63 }
 0x497   : > { %vm6821_vm13 = vcmp.gt.f32.partialorder %v8108_v5, 0.0  ;;  %v6933_v9 = vmul.f32 0.01, %v8108_v5  ;;  %v8112_v10 = vadd.f32 %v8111_v6, %v6709_v4 }
 0x498   : > { %v7044_v11 = vsel %vm6820_vm12, %v8106_v0, %v6932_v7  ;;  %vm6822_vm14 = vcmp.gt.f32.partialorder %v8110_v8, 0.0  ;;  %v6934_v12 = vmul.f32 0.01, %v8110_v8 }
 0x499   : > { %7156 = vst [vmem:[%s11001_s19 + $0x360] sm:$0xff] %v7044_v11  ;;  %v7045_v13 = vsel %vm6821_vm13, %v8108_v5, %v6933_v9  ;;  %vm6823_vm15 = vcmp.gt.f32.partialorder %v8112_v10, 0.0  ;;  %v6935_v25 = vmul.f32 0.01, %v8112_v10 }
 0x49a   : > { %7157 = vst [vmem:[%s11001_s19 + $0x368] sm:$0xff] %v7045_v13  ;;  %v7046_v14 = vsel %vm6822_vm14, %v8110_v8, %v6934_v12 }
 0x49b   : > { %7158 = vst [vmem:[%s11001_s19 + $0x370] sm:$0xff] %v7046_v14  ;;  %v7047_v15 = vsel %vm6823_vm15, %v8112_v10, %v6935_v25 }
 0x49c   : > { %7159 = vst [vmem:[%s11001_s19 + $0x378] sm:$0xff] %v7047_v15 }
 0x49d PF: > { %s13_s12 = sadd.s32 1, %s9777_s12  }
 0x49e   : > { %p10_p4 = scmp.ge.s32.totalorder %s13_s12, 4  }
 0x4a0   :  { %12 = sbr.rel (!%p10_p4) target bundleno = 1 (0x1), region = 62 }

// kernel: net_forward.7
= control target key start
LH: loop header
LB: loop body
LE: loop exit
PB: predicated region body
PF: predicated region fallthrough
CT: control target
= control target key end

     0   :  { %8 = vsyncpa [#allocation3], 0  ;;  %s4515_s12 = smov 0   ;;  %s5433_s0 = inlined_call_operand.vmem [shape: f32[2,46080], index: 0, kind: input, shape index: {}]   ;;  %s5434_s1 = inlined_call_operand.vmem [shape: f32[46080,2], index: 1, kind: input, shape index: {}]   ;;  %s5435_s2 = inlined_call_operand.vmem [shape: f32[1,2], index: 2, kind: input, shape index: {}]   ;;  %s5436_s3 = inlined_call_operand.hbm [shape: f32[2,2], index: 3, kind: output, shape index: {}]  }
   0x1 LB: > { %s4521_s13 = sadd.s32 4294967295, %s4487_s12   ;;  %p2859_p0 = scmp.ge.s32.totalorder %s4487_s12, 1  ;;  %s4487_s12 = sphi %s4515_s12, %s14_s12  }
   0x2   : > { %p145_p1 = scmp.lt.s32.totalorder %s4487_s12, 9 }
   0x4   : > { %p146_p2 = pnand %p2859_p0, %p145_p1 }
   0x5   : > { %s169_s14 = smul.u32 (!%p146_p2), 45, %s4521_s13  ;;  %p2862_p5 = scmp.ne.s32.totalorder (!%p146_p2), %s4521_s13, 0 }
   0x6   : > { %149 = sbr.rel (%p146_p2) target bundleno = 663 (0x297), region = 32 }
   0x7   : > { %s175_s15 = smul.u32 (!%p146_p2), 720, %s4521_s13  ;;  %p170_p3 = scmp.lt.s32.totalorder (!%p146_p2), %s169_s14, 359 }
   0x9   : > { %p176_p4 = scmp.lt.s32.totalorder (!%p146_p2), %s175_s15, 5759 }
   0xd   : > { %s5438_s14 = smov (!%p170_p3, %s169_s14), 359  ;;  %s5440_s15 = smov (!%p176_p4, %s175_s15), 5759 }
   0xe   : > { %s2860_s16 = sshll.u32 %s5438_s14, 1  ;;  %s2861_s20 = sshll.u32 %s5440_s15, 3  ;;  %vm185_vm0 = vcmask (!%p2862_p5), 9216   ;;  %v4489_v0 = vmov (!%p2862_p5), 0.0  }
   0xf   : > { %s4530_s19 = scalar_lea.vmem %s5433_s0, %s2860_s16  ;;  %s4535_s23 = scalar_lea.vmem %s5434_s1, %s2861_s20  ;;  %186 = vst.msk [vmem:[#allocation2] sm:$0x3] (!%p2862_p5), %vm185_vm0, %v4489_v0 }
  0x10   : > { %184 = sbr.rel (%p2862_p5) target bundleno = 23 (0x17), region = 36 }
  0x17 PF: > { %v216_v1 = vld [vmem:[%s4535_s23 + $0x80] sm:$0xff]  ;;  %v217_v2 = vld [vmem:[%s4535_s23 + $0x88] sm:$0xff]  ;;  %v218_v12 = vld [vmem:[%s4535_s23 + $0x90] sm:$0xff]  ;;  %v4490_v48 = vmov 1983009808   ;;  %v936_v50 = vlaneseq  ;;  %vm4492_vm1 = vmmov 0  }
  0x18   : > { %v248_v3 = vld [vmem:[%s4535_s23 + $0x180] sm:$0xff]  ;;  %v3692_v4 = vpack.c.bf16 %v217_v2, %v216_v1  ;;  %v249_v5 = vld [vmem:[%s4535_s23 + $0x188] sm:$0xff]  ;;  %v219_v14 = vld [vmem:[%s4535_s23 + $0x98] sm:$0xff]  ;;  %v934_v49 = vunpack.c.l.s4 %v4490_v48  ;;  %vm2782_vm2 = vcmask 9216   ;;  %p2864_p6 = scmp.ne.s32.totalorder %s4521_s13, 7 }
  0x19   : > { %v200_v6 = vld [vmem:[%s4535_s23] sm:$0xff]  ;;  %v201_v7 = vld [vmem:[%s4535_s23 + $0x8] sm:$0xff]  ;;  %v3724_v8 = vpack.c.bf16 %v249_v5, %v248_v3  ;;  %v250_v15 = vld [vmem:[%s4535_s23 + $0x190] sm:$0xff]  ;;  %v3696_v17 = vpack.c.bf16 %v219_v14, %v218_v12  ;;  %v937_v1 = vshrl.u32 %v936_v50, 7 }
  0x1a   : > { %v3694_v9 = vpack.c.bf16 %v201_v7, %v200_v6  ;;  %v232_v10 = vld [vmem:[%s4535_s23 + $0x100] sm:$0xff]  ;;  %v233_v11 = vld [vmem:[%s4535_s23 + $0x108] sm:$0xff]  ;;  %3693 = vmatprep.subr.bf16.mxu0 %v3692_v4  ;;  %v251_v16 = vld [vmem:[%s4535_s23 + $0x198] sm:$0xff]  ;;  %v935_v0 = vunpack.c.0.s8 %v934_v49 }
  0x1b   : > { %v3726_v13 = vpack.c.bf16 %v233_v11, %v232_v10  ;;  %3725 = vmatprep.subr.bf16.mxu1 %v3724_v8  ;;  %v3728_v18 = vpack.c.bf16 %v251_v16, %v250_v15  ;;  %v202_v19 = vld [vmem:[%s4535_s23 + $0x10] sm:$0xff]  ;;  %v203_v20 = vld [vmem:[%s4535_s23 + $0x18] sm:$0xff]  ;;  %v220_v24 = vld [vmem:[%s4535_s23 + $0xa0] sm:$0xff] }
  0x1c   : > { %3695 = vmatpush3.bf16.msra.mxu0 %v3694_v9  ;;  %v234_v21 = vld [vmem:[%s4535_s23 + $0x110] sm:$0xff]  ;;  %v3698_v22 = vpack.c.bf16 %v203_v20, %v202_v19  ;;  %v235_v23 = vld [vmem:[%s4535_s23 + $0x118] sm:$0xff]  ;;  %v221_v25 = vld [vmem:[%s4535_s23 + $0xa8] sm:$0xff]  ;;  %v4588_v14 = vsub.s32 %v935_v0, %v937_v1 }
  0x1d   : > { %3727 = vmatpush3.bf16.msra.mxu1 %v3726_v13  ;;  %3697 = vmatprep.subr.bf16.mxu0 %v3696_v17  ;;  %v3730_v26 = vpack.c.bf16 %v235_v23, %v234_v21  ;;  %v3700_v27 = vpack.c.bf16 %v221_v25, %v220_v24  ;;  %v252_v28 = vld [vmem:[%s4535_s23 + $0x1a0] sm:$0xff]  ;;  %v253_v29 = vld [vmem:[%s4535_s23 + $0x1a8] sm:$0xff]  ;;  %v222_v36 = vld [vmem:[%s4535_s23 + $0xb0] sm:$0xff] }
  0x1e   : > { %3729 = vmatprep.subr.bf16.mxu1 %v3728_v18  ;;  %v204_v30 = vld [vmem:[%s4535_s23 + $0x20] sm:$0xff]  ;;  %v3732_v31 = vpack.c.bf16 %v253_v29, %v252_v28  ;;  %v205_v32 = vld [vmem:[%s4535_s23 + $0x28] sm:$0xff]  ;;  %v223_v37 = vld [vmem:[%s4535_s23 + $0xb8] sm:$0xff] }
  0x1f   : > { %v236_v33 = vld [vmem:[%s4535_s23 + $0x120] sm:$0xff]  ;;  %v237_v34 = vld [vmem:[%s4535_s23 + $0x128] sm:$0xff]  ;;  %v3702_v35 = vpack.c.bf16 %v205_v32, %v204_v30  ;;  %v254_v38 = vld [vmem:[%s4535_s23 + $0x1b0] sm:$0xff]  ;;  %v3704_v40 = vpack.c.bf16 %v223_v37, %v222_v36 }
  0x20   : > { %3699 = vmatpush3.bf16.msra.mxu0 %v3698_v22  ;;  %v3734_v39 = vpack.c.bf16 %v237_v34, %v236_v33  ;;  %v255_v41 = vld [vmem:[%s4535_s23 + $0x1b8] sm:$0xff]  ;;  %v206_v42 = vld [vmem:[%s4535_s23 + $0x30] sm:$0xff]  ;;  %v224_v47 = vld [vmem:[%s4535_s23 + $0xc0] sm:$0xff] }
  0x21   : > { %3731 = vmatpush3.bf16.msra.mxu1 %v3730_v26  ;;  %3701 = vmatprep.subr.bf16.mxu0 %v3700_v27  ;;  %v207_v43 = vld [vmem:[%s4535_s23 + $0x38] sm:$0xff]  ;;  %v3736_v44 = vpack.c.bf16 %v255_v41, %v254_v38  ;;  %v238_v45 = vld [vmem:[%s4535_s23 + $0x130] sm:$0xff]  ;;  %v225_v51 = vld [vmem:[%s4535_s23 + $0xc8] sm:$0xff] }
  0x22   : > { %3733 = vmatprep.subr.bf16.mxu1 %v3732_v31  ;;  %v239_v46 = vld [vmem:[%s4535_s23 + $0x138] sm:$0xff]  ;;  %v256_v52 = vld [vmem:[%s4535_s23 + $0x1c0] sm:$0xff]  ;;  %v257_v53 = vld [vmem:[%s4535_s23 + $0x1c8] sm:$0xff]  ;;  %v3706_v54 = vpack.c.bf16 %v207_v43, %v206_v42  ;;  %v3708_v56 = vpack.c.bf16 %v225_v51, %v224_v47 }
  0x23   : > { %v3738_v55 = vpack.c.bf16 %v239_v46, %v238_v45  ;;  %v208_v57 = vld [vmem:[%s4535_s23 + $0x40] sm:$0xff]  ;;  %v209_v58 = vld [vmem:[%s4535_s23 + $0x48] sm:$0xff]  ;;  %v3740_v60 = vpack.c.bf16 %v257_v53, %v256_v52  ;;  %v226_v62 = vld [vmem:[%s4535_s23 + $0xd0] sm:$0xff] }
  0x24   : > { %3703 = vmatpush3.bf16.msra.mxu0 %v3702_v35  ;;  %v240_v59 = vld [vmem:[%s4535_s23 + $0x140] sm:$0xff]  ;;  %v241_v61 = vld [vmem:[%s4535_s23 + $0x148] sm:$0xff]  ;;  %v227_v63 = vld [vmem:[%s4535_s23 + $0xd8] sm:$0xff]  ;;  %v3710_v4 = vpack.c.bf16 %v209_v58, %v208_v57 }
  0x25   : > { %3735 = vmatpush3.bf16.msra.mxu1 %v3734_v39  ;;  %3705 = vmatprep.subr.bf16.mxu0 %v3704_v40  ;;  %v258_v2 = vld [vmem:[%s4535_s23 + $0x1d0] sm:$0xff]  ;;  %v259_v3 = vld [vmem:[%s4535_s23 + $0x1d8] sm:$0xff]  ;;  %v3742_v5 = vpack.c.bf16 %v241_v61, %v240_v59  ;;  %v3712_v6 = vpack.c.bf16 %v227_v63, %v226_v62  ;;  %v228_v12 = vld [vmem:[%s4535_s23 + $0xe0] sm:$0xff] }
  0x26   : > { %3737 = vmatprep.subr.bf16.mxu1 %v3736_v44  ;;  %v210_v7 = vld [vmem:[%s4535_s23 + $0x50] sm:$0xff]  ;;  %v211_v8 = vld [vmem:[%s4535_s23 + $0x58] sm:$0xff]  ;;  %v3744_v10 = vpack.c.bf16 %v259_v3, %v258_v2  ;;  %v229_v13 = vld [vmem:[%s4535_s23 + $0xe8] sm:$0xff] }
  0x27   : > { %v242_v9 = vld [vmem:[%s4535_s23 + $0x150] sm:$0xff]  ;;  %v243_v11 = vld [vmem:[%s4535_s23 + $0x158] sm:$0xff]  ;;  %v260_v15 = vld [vmem:[%s4535_s23 + $0x1e0] sm:$0xff]  ;;  %v3714_v17 = vpack.c.bf16 %v211_v8, %v210_v7  ;;  %v3716_v20 = vpack.c.bf16 %v229_v13, %v228_v12 }
  0x28   : > { %3707 = vmatpush3.bf16.msra.mxu0 %v3706_v54  ;;  %v261_v16 = vld [vmem:[%s4535_s23 + $0x1e8] sm:$0xff]  ;;  %v212_v18 = vld [vmem:[%s4535_s23 + $0x60] sm:$0xff]  ;;  %v3746_v19 = vpack.c.bf16 %v243_v11, %v242_v9  ;;  %v230_v26 = vld [vmem:[%s4535_s23 + $0xf0] sm:$0xff] }
  0x29   : > { %3739 = vmatpush3.bf16.msra.mxu1 %v3738_v55  ;;  %3709 = vmatprep.subr.bf16.mxu0 %v3708_v56  ;;  %v213_v21 = vld [vmem:[%s4535_s23 + $0x68] sm:$0xff]  ;;  %v244_v22 = vld [vmem:[%s4535_s23 + $0x160] sm:$0xff]  ;;  %v3748_v24 = vpack.c.bf16 %v261_v16, %v260_v15  ;;  %v231_v27 = vld [vmem:[%s4535_s23 + $0xf8] sm:$0xff] }
  0x2a   : > { %3741 = vmatprep.subr.bf16.mxu1 %v3740_v60  ;;  %v188_v23 = vld [vmem:[%s4530_s19] sm:$0xff]  ;;  %v245_v25 = vld [vmem:[%s4535_s23 + $0x168] sm:$0xff]  ;;  %v262_v30 = vld [vmem:[%s4535_s23 + $0x1f0] sm:$0xff]  ;;  %v3718_v32 = vpack.c.bf16 %v213_v21, %v212_v18  ;;  %v3720_v36 = vpack.c.bf16 %v231_v27, %v230_v26 }
  0x2b   : > { %v939_v28 = vrot.slane %v188_v23, %v4588_v14  ;;  %v932_v29 = vcombine.high %v188_v23, %v188_v23  ;;  %v263_v31 = vld [vmem:[%s4535_s23 + $0x1f8] sm:$0xff]  ;;  %v3750_v35 = vpack.c.bf16 %v245_v25, %v244_v22  ;;  %v214_v37 = vld [vmem:[%s4535_s23 + $0x70] sm:$0xff]  ;;  %v280_v43 = vld [vmem:[%s4535_s23 + $0x280] sm:$0xff] }
  0x2c   : > { %3711 = vmatpush3.bf16.msra.mxu0 %v3710_v4  ;;  %v215_v38 = vld [vmem:[%s4535_s23 + $0x78] sm:$0xff]  ;;  %v246_v39 = vld [vmem:[%s4535_s23 + $0x170] sm:$0xff]  ;;  %v3752_v40 = vpack.c.bf16 %v263_v31, %v262_v30  ;;  %v281_v44 = vld [vmem:[%s4535_s23 + $0x288] sm:$0xff] }
  0x2d   : > { %3743 = vmatpush3.bf16.msra.mxu1 %v3742_v5  ;;  %3713 = vmatprep.subr.bf16.mxu0 %v3712_v6  ;;  %v947_v33 = vcombine.high %v939_v28, %v939_v28  ;;  %v946_v34 = vrot.slane %v932_v29, %v4588_v14  ;;  %v247_v41 = vld [vmem:[%s4535_s23 + $0x178] sm:$0xff]  ;;  %v312_v45 = vld [vmem:[%s4535_s23 + $0x380] sm:$0xff]  ;;  %v313_v46 = vld [vmem:[%s4535_s23 + $0x388] sm:$0xff]  ;;  %v3722_v47 = vpack.c.bf16 %v215_v38, %v214_v37 }
  0x2e   : > { %3745 = vmatprep.subr.bf16.mxu1 %v3744_v10  ;;  %v3754_v48 = vpack.c.bf16 %v247_v41, %v246_v39  ;;  %v3756_v49 = vpack.c.bf16 %v281_v44, %v280_v43  ;;  %v264_v50 = vld [vmem:[%s4535_s23 + $0x200] sm:$0xff]  ;;  %v265_v51 = vld [vmem:[%s4535_s23 + $0x208] sm:$0xff]  ;;  %v3788_v53 = vpack.c.bf16 %v313_v46, %v312_v45  ;;  %v282_v55 = vld [vmem:[%s4535_s23 + $0x290] sm:$0xff] }
  0x2f   : > { %1235 = vmatprep.mubr.f32.mxu0 %v947_v33  ;;  %v948_v42 = vcombine.high %v946_v34, %v946_v34  ;;  %v296_v52 = vld [vmem:[%s4535_s23 + $0x300] sm:$0xff]  ;;  %v297_v54 = vld [vmem:[%s4535_s23 + $0x308] sm:$0xff]  ;;  %v283_v56 = vld [vmem:[%s4535_s23 + $0x298] sm:$0xff]  ;;  %v3758_v59 = vpack.c.bf16 %v265_v51, %v264_v50 }
  0x30   : > { %3715 = vmatpush3.bf16.msra.mxu0 %v3714_v17  ;;  %v314_v57 = vld [vmem:[%s4535_s23 + $0x390] sm:$0xff]  ;;  %v315_v58 = vld [vmem:[%s4535_s23 + $0x398] sm:$0xff]  ;;  %v3790_v60 = vpack.c.bf16 %v297_v54, %v296_v52  ;;  %v3760_v61 = vpack.c.bf16 %v283_v56, %v282_v55  ;;  %v284_v3 = vld [vmem:[%s4535_s23 + $0x2a0] sm:$0xff] }
  0x31   : > { %3747 = vmatpush3.bf16.msra.mxu1 %v3746_v19  ;;  %3717 = vmatprep.subr.bf16.mxu0 %v3716_v20  ;;  %v266_v62 = vld [vmem:[%s4535_s23 + $0x210] sm:$0xff]  ;;  %v267_v63 = vld [vmem:[%s4535_s23 + $0x218] sm:$0xff]  ;;  %v3792_v1 = vpack.c.bf16 %v315_v58, %v314_v57  ;;  %v285_v4 = vld [vmem:[%s4535_s23 + $0x2a8] sm:$0xff] }
  0x32   : > { %3749 = vmatprep.subr.bf16.mxu1 %v3748_v24  ;;  %1305 = vmatprep.mubr.f32.mxu1 %v948_v42  ;;  %v298_v0 = vld [vmem:[%s4535_s23 + $0x310] sm:$0xff]  ;;  %v299_v2 = vld [vmem:[%s4535_s23 + $0x318] sm:$0xff]  ;;  %v316_v5 = vld [vmem:[%s4535_s23 + $0x3a0] sm:$0xff]  ;;  %v3762_v7 = vpack.c.bf16 %v267_v63, %v266_v62  ;;  %v3764_v9 = vpack.c.bf16 %v285_v4, %v284_v3 }
  0x33   : > { %v317_v6 = vld [vmem:[%s4535_s23 + $0x3a8] sm:$0xff]  ;;  %v3794_v8 = vpack.c.bf16 %v299_v2, %v298_v0  ;;  %v268_v10 = vld [vmem:[%s4535_s23 + $0x220] sm:$0xff]  ;;  %v286_v16 = vld [vmem:[%s4535_s23 + $0x2b0] sm:$0xff] }
  0x34   : > { %3719 = vmatpush3.bf16.msra.mxu0 %v3718_v32  ;;  %v269_v11 = vld [vmem:[%s4535_s23 + $0x228] sm:$0xff]  ;;  %v300_v12 = vld [vmem:[%s4535_s23 + $0x320] sm:$0xff]  ;;  %v3796_v13 = vpack.c.bf16 %v317_v6, %v316_v5  ;;  %v287_v17 = vld [vmem:[%s4535_s23 + $0x2b8] sm:$0xff] }
  0x35   : > { %3751 = vmatpush3.bf16.msra.mxu1 %v3750_v35  ;;  %3721 = vmatprep.subr.bf16.mxu0 %v3720_v36  ;;  %v301_v15 = vld [vmem:[%s4535_s23 + $0x328] sm:$0xff]  ;;  %v318_v18 = vld [vmem:[%s4535_s23 + $0x3b0] sm:$0xff]  ;;  %v319_v19 = vld [vmem:[%s4535_s23 + $0x3b8] sm:$0xff]  ;;  %v3766_v20 = vpack.c.bf16 %v269_v11, %v268_v10  ;;  %v3768_v23 = vpack.c.bf16 %v287_v17, %v286_v16 }
  0x36   : > { %3753 = vmatprep.subr.bf16.mxu1 %v3752_v40  ;;  %v270_v21 = vld [vmem:[%s4535_s23 + $0x230] sm:$0xff]  ;;  %v3798_v22 = vpack.c.bf16 %v301_v15, %v300_v12  ;;  %v271_v24 = vld [vmem:[%s4535_s23 + $0x238] sm:$0xff]  ;;  %v3800_v27 = vpack.c.bf16 %v319_v19, %v318_v18  ;;  %v289_v29 = vld [vmem:[%s4535_s23 + $0x2c8] sm:$0xff] }
  0x37   : > { %v302_v25 = vld [vmem:[%s4535_s23 + $0x330] sm:$0xff]  ;;  %v303_v26 = vld [vmem:[%s4535_s23 + $0x338] sm:$0xff]  ;;  %v189_v30 = vld [vmem:[%s4530_s19 + $0x8] sm:$0xff]  ;;  %v3770_v35 = vpack.c.bf16 %v271_v24, %v270_v21 }
  0x38   : > { %3723 = vmatpush3.bf16.msra.mxu0 %v3722_v47  ;;  %v320_v31 = vld [vmem:[%s4535_s23 + $0x3c0] sm:$0xff]  ;;  %v321_v32 = vld [vmem:[%s4535_s23 + $0x3c8] sm:$0xff]  ;;  %v4645_v33 = vrot.slane %v189_v30, %v4588_v14  ;;  %v3802_v36 = vpack.c.bf16 %v303_v26, %v302_v25  ;;  %v290_v45 = vld [vmem:[%s4535_s23 + $0x2d0] sm:$0xff] }
  0x39   : > { %3755 = vmatpush3.bf16.msra.mxu1 %v3754_v48  ;;  %3757 = vmatprep.subr.bf16.mxu0 %v3756_v49  ;;  %v272_v38 = vld [vmem:[%s4535_s23 + $0x240] sm:$0xff]  ;;  %v273_v39 = vld [vmem:[%s4535_s23 + $0x248] sm:$0xff]  ;;  %v3804_v43 = vpack.c.bf16 %v321_v32, %v320_v31  ;;  %v291_v46 = vld [vmem:[%s4535_s23 + $0x2d8] sm:$0xff] }
  0x3a   : > { %3789 = vmatprep.subr.bf16.mxu1 %v3788_v53  ;;  %v304_v40 = vld [vmem:[%s4535_s23 + $0x340] sm:$0xff]  ;;  %v964_v41 = vcombine.high %v4645_v33, %v4645_v33  ;;  %v305_v44 = vld [vmem:[%s4535_s23 + $0x348] sm:$0xff]  ;;  %v322_v47 = vld [vmem:[%s4535_s23 + $0x3d0] sm:$0xff]  ;;  %v3774_v50 = vpack.c.bf16 %v273_v39, %v272_v38  ;;  %v3776_v52 = vpack.c.bf16 %v291_v46, %v290_v45 }
  0x3b   : > { %1236 = vmatmul.mubr.f32.vlgmr.msra.gmra.mrb[0].mxu0 %v939_v28  ;;  %v288_v28 = vld [vmem:[%s4535_s23 + $0x2c0] sm:$0xff]  ;;  %v323_v48 = vld [vmem:[%s4535_s23 + $0x3d8] sm:$0xff]  ;;  %v3806_v51 = vpack.c.bf16 %v305_v44, %v304_v40  ;;  %v274_v53 = vld [vmem:[%s4535_s23 + $0x250] sm:$0xff] }
  0x3c   : > { %1306 = vmatmul.mubr.f32.vlgmr.msra.gmra.mrb[0].mxu1 %v946_v34  ;;  %3759 = vmatpush3.bf16.msra.mxu0 %v3758_v59  ;;  %v949_v34 = vcombine.high %v189_v30, %v189_v30  ;;  %v3772_v37 = vpack.c.bf16 %v289_v29, %v288_v28  ;;  %v275_v54 = vld [vmem:[%s4535_s23 + $0x258] sm:$0xff]  ;;  %v306_v55 = vld [vmem:[%s4535_s23 + $0x350] sm:$0xff]  ;;  %v3808_v56 = vpack.c.bf16 %v323_v48, %v322_v47  ;;  %v292_v58 = vld [vmem:[%s4535_s23 + $0x2e0] sm:$0xff] }
  0x3d   : > { %3791 = vmatpush3.bf16.msra.mxu1 %v3790_v60  ;;  %3761 = vmatprep.subr.bf16.mxu0 %v3760_v61  ;;  %v307_v57 = vld [vmem:[%s4535_s23 + $0x358] sm:$0xff]  ;;  %v293_v59 = vld [vmem:[%s4535_s23 + $0x2e8] sm:$0xff]  ;;  %v324_v60 = vld [vmem:[%s4535_s23 + $0x3e0] sm:$0xff]  ;;  %v3778_v62 = vpack.c.bf16 %v275_v54, %v274_v53 }
  0x3e   : > { %3793 = vmatprep.subr.bf16.mxu1 %v3792_v1  ;;  %v4653_v42 = vrot.slane %v949_v34, %v4588_v14  ;;  %1375 = vmatprep.mubr.f32.mxu0 %v964_v41  ;;  %v325_v61 = vld [vmem:[%s4535_s23 + $0x3e8] sm:$0xff]  ;;  %v3810_v63 = vpack.c.bf16 %v307_v57, %v306_v55  ;;  %v3780_v0 = vpack.c.bf16 %v293_v59, %v292_v58  ;;  %v276_v1 = vld [vmem:[%s4535_s23 + $0x260] sm:$0xff]  ;;  %v294_v6 = vld [vmem:[%s4535_s23 + $0x2f0] sm:$0xff] }
  0x3f   : > { %v277_v2 = vld [vmem:[%s4535_s23 + $0x268] sm:$0xff]  ;;  %v308_v3 = vld [vmem:[%s4535_s23 + $0x360] sm:$0xff]  ;;  %v3812_v4 = vpack.c.bf16 %v325_v61, %v324_v60  ;;  %v279_v15 = vld [vmem:[%s4535_s23 + $0x278] sm:$0xff] }
  0x40   : > { %3763 = vmatpush3.bf16.msra.mxu0 %v3762_v7  ;;  %v965_v49 = vcombine.high %v4653_v42, %v4653_v42  ;;  %v309_v5 = vld [vmem:[%s4535_s23 + $0x368] sm:$0xff]  ;;  %v295_v7 = vld [vmem:[%s4535_s23 + $0x2f8] sm:$0xff]  ;;  %v3782_v10 = vpack.c.bf16 %v277_v2, %v276_v1  ;;  %v310_v16 = vld [vmem:[%s4535_s23 + $0x370] sm:$0xff] }
  0x41   : > { %3795 = vmatpush3.bf16.msra.mxu1 %v3794_v8  ;;  %3765 = vmatprep.subr.bf16.mxu0 %v3764_v9  ;;  %v326_v8 = vld [vmem:[%s4535_s23 + $0x3f0] sm:$0xff]  ;;  %v327_v9 = vld [vmem:[%s4535_s23 + $0x3f8] sm:$0xff]  ;;  %v3814_v11 = vpack.c.bf16 %v309_v5, %v308_v3  ;;  %v3784_v12 = vpack.c.bf16 %v295_v7, %v294_v6  ;;  %v344_v19 = vld [vmem:[%s4535_s23 + $0x480] sm:$0xff] }
  0x42   : > { %3797 = vmatprep.subr.bf16.mxu1 %v3796_v13  ;;  %1445 = vmatprep.mubr.f32.mxu1 %v965_v49  ;;  %v278_v13 = vld [vmem:[%s4535_s23 + $0x270] sm:$0xff]  ;;  %v3816_v17 = vpack.c.bf16 %v327_v9, %v326_v8  ;;  %v311_v18 = vld [vmem:[%s4535_s23 + $0x378] sm:$0xff]  ;;  %v376_v21 = vld [vmem:[%s4535_s23 + $0x580] sm:$0xff] }
  0x43   : > { %v328_v24 = vld [vmem:[%s4535_s23 + $0x400] sm:$0xff]  ;;  %v3818_v25 = vpack.c.bf16 %v311_v18, %v310_v16  ;;  %v361_v29 = vld [vmem:[%s4535_s23 + $0x508] sm:$0xff]  ;;  %v346_v31 = vld [vmem:[%s4535_s23 + $0x490] sm:$0xff] }
  0x44   : > { %3767 = vmatpush3.bf16.msra.mxu0 %v3766_v20  ;;  %v345_v20 = vld [vmem:[%s4535_s23 + $0x488] sm:$0xff]  ;;  %v360_v28 = vld [vmem:[%s4535_s23 + $0x500] sm:$0xff]  ;;  %v347_v32 = vld [vmem:[%s4535_s23 + $0x498] sm:$0xff] }
  0x45   : > { %3799 = vmatpush3.bf16.msra.mxu1 %v3798_v22  ;;  %3769 = vmatprep.subr.bf16.mxu0 %v3768_v23  ;;  %v377_v22 = vld [vmem:[%s4535_s23 + $0x588] sm:$0xff]  ;;  %v3786_v23 = vpack.c.bf16 %v279_v15, %v278_v13  ;;  %v3820_v26 = vpack.c.bf16 %v345_v20, %v344_v19  ;;  %v378_v34 = vld [vmem:[%s4535_s23 + $0x590] sm:$0xff]  ;;  %v3824_v39 = vpack.c.bf16 %v347_v32, %v346_v31  ;;  %v331_v41 = vld [vmem:[%s4535_s23 + $0x418] sm:$0xff] }
  0x46   : > { %3801 = vmatprep.subr.bf16.mxu1 %v3800_v27  ;;  %v329_v27 = vld [vmem:[%s4535_s23 + $0x408] sm:$0xff]  ;;  %v3852_v30 = vpack.c.bf16 %v377_v22, %v376_v21  ;;  %v190_v38 = vld [vmem:[%s4530_s19 + $0x10] sm:$0xff]  ;;  %v363_v47 = vld [vmem:[%s4535_s23 + $0x518] sm:$0xff] }
  0x47   : > { %v330_v40 = vld [vmem:[%s4535_s23 + $0x410] sm:$0xff]  ;;  %v4699_v44 = vrot.slane %v190_v38, %v4588_v14  ;;  %v966_v45 = vcombine.high %v190_v38, %v190_v38  ;;  %v348_v48 = vld [vmem:[%s4535_s23 + $0x4a0] sm:$0xff]  ;;  %v349_v49 = vld [vmem:[%s4535_s23 + $0x4a8] sm:$0xff] }
  0x48   : > { %3771 = vmatpush3.bf16.msra.mxu0 %v3770_v35  ;;  %v379_v35 = vld [vmem:[%s4535_s23 + $0x598] sm:$0xff]  ;;  %v3826_v54 = vpack.c.bf16 %v331_v41, %v330_v40  ;;  %v3828_v55 = vpack.c.bf16 %v349_v49, %v348_v48  ;;  %v333_v57 = vld [vmem:[%s4535_s23 + $0x428] sm:$0xff]  ;;  %v364_v58 = vld [vmem:[%s4535_s23 + $0x520] sm:$0xff] }
  0x49   : > { %3803 = vmatpush3.bf16.msra.mxu1 %v3802_v36  ;;  %3773 = vmatprep.subr.bf16.mxu0 %v3772_v37  ;;  %v3822_v36 = vpack.c.bf16 %v329_v27, %v328_v24  ;;  %v3854_v37 = vpack.c.bf16 %v361_v29, %v360_v28  ;;  %v3856_v46 = vpack.c.bf16 %v379_v35, %v378_v34  ;;  %v365_v61 = vld [vmem:[%s4535_s23 + $0x528] sm:$0xff]  ;;  %v335_v5 = vld [vmem:[%s4535_s23 + $0x438] sm:$0xff]  ;;  %v366_v6 = vld [vmem:[%s4535_s23 + $0x530] sm:$0xff] }
  0x4a   : > { %3805 = vmatprep.subr.bf16.mxu1 %v3804_v43  ;;  %v362_v43 = vld [vmem:[%s4535_s23 + $0x510] sm:$0xff]  ;;  %v4710_v53 = vrot.slane %v966_v45, %v4588_v14  ;;  %v3862_v2 = vpack.c.bf16 %v365_v61, %v364_v58  ;;  %v367_v8 = vld [vmem:[%s4535_s23 + $0x538] sm:$0xff]  ;;  %v352_v9 = vld [vmem:[%s4535_s23 + $0x4c0] sm:$0xff] }
  0x4b   : > { %v3866_v15 = vpack.c.bf16 %v367_v8, %v366_v6  ;;  %v337_v18 = vld [vmem:[%s4535_s23 + $0x448] sm:$0xff]  ;;  %v368_v19 = vld [vmem:[%s4535_s23 + $0x540] sm:$0xff]  ;;  %v354_v22 = vld [vmem:[%s4535_s23 + $0x4d0] sm:$0xff] }
  0x4c   : > { %3775 = vmatpush3.bf16.msra.mxu0 %v3774_v50  ;;  %v380_v50 = vld [vmem:[%s4535_s23 + $0x5a0] sm:$0xff]  ;;  %v982_v59 = vcombine.high %v4710_v53, %v4710_v53  ;;  %v369_v21 = vld [vmem:[%s4535_s23 + $0x548] sm:$0xff]  ;;  %v386_v24 = vld [vmem:[%s4535_s23 + $0x5d0] sm:$0xff] }
  0x4d   : > { %3807 = vmatpush3.bf16.msra.mxu1 %v3806_v51  ;;  %3777 = vmatprep.subr.bf16.mxu0 %v3776_v52  ;;  %v381_v51 = vld [vmem:[%s4535_s23 + $0x5a8] sm:$0xff]  ;;  %v981_v52 = vcombine.high %v4699_v44, %v4699_v44  ;;  %v3870_v27 = vpack.c.bf16 %v369_v21, %v368_v19  ;;  %v338_v29 = vld [vmem:[%s4535_s23 + $0x450] sm:$0xff]  ;;  %v371_v34 = vld [vmem:[%s4535_s23 + $0x558] sm:$0xff] }
  0x4e   : > { %3809 = vmatprep.subr.bf16.mxu1 %v3808_v56  ;;  %v332_v56 = vld [vmem:[%s4535_s23 + $0x420] sm:$0xff]  ;;  %v3860_v60 = vpack.c.bf16 %v381_v51, %v380_v50  ;;  %v370_v31 = vld [vmem:[%s4535_s23 + $0x550] sm:$0xff]  ;;  %v389_v38 = vld [vmem:[%s4535_s23 + $0x5e8] sm:$0xff] }
  0x4f   : > { %v3830_v1 = vpack.c.bf16 %v333_v57, %v332_v56  ;;  %v356_v35 = vld [vmem:[%s4535_s23 + $0x4e0] sm:$0xff]  ;;  %v3874_v40 = vpack.c.bf16 %v371_v34, %v370_v31  ;;  %v341_v45 = vld [vmem:[%s4535_s23 + $0x468] sm:$0xff]  ;;  %v358_v49 = vld [vmem:[%s4535_s23 + $0x4f0] sm:$0xff] }
  0x50   : > { %3779 = vmatpush3.bf16.msra.mxu0 %v3778_v62  ;;  %v351_v62 = vld [vmem:[%s4535_s23 + $0x4b8] sm:$0xff]  ;;  %v373_v48 = vld [vmem:[%s4535_s23 + $0x568] sm:$0xff]  ;;  %v390_v51 = vld [vmem:[%s4535_s23 + $0x5f0] sm:$0xff] }
  0x51   : > { %3811 = vmatpush3.bf16.msra.mxu1 %v3810_v63  ;;  %3781 = vmatprep.subr.bf16.mxu0 %v3780_v0  ;;  %v382_v63 = vld [vmem:[%s4535_s23 + $0x5b0] sm:$0xff]  ;;  %v383_v0 = vld [vmem:[%s4535_s23 + $0x5b8] sm:$0xff]  ;;  %v393_v6 = vld [vmem:[%s4535_s23 + $0x608] sm:$0xff] }
  0x52   : > { %3813 = vmatprep.subr.bf16.mxu1 %v3812_v4  ;;  %v334_v4 = vld [vmem:[%s4535_s23 + $0x430] sm:$0xff]  ;;  %v3864_v7 = vpack.c.bf16 %v383_v0, %v382_v63  ;;  %v359_v50 = vld [vmem:[%s4535_s23 + $0x4f8] sm:$0xff]  ;;  %v440_v63 = vld [vmem:[%s4535_s23 + $0x780] sm:$0xff] }
  0x53   : > { %v3834_v13 = vpack.c.bf16 %v335_v5, %v334_v4  ;;  %v3848_v56 = vpack.c.bf16 %v359_v50, %v358_v49  ;;  %v342_v57 = vld [vmem:[%s4535_s23 + $0x470] sm:$0xff]  ;;  %v343_v58 = vld [vmem:[%s4535_s23 + $0x478] sm:$0xff]  ;;  %v441_v0 = vld [vmem:[%s4535_s23 + $0x788] sm:$0xff] }
  0x54   : > { %3783 = vmatpush3.bf16.msra.mxu0 %v3782_v10  ;;  %v353_v10 = vld [vmem:[%s4535_s23 + $0x4c8] sm:$0xff]  ;;  %v375_v61 = vld [vmem:[%s4535_s23 + $0x578] sm:$0xff]  ;;  %v392_v5 = vld [vmem:[%s4535_s23 + $0x600] sm:$0xff]  ;;  %v3916_v8 = vpack.c.bf16 %v441_v0, %v440_v63 }
  0x55   : > { %3815 = vmatpush3.bf16.msra.mxu1 %v3814_v11  ;;  %3785 = vmatprep.subr.bf16.mxu0 %v3784_v12  ;;  %v384_v11 = vld [vmem:[%s4535_s23 + $0x5c0] sm:$0xff]  ;;  %v385_v12 = vld [vmem:[%s4535_s23 + $0x5c8] sm:$0xff]  ;;  %v3836_v16 = vpack.c.bf16 %v353_v10, %v352_v9  ;;  %v410_v10 = vld [vmem:[%s4535_s23 + $0x690] sm:$0xff] }
  0x56   : > { %3817 = vmatprep.subr.bf16.mxu1 %v3816_v17  ;;  %v336_v17 = vld [vmem:[%s4535_s23 + $0x440] sm:$0xff]  ;;  %v3868_v20 = vpack.c.bf16 %v385_v12, %v384_v11  ;;  %v425_v9 = vld [vmem:[%s4535_s23 + $0x708] sm:$0xff]  ;;  %v411_v11 = vld [vmem:[%s4535_s23 + $0x698] sm:$0xff] }
  0x57   : > { %v3888_v19 = vpack.c.bf16 %v411_v11, %v410_v10  ;;  %v395_v21 = vld [vmem:[%s4535_s23 + $0x618] sm:$0xff]  ;;  %v430_v49 = vld [vmem:[%s4535_s23 + $0x730] sm:$0xff]  ;;  %v420_v11 = vld [vmem:[%s4535_s23 + $0x6e0] sm:$0xff] }
  0x58   : > { %3787 = vmatpush3.bf16.msra.mxu0 %v3786_v23  ;;  %v355_v23 = vld [vmem:[%s4535_s23 + $0x4d8] sm:$0xff]  ;;  %v418_v63 = vld [vmem:[%s4535_s23 + $0x6d0] sm:$0xff] }
  0x59   : > { %3819 = vmatpush3.bf16.msra.mxu1 %v3818_v25  ;;  %3821 = vmatprep.subr.bf16.mxu0 %v3820_v26  ;;  %v387_v25 = vld [vmem:[%s4535_s23 + $0x5d8] sm:$0xff]  ;;  %v3838_v26 = vpack.c.bf16 %v337_v18, %v336_v17  ;;  %v3840_v28 = vpack.c.bf16 %v355_v23, %v354_v22  ;;  %v3886_v17 = vpack.c.bf16 %v393_v6, %v392_v5  ;;  %v426_v22 = vld [vmem:[%s4535_s23 + $0x710] sm:$0xff] }
  0x5a   : > { %3853 = vmatprep.subr.bf16.mxu1 %v3852_v30  ;;  %v339_v30 = vld [vmem:[%s4535_s23 + $0x458] sm:$0xff]  ;;  %v3872_v32 = vpack.c.bf16 %v387_v25, %v386_v24  ;;  %v412_v25 = vld [vmem:[%s4535_s23 + $0x6a0] sm:$0xff]  ;;  %v402_v6 = vld [vmem:[%s4535_s23 + $0x650] sm:$0xff] }
  0x5b   : > { %1376 = vmatmul.mubr.f32.vlgmr.msra.gmra.mrb[2].mxu0 %v4645_v33  ;;  %v3858_v33 = vpack.c.bf16 %v363_v47, %v362_v43  ;;  %v340_v43 = vld [vmem:[%s4535_s23 + $0x460] sm:$0xff]  ;;  %v427_v24 = vld [vmem:[%s4535_s23 + $0x718] sm:$0xff] }
  0x5c   : > { %3823 = vmatpush3.bf16.msra.mxu0 %v3822_v36  ;;  %1446 = vmatmul.mubr.f32.vlgmr.msra.gmra.mrb[2].mxu1 %v4653_v42  ;;  %v350_v42 = vld [vmem:[%s4535_s23 + $0x4b0] sm:$0xff]  ;;  %v357_v36 = vld [vmem:[%s4535_s23 + $0x4e8] sm:$0xff]  ;;  %v419_v0 = vld [vmem:[%s4535_s23 + $0x6d8] sm:$0xff] }
  0x5d   : > { %3855 = vmatpush3.bf16.msra.mxu1 %v3854_v37  ;;  %3825 = vmatprep.subr.bf16.mxu0 %v3824_v39  ;;  %v3832_v3 = vpack.c.bf16 %v351_v62, %v350_v42  ;;  %v388_v37 = vld [vmem:[%s4535_s23 + $0x5e0] sm:$0xff]  ;;  %v3842_v39 = vpack.c.bf16 %v339_v30, %v338_v29  ;;  %v3844_v41 = vpack.c.bf16 %v357_v36, %v356_v35  ;;  %v409_v62 = vld [vmem:[%s4535_s23 + $0x688] sm:$0xff]  ;;  %v435_v10 = vld [vmem:[%s4535_s23 + $0x758] sm:$0xff] }
  0x5e   : > { %3857 = vmatprep.subr.bf16.mxu1 %v3856_v46  ;;  %1515 = vmatprep.mubr.f32.mxu0 %v981_v52  ;;  %v372_v46 = vld [vmem:[%s4535_s23 + $0x560] sm:$0xff]  ;;  %v3876_v47 = vpack.c.bf16 %v389_v38, %v388_v37  ;;  %v391_v52 = vld [vmem:[%s4535_s23 + $0x5f8] sm:$0xff]  ;;  %v445_v29 = vld [vmem:[%s4535_s23 + $0x7a8] sm:$0xff]  ;;  %v3904_v5 = vpack.c.bf16 %v419_v0, %v418_v63 }
  0x5f   : > { %1585 = vmatprep.mubr.f32.mxu1 %v982_v59  ;;  %v374_v59 = vld [vmem:[%s4535_s23 + $0x570] sm:$0xff]  ;;  %v408_v42 = vld [vmem:[%s4535_s23 + $0x680] sm:$0xff]  ;;  %v429_v38 = vld [vmem:[%s4535_s23 + $0x728] sm:$0xff] }
  0x60   : > { %3827 = vmatpush3.bf16.msra.mxu0 %v3826_v54  ;;  %v3846_v54 = vpack.c.bf16 %v341_v45, %v340_v43  ;;  %v3884_v4 = vpack.c.bf16 %v409_v62, %v408_v42  ;;  %v396_v35 = vld [vmem:[%s4535_s23 + $0x620] sm:$0xff]  ;;  %v433_v62 = vld [vmem:[%s4535_s23 + $0x748] sm:$0xff]  ;;  %v490_v63 = vld [vmem:[%s4535_s23 + $0x910] sm:$0xff] }
  0x61   : > { %3859 = vmatpush3.bf16.msra.mxu1 %v3858_v33  ;;  %3829 = vmatprep.subr.bf16.mxu0 %v3828_v55  ;;  %v191_v33 = vld [vmem:[%s4530_s19 + $0x18] sm:$0xff]  ;;  %v3878_v55 = vpack.c.bf16 %v373_v48, %v372_v46  ;;  %v428_v36 = vld [vmem:[%s4535_s23 + $0x720] sm:$0xff] }
  0x62   : > { %3861 = vmatprep.subr.bf16.mxu1 %v3860_v60  ;;  %v3880_v60 = vpack.c.bf16 %v391_v52, %v390_v51  ;;  %v4771_v12 = vrot.slane %v191_v33, %v4588_v14  ;;  %v3926_v45 = vpack.c.bf16 %v429_v38, %v428_v36  ;;  %v399_v48 = vld [vmem:[%s4535_s23 + $0x638] sm:$0xff]  ;;  %v416_v52 = vld [vmem:[%s4535_s23 + $0x6c0] sm:$0xff]  ;;  %v438_v36 = vld [vmem:[%s4535_s23 + $0x770] sm:$0xff] }
  0x63   : > { %v431_v51 = vld [vmem:[%s4535_s23 + $0x738] sm:$0xff] }
  0x64   : > { %3831 = vmatpush3.bf16.msra.mxu0 %v3830_v1  ;;  %v983_v1 = vcombine.high %v191_v33, %v191_v33  ;;  %v448_v33 = vld [vmem:[%s4535_s23 + $0x7c0] sm:$0xff]  ;;  %v439_v38 = vld [vmem:[%s4535_s23 + $0x778] sm:$0xff] }
  0x65   : > { %3863 = vmatpush3.bf16.msra.mxu1 %v3862_v2  ;;  %3833 = vmatprep.subr.bf16.mxu0 %v3832_v3  ;;  %v3850_v2 = vpack.c.bf16 %v343_v58, %v342_v57  ;;  %v3882_v3 = vpack.c.bf16 %v375_v61, %v374_v59  ;;  %v3930_v57 = vpack.c.bf16 %v431_v51, %v430_v49  ;;  %v400_v59 = vld [vmem:[%s4535_s23 + $0x640] sm:$0xff]  ;;  %v457_v49 = vld [vmem:[%s4535_s23 + $0x808] sm:$0xff] }
  0x66   : > { %3865 = vmatprep.subr.bf16.mxu1 %v3864_v7  ;;  %v424_v7 = vld [vmem:[%s4535_s23 + $0x700] sm:$0xff] }
  0x67   : > { %v3918_v18 = vpack.c.bf16 %v425_v9, %v424_v7  ;;  %v432_v61 = vld [vmem:[%s4535_s23 + $0x740] sm:$0xff]  ;;  %v403_v7 = vld [vmem:[%s4535_s23 + $0x658] sm:$0xff] }
  0x68   : > { %3835 = vmatpush3.bf16.msra.mxu0 %v3834_v13  ;;  %v442_v13 = vld [vmem:[%s4535_s23 + $0x790] sm:$0xff] }
  0x69   : > { %3867 = vmatpush3.bf16.msra.mxu1 %v3866_v15  ;;  %3837 = vmatprep.subr.bf16.mxu0 %v3836_v16  ;;  %v443_v15 = vld [vmem:[%s4535_s23 + $0x798] sm:$0xff]  ;;  %v4776_v16 = vrot.slane %v983_v1, %v4588_v14  ;;  %v450_v1 = vld [vmem:[%s4535_s23 + $0x7d0] sm:$0xff] }
  0x6a   : > { %3869 = vmatprep.subr.bf16.mxu1 %v3868_v20  ;;  %v394_v20 = vld [vmem:[%s4535_s23 + $0x610] sm:$0xff]  ;;  %v3920_v23 = vpack.c.bf16 %v443_v15, %v442_v13  ;;  %v421_v13 = vld [vmem:[%s4535_s23 + $0x6e8] sm:$0xff]  ;;  %v452_v15 = vld [vmem:[%s4535_s23 + $0x7e0] sm:$0xff] }
  0x6b   : > { %v999_v30 = vcombine.high %v4776_v16, %v4776_v16  ;;  %v3890_v31 = vpack.c.bf16 %v395_v21, %v394_v20  ;;  %v3908_v20 = vpack.c.bf16 %v421_v13, %v420_v11  ;;  %v404_v21 = vld [vmem:[%s4535_s23 + $0x660] sm:$0xff] }
  0x6c   : > { %3839 = vmatpush3.bf16.msra.mxu0 %v3838_v26  ;;  %v413_v26 = vld [vmem:[%s4535_s23 + $0x6a8] sm:$0xff]  ;;  %v460_v11 = vld [vmem:[%s4535_s23 + $0x820] sm:$0xff] }
  0x6d   : > { %3871 = vmatpush3.bf16.msra.mxu1 %v3870_v27  ;;  %3841 = vmatprep.subr.bf16.mxu0 %v3840_v28  ;;  %v998_v27 = vcombine.high %v4771_v12, %v4771_v12  ;;  %v444_v28 = vld [vmem:[%s4535_s23 + $0x7a0] sm:$0xff]  ;;  %v3892_v34 = vpack.c.bf16 %v413_v26, %v412_v25  ;;  %v437_v25 = vld [vmem:[%s4535_s23 + $0x768] sm:$0xff]  ;;  %v422_v26 = vld [vmem:[%s4535_s23 + $0x6f0] sm:$0xff] }
  0x6e   : > { %3873 = vmatprep.subr.bf16.mxu1 %v3872_v32  ;;  %v3922_v32 = vpack.c.bf16 %v427_v24, %v426_v22  ;;  %v3924_v37 = vpack.c.bf16 %v445_v29, %v444_v28  ;;  %v405_v22 = vld [vmem:[%s4535_s23 + $0x668] sm:$0xff]  ;;  %v454_v28 = vld [vmem:[%s4535_s23 + $0x7f0] sm:$0xff]  ;;  %v455_v29 = vld [vmem:[%s4535_s23 + $0x7f8] sm:$0xff] }
  0x6f   : > { %v492_v13 = vld [vmem:[%s4535_s23 + $0x920] sm:$0xff] }
  0x70   : > { %3843 = vmatpush3.bf16.msra.mxu0 %v3842_v39  ;;  %v414_v39 = vld [vmem:[%s4535_s23 + $0x6b0] sm:$0xff] }
  0x71   : > { %3875 = vmatpush3.bf16.msra.mxu1 %v3874_v40  ;;  %3845 = vmatprep.subr.bf16.mxu0 %v3844_v41  ;;  %v415_v40 = vld [vmem:[%s4535_s23 + $0x6b8] sm:$0xff] }
  0x72   : > { %3877 = vmatprep.subr.bf16.mxu1 %v3876_v47  ;;  %v447_v41 = vld [vmem:[%s4535_s23 + $0x7b8] sm:$0xff]  ;;  %v3896_v46 = vpack.c.bf16 %v415_v40, %v414_v39  ;;  %v398_v47 = vld [vmem:[%s4535_s23 + $0x630] sm:$0xff]  ;;  %v472_v39 = vld [vmem:[%s4535_s23 + $0x880] sm:$0xff] }
  0x73   : > { %v473_v40 = vld [vmem:[%s4535_s23 + $0x888] sm:$0xff] }
  0x74   : > { %3847 = vmatpush3.bf16.msra.mxu0 %v3846_v54  ;;  %v417_v54 = vld [vmem:[%s4535_s23 + $0x6c8] sm:$0xff] }
  0x75   : > { %3879 = vmatpush3.bf16.msra.mxu1 %v3878_v55  ;;  %3849 = vmatprep.subr.bf16.mxu0 %v3848_v56  ;;  %v449_v55 = vld [vmem:[%s4535_s23 + $0x7c8] sm:$0xff]  ;;  %v3898_v56 = vpack.c.bf16 %v399_v48, %v398_v47  ;;  %v3900_v58 = vpack.c.bf16 %v417_v54, %v416_v52  ;;  %v3948_v47 = vpack.c.bf16 %v473_v40, %v472_v39  ;;  %v456_v48 = vld [vmem:[%s4535_s23 + $0x800] sm:$0xff]  ;;  %v474_v54 = vld [vmem:[%s4535_s23 + $0x890] sm:$0xff] }
  0x76   : > { %3881 = vmatprep.subr.bf16.mxu1 %v3880_v60  ;;  %v401_v60 = vld [vmem:[%s4535_s23 + $0x648] sm:$0xff]  ;;  %v3932_v42 = vpack.c.bf16 %v449_v55, %v448_v33  ;;  %v475_v33 = vld [vmem:[%s4535_s23 + $0x898] sm:$0xff] }
  0x77   : > { %v489_v52 = vld [vmem:[%s4535_s23 + $0x908] sm:$0xff] }
  0x78   : > { %3851 = vmatpush3.bf16.msra.mxu0 %v3850_v2  ;;  %v451_v2 = vld [vmem:[%s4535_s23 + $0x7d8] sm:$0xff]  ;;  %v497_v40 = vld [vmem:[%s4535_s23 + $0x948] sm:$0xff] }
  0x79   : > { %3883 = vmatpush3.bf16.msra.mxu1 %v3882_v3  ;;  %3885 = vmatprep.subr.bf16.mxu0 %v3884_v4  ;;  %v3902_v3 = vpack.c.bf16 %v401_v60, %v400_v59  ;;  %v3934_v4 = vpack.c.bf16 %v433_v62, %v432_v61  ;;  %v3936_v9 = vpack.c.bf16 %v451_v2, %v450_v1  ;;  %v459_v62 = vld [vmem:[%s4535_s23 + $0x818] sm:$0xff]  ;;  %v476_v2 = vld [vmem:[%s4535_s23 + $0x8a0] sm:$0xff] }
  0x7a   : > { %3917 = vmatprep.subr.bf16.mxu1 %v3916_v8  ;;  %v434_v8 = vld [vmem:[%s4535_s23 + $0x750] sm:$0xff]  ;;  %v3950_v59 = vpack.c.bf16 %v457_v49, %v456_v48  ;;  %v3952_v61 = vpack.c.bf16 %v475_v33, %v474_v54  ;;  %v491_v1 = vld [vmem:[%s4535_s23 + $0x918] sm:$0xff]  ;;  %v484_v33 = vld [vmem:[%s4535_s23 + $0x8e0] sm:$0xff] }
  0x7b   : > { %1516 = vmatmul.mubr.f32.vlgmr.msra.gmra.mrb[4].mxu0 %v4699_v44  ;;  %v397_v44 = vld [vmem:[%s4535_s23 + $0x628] sm:$0xff]  ;;  %v466_v49 = vld [vmem:[%s4535_s23 + $0x850] sm:$0xff]  ;;  %v499_v54 = vld [vmem:[%s4535_s23 + $0x958] sm:$0xff] }
  0x7c   : > { %3887 = vmatpush3.bf16.msra.mxu0 %v3886_v17  ;;  %1586 = vmatmul.mubr.f32.vlgmr.msra.gmra.mrb[4].mxu1 %v4710_v53  ;;  %v446_v53 = vld [vmem:[%s4535_s23 + $0x7b0] sm:$0xff]  ;;  %v3894_v43 = vpack.c.bf16 %v397_v44, %v396_v35  ;;  %v453_v17 = vld [vmem:[%s4535_s23 + $0x7e8] sm:$0xff]  ;;  %v407_v44 = vld [vmem:[%s4535_s23 + $0x678] sm:$0xff] }
  0x7d   : > { %3919 = vmatpush3.bf16.msra.mxu1 %v3918_v18  ;;  %3889 = vmatprep.subr.bf16.mxu0 %v3888_v19  ;;  %v3928_v50 = vpack.c.bf16 %v447_v41, %v446_v53  ;;  %v3906_v18 = vpack.c.bf16 %v403_v7, %v402_v6  ;;  %v3938_v19 = vpack.c.bf16 %v435_v10, %v434_v8  ;;  %v406_v35 = vld [vmem:[%s4535_s23 + $0x670] sm:$0xff]  ;;  %v504_v53 = vld [vmem:[%s4535_s23 + $0x980] sm:$0xff]  ;;  %v505_v41 = vld [vmem:[%s4535_s23 + $0x988] sm:$0xff] }
  0x7e   : > { %3921 = vmatprep.subr.bf16.mxu1 %v3920_v23  ;;  %1655 = vmatprep.mubr.f32.mxu0 %v998_v27  ;;  %v436_v23 = vld [vmem:[%s4535_s23 + $0x760] sm:$0xff]  ;;  %v3940_v24 = vpack.c.bf16 %v453_v17, %v452_v15  ;;  %v423_v27 = vld [vmem:[%s4535_s23 + $0x6f8] sm:$0xff]  ;;  %v3980_v51 = vpack.c.bf16 %v505_v41, %v504_v53  ;;  %v509_v6 = vld [vmem:[%s4535_s23 + $0x9a8] sm:$0xff] }
  0x7f   : > { %1725 = vmatprep.mubr.f32.mxu1 %v999_v30  ;;  %v3910_v30 = vpack.c.bf16 %v405_v22, %v404_v21  ;;  %v493_v17 = vld [vmem:[%s4535_s23 + $0x928] sm:$0xff]  ;;  %v482_v53 = vld [vmem:[%s4535_s23 + $0x8d0] sm:$0xff]  ;;  %v483_v41 = vld [vmem:[%s4535_s23 + $0x8d8] sm:$0xff] }
  0x80   : > { %3891 = vmatpush3.bf16.msra.mxu0 %v3890_v31  ;;  %v192_v31 = vld [vmem:[%s4530_s19 + $0x20] sm:$0xff]  ;;  %v3990_v22 = vpack.c.bf16 %v493_v17, %v492_v13  ;;  %v3968_v48 = vpack.c.bf16 %v483_v41, %v482_v53  ;;  %v502_v13 = vld [vmem:[%s4535_s23 + $0x970] sm:$0xff]  ;;  %v503_v17 = vld [vmem:[%s4535_s23 + $0x978] sm:$0xff] }
  0x81   : > { %3923 = vmatpush3.bf16.msra.mxu1 %v3922_v32  ;;  %3893 = vmatprep.subr.bf16.mxu0 %v3892_v34  ;;  %v3942_v32 = vpack.c.bf16 %v437_v25, %v436_v23  ;;  %v3912_v34 = vpack.c.bf16 %v423_v27, %v422_v26  ;;  %v4848_v55 = vrot.slane %v192_v31, %v4588_v14  ;;  %v463_v25 = vld [vmem:[%s4535_s23 + $0x838] sm:$0xff]  ;;  %v494_v26 = vld [vmem:[%s4535_s23 + $0x930] sm:$0xff] }
  0x82   : > { %3925 = vmatprep.subr.bf16.mxu1 %v3924_v37  ;;  %v3944_v37 = vpack.c.bf16 %v455_v29, %v454_v28  ;;  %v495_v28 = vld [vmem:[%s4535_s23 + $0x938] sm:$0xff]  ;;  %v480_v29 = vld [vmem:[%s4535_s23 + $0x8c0] sm:$0xff]  ;;  %v554_v53 = vld [vmem:[%s4535_s23 + $0xb10] sm:$0xff] }
  0x84   : > { %3895 = vmatpush3.bf16.msra.mxu0 %v3894_v43  ;;  %v1000_v43 = vcombine.high %v192_v31, %v192_v31  ;;  %v512_v31 = vld [vmem:[%s4535_s23 + $0x9c0] sm:$0xff] }
  0x85   : > { %3927 = vmatpush3.bf16.msra.mxu1 %v3926_v45  ;;  %3897 = vmatprep.subr.bf16.mxu0 %v3896_v46  ;;  %v3914_v45 = vpack.c.bf16 %v407_v44, %v406_v35  ;;  %v3946_v46 = vpack.c.bf16 %v439_v38, %v438_v36  ;;  %v3994_v35 = vpack.c.bf16 %v495_v28, %v494_v26  ;;  %v464_v36 = vld [vmem:[%s4535_s23 + $0x840] sm:$0xff]  ;;  %v521_v26 = vld [vmem:[%s4535_s23 + $0xa08] sm:$0xff] }
  0x86   : > { %3929 = vmatprep.subr.bf16.mxu1 %v3928_v50  ;;  %v488_v50 = vld [vmem:[%s4535_s23 + $0x900] sm:$0xff] }
  0x87   : > { %v3982_v60 = vpack.c.bf16 %v489_v52, %v488_v50  ;;  %v496_v38 = vld [vmem:[%s4535_s23 + $0x940] sm:$0xff]  ;;  %v467_v50 = vld [vmem:[%s4535_s23 + $0x858] sm:$0xff] }
  0x88   : > { %3899 = vmatpush3.bf16.msra.mxu0 %v3898_v56  ;;  %v506_v56 = vld [vmem:[%s4535_s23 + $0x990] sm:$0xff] }
  0x89   : > { %3931 = vmatpush3.bf16.msra.mxu1 %v3930_v57  ;;  %3901 = vmatprep.subr.bf16.mxu0 %v3900_v58  ;;  %v507_v57 = vld [vmem:[%s4535_s23 + $0x998] sm:$0xff]  ;;  %v4853_v58 = vrot.slane %v1000_v43, %v4588_v14  ;;  %v514_v43 = vld [vmem:[%s4535_s23 + $0x9d0] sm:$0xff] }
  0x8a   : > { %3933 = vmatprep.subr.bf16.mxu1 %v3932_v42  ;;  %v458_v42 = vld [vmem:[%s4535_s23 + $0x810] sm:$0xff]  ;;  %v3984_v0 = vpack.c.bf16 %v507_v57, %v506_v56  ;;  %v485_v56 = vld [vmem:[%s4535_s23 + $0x8e8] sm:$0xff]  ;;  %v516_v57 = vld [vmem:[%s4535_s23 + $0x9e0] sm:$0xff] }
  0x8b   : > { %v1016_v7 = vcombine.high %v4853_v58, %v4853_v58  ;;  %v3954_v8 = vpack.c.bf16 %v459_v62, %v458_v42  ;;  %v3972_v42 = vpack.c.bf16 %v485_v56, %v484_v33  ;;  %v468_v62 = vld [vmem:[%s4535_s23 + $0x860] sm:$0xff] }
  0x8c   : > { %3903 = vmatpush3.bf16.msra.mxu0 %v3902_v3  ;;  %v477_v3 = vld [vmem:[%s4535_s23 + $0x8a8] sm:$0xff]  ;;  %v524_v33 = vld [vmem:[%s4535_s23 + $0xa20] sm:$0xff] }
  0x8d   : > { %3935 = vmatpush3.bf16.msra.mxu1 %v3934_v4  ;;  %3905 = vmatprep.subr.bf16.mxu0 %v3904_v5  ;;  %v1015_v4 = vcombine.high %v4848_v55, %v4848_v55  ;;  %v508_v5 = vld [vmem:[%s4535_s23 + $0x9a0] sm:$0xff]  ;;  %v3956_v10 = vpack.c.bf16 %v477_v3, %v476_v2  ;;  %v501_v2 = vld [vmem:[%s4535_s23 + $0x968] sm:$0xff]  ;;  %v486_v3 = vld [vmem:[%s4535_s23 + $0x8f0] sm:$0xff] }
  0x8e   : > { %3937 = vmatprep.subr.bf16.mxu1 %v3936_v9  ;;  %v3986_v9 = vpack.c.bf16 %v491_v1, %v490_v63  ;;  %v3988_v15 = vpack.c.bf16 %v509_v6, %v508_v5  ;;  %v469_v63 = vld [vmem:[%s4535_s23 + $0x868] sm:$0xff]  ;;  %v518_v5 = vld [vmem:[%s4535_s23 + $0x9f0] sm:$0xff]  ;;  %v519_v6 = vld [vmem:[%s4535_s23 + $0x9f8] sm:$0xff] }
  0x8f   : > { %v556_v56 = vld [vmem:[%s4535_s23 + $0xb20] sm:$0xff] }
  0x90   : > { %3907 = vmatpush3.bf16.msra.mxu0 %v3906_v18  ;;  %v478_v18 = vld [vmem:[%s4535_s23 + $0x8b0] sm:$0xff] }
  0x91   : > { %3939 = vmatpush3.bf16.msra.mxu1 %v3938_v19  ;;  %3909 = vmatprep.subr.bf16.mxu0 %v3908_v20  ;;  %v479_v19 = vld [vmem:[%s4535_s23 + $0x8b8] sm:$0xff] }
  0x92   : > { %3941 = vmatprep.subr.bf16.mxu1 %v3940_v24  ;;  %v511_v20 = vld [vmem:[%s4535_s23 + $0x9b8] sm:$0xff]  ;;  %v3960_v23 = vpack.c.bf16 %v479_v19, %v478_v18  ;;  %v462_v24 = vld [vmem:[%s4535_s23 + $0x830] sm:$0xff]  ;;  %v536_v18 = vld [vmem:[%s4535_s23 + $0xa80] sm:$0xff] }
  0x93   : > { %v537_v19 = vld [vmem:[%s4535_s23 + $0xa88] sm:$0xff] }
  0x94   : > { %3911 = vmatpush3.bf16.msra.mxu0 %v3910_v30  ;;  %v481_v30 = vld [vmem:[%s4535_s23 + $0x8c8] sm:$0xff] }
  0x95   : > { %3943 = vmatpush3.bf16.msra.mxu1 %v3942_v32  ;;  %3913 = vmatprep.subr.bf16.mxu0 %v3912_v34  ;;  %v513_v32 = vld [vmem:[%s4535_s23 + $0x9c8] sm:$0xff]  ;;  %v3962_v34 = vpack.c.bf16 %v463_v25, %v462_v24  ;;  %v3964_v44 = vpack.c.bf16 %v481_v30, %v480_v29  ;;  %v4012_v24 = vpack.c.bf16 %v537_v19, %v536_v18  ;;  %v520_v25 = vld [vmem:[%s4535_s23 + $0xa00] sm:$0xff]  ;;  %v538_v30 = vld [vmem:[%s4535_s23 + $0xa90] sm:$0xff] }
  0x96   : > { %3945 = vmatprep.subr.bf16.mxu1 %v3944_v37  ;;  %v465_v37 = vld [vmem:[%s4535_s23 + $0x848] sm:$0xff]  ;;  %v3996_v39 = vpack.c.bf16 %v513_v32, %v512_v31  ;;  %v539_v31 = vld [vmem:[%s4535_s23 + $0xa98] sm:$0xff] }
  0x97   : > { %v553_v29 = vld [vmem:[%s4535_s23 + $0xb08] sm:$0xff] }
  0x98   : > { %3915 = vmatpush3.bf16.msra.mxu0 %v3914_v45  ;;  %v515_v45 = vld [vmem:[%s4535_s23 + $0x9d8] sm:$0xff]  ;;  %v561_v19 = vld [vmem:[%s4535_s23 + $0xb48] sm:$0xff] }
  0x99   : > { %3947 = vmatpush3.bf16.msra.mxu1 %v3946_v46  ;;  %3949 = vmatprep.subr.bf16.mxu0 %v3948_v47  ;;  %v3966_v46 = vpack.c.bf16 %v465_v37, %v464_v36  ;;  %v3998_v47 = vpack.c.bf16 %v497_v40, %v496_v38  ;;  %v4000_v52 = vpack.c.bf16 %v515_v45, %v514_v43  ;;  %v523_v40 = vld [vmem:[%s4535_s23 + $0xa18] sm:$0xff]  ;;  %v540_v45 = vld [vmem:[%s4535_s23 + $0xaa0] sm:$0xff] }
  0x9a   : > { %3981 = vmatprep.subr.bf16.mxu1 %v3980_v51  ;;  %v498_v51 = vld [vmem:[%s4535_s23 + $0x950] sm:$0xff]  ;;  %v4014_v36 = vpack.c.bf16 %v521_v26, %v520_v25  ;;  %v4016_v38 = vpack.c.bf16 %v539_v31, %v538_v30  ;;  %v555_v43 = vld [vmem:[%s4535_s23 + $0xb18] sm:$0xff]  ;;  %v548_v31 = vld [vmem:[%s4535_s23 + $0xae0] sm:$0xff] }
  0x9b   : > { %1656 = vmatmul.mubr.f32.vlgmr.msra.gmra.mrb[6].mxu0 %v4771_v12  ;;  %v461_v12 = vld [vmem:[%s4535_s23 + $0x828] sm:$0xff]  ;;  %v530_v26 = vld [vmem:[%s4535_s23 + $0xa50] sm:$0xff]  ;;  %v563_v30 = vld [vmem:[%s4535_s23 + $0xb58] sm:$0xff] }
  0x9c   : > { %3951 = vmatpush3.bf16.msra.mxu0 %v3950_v59  ;;  %1726 = vmatmul.mubr.f32.vlgmr.msra.gmra.mrb[6].mxu1 %v4776_v16  ;;  %v510_v16 = vld [vmem:[%s4535_s23 + $0x9b0] sm:$0xff]  ;;  %v3958_v21 = vpack.c.bf16 %v461_v12, %v460_v11  ;;  %v517_v59 = vld [vmem:[%s4535_s23 + $0x9e8] sm:$0xff]  ;;  %v471_v12 = vld [vmem:[%s4535_s23 + $0x878] sm:$0xff] }
  0x9d   : > { %3983 = vmatpush3.bf16.msra.mxu1 %v3982_v60  ;;  %3953 = vmatprep.subr.bf16.mxu0 %v3952_v61  ;;  %v3992_v27 = vpack.c.bf16 %v511_v20, %v510_v16  ;;  %v3970_v60 = vpack.c.bf16 %v467_v50, %v466_v49  ;;  %v4002_v61 = vpack.c.bf16 %v499_v54, %v498_v51  ;;  %v470_v11 = vld [vmem:[%s4535_s23 + $0x870] sm:$0xff]  ;;  %v568_v16 = vld [vmem:[%s4535_s23 + $0xb80] sm:$0xff]  ;;  %v569_v20 = vld [vmem:[%s4535_s23 + $0xb88] sm:$0xff] }
  0x9e   : > { %3985 = vmatprep.subr.bf16.mxu1 %v3984_v0  ;;  %1795 = vmatprep.mubr.f32.mxu0 %v1015_v4  ;;  %v500_v0 = vld [vmem:[%s4535_s23 + $0x960] sm:$0xff]  ;;  %v4004_v1 = vpack.c.bf16 %v517_v59, %v516_v57  ;;  %v487_v4 = vld [vmem:[%s4535_s23 + $0x8f8] sm:$0xff]  ;;  %v4044_v28 = vpack.c.bf16 %v569_v20, %v568_v16  ;;  %v573_v49 = vld [vmem:[%s4535_s23 + $0xba8] sm:$0xff] }
  0x9f   : > { %1865 = vmatprep.mubr.f32.mxu1 %v1016_v7  ;;  %v3974_v7 = vpack.c.bf16 %v469_v63, %v468_v62  ;;  %v557_v59 = vld [vmem:[%s4535_s23 + $0xb28] sm:$0xff]  ;;  %v546_v16 = vld [vmem:[%s4535_s23 + $0xad0] sm:$0xff]  ;;  %v547_v20 = vld [vmem:[%s4535_s23 + $0xad8] sm:$0xff] }
  0xa0   : > { %3955 = vmatpush3.bf16.msra.mxu0 %v3954_v8  ;;  %v193_v8 = vld [vmem:[%s4530_s19 + $0x28] sm:$0xff]  ;;  %v4054_v63 = vpack.c.bf16 %v557_v59, %v556_v56  ;;  %v4032_v25 = vpack.c.bf16 %v547_v20, %v546_v16  ;;  %v566_v56 = vld [vmem:[%s4535_s23 + $0xb70] sm:$0xff]  ;;  %v567_v59 = vld [vmem:[%s4535_s23 + $0xb78] sm:$0xff] }
  0xa1   : > { %3987 = vmatpush3.bf16.msra.mxu1 %v3986_v9  ;;  %3957 = vmatprep.subr.bf16.mxu0 %v3956_v10  ;;  %v4006_v9 = vpack.c.bf16 %v501_v2, %v500_v0  ;;  %v3976_v10 = vpack.c.bf16 %v487_v4, %v486_v3  ;;  %v4925_v32 = vrot.slane %v193_v8, %v4588_v14  ;;  %v527_v2 = vld [vmem:[%s4535_s23 + $0xa38] sm:$0xff]  ;;  %v558_v3 = vld [vmem:[%s4535_s23 + $0xb30] sm:$0xff] }
  0xa2   : > { %3989 = vmatprep.subr.bf16.mxu1 %v3988_v15  ;;  %v4008_v15 = vpack.c.bf16 %v519_v6, %v518_v5  ;;  %v559_v5 = vld [vmem:[%s4535_s23 + $0xb38] sm:$0xff]  ;;  %v544_v6 = vld [vmem:[%s4535_s23 + $0xac0] sm:$0xff]  ;;  %v618_v16 = vld [vmem:[%s4535_s23 + $0xd10] sm:$0xff] }
  0xa4   : > { %3959 = vmatpush3.bf16.msra.mxu0 %v3958_v21  ;;  %v1017_v21 = vcombine.high %v193_v8, %v193_v8  ;;  %v576_v8 = vld [vmem:[%s4535_s23 + $0xbc0] sm:$0xff] }
  0xa5   : > { %3991 = vmatpush3.bf16.msra.mxu1 %v3990_v22  ;;  %3961 = vmatprep.subr.bf16.mxu0 %v3960_v23  ;;  %v3978_v22 = vpack.c.bf16 %v471_v12, %v470_v11  ;;  %v4010_v23 = vpack.c.bf16 %v503_v17, %v502_v13  ;;  %v4058_v11 = vpack.c.bf16 %v559_v5, %v558_v3  ;;  %v528_v13 = vld [vmem:[%s4535_s23 + $0xa40] sm:$0xff]  ;;  %v585_v3 = vld [vmem:[%s4535_s23 + $0xc08] sm:$0xff] }
  0xa6   : > { %3993 = vmatprep.subr.bf16.mxu1 %v3992_v27  ;;  %v552_v27 = vld [vmem:[%s4535_s23 + $0xb00] sm:$0xff] }
  0xa7   : > { %v4046_v37 = vpack.c.bf16 %v553_v29, %v552_v27  ;;  %v560_v17 = vld [vmem:[%s4535_s23 + $0xb40] sm:$0xff]  ;;  %v531_v27 = vld [vmem:[%s4535_s23 + $0xa58] sm:$0xff] }
  0xa8   : > { %3963 = vmatpush3.bf16.msra.mxu0 %v3962_v34  ;;  %v570_v34 = vld [vmem:[%s4535_s23 + $0xb90] sm:$0xff] }
  0xa9   : > { %3995 = vmatpush3.bf16.msra.mxu1 %v3994_v35  ;;  %3965 = vmatprep.subr.bf16.mxu0 %v3964_v44  ;;  %v571_v35 = vld [vmem:[%s4535_s23 + $0xb98] sm:$0xff]  ;;  %v4930_v44 = vrot.slane %v1017_v21, %v4588_v14  ;;  %v578_v21 = vld [vmem:[%s4535_s23 + $0xbd0] sm:$0xff] }
  0xaa   : > { %3997 = vmatprep.subr.bf16.mxu1 %v3996_v39  ;;  %v522_v39 = vld [vmem:[%s4535_s23 + $0xa10] sm:$0xff]  ;;  %v4048_v41 = vpack.c.bf16 %v571_v35, %v570_v34  ;;  %v549_v34 = vld [vmem:[%s4535_s23 + $0xae8] sm:$0xff]  ;;  %v580_v35 = vld [vmem:[%s4535_s23 + $0xbe0] sm:$0xff] }
  0xab   : > { %v1033_v50 = vcombine.high %v4930_v44, %v4930_v44  ;;  %v4018_v51 = vpack.c.bf16 %v523_v40, %v522_v39  ;;  %v4036_v39 = vpack.c.bf16 %v549_v34, %v548_v31  ;;  %v532_v40 = vld [vmem:[%s4535_s23 + $0xa60] sm:$0xff] }
  0xac   : > { %3967 = vmatpush3.bf16.msra.mxu0 %v3966_v46  ;;  %v541_v46 = vld [vmem:[%s4535_s23 + $0xaa8] sm:$0xff]  ;;  %v588_v31 = vld [vmem:[%s4535_s23 + $0xc20] sm:$0xff] }
  0xad   : > { %3999 = vmatpush3.bf16.msra.mxu1 %v3998_v47  ;;  %3969 = vmatprep.subr.bf16.mxu0 %v3968_v48  ;;  %v1032_v47 = vcombine.high %v4925_v32, %v4925_v32  ;;  %v572_v48 = vld [vmem:[%s4535_s23 + $0xba0] sm:$0xff]  ;;  %v4020_v54 = vpack.c.bf16 %v541_v46, %v540_v45  ;;  %v565_v45 = vld [vmem:[%s4535_s23 + $0xb68] sm:$0xff]  ;;  %v550_v46 = vld [vmem:[%s4535_s23 + $0xaf0] sm:$0xff] }
  0xae   : > { %4001 = vmatprep.subr.bf16.mxu1 %v4000_v52  ;;  %v4050_v52 = vpack.c.bf16 %v555_v43, %v554_v53  ;;  %v4052_v57 = vpack.c.bf16 %v573_v49, %v572_v48  ;;  %v533_v53 = vld [vmem:[%s4535_s23 + $0xa68] sm:$0xff]  ;;  %v582_v48 = vld [vmem:[%s4535_s23 + $0xbf0] sm:$0xff]  ;;  %v583_v49 = vld [vmem:[%s4535_s23 + $0xbf8] sm:$0xff] }
  0xaf   : > { %v620_v34 = vld [vmem:[%s4535_s23 + $0xd20] sm:$0xff] }
  0xb0   : > { %3971 = vmatpush3.bf16.msra.mxu0 %v3970_v60  ;;  %v542_v60 = vld [vmem:[%s4535_s23 + $0xab0] sm:$0xff] }
  0xb1   : > { %4003 = vmatpush3.bf16.msra.mxu1 %v4002_v61  ;;  %3973 = vmatprep.subr.bf16.mxu0 %v3972_v42  ;;  %v543_v61 = vld [vmem:[%s4535_s23 + $0xab8] sm:$0xff] }
  0xb2   : > { %4005 = vmatprep.subr.bf16.mxu1 %v4004_v1  ;;  %v575_v42 = vld [vmem:[%s4535_s23 + $0xbb8] sm:$0xff]  ;;  %v4024_v0 = vpack.c.bf16 %v543_v61, %v542_v60  ;;  %v526_v1 = vld [vmem:[%s4535_s23 + $0xa30] sm:$0xff]  ;;  %v600_v60 = vld [vmem:[%s4535_s23 + $0xc80] sm:$0xff] }
  0xb3   : > { %v601_v61 = vld [vmem:[%s4535_s23 + $0xc88] sm:$0xff] }
  0xb4   : > { %3975 = vmatpush3.bf16.msra.mxu0 %v3974_v7  ;;  %v545_v7 = vld [vmem:[%s4535_s23 + $0xac8] sm:$0xff] }
  0xb5   : > { %4007 = vmatpush3.bf16.msra.mxu1 %v4006_v9  ;;  %3977 = vmatprep.subr.bf16.mxu0 %v3976_v10  ;;  %v577_v9 = vld [vmem:[%s4535_s23 + $0xbc8] sm:$0xff]  ;;  %v4026_v10 = vpack.c.bf16 %v527_v2, %v526_v1  ;;  %v4028_v12 = vpack.c.bf16 %v545_v7, %v544_v6  ;;  %v4076_v1 = vpack.c.bf16 %v601_v61, %v600_v60  ;;  %v584_v2 = vld [vmem:[%s4535_s23 + $0xc00] sm:$0xff]  ;;  %v602_v7 = vld [vmem:[%s4535_s23 + $0xc90] sm:$0xff] }
  0xb6   : > { %4009 = vmatprep.subr.bf16.mxu1 %v4008_v15  ;;  %v529_v15 = vld [vmem:[%s4535_s23 + $0xa48] sm:$0xff]  ;;  %v4060_v18 = vpack.c.bf16 %v577_v9, %v576_v8  ;;  %v603_v8 = vld [vmem:[%s4535_s23 + $0xc98] sm:$0xff] }
  0xb7   : > { %v617_v6 = vld [vmem:[%s4535_s23 + $0xd08] sm:$0xff] }
  0xb8   : > { %3979 = vmatpush3.bf16.msra.mxu0 %v3978_v22  ;;  %v579_v22 = vld [vmem:[%s4535_s23 + $0xbd8] sm:$0xff]  ;;  %v625_v61 = vld [vmem:[%s4535_s23 + $0xd48] sm:$0xff] }
  0xb9   : > { %4011 = vmatpush3.bf16.msra.mxu1 %v4010_v23  ;;  %4013 = vmatprep.subr.bf16.mxu0 %v4012_v24  ;;  %v4030_v23 = vpack.c.bf16 %v529_v15, %v528_v13  ;;  %v4062_v24 = vpack.c.bf16 %v561_v19, %v560_v17  ;;  %v4064_v29 = vpack.c.bf16 %v579_v22, %v578_v21  ;;  %v587_v19 = vld [vmem:[%s4535_s23 + $0xc18] sm:$0xff]  ;;  %v604_v22 = vld [vmem:[%s4535_s23 + $0xca0] sm:$0xff] }
  0xba   : > { %4045 = vmatprep.subr.bf16.mxu1 %v4044_v28  ;;  %v562_v28 = vld [vmem:[%s4535_s23 + $0xb50] sm:$0xff]  ;;  %v4078_v13 = vpack.c.bf16 %v585_v3, %v584_v2  ;;  %v4080_v17 = vpack.c.bf16 %v603_v8, %v602_v7  ;;  %v619_v21 = vld [vmem:[%s4535_s23 + $0xd18] sm:$0xff]  ;;  %v612_v8 = vld [vmem:[%s4535_s23 + $0xce0] sm:$0xff] }
  0xbb   : > { %1796 = vmatmul.mubr.f32.vlgmr.msra.gmra.mrb[8].mxu0 %v4848_v55  ;;  %v525_v55 = vld [vmem:[%s4535_s23 + $0xa28] sm:$0xff]  ;;  %v594_v3 = vld [vmem:[%s4535_s23 + $0xc50] sm:$0xff]  ;;  %v627_v7 = vld [vmem:[%s4535_s23 + $0xd58] sm:$0xff] }
  0xbc   : > { %4015 = vmatpush3.bf16.msra.mxu0 %v4014_v36  ;;  %1866 = vmatmul.mubr.f32.vlgmr.msra.gmra.mrb[8].mxu1 %v4853_v58  ;;  %v574_v58 = vld [vmem:[%s4535_s23 + $0xbb0] sm:$0xff]  ;;  %v4022_v62 = vpack.c.bf16 %v525_v55, %v524_v33  ;;  %v581_v36 = vld [vmem:[%s4535_s23 + $0xbe8] sm:$0xff]  ;;  %v535_v55 = vld [vmem:[%s4535_s23 + $0xa78] sm:$0xff] }
  0xbd   : > { %4047 = vmatpush3.bf16.msra.mxu1 %v4046_v37  ;;  %4017 = vmatprep.subr.bf16.mxu0 %v4016_v38  ;;  %v4056_v4 = vpack.c.bf16 %v575_v42, %v574_v58  ;;  %v4034_v37 = vpack.c.bf16 %v531_v27, %v530_v26  ;;  %v4066_v38 = vpack.c.bf16 %v563_v30, %v562_v28  ;;  %v534_v33 = vld [vmem:[%s4535_s23 + $0xa70] sm:$0xff]  ;;  %v632_v58 = vld [vmem:[%s4535_s23 + $0xd80] sm:$0xff]  ;;  %v633_v42 = vld [vmem:[%s4535_s23 + $0xd88] sm:$0xff] }
  0xbe   : > { %4049 = vmatprep.subr.bf16.mxu1 %v4048_v41  ;;  %1935 = vmatprep.mubr.f32.mxu0 %v1032_v47  ;;  %v564_v41 = vld [vmem:[%s4535_s23 + $0xb60] sm:$0xff]  ;;  %v4068_v43 = vpack.c.bf16 %v581_v36, %v580_v35  ;;  %v551_v47 = vld [vmem:[%s4535_s23 + $0xaf8] sm:$0xff]  ;;  %v4108_v5 = vpack.c.bf16 %v633_v42, %v632_v58  ;;  %v637_v26 = vld [vmem:[%s4535_s23 + $0xda8] sm:$0xff] }
  0xbf   : > { %2005 = vmatprep.mubr.f32.mxu1 %v1033_v50  ;;  %v4038_v50 = vpack.c.bf16 %v533_v53, %v532_v40  ;;  %v621_v36 = vld [vmem:[%s4535_s23 + $0xd28] sm:$0xff]  ;;  %v610_v58 = vld [vmem:[%s4535_s23 + $0xcd0] sm:$0xff]  ;;  %v611_v42 = vld [vmem:[%s4535_s23 + $0xcd8] sm:$0xff] }
  0xc0   : > { %4019 = vmatpush3.bf16.msra.mxu0 %v4018_v51  ;;  %v194_v51 = vld [vmem:[%s4530_s19 + $0x30] sm:$0xff]  ;;  %v4118_v53 = vpack.c.bf16 %v621_v36, %v620_v34  ;;  %v4096_v2 = vpack.c.bf16 %v611_v42, %v610_v58  ;;  %v631_v36 = vld [vmem:[%s4535_s23 + $0xd78] sm:$0xff] }
  0xc1   : > { %4051 = vmatpush3.bf16.msra.mxu1 %v4050_v52  ;;  %4021 = vmatprep.subr.bf16.mxu0 %v4020_v54  ;;  %v4070_v52 = vpack.c.bf16 %v565_v45, %v564_v41  ;;  %v4040_v54 = vpack.c.bf16 %v551_v47, %v550_v46  ;;  %v5002_v9 = vrot.slane %v194_v51, %v4588_v14  ;;  %v591_v45 = vld [vmem:[%s4535_s23 + $0xc38] sm:$0xff]  ;;  %v622_v46 = vld [vmem:[%s4535_s23 + $0xd30] sm:$0xff] }
  0xc2   : > { %4053 = vmatprep.subr.bf16.mxu1 %v4052_v57  ;;  %v4072_v57 = vpack.c.bf16 %v583_v49, %v582_v48  ;;  %v623_v48 = vld [vmem:[%s4535_s23 + $0xd38] sm:$0xff]  ;;  %v608_v49 = vld [vmem:[%s4535_s23 + $0xcc0] sm:$0xff]  ;;  %v630_v34 = vld [vmem:[%s4535_s23 + $0xd70] sm:$0xff] }
  0xc3   : > { %v682_v58 = vld [vmem:[%s4535_s23 + $0xf10] sm:$0xff] }
  0xc4   : > { %4023 = vmatpush3.bf16.msra.mxu0 %v4022_v62  ;;  %v1034_v62 = vcombine.high %v194_v51, %v194_v51  ;;  %v640_v51 = vld [vmem:[%s4535_s23 + $0xdc0] sm:$0xff] }
  0xc5   : > { %4055 = vmatpush3.bf16.msra.mxu1 %v4054_v63  ;;  %4025 = vmatprep.subr.bf16.mxu0 %v4024_v0  ;;  %v4042_v63 = vpack.c.bf16 %v535_v55, %v534_v33  ;;  %v4074_v0 = vpack.c.bf16 %v567_v59, %v566_v56  ;;  %v4122_v33 = vpack.c.bf16 %v623_v48, %v622_v46  ;;  %v592_v56 = vld [vmem:[%s4535_s23 + $0xc40] sm:$0xff]  ;;  %v649_v46 = vld [vmem:[%s4535_s23 + $0xe08] sm:$0xff] }
  0xc6   : > { %4057 = vmatprep.subr.bf16.mxu1 %v4056_v4  ;;  %v616_v4 = vld [vmem:[%s4535_s23 + $0xd00] sm:$0xff] }
  0xc7   : > { %v4110_v15 = vpack.c.bf16 %v617_v6, %v616_v4  ;;  %v624_v59 = vld [vmem:[%s4535_s23 + $0xd40] sm:$0xff]  ;;  %v595_v4 = vld [vmem:[%s4535_s23 + $0xc58] sm:$0xff] }
  0xc8   : > { %4027 = vmatpush3.bf16.msra.mxu0 %v4026_v10  ;;  %v634_v10 = vld [vmem:[%s4535_s23 + $0xd90] sm:$0xff] }
  0xc9   : > { %4059 = vmatpush3.bf16.msra.mxu1 %v4058_v11  ;;  %4029 = vmatprep.subr.bf16.mxu0 %v4028_v12  ;;  %v635_v11 = vld [vmem:[%s4535_s23 + $0xd98] sm:$0xff]  ;;  %v5007_v12 = vrot.slane %v1034_v62, %v4588_v14  ;;  %v642_v62 = vld [vmem:[%s4535_s23 + $0xdd0] sm:$0xff] }
  0xca   : > { %4061 = vmatprep.subr.bf16.mxu1 %v4060_v18  ;;  %v586_v18 = vld [vmem:[%s4535_s23 + $0xc10] sm:$0xff]  ;;  %v4112_v20 = vpack.c.bf16 %v635_v11, %v634_v10  ;;  %v613_v10 = vld [vmem:[%s4535_s23 + $0xce8] sm:$0xff]  ;;  %v644_v11 = vld [vmem:[%s4535_s23 + $0xde0] sm:$0xff] }
  0xcb   : > { %v1050_v27 = vcombine.high %v5007_v12, %v5007_v12  ;;  %v4082_v28 = vpack.c.bf16 %v587_v19, %v586_v18  ;;  %v4100_v18 = vpack.c.bf16 %v613_v10, %v612_v8  ;;  %v596_v19 = vld [vmem:[%s4535_s23 + $0xc60] sm:$0xff] }
  0xcc   : > { %4031 = vmatpush3.bf16.msra.mxu0 %v4030_v23  ;;  %v605_v23 = vld [vmem:[%s4535_s23 + $0xca8] sm:$0xff]  ;;  %v652_v8 = vld [vmem:[%s4535_s23 + $0xe20] sm:$0xff] }
  0xcd   : > { %4063 = vmatpush3.bf16.msra.mxu1 %v4062_v24  ;;  %4033 = vmatprep.subr.bf16.mxu0 %v4032_v25  ;;  %v1049_v24 = vcombine.high %v5002_v9, %v5002_v9  ;;  %v636_v25 = vld [vmem:[%s4535_s23 + $0xda0] sm:$0xff]  ;;  %v4084_v30 = vpack.c.bf16 %v605_v23, %v604_v22  ;;  %v629_v22 = vld [vmem:[%s4535_s23 + $0xd68] sm:$0xff]  ;;  %v614_v23 = vld [vmem:[%s4535_s23 + $0xcf0] sm:$0xff] }
  0xce   : > { %4065 = vmatprep.subr.bf16.mxu1 %v4064_v29  ;;  %v4114_v29 = vpack.c.bf16 %v619_v21, %v618_v16  ;;  %v4116_v35 = vpack.c.bf16 %v637_v26, %v636_v25  ;;  %v597_v16 = vld [vmem:[%s4535_s23 + $0xc68] sm:$0xff]  ;;  %v646_v25 = vld [vmem:[%s4535_s23 + $0xdf0] sm:$0xff]  ;;  %v647_v26 = vld [vmem:[%s4535_s23 + $0xdf8] sm:$0xff] }
  0xcf   : > { %v684_v10 = vld [vmem:[%s4535_s23 + $0xf20] sm:$0xff] }
  0xd0   : > { %4035 = vmatpush3.bf16.msra.mxu0 %v4034_v37  ;;  %v606_v37 = vld [vmem:[%s4535_s23 + $0xcb0] sm:$0xff] }
  0xd1   : > { %4067 = vmatpush3.bf16.msra.mxu1 %v4066_v38  ;;  %4037 = vmatprep.subr.bf16.mxu0 %v4036_v39  ;;  %v607_v38 = vld [vmem:[%s4535_s23 + $0xcb8] sm:$0xff] }
  0xd2   : > { %4069 = vmatprep.subr.bf16.mxu1 %v4068_v43  ;;  %v639_v39 = vld [vmem:[%s4535_s23 + $0xdb8] sm:$0xff]  ;;  %v4088_v41 = vpack.c.bf16 %v607_v38, %v606_v37  ;;  %v590_v43 = vld [vmem:[%s4535_s23 + $0xc30] sm:$0xff]  ;;  %v664_v37 = vld [vmem:[%s4535_s23 + $0xe80] sm:$0xff] }
  0xd3   : > { %v665_v38 = vld [vmem:[%s4535_s23 + $0xe88] sm:$0xff] }
  0xd4   : > { %4039 = vmatpush3.bf16.msra.mxu0 %v4038_v50  ;;  %v609_v50 = vld [vmem:[%s4535_s23 + $0xcc8] sm:$0xff] }
  0xd5   : > { %4071 = vmatpush3.bf16.msra.mxu1 %v4070_v52  ;;  %4041 = vmatprep.subr.bf16.mxu0 %v4040_v54  ;;  %v641_v52 = vld [vmem:[%s4535_s23 + $0xdc8] sm:$0xff]  ;;  %v4090_v54 = vpack.c.bf16 %v591_v45, %v590_v43  ;;  %v4092_v55 = vpack.c.bf16 %v609_v50, %v608_v49  ;;  %v4140_v43 = vpack.c.bf16 %v665_v38, %v664_v37  ;;  %v648_v45 = vld [vmem:[%s4535_s23 + $0xe00] sm:$0xff]  ;;  %v666_v50 = vld [vmem:[%s4535_s23 + $0xe90] sm:$0xff] }
  0xd6   : > { %4073 = vmatprep.subr.bf16.mxu1 %v4072_v57  ;;  %v593_v57 = vld [vmem:[%s4535_s23 + $0xc48] sm:$0xff]  ;;  %v4124_v60 = vpack.c.bf16 %v641_v52, %v640_v51  ;;  %v667_v51 = vld [vmem:[%s4535_s23 + $0xe98] sm:$0xff] }
  0xd7   : > { %v681_v49 = vld [vmem:[%s4535_s23 + $0xf08] sm:$0xff] }
  0xd8   : > { %4043 = vmatpush3.bf16.msra.mxu0 %v4042_v63  ;;  %v643_v63 = vld [vmem:[%s4535_s23 + $0xdd8] sm:$0xff]  ;;  %v689_v38 = vld [vmem:[%s4535_s23 + $0xf48] sm:$0xff] }
  0xd9   : > { %4075 = vmatpush3.bf16.msra.mxu1 %v4074_v0  ;;  %4077 = vmatprep.subr.bf16.mxu0 %v4076_v1  ;;  %v4094_v0 = vpack.c.bf16 %v593_v57, %v592_v56  ;;  %v4126_v1 = vpack.c.bf16 %v625_v61, %v624_v59  ;;  %v4128_v6 = vpack.c.bf16 %v643_v63, %v642_v62  ;;  %v651_v61 = vld [vmem:[%s4535_s23 + $0xe18] sm:$0xff]  ;;  %v668_v63 = vld [vmem:[%s4535_s23 + $0xea0] sm:$0xff] }
  0xda   : > { %4109 = vmatprep.subr.bf16.mxu1 %v4108_v5  ;;  %v626_v5 = vld [vmem:[%s4535_s23 + $0xd50] sm:$0xff]  ;;  %v4142_v56 = vpack.c.bf16 %v649_v46, %v648_v45  ;;  %v4144_v59 = vpack.c.bf16 %v667_v51, %v666_v50  ;;  %v683_v62 = vld [vmem:[%s4535_s23 + $0xf18] sm:$0xff]  ;;  %v676_v51 = vld [vmem:[%s4535_s23 + $0xee0] sm:$0xff] }
  0xdb   : > { %1936 = vmatmul.mubr.f32.vlgmr.msra.gmra.mrb[10].mxu0 %v4925_v32  ;;  %v589_v32 = vld [vmem:[%s4535_s23 + $0xc28] sm:$0xff]  ;;  %v658_v46 = vld [vmem:[%s4535_s23 + $0xe50] sm:$0xff]  ;;  %v691_v50 = vld [vmem:[%s4535_s23 + $0xf58] sm:$0xff] }
  0xdc   : > { %4079 = vmatpush3.bf16.msra.mxu0 %v4078_v13  ;;  %2006 = vmatmul.mubr.f32.vlgmr.msra.gmra.mrb[10].mxu1 %v4930_v44  ;;  %v638_v44 = vld [vmem:[%s4535_s23 + $0xdb0] sm:$0xff]  ;;  %v4086_v40 = vpack.c.bf16 %v589_v32, %v588_v31  ;;  %v645_v13 = vld [vmem:[%s4535_s23 + $0xde8] sm:$0xff]  ;;  %v599_v32 = vld [vmem:[%s4535_s23 + $0xc78] sm:$0xff] }
  0xdd   : > { %4111 = vmatpush3.bf16.msra.mxu1 %v4110_v15  ;;  %4081 = vmatprep.subr.bf16.mxu0 %v4080_v17  ;;  %v4120_v47 = vpack.c.bf16 %v639_v39, %v638_v44  ;;  %v4098_v15 = vpack.c.bf16 %v595_v4, %v594_v3  ;;  %v4130_v17 = vpack.c.bf16 %v627_v7, %v626_v5  ;;  %v598_v31 = vld [vmem:[%s4535_s23 + $0xc70] sm:$0xff]  ;;  %v696_v44 = vld [vmem:[%s4535_s23 + $0xf80] sm:$0xff]  ;;  %v697_v39 = vld [vmem:[%s4535_s23 + $0xf88] sm:$0xff] }
  0xde   : > { %4113 = vmatprep.subr.bf16.mxu1 %v4112_v20  ;;  %2075 = vmatprep.mubr.f32.mxu0 %v1049_v24  ;;  %v628_v20 = vld [vmem:[%s4535_s23 + $0xd60] sm:$0xff]  ;;  %v4132_v21 = vpack.c.bf16 %v645_v13, %v644_v11  ;;  %v615_v24 = vld [vmem:[%s4535_s23 + $0xcf8] sm:$0xff]  ;;  %v4172_v48 = vpack.c.bf16 %v697_v39, %v696_v44  ;;  %v701_v3 = vld [vmem:[%s4535_s23 + $0xfa8] sm:$0xff] }
  0xdf   : > { %2145 = vmatprep.mubr.f32.mxu1 %v1050_v27  ;;  %v4102_v27 = vpack.c.bf16 %v597_v16, %v596_v19  ;;  %v685_v13 = vld [vmem:[%s4535_s23 + $0xf28] sm:$0xff]  ;;  %v674_v44 = vld [vmem:[%s4535_s23 + $0xed0] sm:$0xff]  ;;  %v675_v39 = vld [vmem:[%s4535_s23 + $0xed8] sm:$0xff] }
  0xe0   : > { %4083 = vmatpush3.bf16.msra.mxu0 %v4082_v28  ;;  %v195_v28 = vld [vmem:[%s4530_s19 + $0x38] sm:$0xff]  ;;  %v4182_v16 = vpack.c.bf16 %v685_v13, %v684_v10  ;;  %v4160_v45 = vpack.c.bf16 %v675_v39, %v674_v44  ;;  %v196_v10 = vld [vmem:[%s4530_s19 + $0x40] sm:$0xff] }
  0xe1   : > { %4115 = vmatpush3.bf16.msra.mxu1 %v4114_v29  ;;  %4085 = vmatprep.subr.bf16.mxu0 %v4084_v30  ;;  %v4134_v29 = vpack.c.bf16 %v629_v22, %v628_v20  ;;  %v4104_v30 = vpack.c.bf16 %v615_v24, %v614_v23  ;;  %v5079_v52 = vrot.slane %v195_v28, %v4588_v14  ;;  %v655_v22 = vld [vmem:[%s4535_s23 + $0xe38] sm:$0xff]  ;;  %v686_v23 = vld [vmem:[%s4535_s23 + $0xf30] sm:$0xff] }
  0xe2   : > { %4117 = vmatprep.subr.bf16.mxu1 %v4116_v35  ;;  %v4136_v35 = vpack.c.bf16 %v647_v26, %v646_v25  ;;  %v687_v25 = vld [vmem:[%s4535_s23 + $0xf38] sm:$0xff]  ;;  %v672_v26 = vld [vmem:[%s4535_s23 + $0xec0] sm:$0xff] }
  0xe3   : > { %v763_v44 = vld [vmem:[%s4535_s23 + $0x1198] sm:$0xff] }
  0xe4   : > { %4087 = vmatpush3.bf16.msra.mxu0 %v4086_v40  ;;  %v1051_v40 = vcombine.high %v195_v28, %v195_v28  ;;  %v704_v28 = vld [vmem:[%s4535_s23 + $0xfc0] sm:$0xff] }
  0xe5   : > { %4119 = vmatpush3.bf16.msra.mxu1 %v4118_v53  ;;  %4089 = vmatprep.subr.bf16.mxu0 %v4088_v41  ;;  %v4106_v53 = vpack.c.bf16 %v599_v32, %v598_v31  ;;  %v4138_v41 = vpack.c.bf16 %v631_v36, %v630_v34  ;;  %v4186_v31 = vpack.c.bf16 %v687_v25, %v686_v23  ;;  %v656_v34 = vld [vmem:[%s4535_s23 + $0xe40] sm:$0xff] }
  0xe6   : > { %4121 = vmatprep.subr.bf16.mxu1 %v4120_v47  ;;  %v680_v47 = vld [vmem:[%s4535_s23 + $0xf00] sm:$0xff]  ;;  %v1068_v25 = vcombine.high %v196_v10, %v196_v10 }
  0xe7   : > { %v4174_v57 = vpack.c.bf16 %v681_v49, %v680_v47  ;;  %v688_v36 = vld [vmem:[%s4535_s23 + $0xf40] sm:$0xff]  ;;  %v659_v47 = vld [vmem:[%s4535_s23 + $0xe58] sm:$0xff] }
  0xe8   : > { %4091 = vmatpush3.bf16.msra.mxu0 %v4090_v54  ;;  %v698_v54 = vld [vmem:[%s4535_s23 + $0xf90] sm:$0xff]  ;;  %v760_v23 = vld [vmem:[%s4535_s23 + $0x1180] sm:$0xff]  ;;  %v5163_v39 = vrot.slane %v1068_v25, %v4588_v14  ;;  %v739_v25 = vld [vmem:[%s4535_s23 + $0x10d8] sm:$0xff] }
  0xe9   : > { %4123 = vmatpush3.bf16.msra.mxu1 %v4122_v33  ;;  %4093 = vmatprep.subr.bf16.mxu0 %v4092_v55  ;;  %v699_v33 = vld [vmem:[%s4535_s23 + $0xf98] sm:$0xff]  ;;  %v5084_v55 = vrot.slane %v1051_v40, %v4588_v14  ;;  %v706_v40 = vld [vmem:[%s4535_s23 + $0xfd0] sm:$0xff] }
  0xea   : > { %4125 = vmatprep.subr.bf16.mxu1 %v4124_v60  ;;  %v650_v60 = vld [vmem:[%s4535_s23 + $0xe10] sm:$0xff]  ;;  %v4176_v42 = vpack.c.bf16 %v699_v33, %v698_v54  ;;  %v677_v54 = vld [vmem:[%s4535_s23 + $0xee8] sm:$0xff]  ;;  %v708_v33 = vld [vmem:[%s4535_s23 + $0xfe0] sm:$0xff] }
  0xeb   : > { %v1067_v4 = vcombine.high %v5084_v55, %v5084_v55  ;;  %v4146_v5 = vpack.c.bf16 %v651_v61, %v650_v60  ;;  %v4164_v60 = vpack.c.bf16 %v677_v54, %v676_v51  ;;  %v660_v61 = vld [vmem:[%s4535_s23 + $0xe60] sm:$0xff] }
  0xec   : > { %4095 = vmatpush3.bf16.msra.mxu0 %v4094_v0  ;;  %v669_v0 = vld [vmem:[%s4535_s23 + $0xea8] sm:$0xff]  ;;  %v764_v54 = vld [vmem:[%s4535_s23 + $0x11a0] sm:$0xff] }
  0xed   : > { %4127 = vmatpush3.bf16.msra.mxu1 %v4126_v1  ;;  %4097 = vmatprep.subr.bf16.mxu0 %v4096_v2  ;;  %v1066_v1 = vcombine.high %v5079_v52, %v5079_v52  ;;  %v700_v2 = vld [vmem:[%s4535_s23 + $0xfa0] sm:$0xff]  ;;  %v4148_v7 = vpack.c.bf16 %v669_v0, %v668_v63  ;;  %v693_v0 = vld [vmem:[%s4535_s23 + $0xf68] sm:$0xff] }
  0xee   : > { %4129 = vmatprep.subr.bf16.mxu1 %v4128_v6  ;;  %v4178_v6 = vpack.c.bf16 %v683_v62, %v682_v58  ;;  %v4180_v11 = vpack.c.bf16 %v701_v3, %v700_v2  ;;  %v661_v58 = vld [vmem:[%s4535_s23 + $0xe68] sm:$0xff]  ;;  %v679_v2 = vld [vmem:[%s4535_s23 + $0xef8] sm:$0xff] }
  0xf0   : > { %4099 = vmatpush3.bf16.msra.mxu0 %v4098_v15  ;;  %v670_v15 = vld [vmem:[%s4535_s23 + $0xeb0] sm:$0xff] }
  0xf1   : > { %4131 = vmatpush3.bf16.msra.mxu1 %v4130_v17  ;;  %4101 = vmatprep.subr.bf16.mxu0 %v4100_v18  ;;  %v671_v17 = vld [vmem:[%s4535_s23 + $0xeb8] sm:$0xff] }
  0xf2   : > { %4133 = vmatprep.subr.bf16.mxu1 %v4132_v21  ;;  %v703_v18 = vld [vmem:[%s4535_s23 + $0xfb8] sm:$0xff]  ;;  %v4152_v20 = vpack.c.bf16 %v671_v17, %v670_v15  ;;  %v654_v21 = vld [vmem:[%s4535_s23 + $0xe30] sm:$0xff] }
  0xf3   : > { %v662_v17 = vld [vmem:[%s4535_s23 + $0xe70] sm:$0xff] }
  0xf4   : > { %4103 = vmatpush3.bf16.msra.mxu0 %v4102_v27  ;;  %v673_v27 = vld [vmem:[%s4535_s23 + $0xec8] sm:$0xff] }
  0xf5   : > { %4135 = vmatpush3.bf16.msra.mxu1 %v4134_v29  ;;  %4105 = vmatprep.subr.bf16.mxu0 %v4104_v30  ;;  %v705_v29 = vld [vmem:[%s4535_s23 + $0xfc8] sm:$0xff]  ;;  %v4154_v30 = vpack.c.bf16 %v655_v22, %v654_v21  ;;  %v4156_v32 = vpack.c.bf16 %v673_v27, %v672_v26 }
  0xf6   : > { %4137 = vmatprep.subr.bf16.mxu1 %v4136_v35  ;;  %v657_v35 = vld [vmem:[%s4535_s23 + $0xe48] sm:$0xff]  ;;  %v4188_v37 = vpack.c.bf16 %v705_v29, %v704_v28  ;;  %v712_v29 = vld [vmem:[%s4535_s23 + $0x1000] sm:$0xff] }
  0xf7   : > { %v729_v21 = vld [vmem:[%s4535_s23 + $0x1088] sm:$0xff] }
  0xf8   : > { %4107 = vmatpush3.bf16.msra.mxu0 %v4106_v53  ;;  %v707_v53 = vld [vmem:[%s4535_s23 + $0xfd8] sm:$0xff] }
  0xf9   : > { %4139 = vmatpush3.bf16.msra.mxu1 %v4138_v41  ;;  %4141 = vmatprep.subr.bf16.mxu0 %v4140_v43  ;;  %v4158_v41 = vpack.c.bf16 %v657_v35, %v656_v34  ;;  %v4190_v43 = vpack.c.bf16 %v689_v38, %v688_v36  ;;  %v4192_v49 = vpack.c.bf16 %v707_v53, %v706_v40  ;;  %v745_v34 = vld [vmem:[%s4535_s23 + $0x1108] sm:$0xff]  ;;  %v730_v35 = vld [vmem:[%s4535_s23 + $0x1090] sm:$0xff]  ;;  %v731_v36 = vld [vmem:[%s4535_s23 + $0x1098] sm:$0xff] }
  0xfa   : > { %4173 = vmatprep.subr.bf16.mxu1 %v4172_v48  ;;  %v690_v48 = vld [vmem:[%s4535_s23 + $0xf50] sm:$0xff] }
  0xfb   : > { %2076 = vmatmul.mubr.f32.vlgmr.msra.gmra.mrb[12].mxu0 %v5002_v9  ;;  %v653_v9 = vld [vmem:[%s4535_s23 + $0xe28] sm:$0xff]  ;;  %v762_v38 = vld [vmem:[%s4535_s23 + $0x1190] sm:$0xff] }
  0xfc   : > { %4143 = vmatpush3.bf16.msra.mxu0 %v4142_v56  ;;  %2146 = vmatmul.mubr.f32.vlgmr.msra.gmra.mrb[12].mxu1 %v5007_v12  ;;  %v702_v12 = vld [vmem:[%s4535_s23 + $0xfb0] sm:$0xff]  ;;  %v4150_v19 = vpack.c.bf16 %v653_v9, %v652_v8  ;;  %v709_v56 = vld [vmem:[%s4535_s23 + $0xfe8] sm:$0xff]  ;;  %v4166_v9 = vpack.c.bf16 %v661_v58, %v660_v61  ;;  %v716_v61 = vld [vmem:[%s4535_s23 + $0x1020] sm:$0xff] }
  0xfd   : > { %4175 = vmatpush3.bf16.msra.mxu1 %v4174_v57  ;;  %4145 = vmatprep.subr.bf16.mxu0 %v4144_v59  ;;  %v4184_v24 = vpack.c.bf16 %v703_v18, %v702_v12  ;;  %v4162_v57 = vpack.c.bf16 %v659_v47, %v658_v46  ;;  %v4194_v59 = vpack.c.bf16 %v691_v50, %v690_v48  ;;  %v663_v12 = vld [vmem:[%s4535_s23 + $0xe78] sm:$0xff]  ;;  %v694_v18 = vld [vmem:[%s4535_s23 + $0xf70] sm:$0xff]  ;;  %v733_v50 = vld [vmem:[%s4535_s23 + $0x10a8] sm:$0xff] }
  0xfe   : > { %4177 = vmatprep.subr.bf16.mxu1 %v4176_v42  ;;  %2215 = vmatprep.mubr.f32.mxu0 %v1066_v1  ;;  %v692_v42 = vld [vmem:[%s4535_s23 + $0xf60] sm:$0xff]  ;;  %v4196_v63 = vpack.c.bf16 %v709_v56, %v708_v33  ;;  %v678_v1 = vld [vmem:[%s4535_s23 + $0xef0] sm:$0xff]  ;;  %v4170_v26 = vpack.c.bf16 %v663_v12, %v662_v17  ;;  %v4240_v47 = vpack.c.bf16 %v763_v44, %v762_v38  ;;  %v747_v48 = vld [vmem:[%s4535_s23 + $0x1118] sm:$0xff] }
  0xff   : > { %2285 = vmatprep.mubr.f32.mxu1 %v1067_v4  ;;  %v4198_v13 = vpack.c.bf16 %v693_v0, %v692_v42  ;;  %v4168_v15 = vpack.c.bf16 %v679_v2, %v678_v1  ;;  %v746_v46 = vld [vmem:[%s4535_s23 + $0x1110] sm:$0xff]  ;;  %v765_v33 = vld [vmem:[%s4535_s23 + $0x11a8] sm:$0xff]  ;;  %v1084_v56 = vcombine.high %v5163_v39, %v5163_v39  ;;  %v748_v58 = vld [vmem:[%s4535_s23 + $0x1120] sm:$0xff] }
 0x100   : > { %4147 = vmatpush3.bf16.msra.mxu0 %v4146_v5  ;;  %v710_v5 = vld [vmem:[%s4535_s23 + $0xff0] sm:$0xff]  ;;  %v4244_v42 = vpack.c.bf16 %v765_v33, %v764_v54  ;;  %v735_v0 = vld [vmem:[%s4535_s23 + $0x10b8] sm:$0xff]  ;;  %v740_v38 = vld [vmem:[%s4535_s23 + $0x10e0] sm:$0xff] }
 0x101   : > { %4179 = vmatpush3.bf16.msra.mxu1 %v4178_v6  ;;  %4149 = vmatprep.subr.bf16.mxu0 %v4148_v7  ;;  %v711_v6 = vld [vmem:[%s4535_s23 + $0xff8] sm:$0xff]  ;;  %v741_v44 = vld [vmem:[%s4535_s23 + $0x10e8] sm:$0xff]  ;;  %v742_v54 = vld [vmem:[%s4535_s23 + $0x10f0] sm:$0xff] }
 0x102   : > { %4181 = vmatprep.subr.bf16.mxu1 %v4180_v11  ;;  %v767_v1 = vld [vmem:[%s4535_s23 + $0x11b8] sm:$0xff] }
 0x103   : > { %v743_v33 = vld [vmem:[%s4535_s23 + $0x10f8] sm:$0xff] }
 0x104   : > { %4151 = vmatpush3.bf16.msra.mxu0 %v4150_v19  ;;  %v4200_v19 = vpack.c.bf16 %v711_v6, %v710_v5  ;;  %v718_v5 = vld [vmem:[%s4535_s23 + $0x1030] sm:$0xff]  ;;  %v719_v6 = vld [vmem:[%s4535_s23 + $0x1038] sm:$0xff] }
 0x105   : > { %4183 = vmatpush3.bf16.msra.mxu1 %v4182_v16  ;;  %4153 = vmatprep.subr.bf16.mxu0 %v4152_v20  ;;  %v695_v16 = vld [vmem:[%s4535_s23 + $0xf78] sm:$0xff]  ;;  %v728_v20 = vld [vmem:[%s4535_s23 + $0x1080] sm:$0xff]  ;;  %v4218_v17 = vpack.c.bf16 %v719_v6, %v718_v5 }
 0x106   : > { %4185 = vmatprep.subr.bf16.mxu1 %v4184_v24  ;;  %v761_v24 = vld [vmem:[%s4535_s23 + $0x1188] sm:$0xff]  ;;  %v4202_v27 = vpack.c.bf16 %v695_v16, %v694_v18  ;;  %v4204_v28 = vpack.c.bf16 %v729_v21, %v728_v20  ;;  %v752_v20 = vld [vmem:[%s4535_s23 + $0x1140] sm:$0xff]  ;;  %v759_v5 = vld [vmem:[%s4535_s23 + $0x1178] sm:$0xff] }
 0x107   : > { %v721_v16 = vld [vmem:[%s4535_s23 + $0x1048] sm:$0xff]  ;;  %v792_v6 = vld [vmem:[%s4535_s23 + $0x1280] sm:$0xff] }
 0x108   : > { %4155 = vmatpush3.bf16.msra.mxu0 %v4154_v30  ;;  %v713_v30 = vld [vmem:[%s4535_s23 + $0x1008] sm:$0xff] }
 0x109   : > { %4187 = vmatpush3.bf16.msra.mxu1 %v4186_v31  ;;  %4157 = vmatprep.subr.bf16.mxu0 %v4156_v32  ;;  %v744_v31 = vld [vmem:[%s4535_s23 + $0x1100] sm:$0xff]  ;;  %v4236_v32 = vpack.c.bf16 %v761_v24, %v760_v23  ;;  %v4206_v40 = vpack.c.bf16 %v713_v30, %v712_v29  ;;  %v753_v23 = vld [vmem:[%s4535_s23 + $0x1148] sm:$0xff]  ;;  %v738_v24 = vld [vmem:[%s4535_s23 + $0x10d0] sm:$0xff] }
 0x10a   : > { %4189 = vmatprep.subr.bf16.mxu1 %v4188_v37  ;;  %v5158_v37 = vrot.slane %v196_v10, %v4588_v14  ;;  %v4238_v53 = vpack.c.bf16 %v745_v34, %v744_v31  ;;  %v736_v10 = vld [vmem:[%s4535_s23 + $0x10c0] sm:$0xff]  ;;  %v4254_v29 = vpack.c.bf16 %v753_v23, %v752_v20  ;;  %v4224_v30 = vpack.c.bf16 %v739_v25, %v738_v24  ;;  %v722_v31 = vld [vmem:[%s4535_s23 + $0x1050] sm:$0xff]  ;;  %v827_v25 = vld [vmem:[%s4535_s23 + $0x1398] sm:$0xff] }
 0x10b   : > { %v754_v34 = vld [vmem:[%s4535_s23 + $0x1150] sm:$0xff] }
 0x10c   : > { %4159 = vmatpush3.bf16.msra.mxu0 %v4158_v41  ;;  %v4208_v41 = vpack.c.bf16 %v731_v36, %v730_v35  ;;  %v1083_v51 = vcombine.high %v5158_v37, %v5158_v37  ;;  %v755_v36 = vld [vmem:[%s4535_s23 + $0x1158] sm:$0xff]  ;;  %v794_v20 = vld [vmem:[%s4535_s23 + $0x1290] sm:$0xff] }
 0x10d   : > { %4191 = vmatpush3.bf16.msra.mxu1 %v4190_v43  ;;  %4161 = vmatprep.subr.bf16.mxu0 %v4160_v45  ;;  %v714_v43 = vld [vmem:[%s4535_s23 + $0x1010] sm:$0xff]  ;;  %v715_v45 = vld [vmem:[%s4535_s23 + $0x1018] sm:$0xff] }
 0x10e   : > { %v2902_v62 = vpop.f32.mrb[0].mxu0  ;;  %4193 = vmatprep.subr.bf16.mxu1 %v4192_v49  ;;  %v732_v49 = vld [vmem:[%s4535_s23 + $0x10a0] sm:$0xff]  ;;  %v826_v24 = vld [vmem:[%s4535_s23 + $0x1390] sm:$0xff] }
 0x10f   : > { %v2937_v3 = vpop.f32.mrb[0].mxu1  ;;  %v2903_v4 = vpop.f32.mrb[1].mxu0 }
 0x110   : > { %v2904_v7 = vadd.f32 %v2903_v4, %v2902_v62  ;;  %v2938_v8 = vpop.f32.mrb[1].mxu1  ;;  %4163 = vmatpush3.bf16.msra.mxu0 %v4162_v57  ;;  %v4210_v57 = vpack.c.bf16 %v715_v45, %v714_v43  ;;  %v749_v62 = vld [vmem:[%s4535_s23 + $0x1128] sm:$0xff]  ;;  %v4258_v43 = vpack.c.bf16 %v755_v36, %v754_v34  ;;  %v4228_v45 = vpack.c.bf16 %v741_v44, %v740_v38  ;;  %v796_v36 = vld [vmem:[%s4535_s23 + $0x12a0] sm:$0xff] }
 0x111   : > { %v2939_v11 = vadd.f32 %v2938_v8, %v2937_v3  ;;  %4195 = vmatpush3.bf16.msra.mxu1 %v4194_v59  ;;  %4165 = vmatprep.subr.bf16.mxu0 %v4164_v60  ;;  %v4242_v59 = vpack.c.bf16 %v747_v48, %v746_v46  ;;  %v4212_v60 = vpack.c.bf16 %v733_v50, %v732_v49  ;;  %v724_v46 = vld [vmem:[%s4535_s23 + $0x1060] sm:$0xff]  ;;  %v797_v38 = vld [vmem:[%s4535_s23 + $0x12a8] sm:$0xff] }
 0x112   : > { %4197 = vmatprep.subr.bf16.mxu1 %v4196_v63  ;;  %v734_v63 = vld [vmem:[%s4535_s23 + $0x10b0] sm:$0xff]  ;;  %v4246_v3 = vpack.c.bf16 %v749_v62, %v748_v58  ;;  %v756_v48 = vld [vmem:[%s4535_s23 + $0x1160] sm:$0xff]  ;;  %v4304_v34 = vpack.c.bf16 %v827_v25, %v826_v24  ;;  %v805_v25 = vld [vmem:[%s4535_s23 + $0x12e8] sm:$0xff] }
 0x113   : > { %v5147_v22 = vadd.f32 %v2939_v11, %v2904_v7  ;;  %v4216_v4 = vpack.c.bf16 %v735_v0, %v734_v63  ;;  %v750_v7 = vld [vmem:[%s4535_s23 + $0x1130] sm:$0xff]  ;;  %v737_v11 = vld [vmem:[%s4535_s23 + $0x10c8] sm:$0xff]  ;;  %v4232_v0 = vpack.c.bf16 %v743_v33, %v742_v54  ;;  %v799_v54 = vld [vmem:[%s4535_s23 + $0x12b8] sm:$0xff] }
 0x114   : > { %4167 = vmatpush3.bf16.msra.mxu0 %v4166_v9  ;;  %v751_v9 = vld [vmem:[%s4535_s23 + $0x1138] sm:$0xff]  ;;  %v4220_v18 = vpack.c.bf16 %v737_v11, %v736_v10  ;;  %v804_v24 = vld [vmem:[%s4535_s23 + $0x12e0] sm:$0xff] }
 0x115   : > { %4199 = vmatpush3.bf16.msra.mxu1 %v4198_v13  ;;  %4169 = vmatprep.subr.bf16.mxu0 %v4168_v15  ;;  %v768_v13 = vld [vmem:[%s4535_s23 + $0x11c0] sm:$0xff]  ;;  %v769_v15 = vld [vmem:[%s4535_s23 + $0x11c8] sm:$0xff]  ;;  %v4250_v12 = vpack.c.bf16 %v751_v9, %v750_v7  ;;  %v831_v33 = vld [vmem:[%s4535_s23 + $0x13b8] sm:$0xff] }
 0x116   : > { %4201 = vmatprep.subr.bf16.mxu1 %v4200_v19  ;;  %v720_v19 = vld [vmem:[%s4535_s23 + $0x1040] sm:$0xff]  ;;  %v4252_v21 = vpack.c.bf16 %v769_v15, %v768_v13  ;;  %v793_v7 = vld [vmem:[%s4535_s23 + $0x1288] sm:$0xff] }
 0x117   : > { %v825_v9 = vld [vmem:[%s4535_s23 + $0x1388] sm:$0xff]  ;;  %v4268_v15 = vpack.c.bf16 %v793_v7, %v792_v6  ;;  %v816_v6 = vld [vmem:[%s4535_s23 + $0x1340] sm:$0xff] }
 0x118   : > { %4171 = vmatpush3.bf16.msra.mxu0 %v4170_v26  ;;  %v770_v26 = vld [vmem:[%s4535_s23 + $0x11d0] sm:$0xff] }
 0x119   : > { %4203 = vmatpush3.bf16.msra.mxu1 %v4202_v27  ;;  %4205 = vmatprep.subr.bf16.mxu0 %v4204_v28  ;;  %v771_v27 = vld [vmem:[%s4535_s23 + $0x11d8] sm:$0xff]  ;;  %v4222_v28 = vpack.c.bf16 %v721_v16, %v720_v19  ;;  %v809_v16 = vld [vmem:[%s4535_s23 + $0x1308] sm:$0xff] }
 0x11a   : > { %4237 = vmatprep.subr.bf16.mxu1 %v4236_v32  ;;  %v723_v32 = vld [vmem:[%s4535_s23 + $0x1058] sm:$0xff]  ;;  %v4256_v35 = vpack.c.bf16 %v771_v27, %v770_v26 }
 0x11b   : > { %2216 = vmatmul.mubr.f32.vlgmr.msra.gmra.mrb[14].mxu0 %v5079_v52  ;;  %v717_v52 = vld [vmem:[%s4535_s23 + $0x1028] sm:$0xff] }
 0x11c   : > { %4207 = vmatpush3.bf16.msra.mxu0 %v4206_v40  ;;  %2286 = vmatmul.mubr.f32.vlgmr.msra.gmra.mrb[14].mxu1 %v5084_v55  ;;  %v766_v55 = vld [vmem:[%s4535_s23 + $0x11b0] sm:$0xff]  ;;  %v4214_v2 = vpack.c.bf16 %v717_v52, %v716_v61  ;;  %v772_v40 = vld [vmem:[%s4535_s23 + $0x11e0] sm:$0xff] }
 0x11d   : > { %4239 = vmatpush3.bf16.msra.mxu1 %v4238_v53  ;;  %4209 = vmatprep.subr.bf16.mxu0 %v4208_v41  ;;  %v4248_v8 = vpack.c.bf16 %v767_v1, %v766_v55  ;;  %v773_v53 = vld [vmem:[%s4535_s23 + $0x11e8] sm:$0xff]  ;;  %v4226_v41 = vpack.c.bf16 %v723_v32, %v722_v31  ;;  %v726_v55 = vld [vmem:[%s4535_s23 + $0x1070] sm:$0xff]  ;;  %v727_v1 = vld [vmem:[%s4535_s23 + $0x1078] sm:$0xff] }
 0x11e   : > { %4241 = vmatprep.subr.bf16.mxu1 %v4240_v47  ;;  %2355 = vmatprep.mubr.f32.mxu0 %v1083_v51  ;;  %v725_v47 = vld [vmem:[%s4535_s23 + $0x1068] sm:$0xff]  ;;  %v4260_v50 = vpack.c.bf16 %v773_v53, %v772_v40  ;;  %v779_v31 = vld [vmem:[%s4535_s23 + $0x1218] sm:$0xff]  ;;  %v810_v32 = vld [vmem:[%s4535_s23 + $0x1310] sm:$0xff] }
 0x11f   : > { %2425 = vmatprep.mubr.f32.mxu1 %v1084_v56  ;;  %v757_v51 = vld [vmem:[%s4535_s23 + $0x1168] sm:$0xff]  ;;  %v4230_v58 = vpack.c.bf16 %v725_v47, %v724_v46  ;;  %v828_v40 = vld [vmem:[%s4535_s23 + $0x13a0] sm:$0xff]  ;;  %v4276_v46 = vpack.c.bf16 %v797_v38, %v796_v36 }
 0x120   : > { %4211 = vmatpush3.bf16.msra.mxu0 %v4210_v57  ;;  %v4262_v63 = vpack.c.bf16 %v757_v51, %v756_v48  ;;  %v829_v53 = vld [vmem:[%s4535_s23 + $0x13a8] sm:$0xff]  ;;  %v780_v47 = vld [vmem:[%s4535_s23 + $0x1220] sm:$0xff]  ;;  %v798_v51 = vld [vmem:[%s4535_s23 + $0x12b0] sm:$0xff] }
 0x121   : > { %4243 = vmatpush3.bf16.msra.mxu1 %v4242_v59  ;;  %4213 = vmatprep.subr.bf16.mxu0 %v4212_v60  ;;  %v774_v59 = vld [vmem:[%s4535_s23 + $0x11f0] sm:$0xff]  ;;  %v775_v60 = vld [vmem:[%s4535_s23 + $0x11f8] sm:$0xff]  ;;  %v812_v48 = vld [vmem:[%s4535_s23 + $0x1320] sm:$0xff] }
 0x122   : > { %4245 = vmatprep.subr.bf16.mxu1 %v4244_v42  ;;  %v197_v42 = vld [vmem:[%s4530_s19 + $0x48] sm:$0xff] }
 0x123   : > { %v1085_v10 = vcombine.high %v197_v42, %v197_v42  ;;  %v5238_v23 = vrot.slane %v197_v42, %v4588_v14  ;;  %v815_v42 = vld [vmem:[%s4535_s23 + $0x1338] sm:$0xff] }
 0x124   : > { %4215 = vmatpush3.bf16.msra.mxu0 %v4214_v2  ;;  %v758_v2 = vld [vmem:[%s4535_s23 + $0x1170] sm:$0xff] }
 0x125   : > { %4247 = vmatpush3.bf16.msra.mxu1 %v4246_v3  ;;  %4217 = vmatprep.subr.bf16.mxu0 %v4216_v4  ;;  %v4264_v4 = vpack.c.bf16 %v775_v60, %v774_v59  ;;  %v4266_v13 = vpack.c.bf16 %v759_v5, %v758_v2  ;;  %v5243_v26 = vrot.slane %v1085_v10, %v4588_v14  ;;  %v782_v60 = vld [vmem:[%s4535_s23 + $0x1230] sm:$0xff]  ;;  %v785_v5 = vld [vmem:[%s4535_s23 + $0x1248] sm:$0xff]  ;;  %v803_v10 = vld [vmem:[%s4535_s23 + $0x12d8] sm:$0xff] }
 0x126   : > { %4249 = vmatprep.subr.bf16.mxu1 %v4248_v8  ;;  %v824_v8 = vld [vmem:[%s4535_s23 + $0x1380] sm:$0xff]  ;;  %v1100_v44 = vcombine.high %v5238_v23, %v5238_v23  ;;  %v4280_v59 = vpack.c.bf16 %v799_v54, %v798_v51 }
 0x127   : > { %v4300_v19 = vpack.c.bf16 %v825_v9, %v824_v8  ;;  %v817_v8 = vld [vmem:[%s4535_s23 + $0x1348] sm:$0xff]  ;;  %v802_v9 = vld [vmem:[%s4535_s23 + $0x12d0] sm:$0xff] }
 0x128   : > { %4219 = vmatpush3.bf16.msra.mxu0 %v4218_v17  ;;  %v776_v17 = vld [vmem:[%s4535_s23 + $0x1200] sm:$0xff] }
 0x129   : > { %4251 = vmatpush3.bf16.msra.mxu1 %v4250_v12  ;;  %4221 = vmatprep.subr.bf16.mxu0 %v4220_v18  ;;  %v777_v12 = vld [vmem:[%s4535_s23 + $0x1208] sm:$0xff]  ;;  %v808_v18 = vld [vmem:[%s4535_s23 + $0x1300] sm:$0xff] }
 0x12a   : > { %4253 = vmatprep.subr.bf16.mxu1 %v4252_v21  ;;  %v795_v21 = vld [vmem:[%s4535_s23 + $0x1298] sm:$0xff]  ;;  %v4270_v27 = vpack.c.bf16 %v777_v12, %v776_v17  ;;  %v4318_v17 = vpack.c.bf16 %v817_v8, %v816_v6  ;;  %v4288_v12 = vpack.c.bf16 %v803_v10, %v802_v9  ;;  %v858_v6 = vld [vmem:[%s4535_s23 + $0x1490] sm:$0xff] }
 0x12b   : > { %v890_v9 = vld [vmem:[%s4535_s23 + $0x1590] sm:$0xff]  ;;  %v891_v10 = vld [vmem:[%s4535_s23 + $0x1598] sm:$0xff] }
 0x12c   : > { %4223 = vmatpush3.bf16.msra.mxu0 %v4222_v28  ;;  %v4302_v28 = vpack.c.bf16 %v809_v16, %v808_v18  ;;  %v786_v18 = vld [vmem:[%s4535_s23 + $0x1250] sm:$0xff] }
 0x12d   : > { %4255 = vmatpush3.bf16.msra.mxu1 %v4254_v29  ;;  %4225 = vmatprep.subr.bf16.mxu0 %v4224_v30  ;;  %v4272_v29 = vpack.c.bf16 %v795_v21, %v794_v20  ;;  %v778_v30 = vld [vmem:[%s4535_s23 + $0x1210] sm:$0xff]  ;;  %v819_v21 = vld [vmem:[%s4535_s23 + $0x1358] sm:$0xff] }
 0x12e   : > { %v2972_v49 = vpop.f32.mrb[2].mxu0  ;;  %4257 = vmatprep.subr.bf16.mxu1 %v4256_v35  ;;  %v811_v35 = vld [vmem:[%s4535_s23 + $0x1318] sm:$0xff]  ;;  %v818_v16 = vld [vmem:[%s4535_s23 + $0x1350] sm:$0xff] }
 0x12f   : > { %v2973_v56 = vpop.f32.mrb[3].mxu0  ;;  %v3007_v57 = vpop.f32.mrb[2].mxu1 }
 0x130   : > { %v2974_v61 = vadd.f32 %v2973_v56, %v2972_v49  ;;  %4227 = vmatpush3.bf16.msra.mxu0 %v4226_v41  ;;  %v3008_v52 = vpop.f32.mrb[3].mxu1  ;;  %v1101_v41 = vcombine.high %v5243_v26, %v5243_v26  ;;  %v4308_v49 = vpack.c.bf16 %v829_v53, %v828_v40  ;;  %v806_v40 = vld [vmem:[%s4535_s23 + $0x12f0] sm:$0xff]  ;;  %v807_v53 = vld [vmem:[%s4535_s23 + $0x12f8] sm:$0xff] }
 0x131   : > { %v3009_v62 = vadd.f32 %v3008_v52, %v3007_v57  ;;  %4259 = vmatpush3.bf16.msra.mxu1 %v4258_v43  ;;  %4229 = vmatprep.subr.bf16.mxu0 %v4228_v45  ;;  %v4274_v43 = vpack.c.bf16 %v779_v31, %v778_v30  ;;  %v4306_v45 = vpack.c.bf16 %v811_v35, %v810_v32  ;;  %v814_v52 = vld [vmem:[%s4535_s23 + $0x1330] sm:$0xff]  ;;  %v788_v32 = vld [vmem:[%s4535_s23 + $0x1260] sm:$0xff] }
 0x132   : > { %v1378_v3 = vadd.f32 %v2974_v61, %v5147_v22  ;;  %4261 = vmatprep.subr.bf16.mxu1 %v4260_v50  ;;  %v4234_v22 = vpack.c.bf16 %v727_v1, %v726_v55  ;;  %v813_v50 = vld [vmem:[%s4535_s23 + $0x1328] sm:$0xff]  ;;  %v783_v61 = vld [vmem:[%s4535_s23 + $0x1238] sm:$0xff]  ;;  %v4314_v2 = vpack.c.bf16 %v815_v42, %v814_v52  ;;  %v4322_v30 = vpack.c.bf16 %v819_v21, %v818_v16  ;;  %v820_v35 = vld [vmem:[%s4535_s23 + $0x1360] sm:$0xff] }
 0x133   : > { %v4310_v57 = vpack.c.bf16 %v813_v50, %v812_v48  ;;  %v833_v55 = vld [vmem:[%s4535_s23 + $0x13c8] sm:$0xff]  ;;  %v4282_v1 = vpack.c.bf16 %v783_v61, %v782_v60  ;;  %v4292_v31 = vpack.c.bf16 %v805_v25, %v804_v24  ;;  %v4296_v54 = vpack.c.bf16 %v807_v53, %v806_v40  ;;  %v823_v60 = vld [vmem:[%s4535_s23 + $0x1378] sm:$0xff]  ;;  %v856_v61 = vld [vmem:[%s4535_s23 + $0x1480] sm:$0xff] }
 0x134   : > { %v5229_v11 = vadd.f32 %v3009_v62, %v1378_v3  ;;  %4231 = vmatpush3.bf16.msra.mxu0 %v4230_v58  ;;  %v800_v62 = vld [vmem:[%s4535_s23 + $0x12c0] sm:$0xff]  ;;  %v857_v52 = vld [vmem:[%s4535_s23 + $0x1488] sm:$0xff]  ;;  %v4368_v16 = vpack.c.bf16 %v891_v10, %v890_v9  ;;  %v895_v40 = vld [vmem:[%s4535_s23 + $0x15b8] sm:$0xff] }
 0x135   : > { %4263 = vmatpush3.bf16.msra.mxu1 %v4262_v63  ;;  %4233 = vmatprep.subr.bf16.mxu0 %v4232_v0  ;;  %v801_v63 = vld [vmem:[%s4535_s23 + $0x12c8] sm:$0xff]  ;;  %v832_v0 = vld [vmem:[%s4535_s23 + $0x13c0] sm:$0xff] }
 0x136   : > { %4265 = vmatprep.subr.bf16.mxu1 %v4264_v4  ;;  %v4284_v3 = vpack.c.bf16 %v801_v63, %v800_v62  ;;  %v784_v4 = vld [vmem:[%s4535_s23 + $0x1240] sm:$0xff]  ;;  %v4316_v7 = vpack.c.bf16 %v833_v55, %v832_v0  ;;  %v889_v42 = vld [vmem:[%s4535_s23 + $0x1588] sm:$0xff]  ;;  %v4332_v55 = vpack.c.bf16 %v857_v52, %v856_v61 }
 0x137   : > { %v860_v21 = vld [vmem:[%s4535_s23 + $0x14a0] sm:$0xff]  ;;  %v881_v52 = vld [vmem:[%s4535_s23 + $0x1548] sm:$0xff] }
 0x138   : > { %4235 = vmatpush3.bf16.msra.mxu0 %v4234_v22  ;;  %v834_v22 = vld [vmem:[%s4535_s23 + $0x13d0] sm:$0xff]  ;;  %v892_v25 = vld [vmem:[%s4535_s23 + $0x15a0] sm:$0xff]  ;;  %v869_v9 = vld [vmem:[%s4535_s23 + $0x14e8] sm:$0xff] }
 0x139   : > { %4267 = vmatpush3.bf16.msra.mxu1 %v4266_v13  ;;  %4269 = vmatprep.subr.bf16.mxu0 %v4268_v15  ;;  %v835_v13 = vld [vmem:[%s4535_s23 + $0x13d8] sm:$0xff]  ;;  %v4286_v15 = vpack.c.bf16 %v785_v5, %v784_v4  ;;  %v873_v5 = vld [vmem:[%s4535_s23 + $0x1508] sm:$0xff]  ;;  %v900_v10 = vld [vmem:[%s4535_s23 + $0x15e0] sm:$0xff] }
 0x13a   : > { %4301 = vmatprep.subr.bf16.mxu1 %v4300_v19  ;;  %v787_v19 = vld [vmem:[%s4535_s23 + $0x1258] sm:$0xff]  ;;  %v4320_v20 = vpack.c.bf16 %v835_v13, %v834_v22 }
 0x13b   : > { %2356 = vmatmul.mubr.f32.vlgmr.msra.gmra.mrb[16].mxu0 %v5158_v37  ;;  %v781_v37 = vld [vmem:[%s4535_s23 + $0x1228] sm:$0xff] }
 0x13c   : > { %4271 = vmatpush3.bf16.msra.mxu0 %v4270_v27  ;;  %2426 = vmatmul.mubr.f32.vlgmr.msra.gmra.mrb[16].mxu1 %v5163_v39  ;;  %v830_v39 = vld [vmem:[%s4535_s23 + $0x13b0] sm:$0xff]  ;;  %v4278_v56 = vpack.c.bf16 %v781_v37, %v780_v47  ;;  %v836_v27 = vld [vmem:[%s4535_s23 + $0x13e0] sm:$0xff] }
 0x13d   : > { %4303 = vmatpush3.bf16.msra.mxu1 %v4302_v28  ;;  %4273 = vmatprep.subr.bf16.mxu0 %v4272_v29  ;;  %v4312_v58 = vpack.c.bf16 %v831_v33, %v830_v39  ;;  %v837_v28 = vld [vmem:[%s4535_s23 + $0x13e8] sm:$0xff]  ;;  %v4290_v29 = vpack.c.bf16 %v787_v19, %v786_v18  ;;  %v790_v39 = vld [vmem:[%s4535_s23 + $0x1270] sm:$0xff]  ;;  %v791_v33 = vld [vmem:[%s4535_s23 + $0x1278] sm:$0xff] }
 0x13e   : > { %4305 = vmatprep.subr.bf16.mxu1 %v4304_v34  ;;  %2495 = vmatprep.mubr.f32.mxu0 %v1100_v44  ;;  %v789_v34 = vld [vmem:[%s4535_s23 + $0x1268] sm:$0xff]  ;;  %v4324_v38 = vpack.c.bf16 %v837_v28, %v836_v27  ;;  %v843_v18 = vld [vmem:[%s4535_s23 + $0x1418] sm:$0xff]  ;;  %v874_v19 = vld [vmem:[%s4535_s23 + $0x1510] sm:$0xff] }
 0x13f   : > { %2565 = vmatprep.mubr.f32.mxu1 %v1101_v41  ;;  %v821_v44 = vld [vmem:[%s4535_s23 + $0x1368] sm:$0xff]  ;;  %v4294_v48 = vpack.c.bf16 %v789_v34, %v788_v32  ;;  %v844_v32 = vld [vmem:[%s4535_s23 + $0x1420] sm:$0xff] }
 0x140   : > { %4275 = vmatpush3.bf16.msra.mxu0 %v4274_v43  ;;  %v4326_v51 = vpack.c.bf16 %v821_v44, %v820_v35  ;;  %v893_v27 = vld [vmem:[%s4535_s23 + $0x15a8] sm:$0xff]  ;;  %v876_v34 = vld [vmem:[%s4535_s23 + $0x1520] sm:$0xff]  ;;  %v863_v44 = vld [vmem:[%s4535_s23 + $0x14b8] sm:$0xff] }
 0x141   : > { %4307 = vmatpush3.bf16.msra.mxu1 %v4306_v45  ;;  %4277 = vmatprep.subr.bf16.mxu0 %v4276_v46  ;;  %v838_v45 = vld [vmem:[%s4535_s23 + $0x13f0] sm:$0xff]  ;;  %v839_v46 = vld [vmem:[%s4535_s23 + $0x13f8] sm:$0xff]  ;;  %v4372_v35 = vpack.c.bf16 %v893_v27, %v892_v25 }
 0x142   : > { %4309 = vmatprep.subr.bf16.mxu1 %v4308_v49  ;;  %v198_v49 = vld [vmem:[%s4530_s19 + $0x50] sm:$0xff]  ;;  %v871_v25 = vld [vmem:[%s4535_s23 + $0x14f8] sm:$0xff] }
 0x143   : > { %v1102_v62 = vcombine.high %v198_v49, %v198_v49  ;;  %v5318_v8 = vrot.slane %v198_v49, %v4588_v14  ;;  %v864_v49 = vld [vmem:[%s4535_s23 + $0x14c0] sm:$0xff] }
 0x144   : > { %4279 = vmatpush3.bf16.msra.mxu0 %v4278_v56  ;;  %v822_v56 = vld [vmem:[%s4535_s23 + $0x1370] sm:$0xff] }
 0x145   : > { %4311 = vmatpush3.bf16.msra.mxu1 %v4310_v57  ;;  %4281 = vmatprep.subr.bf16.mxu0 %v4280_v59  ;;  %v4328_v59 = vpack.c.bf16 %v839_v46, %v838_v45  ;;  %v4330_v0 = vpack.c.bf16 %v823_v60, %v822_v56  ;;  %v5323_v22 = vrot.slane %v1102_v62, %v4588_v14  ;;  %v861_v14 = vld [vmem:[%s4535_s23 + $0x14a8] sm:$0xff]  ;;  %v846_v45 = vld [vmem:[%s4535_s23 + $0x1430] sm:$0xff]  ;;  %v847_v46 = vld [vmem:[%s4535_s23 + $0x1438] sm:$0xff] }
 0x146   : > { %4313 = vmatprep.subr.bf16.mxu1 %v4312_v58  ;;  %v888_v58 = vld [vmem:[%s4535_s23 + $0x1580] sm:$0xff]  ;;  %v1117_v24 = vcombine.high %v5318_v8, %v5318_v8  ;;  %v898_v62 = vld [vmem:[%s4535_s23 + $0x15d0] sm:$0xff] }
 0x147   : > { %v4364_v4 = vpack.c.bf16 %v889_v42, %v888_v58  ;;  %v1118_v28 = vcombine.high %v5323_v22, %v5323_v22  ;;  %v880_v60 = vld [vmem:[%s4535_s23 + $0x1540] sm:$0xff]  ;;  %v866_v58 = vld [vmem:[%s4535_s23 + $0x14d0] sm:$0xff]  ;;  %v867_v42 = vld [vmem:[%s4535_s23 + $0x14d8] sm:$0xff] }
 0x148   : > { %4283 = vmatpush3.bf16.msra.mxu0 %v4282_v1  ;;  %v840_v1 = vld [vmem:[%s4535_s23 + $0x1400] sm:$0xff] }
 0x149   : > { %4315 = vmatpush3.bf16.msra.mxu1 %v4314_v2  ;;  %4285 = vmatprep.subr.bf16.mxu0 %v4284_v3  ;;  %v841_v2 = vld [vmem:[%s4535_s23 + $0x1408] sm:$0xff]  ;;  %v872_v3 = vld [vmem:[%s4535_s23 + $0x1500] sm:$0xff] }
 0x14a   : > { %4317 = vmatprep.subr.bf16.mxu1 %v4316_v7  ;;  %v859_v7 = vld [vmem:[%s4535_s23 + $0x1498] sm:$0xff]  ;;  %v4334_v13 = vpack.c.bf16 %v841_v2, %v840_v1  ;;  %v4352_v1 = vpack.c.bf16 %v867_v42, %v866_v58  ;;  %v850_v2 = vld [vmem:[%s4535_s23 + $0x1450] sm:$0xff] }
 0x14b   : > { %v915_v58 = vld [vmem:[%s4535_s23 + $0x1658] sm:$0xff] }
 0x14c   : > { %4287 = vmatpush3.bf16.msra.mxu0 %v4286_v15  ;;  %v4366_v15 = vpack.c.bf16 %v873_v5, %v872_v3  ;;  %v851_v3 = vld [vmem:[%s4535_s23 + $0x1458] sm:$0xff] }
 0x14d   : > { %4319 = vmatpush3.bf16.msra.mxu1 %v4318_v17  ;;  %4289 = vmatprep.subr.bf16.mxu0 %v4288_v12  ;;  %v4336_v17 = vpack.c.bf16 %v859_v7, %v858_v6  ;;  %v842_v12 = vld [vmem:[%s4535_s23 + $0x1410] sm:$0xff]  ;;  %v883_v6 = vld [vmem:[%s4535_s23 + $0x1558] sm:$0xff]  ;;  %v868_v7 = vld [vmem:[%s4535_s23 + $0x14e0] sm:$0xff] }
 0x14e   : > { %v3042_v36 = vpop.f32.mrb[4].mxu0  ;;  %4321 = vmatprep.subr.bf16.mxu1 %v4320_v20  ;;  %v875_v20 = vld [vmem:[%s4535_s23 + $0x1518] sm:$0xff] }
 0x14f   : > { %v3043_v41 = vpop.f32.mrb[5].mxu0  ;;  %v3077_v43 = vpop.f32.mrb[4].mxu1 }
 0x150   : > { %v3044_v47 = vadd.f32 %v3043_v41, %v3042_v36  ;;  %4291 = vmatpush3.bf16.msra.mxu0 %v4290_v29  ;;  %v3078_v37 = vpop.f32.mrb[5].mxu1  ;;  %v4338_v29 = vpack.c.bf16 %v843_v18, %v842_v12  ;;  %v877_v36 = vld [vmem:[%s4535_s23 + $0x1528] sm:$0xff]  ;;  %v4356_v12 = vpack.c.bf16 %v869_v9, %v868_v7  ;;  %v852_v18 = vld [vmem:[%s4535_s23 + $0x1460] sm:$0xff]  ;;  %v919_v7 = vld [vmem:[%s4535_s23 + $0x1678] sm:$0xff] }
 0x151   : > { %v3079_v50 = vadd.f32 %v3078_v37, %v3077_v43  ;;  %4323 = vmatpush3.bf16.msra.mxu1 %v4322_v30  ;;  %4293 = vmatprep.subr.bf16.mxu0 %v4292_v31  ;;  %v4370_v30 = vpack.c.bf16 %v875_v20, %v874_v19  ;;  %v4340_v31 = vpack.c.bf16 %v861_v14, %v860_v21  ;;  %v853_v19 = vld [vmem:[%s4535_s23 + $0x1468] sm:$0xff] }
 0x152   : > { %v1518_v57 = vadd.f32 %v3044_v47, %v5229_v11  ;;  %4325 = vmatprep.subr.bf16.mxu1 %v4324_v38  ;;  %v4298_v11 = vpack.c.bf16 %v791_v33, %v790_v39  ;;  %v862_v38 = vld [vmem:[%s4535_s23 + $0x14b0] sm:$0xff]  ;;  %v4374_v41 = vpack.c.bf16 %v877_v36, %v876_v34  ;;  %v4346_v39 = vpack.c.bf16 %v847_v46, %v846_v45  ;;  %v885_v14 = vld [vmem:[%s4535_s23 + $0x1568] sm:$0xff] }
 0x153   : > { %v4344_v43 = vpack.c.bf16 %v863_v44, %v862_v38  ;;  %v878_v47 = vld [vmem:[%s4535_s23 + $0x1530] sm:$0xff]  ;;  %v855_v44 = vld [vmem:[%s4535_s23 + $0x1478] sm:$0xff] }
 0x154   : > { %v5309_v63 = vadd.f32 %v3079_v50, %v1518_v57  ;;  %4295 = vmatpush3.bf16.msra.mxu0 %v4294_v48  ;;  %v879_v48 = vld [vmem:[%s4535_s23 + $0x1538] sm:$0xff]  ;;  %v865_v50 = vld [vmem:[%s4535_s23 + $0x14c8] sm:$0xff]  ;;  %v848_v57 = vld [vmem:[%s4535_s23 + $0x1440] sm:$0xff] }
 0x155   : > { %4327 = vmatpush3.bf16.msra.mxu1 %v4326_v51  ;;  %4297 = vmatprep.subr.bf16.mxu0 %v4296_v54  ;;  %v896_v51 = vld [vmem:[%s4535_s23 + $0x15c0] sm:$0xff]  ;;  %v897_v54 = vld [vmem:[%s4535_s23 + $0x15c8] sm:$0xff]  ;;  %v4378_v33 = vpack.c.bf16 %v879_v48, %v878_v47  ;;  %v4348_v56 = vpack.c.bf16 %v865_v50, %v864_v49  ;;  %v854_v38 = vld [vmem:[%s4535_s23 + $0x1470] sm:$0xff] }
 0x156   : > { %4329 = vmatprep.subr.bf16.mxu1 %v4328_v59  ;;  %v849_v59 = vld [vmem:[%s4535_s23 + $0x1448] sm:$0xff]  ;;  %v4380_v61 = vpack.c.bf16 %v897_v54, %v896_v51  ;;  %v4362_v45 = vpack.c.bf16 %v855_v44, %v854_v38  ;;  %v904_v47 = vld [vmem:[%s4535_s23 + $0x1600] sm:$0xff]  ;;  %v906_v49 = vld [vmem:[%s4535_s23 + $0x1610] sm:$0xff] }
 0x157   : > { %v907_v50 = vld [vmem:[%s4535_s23 + $0x1618] sm:$0xff]  ;;  %v908_v54 = vld [vmem:[%s4535_s23 + $0x1620] sm:$0xff] }
 0x158   : > { %4299 = vmatpush3.bf16.msra.mxu0 %v4298_v11  ;;  %v899_v11 = vld [vmem:[%s4535_s23 + $0x15d8] sm:$0xff]  ;;  %v4400_v51 = vpack.c.bf16 %v907_v50, %v906_v49 }
 0x159   : > { %4331 = vmatpush3.bf16.msra.mxu1 %v4330_v0  ;;  %4333 = vmatprep.subr.bf16.mxu0 %v4332_v55  ;;  %v4350_v0 = vpack.c.bf16 %v849_v59, %v848_v57  ;;  %v4382_v55 = vpack.c.bf16 %v881_v52, %v880_v60  ;;  %v4384_v5 = vpack.c.bf16 %v899_v11, %v898_v62  ;;  %v910_v57 = vld [vmem:[%s4535_s23 + $0x1630] sm:$0xff]  ;;  %v912_v59 = vld [vmem:[%s4535_s23 + $0x1640] sm:$0xff]  ;;  %v913_v60 = vld [vmem:[%s4535_s23 + $0x1648] sm:$0xff] }
 0x15a   : > { %4365 = vmatprep.subr.bf16.mxu1 %v4364_v4  ;;  %v882_v4 = vld [vmem:[%s4535_s23 + $0x1550] sm:$0xff]  ;;  %v916_v62 = vld [vmem:[%s4535_s23 + $0x1660] sm:$0xff]  ;;  %v917_v11 = vld [vmem:[%s4535_s23 + $0x1668] sm:$0xff] }
 0x15b   : > { %2496 = vmatmul.mubr.f32.vlgmr.msra.gmra.mrb[18].mxu0 %v5238_v23  ;;  %v845_v23 = vld [vmem:[%s4535_s23 + $0x1428] sm:$0xff]  ;;  %v914_v52 = vld [vmem:[%s4535_s23 + $0x1650] sm:$0xff] }
 0x15c   : > { %4335 = vmatpush3.bf16.msra.mxu0 %v4334_v13  ;;  %2566 = vmatmul.mubr.f32.vlgmr.msra.gmra.mrb[18].mxu1 %v5243_v26  ;;  %v894_v26 = vld [vmem:[%s4535_s23 + $0x15b0] sm:$0xff]  ;;  %v4342_v53 = vpack.c.bf16 %v845_v23, %v844_v32  ;;  %v901_v13 = vld [vmem:[%s4535_s23 + $0x15e8] sm:$0xff]  ;;  %v4358_v23 = vpack.c.bf16 %v853_v19, %v852_v18  ;;  %v4412_v42 = vpack.c.bf16 %v915_v58, %v914_v52 }
 0x15d   : > { %4367 = vmatpush3.bf16.msra.mxu1 %v4366_v15  ;;  %4337 = vmatprep.subr.bf16.mxu0 %v4336_v17  ;;  %v4376_v37 = vpack.c.bf16 %v895_v40, %v894_v26  ;;  %v4354_v15 = vpack.c.bf16 %v851_v3, %v850_v2  ;;  %v4386_v17 = vpack.c.bf16 %v883_v6, %v882_v4  ;;  %v918_v6 = vld [vmem:[%s4535_s23 + $0x1670] sm:$0xff] }
 0x15e   : > { %4369 = vmatprep.subr.bf16.mxu1 %v4368_v16  ;;  %2635 = vmatprep.mubr.f32.mxu0 %v1117_v24  ;;  %v884_v16 = vld [vmem:[%s4535_s23 + $0x1560] sm:$0xff]  ;;  %v4388_v21 = vpack.c.bf16 %v901_v13, %v900_v10  ;;  %v870_v24 = vld [vmem:[%s4535_s23 + $0x14f0] sm:$0xff]  ;;  %v4415_v4 = vpack.c.bf16 %v917_v11, %v916_v62  ;;  %v4418_v13 = vpack.c.bf16 %v919_v7, %v918_v6 }
 0x15f   : > { %2705 = vmatprep.mubr.f32.mxu1 %v1118_v28  ;;  %v4360_v36 = vpack.c.bf16 %v871_v25, %v870_v24 }
 0x160   : > { %4339 = vmatpush3.bf16.msra.mxu0 %v4338_v29  ;;  %v902_v29 = vld [vmem:[%s4535_s23 + $0x15f0] sm:$0xff] }
 0x161   : > { %4371 = vmatpush3.bf16.msra.mxu1 %v4370_v30  ;;  %4341 = vmatprep.subr.bf16.mxu0 %v4340_v31  ;;  %v903_v30 = vld [vmem:[%s4535_s23 + $0x15f8] sm:$0xff] }
 0x162   : > { %4373 = vmatprep.subr.bf16.mxu1 %v4372_v35  ;;  %v4390_v35 = vpack.c.bf16 %v885_v14, %v884_v16  ;;  %v4392_v40 = vpack.c.bf16 %v903_v30, %v902_v29 }
 0x164   : > { %4343 = vmatpush3.bf16.msra.mxu0 %v4342_v53  ;;  %v886_v53 = vld [vmem:[%s4535_s23 + $0x1570] sm:$0xff] }
 0x165   : > { %4375 = vmatpush3.bf16.msra.mxu1 %v4374_v41  ;;  %4345 = vmatprep.subr.bf16.mxu0 %v4344_v43  ;;  %v887_v41 = vld [vmem:[%s4535_s23 + $0x1578] sm:$0xff] }
 0x166   : > { %4377 = vmatprep.subr.bf16.mxu1 %v4376_v37  ;;  %v4394_v46 = vpack.c.bf16 %v887_v41, %v886_v53  ;;  %v905_v37 = vld [vmem:[%s4535_s23 + $0x1608] sm:$0xff] }
 0x167   : > { %v4397_v48 = vpack.c.bf16 %v905_v37, %v904_v47 }
 0x168   : > { %4347 = vmatpush3.bf16.msra.mxu0 %v4346_v39  ;;  %v909_v39 = vld [vmem:[%s4535_s23 + $0x1628] sm:$0xff] }
 0x169   : > { %4379 = vmatpush3.bf16.msra.mxu1 %v4378_v33  ;;  %4349 = vmatprep.subr.bf16.mxu0 %v4348_v56  ;;  %v4493_v33 = vmov 0.0   ;;  %v4403_v56 = vpack.c.bf16 %v909_v39, %v908_v54 }
 0x16a   : > { %4381 = vmatprep.subr.bf16.mxu1 %v4380_v61  ;;  %v4409_v61 = vpack.c.bf16 %v913_v60, %v912_v59 }
 0x16c   : > { %4351 = vmatpush3.bf16.msra.mxu0 %v4350_v0 }
 0x16d   : > { %4383 = vmatpush3.bf16.msra.mxu1 %v4382_v55  ;;  %4353 = vmatprep.subr.bf16.mxu0 %v4352_v1 }
 0x16e   : > { %v3112_v20 = vpop.f32.mrb[6].mxu0  ;;  %4385 = vmatprep.subr.bf16.mxu1 %v4384_v5 }
 0x16f   : > { %v3113_v27 = vpop.f32.mrb[7].mxu0  ;;  %v3147_v28 = vpop.f32.mrb[6].mxu1 }
 0x170   : > { %v3114_v31 = vadd.f32 %v3113_v27, %v3112_v20  ;;  %4355 = vmatpush3.bf16.msra.mxu0 %v4354_v15  ;;  %v3148_v32 = vpop.f32.mrb[7].mxu1  ;;  %v2863_v15 = vld.sshfl [vmem:[%s4530_s19 + $0x58] sm:$0x3 pattern:$0x76325410] }
 0x171   : > { %v3149_v34 = vadd.f32 %v3148_v32, %v3147_v28  ;;  %4387 = vmatpush3.bf16.msra.mxu1 %v4386_v17  ;;  %4357 = vmatprep.subr.bf16.mxu0 %v4356_v12 }
 0x172   : > { %v1658_v26 = vadd.f32 %v3114_v31, %v5309_v63  ;;  %4389 = vmatprep.subr.bf16.mxu1 %v4388_v21  ;;  %v4491_v63 = vmov 0.0|0.0  }
 0x174   : > { %v1728_v43 = vadd.f32 %v3149_v34, %v1658_v26  ;;  %4359 = vmatpush3.bf16.msra.mxu0 %v4358_v23 }
 0x175   : > { %4391 = vmatpush3.bf16.msra.mxu1 %v4390_v35  ;;  %4361 = vmatprep.subr.bf16.mxu0 %v4360_v36 }
 0x176   : > { %4393 = vmatprep.subr.bf16.mxu1 %v4392_v40 }
 0x178   : > { %4363 = vmatpush3.bf16.msra.mxu0 %v4362_v45 }
 0x179   : > { %4395 = vmatpush3.bf16.msra.mxu1 %v4394_v46  ;;  %4396 = vmatprep.subr.bf16.mxu0 %v4491_v63 }
 0x17b   : > { %2636 = vmatmul.mubr.f32.vlgmr.msra.gmra.mrb[20].mxu0 %v5318_v8  ;;  %v911_v8 = vld [vmem:[%s4535_s23 + $0x1638] sm:$0xff] }
 0x17c   : > { %4398 = vmatpush3.bf16.msra.mxu0 %v4397_v48  ;;  %2706 = vmatmul.mubr.f32.vlgmr.msra.gmra.mrb[20].mxu1 %v5323_v22  ;;  %v4406_v22 = vpack.c.bf16 %v911_v8, %v910_v57 }
 0x17d   : > { %4399 = vmatprep.subr.bf16.mxu0 %v4491_v63  ;;  %3689 = vmatprep.mubr.msk.f32.mxu0 %vm4492_vm1, %v4493_v33 }
 0x180   : > { %4401 = vmatpush3.bf16.msra.mxu0 %v4400_v51 }
 0x181   : > { %4402 = vmatprep.subr.bf16.mxu0 %v4491_v63 }
 0x184   : > { %4404 = vmatpush3.bf16.msra.mxu0 %v4403_v56 }
 0x185   : > { %4405 = vmatprep.subr.bf16.mxu0 %v4491_v63 }
 0x188   : > { %4407 = vmatpush3.bf16.msra.mxu0 %v4406_v22 }
 0x189   : > { %4408 = vmatprep.subr.bf16.mxu0 %v4491_v63 }
 0x18c   : > { %4410 = vmatpush3.bf16.msra.mxu0 %v4409_v61 }
 0x18d   : > { %4411 = vmatprep.subr.bf16.mxu0 %v4491_v63 }
 0x18e   : > { %v3182_v0 = vpop.f32.mrb[8].mxu0 }
 0x18f   : > { %v3183_v55 = vpop.f32.mrb[9].mxu0  ;;  %v3217_v1 = vpop.f32.mrb[8].mxu1 }
 0x190   : > { %v3184_v2 = vadd.f32 %v3183_v55, %v3182_v0  ;;  %4413 = vmatpush3.bf16.msra.mxu0 %v4412_v42  ;;  %v3218_v3 = vpop.f32.mrb[9].mxu1  ;;  %v187_v42 = vld [vmem:[#allocation2] sm:$0x3] }
 0x191   : > { %v3219_v5 = vadd.f32 %v3218_v3, %v3217_v1  ;;  %4414 = vmatprep.subr.bf16.mxu0 %v4491_v63 }
 0x192   : > { %v1798_v9 = vadd.f32 %v3184_v2, %v1728_v43  ;;  %v2865_v2 = vld [vmem:[%s5435_s2] ss:$0 sm:$0xff] (!%p2864_p6) }
 0x194   : > { %v1868_v10 = vadd.f32 %v3219_v5, %v1798_v9  ;;  %4416 = vmatpush3.bf16.msra.mxu0 %v4415_v4 }
 0x195   : > { %4417 = vmatprep.subr.bf16.mxu0 %v4491_v63 }
 0x198   : > { %4419 = vmatpush3.bf16.msra.mxu0 %v4418_v13 }
 0x19b   : > { %3690 = vmatmul.mubr.f32.vlgmr.msra.gmra.mrb[22].mxu0 %v2863_v15 }
 0x1ae   : > { %v3252_v17 = vpop.f32.mrb[10].mxu0 }
 0x1af   : > { %v3253_v12 = vpop.f32.mrb[11].mxu0  ;;  %v3287_v18 = vpop.f32.mrb[10].mxu1 }
 0x1b0   : > { %v3254_v19 = vadd.f32 %v3253_v12, %v3252_v17  ;;  %v3288_v16 = vpop.f32.mrb[11].mxu1 }
 0x1b1   : > { %v3289_v20 = vadd.f32 %v3288_v16, %v3287_v18 }
 0x1b2   : > { %v1938_v21 = vadd.f32 %v3254_v19, %v1868_v10 }
 0x1b4   : > { %v2008_v14 = vadd.f32 %v3289_v20, %v1938_v21 }
 0x1ce   : > { %v3322_v24 = vpop.f32.mrb[12].mxu0 }
 0x1cf   : > { %v3323_v25 = vpop.f32.mrb[13].mxu0  ;;  %v3357_v27 = vpop.f32.mrb[12].mxu1 }
 0x1d0   : > { %v3324_v28 = vadd.f32 %v3323_v25, %v3322_v24  ;;  %v3358_v29 = vpop.f32.mrb[13].mxu1 }
 0x1d1   : > { %v3359_v30 = vadd.f32 %v3358_v29, %v3357_v27 }
 0x1d2   : > { %v2078_v31 = vadd.f32 %v3324_v28, %v2008_v14 }
 0x1d4   : > { %v2148_v32 = vadd.f32 %v3359_v30, %v2078_v31 }
 0x1ee   : > { %v3392_v23 = vpop.f32.mrb[14].mxu0 }
 0x1ef   : > { %v3393_v34 = vpop.f32.mrb[15].mxu0  ;;  %v3427_v35 = vpop.f32.mrb[14].mxu1 }
 0x1f0   : > { %v3394_v36 = vadd.f32 %v3393_v34, %v3392_v23  ;;  %v3428_v38 = vpop.f32.mrb[15].mxu1 }
 0x1f1   : > { %v3429_v44 = vadd.f32 %v3428_v38, %v3427_v35 }
 0x1f2   : > { %v2218_v26 = vadd.f32 %v3394_v36, %v2148_v32 }
 0x1f4   : > { %v2288_v40 = vadd.f32 %v3429_v44, %v2218_v26 }
 0x20e   : > { %v3462_v53 = vpop.f32.mrb[16].mxu0 }
 0x20f   : > { %v3463_v41 = vpop.f32.mrb[17].mxu0  ;;  %v3497_v43 = vpop.f32.mrb[16].mxu1 }
 0x210   : > { %v3464_v45 = vadd.f32 %v3463_v41, %v3462_v53  ;;  %v3498_v46 = vpop.f32.mrb[17].mxu1 }
 0x211   : > { %v3499_v47 = vadd.f32 %v3498_v46, %v3497_v43 }
 0x212   : > { %v2358_v37 = vadd.f32 %v3464_v45, %v2288_v40 }
 0x214   : > { %v2428_v48 = vadd.f32 %v3499_v47, %v2358_v37 }
 0x22e   : > { %v3532_v63 = vpop.f32.mrb[18].mxu0 }
 0x22f   : > { %v3533_v49 = vpop.f32.mrb[19].mxu0  ;;  %v3567_v50 = vpop.f32.mrb[18].mxu1 }
 0x230   : > { %v3534_v51 = vadd.f32 %v3533_v49, %v3532_v63  ;;  %v3568_v54 = vpop.f32.mrb[19].mxu1 }
 0x231   : > { %v3569_v39 = vadd.f32 %v3568_v54, %v3567_v50 }
 0x232   : > { %v2498_v33 = vadd.f32 %v3534_v51, %v2428_v48 }
 0x234   : > { %v2568_v56 = vadd.f32 %v3569_v39, %v2498_v33 }
 0x24e   : > { %v3602_v57 = vpop.f32.mrb[20].mxu0 }
 0x24f   : > { %v3603_v8 = vpop.f32.mrb[21].mxu0  ;;  %v3637_v22 = vpop.f32.mrb[20].mxu1 }
 0x250   : > { %v3604_v59 = vadd.f32 %v3603_v8, %v3602_v57  ;;  %v3638_v60 = vpop.f32.mrb[21].mxu1 }
 0x251   : > { %v3639_v61 = vadd.f32 %v3638_v60, %v3637_v22 }
 0x252   : > { %v2638_v52 = vadd.f32 %v3604_v59, %v2568_v56 }
 0x254   : > { %v2708_v58 = vadd.f32 %v3639_v61, %v2638_v52 }
 0x26d   : > { %2787 = sbr.rel (%p2864_p6) target bundleno = 638 (0x27e), region = 40 }
 0x26e   : > { %v2777_v62 = vpop.f32.mrb[22].mxu0 }
 0x26f   : > { %v2778_v11 = vadd.f32 %v2777_v62, %v2708_v58  ;;  %v3691_v0 = vpop.f32.mrb[23].mxu0 }
 0x271   : > { %v2781_v55 = vadd.f32 %v2778_v11, %v187_v42 }
 0x273   : > { %2783 = vst.msk [vmem:[#allocation2] sm:$0x3] %vm2782_vm2, %v2781_v55 }
 0x27a   : > { %v2788_v1 = vld [vmem:[#allocation2] sm:$0x3] }
 0x27b   : > { %v2796_v3 = vadd.f32 %v2865_v2, %v2788_v1 }
 0x27d   : > { %2797 = vst.msk [vmem:[#allocation2] sm:$0x3] %vm2782_vm2, %v2796_v3 }
 0x27e PF: > { %p4424_p7 = scmp.eq.s32.totalorder %s4521_s13, 7  ;;  %s4494_s26 = smov [#allocation2]  }
 0x27f   : > { %s2805_s27 = sshll.u32 %s4494_s26, 4  ;;  %s2806_s27 = int_to_ptr.vmem [resolvable:$true] %s2805_s27 }
 0x280   : > { %s4451_s28 = scalar_lea.vmem %s2806_s27, 32  ;;  %p4458_p11 = scmp.lt.s32.totalorder %s2806_s27, %s2806_s27 }
 0x281   : > { %p4452_p8 = scmp.ne.s32.totalorder %s2806_s27, %s4451_s28  ;;  %p4459_p12 = scmp.lt.s32.totalorder %s4451_s28, %s4451_s28 }
 0x283   : > { %p4453_p9 = pnand %p4452_p8, %p4424_p7  ;;  %p4460_p13 = por %p4459_p12, %p4458_p11 }
 0x285   : > { %p4454_p10 = pneg %p4453_p9 }
 0x287   : > { %p4461_p0 = pnand %p4460_p13, %p4454_p10 }
 0x289   : > { %4464 = shalt.err (!%p4461_p0)
}
 0x28a   : > { %s4465_s4 = scalar_lea.hbm %s5436_s3, 32 }
 0x28b   : > { %p4466_p1 = scmp.ne.s32.totalorder %s5436_s3, %s4465_s4  ;;  %p4471_p4 = scmp.lt.u32.totalorder %s4465_s4, %s5436_s3 }
 0x28d   : > { %p4467_p2 = pnand %p4466_p1, %p4424_p7 }
 0x28f   : > { %p4468_p3 = pneg %p4467_p2 }
 0x291   : > { %p4473_p5 = pnand %p4471_p4, %p4468_p3 }
 0x293   : > { %4476 = shalt.err (!%p4473_p5)
}
 0x294   : > { %4421 = dma.vmem_to_hbm [thread:$0]  (%p4424_p7), %s2806_s27, 32, %s5436_s3, [#allocation3]  }
 0x295   : > { %4482 = dma.done.wait (%p4424_p7), [#allocation3], 32  }
 0x296   : > { %4484 = vsyncadd (%p4424_p7), [#allocation3], 4294967264 }
 0x297 PF: > { %s14_s12 = sadd.s32 1, %s4487_s12  }
 0x298   : > { %p11_p6 = scmp.ge.s32.totalorder %s14_s12, 10  }
 0x29a   :  { %13 = sbr.rel (!%p11_p6) target bundleno = 1 (0x1), region = 70 }
 0x2a1   :  { %2818 = vsyncpa [#allocation3], 1 }
 0x2a2   :  { %2820 = vsyncpa [#allocation3 + $0x1], 1 }

</bundles_post_ra>
